<compile_context>
chip_gen: v7x
topology: tpu7x:2x2x1
jax: 0.10.0
libtpu: 0.0.40
codegen_flags: <defaults>
</compile_context>

<pallas_src>
import functools

import numpy as np
import jax
import jax.numpy as jnp
from jax.experimental import pallas as pl
from jax.experimental.pallas import tpu as pltpu

HIGHEST = jax.lax.Precision.HIGHEST


# ---------------- strided (1,2,2) Conv3d (bias=True) as a matmul kernel ----------------

def _downsample_conv_kernel(xp_ref, w_ref, b_ref, o_ref):
    # xp: (1, Kp, P) space-to-depth patches; w: (Cout, Kp); b: (Cout, 1)
    o_ref[0] = (jnp.dot(w_ref[...], xp_ref[0],
                        preferred_element_type=jnp.float32,
                        precision=HIGHEST)
                + b_ref[...])


def _downsample_conv(x, w, b):
    """nn.Conv3d(Cin, Cout, kernel_size=(1,2,2), stride=(1,2,2), bias=True)."""
    B, Cin, D, H, W = x.shape
    Cout = w.shape[0]
    H2, W2 = H // 2, W // 2
    P = D * H2 * W2
    K = Cin * 4
    Kp = ((K + 7) // 8) * 8                      # pad contraction dim for the MXU

    # space-to-depth (layout only, done by XLA): xp[b, ci*4+kh*2+kw, d*H2*W2 + h*W2 + w]
    xp = x.reshape(B, Cin, D, H2, 2, W2, 2)
    xp = jnp.transpose(xp, (0, 1, 4, 6, 2, 3, 5)).reshape(B, K, P).astype(jnp.float32)
    xp = jnp.pad(xp, ((0, 0), (0, Kp - K), (0, 0)))
    w2d = jnp.pad(w.reshape(Cout, K).astype(jnp.float32), ((0, 0), (0, Kp - K)))
    b2d = b.reshape(Cout, 1).astype(jnp.float32)

    out = pl.pallas_call(
        _downsample_conv_kernel,
        out_shape=jax.ShapeDtypeStruct((B, Cout, P), jnp.float32),
        grid=(B,),
        in_specs=[pl.BlockSpec((1, Kp, P), lambda g: (g, 0, 0)),
                  pl.BlockSpec((Cout, Kp), lambda g: (0, 0)),
                  pl.BlockSpec((Cout, 1), lambda g: (0, 0))],
        out_specs=pl.BlockSpec((1, Cout, P), lambda g: (g, 0, 0)),
        compiler_params=pltpu.CompilerParams(dimension_semantics=("parallel",)),
    )(xp, w2d, b2d)
    return out.reshape(B, Cout, D, H2, W2)


# ---------------------- fused TripleAttention3D Pallas kernel --------------------------

def _triple_attention_kernel(x_ref, w1t_ref, w2_ref, wmatf_ref, masks_ref, wd_ref,
                             out_ref, pool_scr, stage_scr,
                             *, ksize, D, W, HW, C, mode):
    pad = ksize // 2
    TD = 2 * D
    xb = x_ref[0]                                                  # (C, D, HW)  f32

    # ---- channel attention: global avg/max pool -> shared MLP -> sigmoid ----
    avg = jnp.mean(jnp.mean(xb, axis=2), axis=1, keepdims=True)    # (C, 1)
    mx = jnp.max(jnp.max(xb, axis=2), axis=1, keepdims=True)       # (C, 1)
    w1t = w1t_ref[...]                                             # (C, mid) = W1^T
    w2 = w2_ref[...]                                               # (C, mid) = W2

    def mlp(v):                                                    # (C,1) -> (C,1)
        h = jnp.maximum(jnp.sum(w1t * v, axis=0, keepdims=True), 0.0)   # (1, mid)
        return jnp.sum(w2 * h, axis=1, keepdims=True)              # (C, 1)

    attn_c = jax.nn.sigmoid(mlp(avg) + mlp(mx))                    # (C, 1)
    a_c = attn_c[:, :, None]                                       # (C, 1, 1)

    # ---- spatial attention: 7x7x7 Conv3d(2->1) as ONE staged MXU matmul ----
    # x_ca = xb * a_c is never stored; the channel scale is folded into the pooled-map
    # reductions here and into the final output multiplies below.
    avg_sp = jnp.mean(xb * a_c, axis=0)                            # (D, HW) mean over C
    max_sp = jnp.max(xb * a_c, axis=0)                             # (D, HW) max  over C

    # pooled maps duplicated along lanes so each (kh,kw) tap is a static lane window
    pool_scr[...] = jnp.concatenate(
        [jnp.concatenate([avg_sp, avg_sp], axis=1),
         jnp.concatenate([max_sp, max_sp], axis=1)], axis=0)       # (2D, 2HW)

    # stage all KK masked, lane-shifted slices, then contract with a single MXU dot
    for kh in range(ksize):
        for kw in range(ksize):
            q = kh * ksize + kw
            sm = ((kh - pad) * W + (kw - pad)) % HW                # static lane offset
            stage_scr[q * TD:(q + 1) * TD, :] = (
                pool_scr[:, sm:sm + HW] * masks_ref[q * TD:(q + 1) * TD, :])

    logits = jnp.dot(wmatf_ref[...], stage_scr[...],               # (D,KK*2D)x(KK*2D,HW)
                     preferred_element_type=jnp.float32,
                     precision=HIGHEST)
    sig_sp = jax.nn.sigmoid(logits)[None]                          # (1, D, HW)

    # ---- depth attention: mean over (H,W) -> 1x1x1 conv over C -> sigmoid ----
    mean_hw = jnp.mean(xb, axis=2)                                 # (C, D)  lane reduce
    wda = wd_ref[...] * attn_c                                     # (C, 1)  fold attn_c
    dlogit = jnp.sum(wda * mean_hw, axis=0, keepdims=True)         # (1, D)
    sig_d = jax.nn.sigmoid(dlogit)[:, :, None]                     # (1, D, 1)

    if mode == "sum":
        # down1 consumer only needs x1 + x2 = x_ca * (sig_sp + sig_d)
        out_ref[0] = (xb * a_c) * (sig_sp + sig_d)                 # (C, D, HW)
    else:  # "maxcat": down2 consumer needs concat(max_D(x1), max_D(x2)) along channels
        m1 = jnp.max((xb * a_c) * sig_sp, axis=1)                  # (C, HW)
        m2 = jnp.max((xb * a_c) * sig_d, axis=1)                   # (C, HW)
        out_ref[0] = jnp.concatenate([m1, m2], axis=0)             # (2C, HW)


def _triple_attention(x, p, ksize, mode):
    B, C, D, H, W = x.shape
    HW = H * W
    KK = ksize * ksize
    TD = 2 * D
    pad = ksize // 2
    f32 = jnp.float32
    mid = p["w_mlp1"].shape[0]

    x4d = x.reshape(B, C, D, HW).astype(f32)          # trailing-dim merge: layout only
    w1t = p["w_mlp1"].T.astype(f32)                   # (C, mid)
    w2 = p["w_mlp2"].astype(f32)                      # (C, mid)
    wd = p["w_depth"].reshape(1, C).T.astype(f32)     # (C, 1)

    # Matmul-ready banded taps: wmatf[d, q*2D + c*D + dz] = w_sp[0, c, dz-d+pad, kh, kw]
    # (zero outside the depth band).  Tiny; built by XLA from the raw conv weight.
    d_i = np.arange(D)[:, None]
    dz_i = np.arange(D)[None, :]
    kd = dz_i - d_i + pad                                              # (D, D)
    band = jnp.asarray(((kd >= 0) & (kd < ksize)).astype(np.float32))
    kd_c = np.clip(kd, 0, ksize - 1)
    wq = jnp.transpose(p["w_spatial"][0].astype(f32), (2, 3, 0, 1)).reshape(KK, 2, ksize)
    wmat = wq[:, :, kd_c] * band[None, None]                           # (KK, 2, D, D)
    wmat = jnp.transpose(wmat, (0, 2, 1, 3)).reshape(KK, D, TD)        # (KK, D, 2D)
    wmatf = jnp.transpose(wmat, (1, 0, 2)).reshape(D, KK * TD)         # (D, KK*2D)

    # Zero-padding masks per tap / per output lane, pre-expanded to the staged row layout
    # (so the kernel never needs a sublane broadcast while masking).
    hh = np.arange(H)[:, None]
    ww = np.arange(W)[None, :]
    masks_np = np.zeros((KK, HW), np.float32)
    for kh in range(ksize):
        for kw in range(ksize):
            m = ((hh + kh - pad >= 0) & (hh + kh - pad < H) &
                 (ww + kw - pad >= 0) & (ww + kw - pad < W))
            masks_np[kh * ksize + kw] = m.astype(np.float32).reshape(-1)
    masks = jnp.asarray(np.repeat(masks_np, TD, axis=0))               # (KK*2D, HW)

    kernel = functools.partial(_triple_attention_kernel, ksize=ksize, D=D, W=W,
                               HW=HW, C=C, mode=mode)

    if mode == "sum":
        out_shape = jax.ShapeDtypeStruct((B, C, D, HW), f32)
        out_spec = pl.BlockSpec((1, C, D, HW), lambda g: (g, 0, 0, 0))
    else:
        out_shape = jax.ShapeDtypeStruct((B, 2 * C, HW), f32)
        out_spec = pl.BlockSpec((1, 2 * C, HW), lambda g: (g, 0, 0))

    out = pl.pallas_call(
        kernel,
        out_shape=out_shape,
        grid=(B,),
        in_specs=[pl.BlockSpec((1, C, D, HW), lambda g: (g, 0, 0, 0)),   # x
                  pl.BlockSpec((C, mid), lambda g: (0, 0)),              # W1^T
                  pl.BlockSpec((C, mid), lambda g: (0, 0)),              # W2
                  pl.BlockSpec((D, KK * TD), lambda g: (0, 0)),          # banded conv taps
                  pl.BlockSpec((KK * TD, HW), lambda g: (0, 0)),         # padding masks
                  pl.BlockSpec((C, 1), lambda g: (0, 0))],               # depth conv weight
        out_specs=out_spec,
        scratch_shapes=[pltpu.VMEM((TD, 2 * HW), f32),                   # duplicated pool
                        pltpu.VMEM((KK * TD, HW), f32)],                 # staged matmul rhs
        compiler_params=pltpu.CompilerParams(
            dimension_semantics=("parallel",),
            vmem_limit_bytes=48 * 1024 * 1024),
    )(x4d, w1t, w2, wmatf, masks, wd)

    if mode == "sum":
        return out.reshape(B, C, D, H, W)
    return out.reshape(B, 2 * C, H, W)


# ------------------------------- MaskEncoder forward -----------------------------------

@functools.partial(jax.jit, static_argnames=("kernel_size",))
def mask_encoder(x, params, kernel_size=7):
    # down1: two strided (1,2,2) convs, then TripleAttention3D; consumer needs x1 + x2
    h = _downsample_conv(x, params["ds1_w"], params["ds1_b"])
    h = _downsample_conv(h, params["ds2_w"], params["ds2_b"])
    h = _triple_attention(h, params["ta1"], kernel_size, mode="sum")
    # down2: two more strided convs, then TripleAttention3D; consumer needs
    # concat(max_D(x1), max_D(x2)) — fused into the kernel's output
    h = _downsample_conv(h, params["ds3_w"], params["ds3_b"])
    h = _downsample_conv(h, params["ds4_w"], params["ds4_b"])
    return _triple_attention(h, params["ta2"], kernel_size, mode="maxcat")


# ------------------------------- pure-JAX reference ------------------------------------

def _ref_downsample(x, w, b):
    y = jax.lax.conv_general_dilated(
        x, w, window_strides=(1, 2, 2), padding="VALID",
        dimension_numbers=("NCDHW", "OIDHW", "NCDHW"), precision=HIGHEST)
    return y + b[None, :, None, None, None]


def _ref_triple_attention(x, p, k):
    avg = jnp.mean(x, axis=(2, 3, 4))
    mx = jnp.max(x, axis=(2, 3, 4))

    def mlp(v):
        h = jnp.maximum(jnp.dot(v, p["w_mlp1"].T, precision=HIGHEST), 0.0)
        return jnp.dot(h, p["w_mlp2"].T, precision=HIGHEST)

    attn = jax.nn.sigmoid(mlp(avg) + mlp(mx))[:, :, None, None, None]
    xc = x * attn

    avg_c = jnp.mean(xc, axis=1, keepdims=True)
    max_c = jnp.max(xc, axis=1, keepdims=True)
    cat = jnp.concatenate([avg_c, max_c], axis=1)
    conv = jax.lax.conv_general_dilated(
        cat, p["w_spatial"], window_strides=(1, 1, 1),
        padding=[(k // 2, k // 2)] * 3,
        dimension_numbers=("NCDHW", "OIDHW", "NCDHW"), precision=HIGHEST)
    x1 = xc * jax.nn.sigmoid(conv)

    avg_hw = jnp.mean(xc, axis=(3, 4), keepdims=True)
    logits = jnp.einsum("bcdij,oc->bodij", avg_hw, p["w_depth"], precision=HIGHEST)
    x2 = jax.nn.sigmoid(logits) * xc
    return x1, x2


def reference_mask_encoder(x, params, kernel_size=7):
    h = _ref_downsample(x, params["ds1_w"], params["ds1_b"])
    h = _ref_downsample(h, params["ds2_w"], params["ds2_b"])
    x1, x2 = _ref_triple_attention(h, params["ta1"], kernel_size)
    h = x1 + x2
    h = _ref_downsample(h, params["ds3_w"], params["ds3_b"])
    h = _ref_downsample(h, params["ds4_w"], params["ds4_b"])
    x1, x2 = _ref_triple_attention(h, params["ta2"], kernel_size)
    sx = jnp.max(x1, axis=2)
    dx = jnp.max(x2, axis=2)
    return jnp.concatenate([sx, dx], axis=1)


# --------------------------------------- main ------------------------------------------

if __name__ == "__main__":
    B, D, H, W = 2, 4, 32, 32
    in_ch = [1, 8, 16, 16]
    out_ch = [8, 16, 16, 32]
    ksize, reduction = 7, 16
    mid1 = max(out_ch[1] // reduction, 1)
    mid2 = max(out_ch[3] // reduction, 1)

    key = jax.random.PRNGKey(0)
    ks = jax.random.split(key, 17)

    def init(k, shape, fan_in):
        return (jax.random.normal(k, shape, jnp.float32) / np.sqrt(fan_in)).astype(jnp.float32)

    params = {
        # MaskEncoder down-sampling Conv3d layers (kernel (1,2,2), stride (1,2,2), bias=True)
        "ds1_w": init(ks[0], (out_ch[0], in_ch[0], 1, 2, 2), in_ch[0] * 4),
        "ds1_b": init(ks[1], (out_ch[0],), in_ch[0] * 4),
        "ds2_w": init(ks[2], (out_ch[1], in_ch[1], 1, 2, 2), in_ch[1] * 4),
        "ds2_b": init(ks[3], (out_ch[1],), in_ch[1] * 4),
        "ds3_w": init(ks[4], (out_ch[2], in_ch[2], 1, 2, 2), in_ch[2] * 4),
        "ds3_b": init(ks[5], (out_ch[2],), in_ch[2] * 4),
        "ds4_w": init(ks[6], (out_ch[3], in_ch[3], 1, 2, 2), in_ch[3] * 4),
        "ds4_b": init(ks[7], (out_ch[3],), in_ch[3] * 4),
        # TripleAttention3D parameters (all attention convs are bias=False, as in the spec)
        "ta1": {
            "w_mlp1": init(ks[8], (mid1, out_ch[1]), out_ch[1]),
            "w_mlp2": init(ks[9], (out_ch[1], mid1), mid1),
            "w_spatial": init(ks[10], (1, 2, ksize, ksize, ksize), 2 * ksize ** 3),
            "w_depth": init(ks[11], (1, out_ch[1]), out_ch[1]),
        },
        "ta2": {
            "w_mlp1": init(ks[12], (mid2, out_ch[3]), out_ch[3]),
            "w_mlp2": init(ks[13], (out_ch[3], mid2), mid2),
            "w_spatial": init(ks[14], (1, 2, ksize, ksize, ksize), 2 * ksize ** 3),
            "w_depth": init(ks[15], (1, out_ch[3]), out_ch[3]),
        },
    }
    x = jax.random.normal(ks[16], (B, in_ch[0], D, H, W), jnp.float32)

    out = mask_encoder(x, params, kernel_size=ksize)
    jax.block_until_ready(out)

    ref = reference_mask_encoder(x, params, kernel_size=ksize)
    np.testing.assert_allclose(np.asarray(out), np.asarray(ref), rtol=2e-3, atol=2e-3)
    print("KERNEL_OK")
</pallas_src>

<mosaic_0001>
module attributes {stable_mosaic.version = 11 : i64} {
  func.func @_downsample_conv_kernel(%arg0: i32, %arg1: memref<1x8x1024xf32, #tpu.memory_space<vmem>>, %arg2: memref<8x8xf32, #tpu.memory_space<vmem>>, %arg3: memref<8x1xf32, #tpu.memory_space<vmem>>, %arg4: memref<1x8x1024xf32, #tpu.memory_space<vmem>>) attributes {dimension_semantics = [#tpu.dimension_semantics<parallel>], iteration_bounds = array<i64: 2>, scalar_prefetch = 0 : i64, scratch_operands = 0 : i64, tpu.core_type = #tpu.core_type<tc>, window_params = [{transform_indices = @transform_0, window_bounds = array<i64: 1, 8, 1024>}, {pipeline_mode = #tpu.pipeline_mode<synchronous>, transform_indices = @transform_1, window_bounds = array<i64: 8, 8>}, {pipeline_mode = #tpu.pipeline_mode<synchronous>, transform_indices = @transform_2, window_bounds = array<i64: 8, 1>}, {transform_indices = @transform_3, window_bounds = array<i64: 1, 8, 1024>}]} {
    %c0 = arith.constant 0 : index
    %c0_0 = arith.constant 0 : index
    %0 = vector.load %arg2[%c0, %c0_0] : memref<8x8xf32, #tpu.memory_space<vmem>>, vector<8x8xf32>
    %c0_1 = arith.constant 0 : index
    %c0_2 = arith.constant 0 : index
    %c0_3 = arith.constant 0 : index
    %1 = vector.load %arg1[%c0_1, %c0_2, %c0_3] : memref<1x8x1024xf32, #tpu.memory_space<vmem>>, vector<1x8x1024xf32>
    %2 = vector.shape_cast %1 : vector<1x8x1024xf32> to vector<8x1024xf32>
    %cst = arith.constant dense<0.000000e+00> : vector<8x1024xf32>
    %3 = tpu.matmul %0, %2, %cst {dimension_numbers = #tpu.dot_dimension_numbers<[1], [0], [0], [1], [0, 0, 1, 1], [], []>, precision = #tpu.contract_precision<fp32>} : vector<8x8xf32>, vector<8x1024xf32>, vector<8x1024xf32> -> vector<8x1024xf32>
    %c0_4 = arith.constant 0 : index
    %c0_5 = arith.constant 0 : index
    %4 = vector.load %arg3[%c0_4, %c0_5] : memref<8x1xf32, #tpu.memory_space<vmem>>, vector<8x1xf32>
    %5 = vector.broadcast %4 : vector<8x1xf32> to vector<8x1024xf32>
    %6 = arith.addf %3, %5 : vector<8x1024xf32>
    %c0_6 = arith.constant 0 : index
    %c0_7 = arith.constant 0 : index
    %c0_8 = arith.constant 0 : index
    %7 = vector.load %arg4[%c0_6, %c0_7, %c0_8] : memref<1x8x1024xf32, #tpu.memory_space<vmem>>, vector<1x8x1024xf32>
    %8 = vector.shape_cast %7 : vector<1x8x1024xf32> to vector<8x1024xf32>
    %9 = vector.shape_cast %6 : vector<8x1024xf32> to vector<1x8x1024xf32>
    tpu.vector_store %arg4[%c0_6, %c0_7, %c0_8], %9 {strides = array<i32>} : memref<1x8x1024xf32, #tpu.memory_space<vmem>>, vector<1x8x1024xf32>,
    return
  }
  func.func @transform_0(%arg0: i32) -> (i32, i32, i32) {
    %c0_i32 = arith.constant 0 : i32
    %c0_i32_0 = arith.constant 0 : i32
    %c0_i32_1 = arith.constant 0 : i32
    return %arg0, %c0_i32, %c0_i32_0 : i32, i32, i32
  }
  func.func @transform_1(%arg0: i32) -> (i32, i32) {
    %c0_i32 = arith.constant 0 : i32
    %c0_i32_0 = arith.constant 0 : i32
    %c0_i32_1 = arith.constant 0 : i32
    return %c0_i32, %c0_i32_0 : i32, i32
  }
  func.func @transform_2(%arg0: i32) -> (i32, i32) {
    %c0_i32 = arith.constant 0 : i32
    %c0_i32_0 = arith.constant 0 : i32
    %c0_i32_1 = arith.constant 0 : i32
    return %c0_i32, %c0_i32_0 : i32, i32
  }
  func.func @transform_3(%arg0: i32) -> (i32, i32, i32) {
    %c0_i32 = arith.constant 0 : i32
    %c0_i32_0 = arith.constant 0 : i32
    %c0_i32_1 = arith.constant 0 : i32
    return %arg0, %c0_i32, %c0_i32_0 : i32, i32, i32
  }
}

module attributes {stable_mosaic.version = 11 : i64} {
  func.func @_downsample_conv_kernel(%arg0: i32, %arg1: memref<1x32x256xf32, #tpu.memory_space<vmem>>, %arg2: memref<16x32xf32, #tpu.memory_space<vmem>>, %arg3: memref<16x1xf32, #tpu.memory_space<vmem>>, %arg4: memref<1x16x256xf32, #tpu.memory_space<vmem>>) attributes {dimension_semantics = [#tpu.dimension_semantics<parallel>], iteration_bounds = array<i64: 2>, scalar_prefetch = 0 : i64, scratch_operands = 0 : i64, tpu.core_type = #tpu.core_type<tc>, window_params = [{transform_indices = @transform_0, window_bounds = array<i64: 1, 32, 256>}, {pipeline_mode = #tpu.pipeline_mode<synchronous>, transform_indices = @transform_1, window_bounds = array<i64: 16, 32>}, {pipeline_mode = #tpu.pipeline_mode<synchronous>, transform_indices = @transform_2, window_bounds = array<i64: 16, 1>}, {transform_indices = @transform_3, window_bounds = array<i64: 1, 16, 256>}]} {
    %c0 = arith.constant 0 : index
    %c0_0 = arith.constant 0 : index
    %0 = vector.load %arg2[%c0, %c0_0] : memref<16x32xf32, #tpu.memory_space<vmem>>, vector<16x32xf32>
    %c0_1 = arith.constant 0 : index
    %c0_2 = arith.constant 0 : index
    %c0_3 = arith.constant 0 : index
    %1 = vector.load %arg1[%c0_1, %c0_2, %c0_3] : memref<1x32x256xf32, #tpu.memory_space<vmem>>, vector<1x32x256xf32>
    %2 = vector.shape_cast %1 : vector<1x32x256xf32> to vector<32x256xf32>
    %cst = arith.constant dense<0.000000e+00> : vector<16x256xf32>
    %3 = tpu.matmul %0, %2, %cst {dimension_numbers = #tpu.dot_dimension_numbers<[1], [0], [0], [1], [0, 0, 1, 1], [], []>, precision = #tpu.contract_precision<fp32>} : vector<16x32xf32>, vector<32x256xf32>, vector<16x256xf32> -> vector<16x256xf32>
    %c0_4 = arith.constant 0 : index
    %c0_5 = arith.constant 0 : index
    %4 = vector.load %arg3[%c0_4, %c0_5] : memref<16x1xf32, #tpu.memory_space<vmem>>, vector<16x1xf32>
    %5 = vector.broadcast %4 : vector<16x1xf32> to vector<16x256xf32>
    %6 = arith.addf %3, %5 : vector<16x256xf32>
    %c0_6 = arith.constant 0 : index
    %c0_7 = arith.constant 0 : index
    %c0_8 = arith.constant 0 : index
    %7 = vector.load %arg4[%c0_6, %c0_7, %c0_8] : memref<1x16x256xf32, #tpu.memory_space<vmem>>, vector<1x16x256xf32>
    %8 = vector.shape_cast %7 : vector<1x16x256xf32> to vector<16x256xf32>
    %9 = vector.shape_cast %6 : vector<16x256xf32> to vector<1x16x256xf32>
    tpu.vector_store %arg4[%c0_6, %c0_7, %c0_8], %9 {strides = array<i32>} : memref<1x16x256xf32, #tpu.memory_space<vmem>>, vector<1x16x256xf32>,
    return
  }
  func.func @transform_0(%arg0: i32) -> (i32, i32, i32) {
    %c0_i32 = arith.constant 0 : i32
    %c0_i32_0 = arith.constant 0 : i32
    %c0_i32_1 = arith.constant 0 : i32
    return %arg0, %c0_i32, %c0_i32_0 : i32, i32, i32
  }
  func.func @transform_1(%arg0: i32) -> (i32, i32) {
    %c0_i32 = arith.constant 0 : i32
    %c0_i32_0 = arith.constant 0 : i32
    %c0_i32_1 = arith.constant 0 : i32
    return %c0_i32, %c0_i32_0 : i32, i32
  }
  func.func @transform_2(%arg0: i32) -> (i32, i32) {
    %c0_i32 = arith.constant 0 : i32
    %c0_i32_0 = arith.constant 0 : i32
    %c0_i32_1 = arith.constant 0 : i32
    return %c0_i32, %c0_i32_0 : i32, i32
  }
  func.func @transform_3(%arg0: i32) -> (i32, i32, i32) {
    %c0_i32 = arith.constant 0 : i32
    %c0_i32_0 = arith.constant 0 : i32
    %c0_i32_1 = arith.constant 0 : i32
    return %arg0, %c0_i32, %c0_i32_0 : i32, i32, i32
  }
}

module attributes {stable_mosaic.version = 11 : i64} {
  func.func @_triple_attention_kernel(%arg0: i32, %arg1: memref<1x16x4x64xf32, #tpu.memory_space<vmem>>, %arg2: memref<16x1xf32, #tpu.memory_space<vmem>>, %arg3: memref<16x1xf32, #tpu.memory_space<vmem>>, %arg4: memref<4x392xf32, #tpu.memory_space<vmem>>, %arg5: memref<392x64xf32, #tpu.memory_space<vmem>>, %arg6: memref<16x1xf32, #tpu.memory_space<vmem>>, %arg7: memref<1x16x4x64xf32, #tpu.memory_space<vmem>>, %arg8: memref<8x128xf32, #tpu.memory_space<vmem>>, %arg9: memref<392x64xf32, #tpu.memory_space<vmem>>) attributes {dimension_semantics = [#tpu.dimension_semantics<parallel>], iteration_bounds = array<i64: 2>, scalar_prefetch = 0 : i64, scratch_operands = 2 : i64, tpu.core_type = #tpu.core_type<tc>, window_params = [{transform_indices = @transform_0, window_bounds = array<i64: 1, 16, 4, 64>}, {pipeline_mode = #tpu.pipeline_mode<synchronous>, transform_indices = @transform_1, window_bounds = array<i64: 16, 1>}, {pipeline_mode = #tpu.pipeline_mode<synchronous>, transform_indices = @transform_2, window_bounds = array<i64: 16, 1>}, {pipeline_mode = #tpu.pipeline_mode<synchronous>, transform_indices = @transform_3, window_bounds = array<i64: 4, 392>}, {pipeline_mode = #tpu.pipeline_mode<synchronous>, transform_indices = @transform_4, window_bounds = array<i64: 392, 64>}, {pipeline_mode = #tpu.pipeline_mode<synchronous>, transform_indices = @transform_5, window_bounds = array<i64: 16, 1>}, {transform_indices = @transform_6, window_bounds = array<i64: 1, 16, 4, 64>}]} {
    %c0 = arith.constant 0 : index
    %c0_0 = arith.constant 0 : index
    %c0_1 = arith.constant 0 : index
    %c0_2 = arith.constant 0 : index
    %0 = vector.load %arg1[%c0, %c0_0, %c0_1, %c0_2] : memref<1x16x4x64xf32, #tpu.memory_space<vmem>>, vector<1x16x4x64xf32>
    %1 = vector.shape_cast %0 : vector<1x16x4x64xf32> to vector<16x4x64xf32>
    %cst = arith.constant dense<0.000000e+00> : vector<16x4xf32>
    %2 = vector.multi_reduction <add>, %1, %cst [2] : vector<16x4x64xf32> to vector<16x4xf32>
    %cst_3 = arith.constant 6.400000e+01 : f32
    %3 = vector.broadcast %cst_3 : f32 to vector<16x4xf32>
    %4 = arith.divf %2, %3 : vector<16x4xf32>
    %cst_4 = arith.constant dense<0.000000e+00> : vector<16xf32>
    %5 = vector.multi_reduction <add>, %4, %cst_4 [1] : vector<16x4xf32> to vector<16xf32>
    %6 = vector.shape_cast %5 : vector<16xf32> to vector<16x1xf32>
    %cst_5 = arith.constant 4.000000e+00 : f32
    %7 = vector.broadcast %cst_5 : f32 to vector<16x1xf32>
    %8 = arith.divf %6, %7 : vector<16x1xf32>
    %cst_6 = arith.constant dense<0xFF800000> : vector<16x4xf32>
    %9 = vector.multi_reduction <maximumf>, %1, %cst_6 [2] : vector<16x4x64xf32> to vector<16x4xf32>
    %cst_7 = arith.constant dense<0xFF800000> : vector<16xf32>
    %10 = vector.multi_reduction <maximumf>, %9, %cst_7 [1] : vector<16x4xf32> to vector<16xf32>
    %11 = vector.shape_cast %10 : vector<16xf32> to vector<16x1xf32>
    %c0_8 = arith.constant 0 : index
    %c0_9 = arith.constant 0 : index
    %12 = vector.load %arg2[%c0_8, %c0_9] : memref<16x1xf32, #tpu.memory_space<vmem>>, vector<16x1xf32>
    %c0_10 = arith.constant 0 : index
    %c0_11 = arith.constant 0 : index
    %13 = vector.load %arg3[%c0_10, %c0_11] : memref<16x1xf32, #tpu.memory_space<vmem>>, vector<16x1xf32>
    %14 = arith.mulf %12, %8 : vector<16x1xf32>
    %cst_12 = arith.constant dense<0.000000e+00> : vector<1xf32>
    %15 = vector.multi_reduction <add>, %14, %cst_12 [0] : vector<16x1xf32> to vector<1xf32>
    %16 = vector.shape_cast %15 : vector<1xf32> to vector<1x1xf32>
    %cst_13 = arith.constant 0.000000e+00 : f32
    %17 = vector.broadcast %cst_13 : f32 to vector<1x1xf32>
    %18 = arith.maximumf %16, %17 : vector<1x1xf32>
    %19 = vector.broadcast %18 : vector<1x1xf32> to vector<16x1xf32>
    %20 = arith.mulf %13, %19 : vector<16x1xf32>
    %cst_14 = arith.constant dense<0.000000e+00> : vector<16xf32>
    %21 = vector.multi_reduction <add>, %20, %cst_14 [1] : vector<16x1xf32> to vector<16xf32>
    %22 = vector.shape_cast %21 : vector<16xf32> to vector<16x1xf32>
    %23 = arith.mulf %12, %11 : vector<16x1xf32>
    %cst_15 = arith.constant dense<0.000000e+00> : vector<1xf32>
    %24 = vector.multi_reduction <add>, %23, %cst_15 [0] : vector<16x1xf32> to vector<1xf32>
    %25 = vector.shape_cast %24 : vector<1xf32> to vector<1x1xf32>
    %cst_16 = arith.constant 0.000000e+00 : f32
    %26 = vector.broadcast %cst_16 : f32 to vector<1x1xf32>
    %27 = arith.maximumf %25, %26 : vector<1x1xf32>
    %28 = vector.broadcast %27 : vector<1x1xf32> to vector<16x1xf32>
    %29 = arith.mulf %13, %28 : vector<16x1xf32>
    %cst_17 = arith.constant dense<0.000000e+00> : vector<16xf32>
    %30 = vector.multi_reduction <add>, %29, %cst_17 [1] : vector<16x1xf32> to vector<16xf32>
    %31 = vector.shape_cast %30 : vector<16xf32> to vector<16x1xf32>
    %32 = arith.addf %22, %31 : vector<16x1xf32>
    %33 = arith.negf %32 : vector<16x1xf32>
    %34 = math.exp %33 : vector<16x1xf32>
    %cst_18 = arith.constant 1.000000e+00 : f32
    %35 = vector.broadcast %cst_18 : f32 to vector<16x1xf32>
    %36 = arith.addf %35, %34 : vector<16x1xf32>
    %37 = arith.divf %35, %36 : vector<16x1xf32>
    %38 = vector.shape_cast %37 : vector<16x1xf32> to vector<16x1x1xf32>
    %39 = vector.broadcast %38 : vector<16x1x1xf32> to vector<16x4x64xf32>
    %40 = arith.mulf %1, %39 : vector<16x4x64xf32>
    %cst_19 = arith.constant dense<0.000000e+00> : vector<4x64xf32>
    %41 = vector.multi_reduction <add>, %40, %cst_19 [0] : vector<16x4x64xf32> to vector<4x64xf32>
    %cst_20 = arith.constant 1.600000e+01 : f32
    %42 = vector.broadcast %cst_20 : f32 to vector<4x64xf32>
    %43 = arith.divf %41, %42 : vector<4x64xf32>
    %44 = vector.broadcast %38 : vector<16x1x1xf32> to vector<16x4x64xf32>
    %45 = arith.mulf %1, %44 : vector<16x4x64xf32>
    %cst_21 = arith.constant dense<0xFF800000> : vector<4x64xf32>
    %46 = vector.multi_reduction <maximumf>, %45, %cst_21 [0] : vector<16x4x64xf32> to vector<4x64xf32>
    %47 = tpu.concatenate %43, %43 in 1 : vector<4x64xf32>, vector<4x64xf32> -> vector<4x128xf32>
    %48 = tpu.concatenate %46, %46 in 1 : vector<4x64xf32>, vector<4x64xf32> -> vector<4x128xf32>
    %49 = tpu.concatenate %47, %48 in 0 : vector<4x128xf32>, vector<4x128xf32> -> vector<8x128xf32>
    %c0_22 = arith.constant 0 : index
    %c0_23 = arith.constant 0 : index
    %50 = vector.load %arg8[%c0_22, %c0_23] : memref<8x128xf32, #tpu.memory_space<vmem>>, vector<8x128xf32>
    tpu.vector_store %arg8[%c0_22, %c0_23], %49 {strides = array<i32>} : memref<8x128xf32, #tpu.memory_space<vmem>>, vector<8x128xf32>,
    %c0_24 = arith.constant 0 : index
    %c37 = arith.constant 37 : index
    %51 = vector.load %arg8[%c0_24, %c37] : memref<8x128xf32, #tpu.memory_space<vmem>>, vector<8x64xf32>
    %c0_25 = arith.constant 0 : index
    %c0_26 = arith.constant 0 : index
    %52 = vector.load %arg5[%c0_25, %c0_26] : memref<392x64xf32, #tpu.memory_space<vmem>>, vector<8x64xf32>
    %53 = arith.mulf %51, %52 : vector<8x64xf32>
    %c0_27 = arith.constant 0 : index
    %c0_28 = arith.constant 0 : index
    %54 = vector.load %arg9[%c0_27, %c0_28] : memref<392x64xf32, #tpu.memory_space<vmem>>, vector<8x64xf32>
    tpu.vector_store %arg9[%c0_27, %c0_28], %53 {strides = array<i32>} : memref<392x64xf32, #tpu.memory_space<vmem>>, vector<8x64xf32>,
    %c0_29 = arith.constant 0 : index
    %c38 = arith.constant 38 : index
    %55 = vector.load %arg8[%c0_29, %c38] : memref<8x128xf32, #tpu.memory_space<vmem>>, vector<8x64xf32>
    %c8 = arith.constant 8 : index
    %c0_30 = arith.constant 0 : index
    %56 = vector.load %arg5[%c8, %c0_30] : memref<392x64xf32, #tpu.memory_space<vmem>>, vector<8x64xf32>
    %57 = arith.mulf %55, %56 : vector<8x64xf32>
    %c8_31 = arith.constant 8 : index
    %c0_32 = arith.constant 0 : index
    %58 = vector.load %arg9[%c8_31, %c0_32] : memref<392x64xf32, #tpu.memory_space<vmem>>, vector<8x64xf32>
    tpu.vector_store %arg9[%c8_31, %c0_32], %57 {strides = array<i32>} : memref<392x64xf32, #tpu.memory_space<vmem>>, vector<8x64xf32>,
    %c0_33 = arith.constant 0 : index
    %c39 = arith.constant 39 : index
    %59 = vector.load %arg8[%c0_33, %c39] : memref<8x128xf32, #tpu.memory_space<vmem>>, vector<8x64xf32>
    %c16 = arith.constant 16 : index
    %c0_34 = arith.constant 0 : index
    %60 = vector.load %arg5[%c16, %c0_34] : memref<392x64xf32, #tpu.memory_space<vmem>>, vector<8x64xf32>
    %61 = arith.mulf %59, %60 : vector<8x64xf32>
    %c16_35 = arith.constant 16 : index
    %c0_36 = arith.constant 0 : index
    %62 = vector.load %arg9[%c16_35, %c0_36] : memref<392x64xf32, #tpu.memory_space<vmem>>, vector<8x64xf32>
    tpu.vector_store %arg9[%c16_35, %c0_36], %61 {strides = array<i32>} : memref<392x64xf32, #tpu.memory_space<vmem>>, vector<8x64xf32>,
    %c0_37 = arith.constant 0 : index
    %c40 = arith.constant 40 : index
    %63 = vector.load %arg8[%c0_37, %c40] : memref<8x128xf32, #tpu.memory_space<vmem>>, vector<8x64xf32>
    %c24 = arith.constant 24 : index
    %c0_38 = arith.constant 0 : index
    %64 = vector.load %arg5[%c24, %c0_38] : memref<392x64xf32, #tpu.memory_space<vmem>>, vector<8x64xf32>
    %65 = arith.mulf %63, %64 : vector<8x64xf32>
    %c24_39 = arith.constant 24 : index
    %c0_40 = arith.constant 0 : index
    %66 = vector.load %arg9[%c24_39, %c0_40] : memref<392x64xf32, #tpu.memory_space<vmem>>, vector<8x64xf32>
    tpu.vector_store %arg9[%c24_39, %c0_40], %65 {strides = array<i32>} : memref<392x64xf32, #tpu.memory_space<vmem>>, vector<8x64xf32>,
    %c0_41 = arith.constant 0 : index
    %c41 = arith.constant 41 : index
    %67 = vector.load %arg8[%c0_41, %c41] : memref<8x128xf32, #tpu.memory_space<vmem>>, vector<8x64xf32>
    %c32 = arith.constant 32 : index
    %c0_42 = arith.constant 0 : index
    %68 = vector.load %arg5[%c32, %c0_42] : memref<392x64xf32, #tpu.memory_space<vmem>>, vector<8x64xf32>
    %69 = arith.mulf %67, %68 : vector<8x64xf32>
    %c32_43 = arith.constant 32 : index
    %c0_44 = arith.constant 0 : index
    %70 = vector.load %arg9[%c32_43, %c0_44] : memref<392x64xf32, #tpu.memory_space<vmem>>, vector<8x64xf32>
    tpu.vector_store %arg9[%c32_43, %c0_44], %69 {strides = array<i32>} : memref<392x64xf32, #tpu.memory_space<vmem>>, vector<8x64xf32>,
    %c0_45 = arith.constant 0 : index
    %c42 = arith.constant 42 : index
    %71 = vector.load %arg8[%c0_45, %c42] : memref<8x128xf32, #tpu.memory_space<vmem>>, vector<8x64xf32>
    %c40_46 = arith.constant 40 : index
    %c0_47 = arith.constant 0 : index
    %72 = vector.load %arg5[%c40_46, %c0_47] : memref<392x64xf32, #tpu.memory_space<vmem>>, vector<8x64xf32>
    %73 = arith.mulf %71, %72 : vector<8x64xf32>
    %c40_48 = arith.constant 40 : index
    %c0_49 = arith.constant 0 : index
    %74 = vector.load %arg9[%c40_48, %c0_49] : memref<392x64xf32, #tpu.memory_space<vmem>>, vector<8x64xf32>
    tpu.vector_store %arg9[%c40_48, %c0_49], %73 {strides = array<i32>} : memref<392x64xf32, #tpu.memory_space<vmem>>, vector<8x64xf32>,
    %c0_50 = arith.constant 0 : index
    %c43 = arith.constant 43 : index
    %75 = vector.load %arg8[%c0_50, %c43] : memref<8x128xf32, #tpu.memory_space<vmem>>, vector<8x64xf32>
    %c48 = arith.constant 48 : index
    %c0_51 = arith.constant 0 : index
    %76 = vector.load %arg5[%c48, %c0_51] : memref<392x64xf32, #tpu.memory_space<vmem>>, vector<8x64xf32>
    %77 = arith.mulf %75, %76 : vector<8x64xf32>
    %c48_52 = arith.constant 48 : index
    %c0_53 = arith.constant 0 : index
    %78 = vector.load %arg9[%c48_52, %c0_53] : memref<392x64xf32, #tpu.memory_space<vmem>>, vector<8x64xf32>
    tpu.vector_store %arg9[%c48_52, %c0_53], %77 {strides = array<i32>} : memref<392x64xf32, #tpu.memory_space<vmem>>, vector<8x64xf32>,
    %c0_54 = arith.constant 0 : index
    %c45 = arith.constant 45 : index
    %79 = vector.load %arg8[%c0_54, %c45] : memref<8x128xf32, #tpu.memory_space<vmem>>, vector<8x64xf32>
    %c56 = arith.constant 56 : index
    %c0_55 = arith.constant 0 : index
    %80 = vector.load %arg5[%c56, %c0_55] : memref<392x64xf32, #tpu.memory_space<vmem>>, vector<8x64xf32>
    %81 = arith.mulf %79, %80 : vector<8x64xf32>
    %c56_56 = arith.constant 56 : index
    %c0_57 = arith.constant 0 : index
    %82 = vector.load %arg9[%c56_56, %c0_57] : memref<392x64xf32, #tpu.memory_space<vmem>>, vector<8x64xf32>
    tpu.vector_store %arg9[%c56_56, %c0_57], %81 {strides = array<i32>} : memref<392x64xf32, #tpu.memory_space<vmem>>, vector<8x64xf32>,
    %c0_58 = arith.constant 0 : index
    %c46 = arith.constant 46 : index
    %83 = vector.load %arg8[%c0_58, %c46] : memref<8x128xf32, #tpu.memory_space<vmem>>, vector<8x64xf32>
    %c64 = arith.constant 64 : index
    %c0_59 = arith.constant 0 : index
    %84 = vector.load %arg5[%c64, %c0_59] : memref<392x64xf32, #tpu.memory_space<vmem>>, vector<8x64xf32>
    %85 = arith.mulf %83, %84 : vector<8x64xf32>
    %c64_60 = arith.constant 64 : index
    %c0_61 = arith.constant 0 : index
    %86 = vector.load %arg9[%c64_60, %c0_61] : memref<392x64xf32, #tpu.memory_space<vmem>>, vector<8x64xf32>
    tpu.vector_store %arg9[%c64_60, %c0_61], %85 {strides = array<i32>} : memref<392x64xf32, #tpu.memory_space<vmem>>, vector<8x64xf32>,
    %c0_62 = arith.constant 0 : index
    %c47 = arith.constant 47 : index
    %87 = vector.load %arg8[%c0_62, %c47] : memref<8x128xf32, #tpu.memory_space<vmem>>, vector<8x64xf32>
    %c72 = arith.constant 72 : index
    %c0_63 = arith.constant 0 : index
    %88 = vector.load %arg5[%c72, %c0_63] : memref<392x64xf32, #tpu.memory_space<vmem>>, vector<8x64xf32>
    %89 = arith.mulf %87, %88 : vector<8x64xf32>
    %c72_64 = arith.constant 72 : index
    %c0_65 = arith.constant 0 : index
    %90 = vector.load %arg9[%c72_64, %c0_65] : memref<392x64xf32, #tpu.memory_space<vmem>>, vector<8x64xf32>
    tpu.vector_store %arg9[%c72_64, %c0_65], %89 {strides = array<i32>} : memref<392x64xf32, #tpu.memory_space<vmem>>, vector<8x64xf32>,
    %c0_66 = arith.constant 0 : index
    %c48_67 = arith.constant 48 : index
    %91 = vector.load %arg8[%c0_66, %c48_67] : memref<8x128xf32, #tpu.memory_space<vmem>>, vector<8x64xf32>
    %c80 = arith.constant 80 : index
    %c0_68 = arith.constant 0 : index
    %92 = vector.load %arg5[%c80, %c0_68] : memref<392x64xf32, #tpu.memory_space<vmem>>, vector<8x64xf32>
    %93 = arith.mulf %91, %92 : vector<8x64xf32>
    %c80_69 = arith.constant 80 : index
    %c0_70 = arith.constant 0 : index
    %94 = vector.load %arg9[%c80_69, %c0_70] : memref<392x64xf32, #tpu.memory_space<vmem>>, vector<8x64xf32>
    tpu.vector_store %arg9[%c80_69, %c0_70], %93 {strides = array<i32>} : memref<392x64xf32, #tpu.memory_space<vmem>>, vector<8x64xf32>,
    %c0_71 = arith.constant 0 : index
    %c49 = arith.constant 49 : index
    %95 = vector.load %arg8[%c0_71, %c49] : memref<8x128xf32, #tpu.memory_space<vmem>>, vector<8x64xf32>
    %c88 = arith.constant 88 : index
    %c0_72 = arith.constant 0 : index
    %96 = vector.load %arg5[%c88, %c0_72] : memref<392x64xf32, #tpu.memory_space<vmem>>, vector<8x64xf32>
    %97 = arith.mulf %95, %96 : vector<8x64xf32>
    %c88_73 = arith.constant 88 : index
    %c0_74 = arith.constant 0 : index
    %98 = vector.load %arg9[%c88_73, %c0_74] : memref<392x64xf32, #tpu.memory_space<vmem>>, vector<8x64xf32>
    tpu.vector_store %arg9[%c88_73, %c0_74], %97 {strides = array<i32>} : memref<392x64xf32, #tpu.memory_space<vmem>>, vector<8x64xf32>,
    %c0_75 = arith.constant 0 : index
    %c50 = arith.constant 50 : index
    %99 = vector.load %arg8[%c0_75, %c50] : memref<8x128xf32, #tpu.memory_space<vmem>>, vector<8x64xf32>
    %c96 = arith.constant 96 : index
    %c0_76 = arith.constant 0 : index
    %100 = vector.load %arg5[%c96, %c0_76] : memref<392x64xf32, #tpu.memory_space<vmem>>, vector<8x64xf32>
    %101 = arith.mulf %99, %100 : vector<8x64xf32>
    %c96_77 = arith.constant 96 : index
    %c0_78 = arith.constant 0 : index
    %102 = vector.load %arg9[%c96_77, %c0_78] : memref<392x64xf32, #tpu.memory_space<vmem>>, vector<8x64xf32>
    tpu.vector_store %arg9[%c96_77, %c0_78], %101 {strides = array<i32>} : memref<392x64xf32, #tpu.memory_space<vmem>>, vector<8x64xf32>,
    %c0_79 = arith.constant 0 : index
    %c51 = arith.constant 51 : index
    %103 = vector.load %arg8[%c0_79, %c51] : memref<8x128xf32, #tpu.memory_space<vmem>>, vector<8x64xf32>
    %c104 = arith.constant 104 : index
    %c0_80 = arith.constant 0 : index
    %104 = vector.load %arg5[%c104, %c0_80] : memref<392x64xf32, #tpu.memory_space<vmem>>, vector<8x64xf32>
    %105 = arith.mulf %103, %104 : vector<8x64xf32>
    %c104_81 = arith.constant 104 : index
    %c0_82 = arith.constant 0 : index
    %106 = vector.load %arg9[%c104_81, %c0_82] : memref<392x64xf32, #tpu.memory_space<vmem>>, vector<8x64xf32>
    tpu.vector_store %arg9[%c104_81, %c0_82], %105 {strides = array<i32>} : memref<392x64xf32, #tpu.memory_space<vmem>>, vector<8x64xf32>,
    %c0_83 = arith.constant 0 : index
    %c53 = arith.constant 53 : index
    %107 = vector.load %arg8[%c0_83, %c53] : memref<8x128xf32, #tpu.memory_space<vmem>>, vector<8x64xf32>
    %c112 = arith.constant 112 : index
    %c0_84 = arith.constant 0 : index
    %108 = vector.load %arg5[%c112, %c0_84] : memref<392x64xf32, #tpu.memory_space<vmem>>, vector<8x64xf32>
    %109 = arith.mulf %107, %108 : vector<8x64xf32>
    %c112_85 = arith.constant 112 : index
    %c0_86 = arith.constant 0 : index
    %110 = vector.load %arg9[%c112_85, %c0_86] : memref<392x64xf32, #tpu.memory_space<vmem>>, vector<8x64xf32>
    tpu.vector_store %arg9[%c112_85, %c0_86], %109 {strides = array<i32>} : memref<392x64xf32, #tpu.memory_space<vmem>>, vector<8x64xf32>,
    %c0_87 = arith.constant 0 : index
    %c54 = arith.constant 54 : index
    %111 = vector.load %arg8[%c0_87, %c54] : memref<8x128xf32, #tpu.memory_space<vmem>>, vector<8x64xf32>
    %c120 = arith.constant 120 : index
    %c0_88 = arith.constant 0 : index
    %112 = vector.load %arg5[%c120, %c0_88] : memref<392x64xf32, #tpu.memory_space<vmem>>, vector<8x64xf32>
    %113 = arith.mulf %111, %112 : vector<8x64xf32>
    %c120_89 = arith.constant 120 : index
    %c0_90 = arith.constant 0 : index
    %114 = vector.load %arg9[%c120_89, %c0_90] : memref<392x64xf32, #tpu.memory_space<vmem>>, vector<8x64xf32>
    tpu.vector_store %arg9[%c120_89, %c0_90], %113 {strides = array<i32>} : memref<392x64xf32, #tpu.memory_space<vmem>>, vector<8x64xf32>,
    %c0_91 = arith.constant 0 : index
    %c55 = arith.constant 55 : index
    %115 = vector.load %arg8[%c0_91, %c55] : memref<8x128xf32, #tpu.memory_space<vmem>>, vector<8x64xf32>
    %c128 = arith.constant 128 : index
    %c0_92 = arith.constant 0 : index
    %116 = vector.load %arg5[%c128, %c0_92] : memref<392x64xf32, #tpu.memory_space<vmem>>, vector<8x64xf32>
    %117 = arith.mulf %115, %116 : vector<8x64xf32>
    %c128_93 = arith.constant 128 : index
    %c0_94 = arith.constant 0 : index
    %118 = vector.load %arg9[%c128_93, %c0_94] : memref<392x64xf32, #tpu.memory_space<vmem>>, vector<8x64xf32>
    tpu.vector_store %arg9[%c128_93, %c0_94], %117 {strides = array<i32>} : memref<392x64xf32, #tpu.memory_space<vmem>>, vector<8x64xf32>,
    %c0_95 = arith.constant 0 : index
    %c56_96 = arith.constant 56 : index
    %119 = vector.load %arg8[%c0_95, %c56_96] : memref<8x128xf32, #tpu.memory_space<vmem>>, vector<8x64xf32>
    %c136 = arith.constant 136 : index
    %c0_97 = arith.constant 0 : index
    %120 = vector.load %arg5[%c136, %c0_97] : memref<392x64xf32, #tpu.memory_space<vmem>>, vector<8x64xf32>
    %121 = arith.mulf %119, %120 : vector<8x64xf32>
    %c136_98 = arith.constant 136 : index
    %c0_99 = arith.constant 0 : index
    %122 = vector.load %arg9[%c136_98, %c0_99] : memref<392x64xf32, #tpu.memory_space<vmem>>, vector<8x64xf32>
    tpu.vector_store %arg9[%c136_98, %c0_99], %121 {strides = array<i32>} : memref<392x64xf32, #tpu.memory_space<vmem>>, vector<8x64xf32>,
    %c0_100 = arith.constant 0 : index
    %c57 = arith.constant 57 : index
    %123 = vector.load %arg8[%c0_100, %c57] : memref<8x128xf32, #tpu.memory_space<vmem>>, vector<8x64xf32>
    %c144 = arith.constant 144 : index
    %c0_101 = arith.constant 0 : index
    %124 = vector.load %arg5[%c144, %c0_101] : memref<392x64xf32, #tpu.memory_space<vmem>>, vector<8x64xf32>
    %125 = arith.mulf %123, %124 : vector<8x64xf32>
    %c144_102 = arith.constant 144 : index
    %c0_103 = arith.constant 0 : index
    %126 = vector.load %arg9[%c144_102, %c0_103] : memref<392x64xf32, #tpu.memory_space<vmem>>, vector<8x64xf32>
    tpu.vector_store %arg9[%c144_102, %c0_103], %125 {strides = array<i32>} : memref<392x64xf32, #tpu.memory_space<vmem>>, vector<8x64xf32>,
    %c0_104 = arith.constant 0 : index
    %c58 = arith.constant 58 : index
    %127 = vector.load %arg8[%c0_104, %c58] : memref<8x128xf32, #tpu.memory_space<vmem>>, vector<8x64xf32>
    %c152 = arith.constant 152 : index
    %c0_105 = arith.constant 0 : index
    %128 = vector.load %arg5[%c152, %c0_105] : memref<392x64xf32, #tpu.memory_space<vmem>>, vector<8x64xf32>
    %129 = arith.mulf %127, %128 : vector<8x64xf32>
    %c152_106 = arith.constant 152 : index
    %c0_107 = arith.constant 0 : index
    %130 = vector.load %arg9[%c152_106, %c0_107] : memref<392x64xf32, #tpu.memory_space<vmem>>, vector<8x64xf32>
    tpu.vector_store %arg9[%c152_106, %c0_107], %129 {strides = array<i32>} : memref<392x64xf32, #tpu.memory_space<vmem>>, vector<8x64xf32>,
    %c0_108 = arith.constant 0 : index
    %c59 = arith.constant 59 : index
    %131 = vector.load %arg8[%c0_108, %c59] : memref<8x128xf32, #tpu.memory_space<vmem>>, vector<8x64xf32>
    %c160 = arith.constant 160 : index
    %c0_109 = arith.constant 0 : index
    %132 = vector.load %arg5[%c160, %c0_109] : memref<392x64xf32, #tpu.memory_space<vmem>>, vector<8x64xf32>
    %133 = arith.mulf %131, %132 : vector<8x64xf32>
    %c160_110 = arith.constant 160 : index
    %c0_111 = arith.constant 0 : index
    %134 = vector.load %arg9[%c160_110, %c0_111] : memref<392x64xf32, #tpu.memory_space<vmem>>, vector<8x64xf32>
    tpu.vector_store %arg9[%c160_110, %c0_111], %133 {strides = array<i32>} : memref<392x64xf32, #tpu.memory_space<vmem>>, vector<8x64xf32>,
    %c0_112 = arith.constant 0 : index
    %c61 = arith.constant 61 : index
    %135 = vector.load %arg8[%c0_112, %c61] : memref<8x128xf32, #tpu.memory_space<vmem>>, vector<8x64xf32>
    %c168 = arith.constant 168 : index
    %c0_113 = arith.constant 0 : index
    %136 = vector.load %arg5[%c168, %c0_113] : memref<392x64xf32, #tpu.memory_space<vmem>>, vector<8x64xf32>
    %137 = arith.mulf %135, %136 : vector<8x64xf32>
    %c168_114 = arith.constant 168 : index
    %c0_115 = arith.constant 0 : index
    %138 = vector.load %arg9[%c168_114, %c0_115] : memref<392x64xf32, #tpu.memory_space<vmem>>, vector<8x64xf32>
    tpu.vector_store %arg9[%c168_114, %c0_115], %137 {strides = array<i32>} : memref<392x64xf32, #tpu.memory_space<vmem>>, vector<8x64xf32>,
    %c0_116 = arith.constant 0 : index
    %c62 = arith.constant 62 : index
    %139 = vector.load %arg8[%c0_116, %c62] : memref<8x128xf32, #tpu.memory_space<vmem>>, vector<8x64xf32>
    %c176 = arith.constant 176 : index
    %c0_117 = arith.constant 0 : index
    %140 = vector.load %arg5[%c176, %c0_117] : memref<392x64xf32, #tpu.memory_space<vmem>>, vector<8x64xf32>
    %141 = arith.mulf %139, %140 : vector<8x64xf32>
    %c176_118 = arith.constant 176 : index
    %c0_119 = arith.constant 0 : index
    %142 = vector.load %arg9[%c176_118, %c0_119] : memref<392x64xf32, #tpu.memory_space<vmem>>, vector<8x64xf32>
    tpu.vector_store %arg9[%c176_118, %c0_119], %141 {strides = array<i32>} : memref<392x64xf32, #tpu.memory_space<vmem>>, vector<8x64xf32>,
    %c0_120 = arith.constant 0 : index
    %c63 = arith.constant 63 : index
    %143 = vector.load %arg8[%c0_120, %c63] : memref<8x128xf32, #tpu.memory_space<vmem>>, vector<8x64xf32>
    %c184 = arith.constant 184 : index
    %c0_121 = arith.constant 0 : index
    %144 = vector.load %arg5[%c184, %c0_121] : memref<392x64xf32, #tpu.memory_space<vmem>>, vector<8x64xf32>
    %145 = arith.mulf %143, %144 : vector<8x64xf32>
    %c184_122 = arith.constant 184 : index
    %c0_123 = arith.constant 0 : index
    %146 = vector.load %arg9[%c184_122, %c0_123] : memref<392x64xf32, #tpu.memory_space<vmem>>, vector<8x64xf32>
    tpu.vector_store %arg9[%c184_122, %c0_123], %145 {strides = array<i32>} : memref<392x64xf32, #tpu.memory_space<vmem>>, vector<8x64xf32>,
    %c0_124 = arith.constant 0 : index
    %c0_125 = arith.constant 0 : index
    %147 = vector.load %arg8[%c0_124, %c0_125] : memref<8x128xf32, #tpu.memory_space<vmem>>, vector<8x64xf32>
    %c192 = arith.constant 192 : index
    %c0_126 = arith.constant 0 : index
    %148 = vector.load %arg5[%c192, %c0_126] : memref<392x64xf32, #tpu.memory_space<vmem>>, vector<8x64xf32>
    %149 = arith.mulf %147, %148 : vector<8x64xf32>
    %c192_127 = arith.constant 192 : index
    %c0_128 = arith.constant 0 : index
    %150 = vector.load %arg9[%c192_127, %c0_128] : memref<392x64xf32, #tpu.memory_space<vmem>>, vector<8x64xf32>
    tpu.vector_store %arg9[%c192_127, %c0_128], %149 {strides = array<i32>} : memref<392x64xf32, #tpu.memory_space<vmem>>, vector<8x64xf32>,
    %c0_129 = arith.constant 0 : index
    %c1 = arith.constant 1 : index
    %151 = vector.load %arg8[%c0_129, %c1] : memref<8x128xf32, #tpu.memory_space<vmem>>, vector<8x64xf32>
    %c200 = arith.constant 200 : index
    %c0_130 = arith.constant 0 : index
    %152 = vector.load %arg5[%c200, %c0_130] : memref<392x64xf32, #tpu.memory_space<vmem>>, vector<8x64xf32>
    %153 = arith.mulf %151, %152 : vector<8x64xf32>
    %c200_131 = arith.constant 200 : index
    %c0_132 = arith.constant 0 : index
    %154 = vector.load %arg9[%c200_131, %c0_132] : memref<392x64xf32, #tpu.memory_space<vmem>>, vector<8x64xf32>
    tpu.vector_store %arg9[%c200_131, %c0_132], %153 {strides = array<i32>} : memref<392x64xf32, #tpu.memory_space<vmem>>, vector<8x64xf32>,
    %c0_133 = arith.constant 0 : index
    %c2 = arith.constant 2 : index
    %155 = vector.load %arg8[%c0_133, %c2] : memref<8x128xf32, #tpu.memory_space<vmem>>, vector<8x64xf32>
    %c208 = arith.constant 208 : index
    %c0_134 = arith.constant 0 : index
    %156 = vector.load %arg5[%c208, %c0_134] : memref<392x64xf32, #tpu.memory_space<vmem>>, vector<8x64xf32>
    %157 = arith.mulf %155, %156 : vector<8x64xf32>
    %c208_135 = arith.constant 208 : index
    %c0_136 = arith.constant 0 : index
    %158 = vector.load %arg9[%c208_135, %c0_136] : memref<392x64xf32, #tpu.memory_space<vmem>>, vector<8x64xf32>
    tpu.vector_store %arg9[%c208_135, %c0_136], %157 {strides = array<i32>} : memref<392x64xf32, #tpu.memory_space<vmem>>, vector<8x64xf32>,
    %c0_137 = arith.constant 0 : index
    %c3 = arith.constant 3 : index
    %159 = vector.load %arg8[%c0_137, %c3] : memref<8x128xf32, #tpu.memory_space<vmem>>, vector<8x64xf32>
    %c216 = arith.constant 216 : index
    %c0_138 = arith.constant 0 : index
    %160 = vector.load %arg5[%c216, %c0_138] : memref<392x64xf32, #tpu.memory_space<vmem>>, vector<8x64xf32>
    %161 = arith.mulf %159, %160 : vector<8x64xf32>
    %c216_139 = arith.constant 216 : index
    %c0_140 = arith.constant 0 : index
    %162 = vector.load %arg9[%c216_139, %c0_140] : memref<392x64xf32, #tpu.memory_space<vmem>>, vector<8x64xf32>
    tpu.vector_store %arg9[%c216_139, %c0_140], %161 {strides = array<i32>} : memref<392x64xf32, #tpu.memory_space<vmem>>, vector<8x64xf32>,
    %c0_141 = arith.constant 0 : index
    %c5 = arith.constant 5 : index
    %163 = vector.load %arg8[%c0_141, %c5] : memref<8x128xf32, #tpu.memory_space<vmem>>, vector<8x64xf32>
    %c224 = arith.constant 224 : index
    %c0_142 = arith.constant 0 : index
    %164 = vector.load %arg5[%c224, %c0_142] : memref<392x64xf32, #tpu.memory_space<vmem>>, vector<8x64xf32>
    %165 = arith.mulf %163, %164 : vector<8x64xf32>
    %c224_143 = arith.constant 224 : index
    %c0_144 = arith.constant 0 : index
    %166 = vector.load %arg9[%c224_143, %c0_144] : memref<392x64xf32, #tpu.memory_space<vmem>>, vector<8x64xf32>
    tpu.vector_store %arg9[%c224_143, %c0_144], %165 {strides = array<i32>} : memref<392x64xf32, #tpu.memory_space<vmem>>, vector<8x64xf32>,
    %c0_145 = arith.constant 0 : index
    %c6 = arith.constant 6 : index
    %167 = vector.load %arg8[%c0_145, %c6] : memref<8x128xf32, #tpu.memory_space<vmem>>, vector<8x64xf32>
    %c232 = arith.constant 232 : index
    %c0_146 = arith.constant 0 : index
    %168 = vector.load %arg5[%c232, %c0_146] : memref<392x64xf32, #tpu.memory_space<vmem>>, vector<8x64xf32>
    %169 = arith.mulf %167, %168 : vector<8x64xf32>
    %c232_147 = arith.constant 232 : index
    %c0_148 = arith.constant 0 : index
    %170 = vector.load %arg9[%c232_147, %c0_148] : memref<392x64xf32, #tpu.memory_space<vmem>>, vector<8x64xf32>
    tpu.vector_store %arg9[%c232_147, %c0_148], %169 {strides = array<i32>} : memref<392x64xf32, #tpu.memory_space<vmem>>, vector<8x64xf32>,
    %c0_149 = arith.constant 0 : index
    %c7 = arith.constant 7 : index
    %171 = vector.load %arg8[%c0_149, %c7] : memref<8x128xf32, #tpu.memory_space<vmem>>, vector<8x64xf32>
    %c240 = arith.constant 240 : index
    %c0_150 = arith.constant 0 : index
    %172 = vector.load %arg5[%c240, %c0_150] : memref<392x64xf32, #tpu.memory_space<vmem>>, vector<8x64xf32>
    %173 = arith.mulf %171, %172 : vector<8x64xf32>
    %c240_151 = arith.constant 240 : index
    %c0_152 = arith.constant 0 : index
    %174 = vector.load %arg9[%c240_151, %c0_152] : memref<392x64xf32, #tpu.memory_space<vmem>>, vector<8x64xf32>
    tpu.vector_store %arg9[%c240_151, %c0_152], %173 {strides = array<i32>} : memref<392x64xf32, #tpu.memory_space<vmem>>, vector<8x64xf32>,
    %c0_153 = arith.constant 0 : index
    %c8_154 = arith.constant 8 : index
    %175 = vector.load %arg8[%c0_153, %c8_154] : memref<8x128xf32, #tpu.memory_space<vmem>>, vector<8x64xf32>
    %c248 = arith.constant 248 : index
    %c0_155 = arith.constant 0 : index
    %176 = vector.load %arg5[%c248, %c0_155] : memref<392x64xf32, #tpu.memory_space<vmem>>, vector<8x64xf32>
    %177 = arith.mulf %175, %176 : vector<8x64xf32>
    %c248_156 = arith.constant 248 : index
    %c0_157 = arith.constant 0 : index
    %178 = vector.load %arg9[%c248_156, %c0_157] : memref<392x64xf32, #tpu.memory_space<vmem>>, vector<8x64xf32>
    tpu.vector_store %arg9[%c248_156, %c0_157], %177 {strides = array<i32>} : memref<392x64xf32, #tpu.memory_space<vmem>>, vector<8x64xf32>,
    %c0_158 = arith.constant 0 : index
    %c9 = arith.constant 9 : index
    %179 = vector.load %arg8[%c0_158, %c9] : memref<8x128xf32, #tpu.memory_space<vmem>>, vector<8x64xf32>
    %c256 = arith.constant 256 : index
    %c0_159 = arith.constant 0 : index
    %180 = vector.load %arg5[%c256, %c0_159] : memref<392x64xf32, #tpu.memory_space<vmem>>, vector<8x64xf32>
    %181 = arith.mulf %179, %180 : vector<8x64xf32>
    %c256_160 = arith.constant 256 : index
    %c0_161 = arith.constant 0 : index
    %182 = vector.load %arg9[%c256_160, %c0_161] : memref<392x64xf32, #tpu.memory_space<vmem>>, vector<8x64xf32>
    tpu.vector_store %arg9[%c256_160, %c0_161], %181 {strides = array<i32>} : memref<392x64xf32, #tpu.memory_space<vmem>>, vector<8x64xf32>,
    %c0_162 = arith.constant 0 : index
    %c10 = arith.constant 10 : index
    %183 = vector.load %arg8[%c0_162, %c10] : memref<8x128xf32, #tpu.memory_space<vmem>>, vector<8x64xf32>
    %c264 = arith.constant 264 : index
    %c0_163 = arith.constant 0 : index
    %184 = vector.load %arg5[%c264, %c0_163] : memref<392x64xf32, #tpu.memory_space<vmem>>, vector<8x64xf32>
    %185 = arith.mulf %183, %184 : vector<8x64xf32>
    %c264_164 = arith.constant 264 : index
    %c0_165 = arith.constant 0 : index
    %186 = vector.load %arg9[%c264_164, %c0_165] : memref<392x64xf32, #tpu.memory_space<vmem>>, vector<8x64xf32>
    tpu.vector_store %arg9[%c264_164, %c0_165], %185 {strides = array<i32>} : memref<392x64xf32, #tpu.memory_space<vmem>>, vector<8x64xf32>,
    %c0_166 = arith.constant 0 : index
    %c11 = arith.constant 11 : index
    %187 = vector.load %arg8[%c0_166, %c11] : memref<8x128xf32, #tpu.memory_space<vmem>>, vector<8x64xf32>
    %c272 = arith.constant 272 : index
    %c0_167 = arith.constant 0 : index
    %188 = vector.load %arg5[%c272, %c0_167] : memref<392x64xf32, #tpu.memory_space<vmem>>, vector<8x64xf32>
    %189 = arith.mulf %187, %188 : vector<8x64xf32>
    %c272_168 = arith.constant 272 : index
    %c0_169 = arith.constant 0 : index
    %190 = vector.load %arg9[%c272_168, %c0_169] : memref<392x64xf32, #tpu.memory_space<vmem>>, vector<8x64xf32>
    tpu.vector_store %arg9[%c272_168, %c0_169], %189 {strides = array<i32>} : memref<392x64xf32, #tpu.memory_space<vmem>>, vector<8x64xf32>,
    %c0_170 = arith.constant 0 : index
    %c13 = arith.constant 13 : index
    %191 = vector.load %arg8[%c0_170, %c13] : memref<8x128xf32, #tpu.memory_space<vmem>>, vector<8x64xf32>
    %c280 = arith.constant 280 : index
    %c0_171 = arith.constant 0 : index
    %192 = vector.load %arg5[%c280, %c0_171] : memref<392x64xf32, #tpu.memory_space<vmem>>, vector<8x64xf32>
    %193 = arith.mulf %191, %192 : vector<8x64xf32>
    %c280_172 = arith.constant 280 : index
    %c0_173 = arith.constant 0 : index
    %194 = vector.load %arg9[%c280_172, %c0_173] : memref<392x64xf32, #tpu.memory_space<vmem>>, vector<8x64xf32>
    tpu.vector_store %arg9[%c280_172, %c0_173], %193 {strides = array<i32>} : memref<392x64xf32, #tpu.memory_space<vmem>>, vector<8x64xf32>,
    %c0_174 = arith.constant 0 : index
    %c14 = arith.constant 14 : index
    %195 = vector.load %arg8[%c0_174, %c14] : memref<8x128xf32, #tpu.memory_space<vmem>>, vector<8x64xf32>
    %c288 = arith.constant 288 : index
    %c0_175 = arith.constant 0 : index
    %196 = vector.load %arg5[%c288, %c0_175] : memref<392x64xf32, #tpu.memory_space<vmem>>, vector<8x64xf32>
    %197 = arith.mulf %195, %196 : vector<8x64xf32>
    %c288_176 = arith.constant 288 : index
    %c0_177 = arith.constant 0 : index
    %198 = vector.load %arg9[%c288_176, %c0_177] : memref<392x64xf32, #tpu.memory_space<vmem>>, vector<8x64xf32>
    tpu.vector_store %arg9[%c288_176, %c0_177], %197 {strides = array<i32>} : memref<392x64xf32, #tpu.memory_space<vmem>>, vector<8x64xf32>,
    %c0_178 = arith.constant 0 : index
    %c15 = arith.constant 15 : index
    %199 = vector.load %arg8[%c0_178, %c15] : memref<8x128xf32, #tpu.memory_space<vmem>>, vector<8x64xf32>
    %c296 = arith.constant 296 : index
    %c0_179 = arith.constant 0 : index
    %200 = vector.load %arg5[%c296, %c0_179] : memref<392x64xf32, #tpu.memory_space<vmem>>, vector<8x64xf32>
    %201 = arith.mulf %199, %200 : vector<8x64xf32>
    %c296_180 = arith.constant 296 : index
    %c0_181 = arith.constant 0 : index
    %202 = vector.load %arg9[%c296_180, %c0_181] : memref<392x64xf32, #tpu.memory_space<vmem>>, vector<8x64xf32>
    tpu.vector_store %arg9[%c296_180, %c0_181], %201 {strides = array<i32>} : memref<392x64xf32, #tpu.memory_space<vmem>>, vector<8x64xf32>,
    %c0_182 = arith.constant 0 : index
    %c16_183 = arith.constant 16 : index
    %203 = vector.load %arg8[%c0_182, %c16_183] : memref<8x128xf32, #tpu.memory_space<vmem>>, vector<8x64xf32>
    %c304 = arith.constant 304 : index
    %c0_184 = arith.constant 0 : index
    %204 = vector.load %arg5[%c304, %c0_184] : memref<392x64xf32, #tpu.memory_space<vmem>>, vector<8x64xf32>
    %205 = arith.mulf %203, %204 : vector<8x64xf32>
    %c304_185 = arith.constant 304 : index
    %c0_186 = arith.constant 0 : index
    %206 = vector.load %arg9[%c304_185, %c0_186] : memref<392x64xf32, #tpu.memory_space<vmem>>, vector<8x64xf32>
    tpu.vector_store %arg9[%c304_185, %c0_186], %205 {strides = array<i32>} : memref<392x64xf32, #tpu.memory_space<vmem>>, vector<8x64xf32>,
    %c0_187 = arith.constant 0 : index
    %c17 = arith.constant 17 : index
    %207 = vector.load %arg8[%c0_187, %c17] : memref<8x128xf32, #tpu.memory_space<vmem>>, vector<8x64xf32>
    %c312 = arith.constant 312 : index
    %c0_188 = arith.constant 0 : index
    %208 = vector.load %arg5[%c312, %c0_188] : memref<392x64xf32, #tpu.memory_space<vmem>>, vector<8x64xf32>
    %209 = arith.mulf %207, %208 : vector<8x64xf32>
    %c312_189 = arith.constant 312 : index
    %c0_190 = arith.constant 0 : index
    %210 = vector.load %arg9[%c312_189, %c0_190] : memref<392x64xf32, #tpu.memory_space<vmem>>, vector<8x64xf32>
    tpu.vector_store %arg9[%c312_189, %c0_190], %209 {strides = array<i32>} : memref<392x64xf32, #tpu.memory_space<vmem>>, vector<8x64xf32>,
    %c0_191 = arith.constant 0 : index
    %c18 = arith.constant 18 : index
    %211 = vector.load %arg8[%c0_191, %c18] : memref<8x128xf32, #tpu.memory_space<vmem>>, vector<8x64xf32>
    %c320 = arith.constant 320 : index
    %c0_192 = arith.constant 0 : index
    %212 = vector.load %arg5[%c320, %c0_192] : memref<392x64xf32, #tpu.memory_space<vmem>>, vector<8x64xf32>
    %213 = arith.mulf %211, %212 : vector<8x64xf32>
    %c320_193 = arith.constant 320 : index
    %c0_194 = arith.constant 0 : index
    %214 = vector.load %arg9[%c320_193, %c0_194] : memref<392x64xf32, #tpu.memory_space<vmem>>, vector<8x64xf32>
    tpu.vector_store %arg9[%c320_193, %c0_194], %213 {strides = array<i32>} : memref<392x64xf32, #tpu.memory_space<vmem>>, vector<8x64xf32>,
    %c0_195 = arith.constant 0 : index
    %c19 = arith.constant 19 : index
    %215 = vector.load %arg8[%c0_195, %c19] : memref<8x128xf32, #tpu.memory_space<vmem>>, vector<8x64xf32>
    %c328 = arith.constant 328 : index
    %c0_196 = arith.constant 0 : index
    %216 = vector.load %arg5[%c328, %c0_196] : memref<392x64xf32, #tpu.memory_space<vmem>>, vector<8x64xf32>
    %217 = arith.mulf %215, %216 : vector<8x64xf32>
    %c328_197 = arith.constant 328 : index
    %c0_198 = arith.constant 0 : index
    %218 = vector.load %arg9[%c328_197, %c0_198] : memref<392x64xf32, #tpu.memory_space<vmem>>, vector<8x64xf32>
    tpu.vector_store %arg9[%c328_197, %c0_198], %217 {strides = array<i32>} : memref<392x64xf32, #tpu.memory_space<vmem>>, vector<8x64xf32>,
    %c0_199 = arith.constant 0 : index
    %c21 = arith.constant 21 : index
    %219 = vector.load %arg8[%c0_199, %c21] : memref<8x128xf32, #tpu.memory_space<vmem>>, vector<8x64xf32>
    %c336 = arith.constant 336 : index
    %c0_200 = arith.constant 0 : index
    %220 = vector.load %arg5[%c336, %c0_200] : memref<392x64xf32, #tpu.memory_space<vmem>>, vector<8x64xf32>
    %221 = arith.mulf %219, %220 : vector<8x64xf32>
    %c336_201 = arith.constant 336 : index
    %c0_202 = arith.constant 0 : index
    %222 = vector.load %arg9[%c336_201, %c0_202] : memref<392x64xf32, #tpu.memory_space<vmem>>, vector<8x64xf32>
    tpu.vector_store %arg9[%c336_201, %c0_202], %221 {strides = array<i32>} : memref<392x64xf32, #tpu.memory_space<vmem>>, vector<8x64xf32>,
    %c0_203 = arith.constant 0 : index
    %c22 = arith.constant 22 : index
    %223 = vector.load %arg8[%c0_203, %c22] : memref<8x128xf32, #tpu.memory_space<vmem>>, vector<8x64xf32>
    %c344 = arith.constant 344 : index
    %c0_204 = arith.constant 0 : index
    %224 = vector.load %arg5[%c344, %c0_204] : memref<392x64xf32, #tpu.memory_space<vmem>>, vector<8x64xf32>
    %225 = arith.mulf %223, %224 : vector<8x64xf32>
    %c344_205 = arith.constant 344 : index
    %c0_206 = arith.constant 0 : index
    %226 = vector.load %arg9[%c344_205, %c0_206] : memref<392x64xf32, #tpu.memory_space<vmem>>, vector<8x64xf32>
    tpu.vector_store %arg9[%c344_205, %c0_206], %225 {strides = array<i32>} : memref<392x64xf32, #tpu.memory_space<vmem>>, vector<8x64xf32>,
    %c0_207 = arith.constant 0 : index
    %c23 = arith.constant 23 : index
    %227 = vector.load %arg8[%c0_207, %c23] : memref<8x128xf32, #tpu.memory_space<vmem>>, vector<8x64xf32>
    %c352 = arith.constant 352 : index
    %c0_208 = arith.constant 0 : index
    %228 = vector.load %arg5[%c352, %c0_208] : memref<392x64xf32, #tpu.memory_space<vmem>>, vector<8x64xf32>
    %229 = arith.mulf %227, %228 : vector<8x64xf32>
    %c352_209 = arith.constant 352 : index
    %c0_210 = arith.constant 0 : index
    %230 = vector.load %arg9[%c352_209, %c0_210] : memref<392x64xf32, #tpu.memory_space<vmem>>, vector<8x64xf32>
    tpu.vector_store %arg9[%c352_209, %c0_210], %229 {strides = array<i32>} : memref<392x64xf32, #tpu.memory_space<vmem>>, vector<8x64xf32>,
    %c0_211 = arith.constant 0 : index
    %c24_212 = arith.constant 24 : index
    %231 = vector.load %arg8[%c0_211, %c24_212] : memref<8x128xf32, #tpu.memory_space<vmem>>, vector<8x64xf32>
    %c360 = arith.constant 360 : index
    %c0_213 = arith.constant 0 : index
    %232 = vector.load %arg5[%c360, %c0_213] : memref<392x64xf32, #tpu.memory_space<vmem>>, vector<8x64xf32>
    %233 = arith.mulf %231, %232 : vector<8x64xf32>
    %c360_214 = arith.constant 360 : index
    %c0_215 = arith.constant 0 : index
    %234 = vector.load %arg9[%c360_214, %c0_215] : memref<392x64xf32, #tpu.memory_space<vmem>>, vector<8x64xf32>
    tpu.vector_store %arg9[%c360_214, %c0_215], %233 {strides = array<i32>} : memref<392x64xf32, #tpu.memory_space<vmem>>, vector<8x64xf32>,
    %c0_216 = arith.constant 0 : index
    %c25 = arith.constant 25 : index
    %235 = vector.load %arg8[%c0_216, %c25] : memref<8x128xf32, #tpu.memory_space<vmem>>, vector<8x64xf32>
    %c368 = arith.constant 368 : index
    %c0_217 = arith.constant 0 : index
    %236 = vector.load %arg5[%c368, %c0_217] : memref<392x64xf32, #tpu.memory_space<vmem>>, vector<8x64xf32>
    %237 = arith.mulf %235, %236 : vector<8x64xf32>
    %c368_218 = arith.constant 368 : index
    %c0_219 = arith.constant 0 : index
    %238 = vector.load %arg9[%c368_218, %c0_219] : memref<392x64xf32, #tpu.memory_space<vmem>>, vector<8x64xf32>
    tpu.vector_store %arg9[%c368_218, %c0_219], %237 {strides = array<i32>} : memref<392x64xf32, #tpu.memory_space<vmem>>, vector<8x64xf32>,
    %c0_220 = arith.constant 0 : index
    %c26 = arith.constant 26 : index
    %239 = vector.load %arg8[%c0_220, %c26] : memref<8x128xf32, #tpu.memory_space<vmem>>, vector<8x64xf32>
    %c376 = arith.constant 376 : index
    %c0_221 = arith.constant 0 : index
    %240 = vector.load %arg5[%c376, %c0_221] : memref<392x64xf32, #tpu.memory_space<vmem>>, vector<8x64xf32>
    %241 = arith.mulf %239, %240 : vector<8x64xf32>
    %c376_222 = arith.constant 376 : index
    %c0_223 = arith.constant 0 : index
    %242 = vector.load %arg9[%c376_222, %c0_223] : memref<392x64xf32, #tpu.memory_space<vmem>>, vector<8x64xf32>
    tpu.vector_store %arg9[%c376_222, %c0_223], %241 {strides = array<i32>} : memref<392x64xf32, #tpu.memory_space<vmem>>, vector<8x64xf32>,
    %c0_224 = arith.constant 0 : index
    %c27 = arith.constant 27 : index
    %243 = vector.load %arg8[%c0_224, %c27] : memref<8x128xf32, #tpu.memory_space<vmem>>, vector<8x64xf32>
    %c384 = arith.constant 384 : index
    %c0_225 = arith.constant 0 : index
    %244 = vector.load %arg5[%c384, %c0_225] : memref<392x64xf32, #tpu.memory_space<vmem>>, vector<8x64xf32>
    %245 = arith.mulf %243, %244 : vector<8x64xf32>
    %c384_226 = arith.constant 384 : index
    %c0_227 = arith.constant 0 : index
    %246 = vector.load %arg9[%c384_226, %c0_227] : memref<392x64xf32, #tpu.memory_space<vmem>>, vector<8x64xf32>
    tpu.vector_store %arg9[%c384_226, %c0_227], %245 {strides = array<i32>} : memref<392x64xf32, #tpu.memory_space<vmem>>, vector<8x64xf32>,
    %c0_228 = arith.constant 0 : index
    %c0_229 = arith.constant 0 : index
    %247 = vector.load %arg4[%c0_228, %c0_229] : memref<4x392xf32, #tpu.memory_space<vmem>>, vector<4x392xf32>
    %c0_230 = arith.constant 0 : index
    %c0_231 = arith.constant 0 : index
    %248 = vector.load %arg9[%c0_230, %c0_231] : memref<392x64xf32, #tpu.memory_space<vmem>>, vector<392x64xf32>
    %cst_232 = arith.constant dense<0.000000e+00> : vector<4x64xf32>
    %249 = tpu.matmul %247, %248, %cst_232 {dimension_numbers = #tpu.dot_dimension_numbers<[1], [0], [0], [1], [0, 0, 1, 1], [], []>, precision = #tpu.contract_precision<fp32>} : vector<4x392xf32>, vector<392x64xf32>, vector<4x64xf32> -> vector<4x64xf32>
    %250 = arith.negf %249 : vector<4x64xf32>
    %251 = math.exp %250 : vector<4x64xf32>
    %cst_233 = arith.constant 1.000000e+00 : f32
    %252 = vector.broadcast %cst_233 : f32 to vector<4x64xf32>
    %253 = arith.addf %252, %251 : vector<4x64xf32>
    %254 = arith.divf %252, %253 : vector<4x64xf32>
    %255 = vector.shape_cast %254 : vector<4x64xf32> to vector<1x4x64xf32>
    %cst_234 = arith.constant dense<0.000000e+00> : vector<16x4xf32>
    %256 = vector.multi_reduction <add>, %1, %cst_234 [2] : vector<16x4x64xf32> to vector<16x4xf32>
    %cst_235 = arith.constant 6.400000e+01 : f32
    %257 = vector.broadcast %cst_235 : f32 to vector<16x4xf32>
    %258 = arith.divf %256, %257 : vector<16x4xf32>
    %c0_236 = arith.constant 0 : index
    %c0_237 = arith.constant 0 : index
    %259 = vector.load %arg6[%c0_236, %c0_237] : memref<16x1xf32, #tpu.memory_space<vmem>>, vector<16x1xf32>
    %260 = arith.mulf %259, %37 : vector<16x1xf32>
    %261 = vector.broadcast %260 : vector<16x1xf32> to vector<16x4xf32>
    %262 = arith.mulf %261, %258 : vector<16x4xf32>
    %cst_238 = arith.constant dense<0.000000e+00> : vector<4xf32>
    %263 = vector.multi_reduction <add>, %262, %cst_238 [0] : vector<16x4xf32> to vector<4xf32>
    %264 = vector.shape_cast %263 : vector<4xf32> to vector<1x4xf32>
    %265 = arith.negf %264 : vector<1x4xf32>
    %266 = math.exp %265 : vector<1x4xf32>
    %cst_239 = arith.constant 1.000000e+00 : f32
    %267 = vector.broadcast %cst_239 : f32 to vector<1x4xf32>
    %268 = arith.addf %267, %266 : vector<1x4xf32>
    %269 = arith.divf %267, %268 : vector<1x4xf32>
    %270 = vector.shape_cast %269 : vector<1x4xf32> to vector<1x4x1xf32>
    %271 = vector.broadcast %38 : vector<16x1x1xf32> to vector<16x4x64xf32>
    %272 = arith.mulf %1, %271 : vector<16x4x64xf32>
    %273 = vector.broadcast %270 : vector<1x4x1xf32> to vector<1x4x64xf32>
    %274 = arith.addf %255, %273 : vector<1x4x64xf32>
    %275 = vector.broadcast %274 : vector<1x4x64xf32> to vector<16x4x64xf32>
    %276 = arith.mulf %272, %275 : vector<16x4x64xf32>
    %c0_240 = arith.constant 0 : index
    %c0_241 = arith.constant 0 : index
    %c0_242 = arith.constant 0 : index
    %c0_243 = arith.constant 0 : index
    %277 = vector.load %arg7[%c0_240, %c0_241, %c0_242, %c0_243] : memref<1x16x4x64xf32, #tpu.memory_space<vmem>>, vector<1x16x4x64xf32>
    %278 = vector.shape_cast %277 : vector<1x16x4x64xf32> to vector<16x4x64xf32>
    %279 = vector.shape_cast %276 : vector<16x4x64xf32> to vector<1x16x4x64xf32>
    tpu.vector_store %arg7[%c0_240, %c0_241, %c0_242, %c0_243], %279 {strides = array<i32>} : memref<1x16x4x64xf32, #tpu.memory_space<vmem>>, vector<1x16x4x64xf32>,
    return
  }
  func.func @transform_0(%arg0: i32) -> (i32, i32, i32, i32) {
    %c0_i32 = arith.constant 0 : i32
    %c0_i32_0 = arith.constant 0 : i32
    %c0_i32_1 = arith.constant 0 : i32
    %c0_i32_2 = arith.constant 0 : i32
    return %arg0, %c0_i32, %c0_i32_0, %c0_i32_1 : i32, i32, i32, i32
  }
  func.func @transform_1(%arg0: i32) -> (i32, i32) {
    %c0_i32 = arith.constant 0 : i32
    %c0_i32_0 = arith.constant 0 : i32
    %c0_i32_1 = arith.constant 0 : i32
    return %c0_i32, %c0_i32_0 : i32, i32
  }
  func.func @transform_2(%arg0: i32) -> (i32, i32) {
    %c0_i32 = arith.constant 0 : i32
    %c0_i32_0 = arith.constant 0 : i32
    %c0_i32_1 = arith.constant 0 : i32
    return %c0_i32, %c0_i32_0 : i32, i32
  }
  func.func @transform_3(%arg0: i32) -> (i32, i32) {
    %c0_i32 = arith.constant 0 : i32
    %c0_i32_0 = arith.constant 0 : i32
    %c0_i32_1 = arith.constant 0 : i32
    return %c0_i32, %c0_i32_0 : i32, i32
  }
  func.func @transform_4(%arg0: i32) -> (i32, i32) {
    %c0_i32 = arith.constant 0 : i32
    %c0_i32_0 = arith.constant 0 : i32
    %c0_i32_1 = arith.constant 0 : i32
    return %c0_i32, %c0_i32_0 : i32, i32
  }
  func.func @transform_5(%arg0: i32) -> (i32, i32) {
    %c0_i32 = arith.constant 0 : i32
    %c0_i32_0 = arith.constant 0 : i32
    %c0_i32_1 = arith.constant 0 : i32
    return %c0_i32, %c0_i32_0 : i32, i32
  }
  func.func @transform_6(%arg0: i32) -> (i32, i32, i32, i32) {
    %c0_i32 = arith.constant 0 : i32
    %c0_i32_0 = arith.constant 0 : i32
    %c0_i32_1 = arith.constant 0 : i32
    %c0_i32_2 = arith.constant 0 : i32
    return %arg0, %c0_i32, %c0_i32_0, %c0_i32_1 : i32, i32, i32, i32
  }
}

module attributes {stable_mosaic.version = 11 : i64} {
  func.func @_downsample_conv_kernel(%arg0: i32, %arg1: memref<1x64x64xf32, #tpu.memory_space<vmem>>, %arg2: memref<16x64xf32, #tpu.memory_space<vmem>>, %arg3: memref<16x1xf32, #tpu.memory_space<vmem>>, %arg4: memref<1x16x64xf32, #tpu.memory_space<vmem>>) attributes {dimension_semantics = [#tpu.dimension_semantics<parallel>], iteration_bounds = array<i64: 2>, scalar_prefetch = 0 : i64, scratch_operands = 0 : i64, tpu.core_type = #tpu.core_type<tc>, window_params = [{transform_indices = @transform_0, window_bounds = array<i64: 1, 64, 64>}, {pipeline_mode = #tpu.pipeline_mode<synchronous>, transform_indices = @transform_1, window_bounds = array<i64: 16, 64>}, {pipeline_mode = #tpu.pipeline_mode<synchronous>, transform_indices = @transform_2, window_bounds = array<i64: 16, 1>}, {transform_indices = @transform_3, window_bounds = array<i64: 1, 16, 64>}]} {
    %c0 = arith.constant 0 : index
    %c0_0 = arith.constant 0 : index
    %0 = vector.load %arg2[%c0, %c0_0] : memref<16x64xf32, #tpu.memory_space<vmem>>, vector<16x64xf32>
    %c0_1 = arith.constant 0 : index
    %c0_2 = arith.constant 0 : index
    %c0_3 = arith.constant 0 : index
    %1 = vector.load %arg1[%c0_1, %c0_2, %c0_3] : memref<1x64x64xf32, #tpu.memory_space<vmem>>, vector<1x64x64xf32>
    %2 = vector.shape_cast %1 : vector<1x64x64xf32> to vector<64x64xf32>
    %cst = arith.constant dense<0.000000e+00> : vector<16x64xf32>
    %3 = tpu.matmul %0, %2, %cst {dimension_numbers = #tpu.dot_dimension_numbers<[1], [0], [0], [1], [0, 0, 1, 1], [], []>, precision = #tpu.contract_precision<fp32>} : vector<16x64xf32>, vector<64x64xf32>, vector<16x64xf32> -> vector<16x64xf32>
    %c0_4 = arith.constant 0 : index
    %c0_5 = arith.constant 0 : index
    %4 = vector.load %arg3[%c0_4, %c0_5] : memref<16x1xf32, #tpu.memory_space<vmem>>, vector<16x1xf32>
    %5 = vector.broadcast %4 : vector<16x1xf32> to vector<16x64xf32>
    %6 = arith.addf %3, %5 : vector<16x64xf32>
    %c0_6 = arith.constant 0 : index
    %c0_7 = arith.constant 0 : index
    %c0_8 = arith.constant 0 : index
    %7 = vector.load %arg4[%c0_6, %c0_7, %c0_8] : memref<1x16x64xf32, #tpu.memory_space<vmem>>, vector<1x16x64xf32>
    %8 = vector.shape_cast %7 : vector<1x16x64xf32> to vector<16x64xf32>
    %9 = vector.shape_cast %6 : vector<16x64xf32> to vector<1x16x64xf32>
    tpu.vector_store %arg4[%c0_6, %c0_7, %c0_8], %9 {strides = array<i32>} : memref<1x16x64xf32, #tpu.memory_space<vmem>>, vector<1x16x64xf32>,
    return
  }
  func.func @transform_0(%arg0: i32) -> (i32, i32, i32) {
    %c0_i32 = arith.constant 0 : i32
    %c0_i32_0 = arith.constant 0 : i32
    %c0_i32_1 = arith.constant 0 : i32
    return %arg0, %c0_i32, %c0_i32_0 : i32, i32, i32
  }
  func.func @transform_1(%arg0: i32) -> (i32, i32) {
    %c0_i32 = arith.constant 0 : i32
    %c0_i32_0 = arith.constant 0 : i32
    %c0_i32_1 = arith.constant 0 : i32
    return %c0_i32, %c0_i32_0 : i32, i32
  }
  func.func @transform_2(%arg0: i32) -> (i32, i32) {
    %c0_i32 = arith.constant 0 : i32
    %c0_i32_0 = arith.constant 0 : i32
    %c0_i32_1 = arith.constant 0 : i32
    return %c0_i32, %c0_i32_0 : i32, i32
  }
  func.func @transform_3(%arg0: i32) -> (i32, i32, i32) {
    %c0_i32 = arith.constant 0 : i32
    %c0_i32_0 = arith.constant 0 : i32
    %c0_i32_1 = arith.constant 0 : i32
    return %arg0, %c0_i32, %c0_i32_0 : i32, i32, i32
  }
}

module attributes {stable_mosaic.version = 11 : i64} {
  func.func @_downsample_conv_kernel(%arg0: i32, %arg1: memref<1x64x16xf32, #tpu.memory_space<vmem>>, %arg2: memref<32x64xf32, #tpu.memory_space<vmem>>, %arg3: memref<32x1xf32, #tpu.memory_space<vmem>>, %arg4: memref<1x32x16xf32, #tpu.memory_space<vmem>>) attributes {dimension_semantics = [#tpu.dimension_semantics<parallel>], iteration_bounds = array<i64: 2>, scalar_prefetch = 0 : i64, scratch_operands = 0 : i64, tpu.core_type = #tpu.core_type<tc>, window_params = [{transform_indices = @transform_0, window_bounds = array<i64: 1, 64, 16>}, {pipeline_mode = #tpu.pipeline_mode<synchronous>, transform_indices = @transform_1, window_bounds = array<i64: 32, 64>}, {pipeline_mode = #tpu.pipeline_mode<synchronous>, transform_indices = @transform_2, window_bounds = array<i64: 32, 1>}, {transform_indices = @transform_3, window_bounds = array<i64: 1, 32, 16>}]} {
    %c0 = arith.constant 0 : index
    %c0_0 = arith.constant 0 : index
    %0 = vector.load %arg2[%c0, %c0_0] : memref<32x64xf32, #tpu.memory_space<vmem>>, vector<32x64xf32>
    %c0_1 = arith.constant 0 : index
    %c0_2 = arith.constant 0 : index
    %c0_3 = arith.constant 0 : index
    %1 = vector.load %arg1[%c0_1, %c0_2, %c0_3] : memref<1x64x16xf32, #tpu.memory_space<vmem>>, vector<1x64x16xf32>
    %2 = vector.shape_cast %1 : vector<1x64x16xf32> to vector<64x16xf32>
    %cst = arith.constant dense<0.000000e+00> : vector<32x16xf32>
    %3 = tpu.matmul %0, %2, %cst {dimension_numbers = #tpu.dot_dimension_numbers<[1], [0], [0], [1], [0, 0, 1, 1], [], []>, precision = #tpu.contract_precision<fp32>} : vector<32x64xf32>, vector<64x16xf32>, vector<32x16xf32> -> vector<32x16xf32>
    %c0_4 = arith.constant 0 : index
    %c0_5 = arith.constant 0 : index
    %4 = vector.load %arg3[%c0_4, %c0_5] : memref<32x1xf32, #tpu.memory_space<vmem>>, vector<32x1xf32>
    %5 = vector.broadcast %4 : vector<32x1xf32> to vector<32x16xf32>
    %6 = arith.addf %3, %5 : vector<32x16xf32>
    %c0_6 = arith.constant 0 : index
    %c0_7 = arith.constant 0 : index
    %c0_8 = arith.constant 0 : index
    %7 = vector.load %arg4[%c0_6, %c0_7, %c0_8] : memref<1x32x16xf32, #tpu.memory_space<vmem>>, vector<1x32x16xf32>
    %8 = vector.shape_cast %7 : vector<1x32x16xf32> to vector<32x16xf32>
    %9 = vector.shape_cast %6 : vector<32x16xf32> to vector<1x32x16xf32>
    tpu.vector_store %arg4[%c0_6, %c0_7, %c0_8], %9 {strides = array<i32>} : memref<1x32x16xf32, #tpu.memory_space<vmem>>, vector<1x32x16xf32>,
    return
  }
  func.func @transform_0(%arg0: i32) -> (i32, i32, i32) {
    %c0_i32 = arith.constant 0 : i32
    %c0_i32_0 = arith.constant 0 : i32
    %c0_i32_1 = arith.constant 0 : i32
    return %arg0, %c0_i32, %c0_i32_0 : i32, i32, i32
  }
  func.func @transform_1(%arg0: i32) -> (i32, i32) {
    %c0_i32 = arith.constant 0 : i32
    %c0_i32_0 = arith.constant 0 : i32
    %c0_i32_1 = arith.constant 0 : i32
    return %c0_i32, %c0_i32_0 : i32, i32
  }
  func.func @transform_2(%arg0: i32) -> (i32, i32) {
    %c0_i32 = arith.constant 0 : i32
    %c0_i32_0 = arith.constant 0 : i32
    %c0_i32_1 = arith.constant 0 : i32
    return %c0_i32, %c0_i32_0 : i32, i32
  }
  func.func @transform_3(%arg0: i32) -> (i32, i32, i32) {
    %c0_i32 = arith.constant 0 : i32
    %c0_i32_0 = arith.constant 0 : i32
    %c0_i32_1 = arith.constant 0 : i32
    return %arg0, %c0_i32, %c0_i32_0 : i32, i32, i32
  }
}

module attributes {stable_mosaic.version = 11 : i64} {
  func.func @_triple_attention_kernel(%arg0: i32, %arg1: memref<1x32x4x4xf32, #tpu.memory_space<vmem>>, %arg2: memref<32x2xf32, #tpu.memory_space<vmem>>, %arg3: memref<32x2xf32, #tpu.memory_space<vmem>>, %arg4: memref<4x392xf32, #tpu.memory_space<vmem>>, %arg5: memref<392x4xf32, #tpu.memory_space<vmem>>, %arg6: memref<32x1xf32, #tpu.memory_space<vmem>>, %arg7: memref<1x64x4xf32, #tpu.memory_space<vmem>>, %arg8: memref<8x8xf32, #tpu.memory_space<vmem>>, %arg9: memref<392x4xf32, #tpu.memory_space<vmem>>) attributes {dimension_semantics = [#tpu.dimension_semantics<parallel>], iteration_bounds = array<i64: 2>, scalar_prefetch = 0 : i64, scratch_operands = 2 : i64, tpu.core_type = #tpu.core_type<tc>, window_params = [{transform_indices = @transform_0, window_bounds = array<i64: 1, 32, 4, 4>}, {pipeline_mode = #tpu.pipeline_mode<synchronous>, transform_indices = @transform_1, window_bounds = array<i64: 32, 2>}, {pipeline_mode = #tpu.pipeline_mode<synchronous>, transform_indices = @transform_2, window_bounds = array<i64: 32, 2>}, {pipeline_mode = #tpu.pipeline_mode<synchronous>, transform_indices = @transform_3, window_bounds = array<i64: 4, 392>}, {pipeline_mode = #tpu.pipeline_mode<synchronous>, transform_indices = @transform_4, window_bounds = array<i64: 392, 4>}, {pipeline_mode = #tpu.pipeline_mode<synchronous>, transform_indices = @transform_5, window_bounds = array<i64: 32, 1>}, {transform_indices = @transform_6, window_bounds = array<i64: 1, 64, 4>}]} {
    %c0 = arith.constant 0 : index
    %c0_0 = arith.constant 0 : index
    %c0_1 = arith.constant 0 : index
    %c0_2 = arith.constant 0 : index
    %0 = vector.load %arg1[%c0, %c0_0, %c0_1, %c0_2] : memref<1x32x4x4xf32, #tpu.memory_space<vmem>>, vector<1x32x4x4xf32>
    %1 = vector.shape_cast %0 : vector<1x32x4x4xf32> to vector<32x4x4xf32>
    %cst = arith.constant dense<0.000000e+00> : vector<32x4xf32>
    %2 = vector.multi_reduction <add>, %1, %cst [2] : vector<32x4x4xf32> to vector<32x4xf32>
    %cst_3 = arith.constant 4.000000e+00 : f32
    %3 = vector.broadcast %cst_3 : f32 to vector<32x4xf32>
    %4 = arith.divf %2, %3 : vector<32x4xf32>
    %cst_4 = arith.constant dense<0.000000e+00> : vector<32xf32>
    %5 = vector.multi_reduction <add>, %4, %cst_4 [1] : vector<32x4xf32> to vector<32xf32>
    %6 = vector.shape_cast %5 : vector<32xf32> to vector<32x1xf32>
    %cst_5 = arith.constant 4.000000e+00 : f32
    %7 = vector.broadcast %cst_5 : f32 to vector<32x1xf32>
    %8 = arith.divf %6, %7 : vector<32x1xf32>
    %cst_6 = arith.constant dense<0xFF800000> : vector<32x4xf32>
    %9 = vector.multi_reduction <maximumf>, %1, %cst_6 [2] : vector<32x4x4xf32> to vector<32x4xf32>
    %cst_7 = arith.constant dense<0xFF800000> : vector<32xf32>
    %10 = vector.multi_reduction <maximumf>, %9, %cst_7 [1] : vector<32x4xf32> to vector<32xf32>
    %11 = vector.shape_cast %10 : vector<32xf32> to vector<32x1xf32>
    %c0_8 = arith.constant 0 : index
    %c0_9 = arith.constant 0 : index
    %12 = vector.load %arg2[%c0_8, %c0_9] : memref<32x2xf32, #tpu.memory_space<vmem>>, vector<32x2xf32>
    %c0_10 = arith.constant 0 : index
    %c0_11 = arith.constant 0 : index
    %13 = vector.load %arg3[%c0_10, %c0_11] : memref<32x2xf32, #tpu.memory_space<vmem>>, vector<32x2xf32>
    %14 = vector.broadcast %8 : vector<32x1xf32> to vector<32x2xf32>
    %15 = arith.mulf %12, %14 : vector<32x2xf32>
    %cst_12 = arith.constant dense<0.000000e+00> : vector<2xf32>
    %16 = vector.multi_reduction <add>, %15, %cst_12 [0] : vector<32x2xf32> to vector<2xf32>
    %17 = vector.shape_cast %16 : vector<2xf32> to vector<1x2xf32>
    %cst_13 = arith.constant 0.000000e+00 : f32
    %18 = vector.broadcast %cst_13 : f32 to vector<1x2xf32>
    %19 = arith.maximumf %17, %18 : vector<1x2xf32>
    %20 = vector.broadcast %19 : vector<1x2xf32> to vector<32x2xf32>
    %21 = arith.mulf %13, %20 : vector<32x2xf32>
    %cst_14 = arith.constant dense<0.000000e+00> : vector<32xf32>
    %22 = vector.multi_reduction <add>, %21, %cst_14 [1] : vector<32x2xf32> to vector<32xf32>
    %23 = vector.shape_cast %22 : vector<32xf32> to vector<32x1xf32>
    %24 = vector.broadcast %11 : vector<32x1xf32> to vector<32x2xf32>
    %25 = arith.mulf %12, %24 : vector<32x2xf32>
    %cst_15 = arith.constant dense<0.000000e+00> : vector<2xf32>
    %26 = vector.multi_reduction <add>, %25, %cst_15 [0] : vector<32x2xf32> to vector<2xf32>
    %27 = vector.shape_cast %26 : vector<2xf32> to vector<1x2xf32>
    %cst_16 = arith.constant 0.000000e+00 : f32
    %28 = vector.broadcast %cst_16 : f32 to vector<1x2xf32>
    %29 = arith.maximumf %27, %28 : vector<1x2xf32>
    %30 = vector.broadcast %29 : vector<1x2xf32> to vector<32x2xf32>
    %31 = arith.mulf %13, %30 : vector<32x2xf32>
    %cst_17 = arith.constant dense<0.000000e+00> : vector<32xf32>
    %32 = vector.multi_reduction <add>, %31, %cst_17 [1] : vector<32x2xf32> to vector<32xf32>
    %33 = vector.shape_cast %32 : vector<32xf32> to vector<32x1xf32>
    %34 = arith.addf %23, %33 : vector<32x1xf32>
    %35 = arith.negf %34 : vector<32x1xf32>
    %36 = math.exp %35 : vector<32x1xf32>
    %cst_18 = arith.constant 1.000000e+00 : f32
    %37 = vector.broadcast %cst_18 : f32 to vector<32x1xf32>
    %38 = arith.addf %37, %36 : vector<32x1xf32>
    %39 = arith.divf %37, %38 : vector<32x1xf32>
    %40 = vector.shape_cast %39 : vector<32x1xf32> to vector<32x1x1xf32>
    %41 = vector.broadcast %40 : vector<32x1x1xf32> to vector<32x4x4xf32>
    %42 = arith.mulf %1, %41 : vector<32x4x4xf32>
    %cst_19 = arith.constant dense<0.000000e+00> : vector<4x4xf32>
    %43 = vector.multi_reduction <add>, %42, %cst_19 [0] : vector<32x4x4xf32> to vector<4x4xf32>
    %cst_20 = arith.constant 3.200000e+01 : f32
    %44 = vector.broadcast %cst_20 : f32 to vector<4x4xf32>
    %45 = arith.divf %43, %44 : vector<4x4xf32>
    %46 = vector.broadcast %40 : vector<32x1x1xf32> to vector<32x4x4xf32>
    %47 = arith.mulf %1, %46 : vector<32x4x4xf32>
    %cst_21 = arith.constant dense<0xFF800000> : vector<4x4xf32>
    %48 = vector.multi_reduction <maximumf>, %47, %cst_21 [0] : vector<32x4x4xf32> to vector<4x4xf32>
    %49 = tpu.concatenate %45, %45 in 1 : vector<4x4xf32>, vector<4x4xf32> -> vector<4x8xf32>
    %50 = tpu.concatenate %48, %48 in 1 : vector<4x4xf32>, vector<4x4xf32> -> vector<4x8xf32>
    %51 = tpu.concatenate %49, %50 in 0 : vector<4x8xf32>, vector<4x8xf32> -> vector<8x8xf32>
    %c0_22 = arith.constant 0 : index
    %c0_23 = arith.constant 0 : index
    %52 = vector.load %arg8[%c0_22, %c0_23] : memref<8x8xf32, #tpu.memory_space<vmem>>, vector<8x8xf32>
    tpu.vector_store %arg8[%c0_22, %c0_23], %51 {strides = array<i32>} : memref<8x8xf32, #tpu.memory_space<vmem>>, vector<8x8xf32>,
    %c0_24 = arith.constant 0 : index
    %c3 = arith.constant 3 : index
    %53 = vector.load %arg8[%c0_24, %c3] : memref<8x8xf32, #tpu.memory_space<vmem>>, vector<8x4xf32>
    %c0_25 = arith.constant 0 : index
    %c0_26 = arith.constant 0 : index
    %54 = vector.load %arg5[%c0_25, %c0_26] : memref<392x4xf32, #tpu.memory_space<vmem>>, vector<8x4xf32>
    %55 = arith.mulf %53, %54 : vector<8x4xf32>
    %c0_27 = arith.constant 0 : index
    %c0_28 = arith.constant 0 : index
    %56 = vector.load %arg9[%c0_27, %c0_28] : memref<392x4xf32, #tpu.memory_space<vmem>>, vector<8x4xf32>
    tpu.vector_store %arg9[%c0_27, %c0_28], %55 {strides = array<i32>} : memref<392x4xf32, #tpu.memory_space<vmem>>, vector<8x4xf32>,
    %c0_29 = arith.constant 0 : index
    %c0_30 = arith.constant 0 : index
    %57 = vector.load %arg8[%c0_29, %c0_30] : memref<8x8xf32, #tpu.memory_space<vmem>>, vector<8x4xf32>
    %c8 = arith.constant 8 : index
    %c0_31 = arith.constant 0 : index
    %58 = vector.load %arg5[%c8, %c0_31] : memref<392x4xf32, #tpu.memory_space<vmem>>, vector<8x4xf32>
    %59 = arith.mulf %57, %58 : vector<8x4xf32>
    %c8_32 = arith.constant 8 : index
    %c0_33 = arith.constant 0 : index
    %60 = vector.load %arg9[%c8_32, %c0_33] : memref<392x4xf32, #tpu.memory_space<vmem>>, vector<8x4xf32>
    tpu.vector_store %arg9[%c8_32, %c0_33], %59 {strides = array<i32>} : memref<392x4xf32, #tpu.memory_space<vmem>>, vector<8x4xf32>,
    %c0_34 = arith.constant 0 : index
    %c1 = arith.constant 1 : index
    %61 = vector.load %arg8[%c0_34, %c1] : memref<8x8xf32, #tpu.memory_space<vmem>>, vector<8x4xf32>
    %c16 = arith.constant 16 : index
    %c0_35 = arith.constant 0 : index
    %62 = vector.load %arg5[%c16, %c0_35] : memref<392x4xf32, #tpu.memory_space<vmem>>, vector<8x4xf32>
    %63 = arith.mulf %61, %62 : vector<8x4xf32>
    %c16_36 = arith.constant 16 : index
    %c0_37 = arith.constant 0 : index
    %64 = vector.load %arg9[%c16_36, %c0_37] : memref<392x4xf32, #tpu.memory_space<vmem>>, vector<8x4xf32>
    tpu.vector_store %arg9[%c16_36, %c0_37], %63 {strides = array<i32>} : memref<392x4xf32, #tpu.memory_space<vmem>>, vector<8x4xf32>,
    %c0_38 = arith.constant 0 : index
    %c2 = arith.constant 2 : index
    %65 = vector.load %arg8[%c0_38, %c2] : memref<8x8xf32, #tpu.memory_space<vmem>>, vector<8x4xf32>
    %c24 = arith.constant 24 : index
    %c0_39 = arith.constant 0 : index
    %66 = vector.load %arg5[%c24, %c0_39] : memref<392x4xf32, #tpu.memory_space<vmem>>, vector<8x4xf32>
    %67 = arith.mulf %65, %66 : vector<8x4xf32>
    %c24_40 = arith.constant 24 : index
    %c0_41 = arith.constant 0 : index
    %68 = vector.load %arg9[%c24_40, %c0_41] : memref<392x4xf32, #tpu.memory_space<vmem>>, vector<8x4xf32>
    tpu.vector_store %arg9[%c24_40, %c0_41], %67 {strides = array<i32>} : memref<392x4xf32, #tpu.memory_space<vmem>>, vector<8x4xf32>,
    %c0_42 = arith.constant 0 : index
    %c3_43 = arith.constant 3 : index
    %69 = vector.load %arg8[%c0_42, %c3_43] : memref<8x8xf32, #tpu.memory_space<vmem>>, vector<8x4xf32>
    %c32 = arith.constant 32 : index
    %c0_44 = arith.constant 0 : index
    %70 = vector.load %arg5[%c32, %c0_44] : memref<392x4xf32, #tpu.memory_space<vmem>>, vector<8x4xf32>
    %71 = arith.mulf %69, %70 : vector<8x4xf32>
    %c32_45 = arith.constant 32 : index
    %c0_46 = arith.constant 0 : index
    %72 = vector.load %arg9[%c32_45, %c0_46] : memref<392x4xf32, #tpu.memory_space<vmem>>, vector<8x4xf32>
    tpu.vector_store %arg9[%c32_45, %c0_46], %71 {strides = array<i32>} : memref<392x4xf32, #tpu.memory_space<vmem>>, vector<8x4xf32>,
    %c0_47 = arith.constant 0 : index
    %c0_48 = arith.constant 0 : index
    %73 = vector.load %arg8[%c0_47, %c0_48] : memref<8x8xf32, #tpu.memory_space<vmem>>, vector<8x4xf32>
    %c40 = arith.constant 40 : index
    %c0_49 = arith.constant 0 : index
    %74 = vector.load %arg5[%c40, %c0_49] : memref<392x4xf32, #tpu.memory_space<vmem>>, vector<8x4xf32>
    %75 = arith.mulf %73, %74 : vector<8x4xf32>
    %c40_50 = arith.constant 40 : index
    %c0_51 = arith.constant 0 : index
    %76 = vector.load %arg9[%c40_50, %c0_51] : memref<392x4xf32, #tpu.memory_space<vmem>>, vector<8x4xf32>
    tpu.vector_store %arg9[%c40_50, %c0_51], %75 {strides = array<i32>} : memref<392x4xf32, #tpu.memory_space<vmem>>, vector<8x4xf32>,
    %c0_52 = arith.constant 0 : index
    %c1_53 = arith.constant 1 : index
    %77 = vector.load %arg8[%c0_52, %c1_53] : memref<8x8xf32, #tpu.memory_space<vmem>>, vector<8x4xf32>
    %c48 = arith.constant 48 : index
    %c0_54 = arith.constant 0 : index
    %78 = vector.load %arg5[%c48, %c0_54] : memref<392x4xf32, #tpu.memory_space<vmem>>, vector<8x4xf32>
    %79 = arith.mulf %77, %78 : vector<8x4xf32>
    %c48_55 = arith.constant 48 : index
    %c0_56 = arith.constant 0 : index
    %80 = vector.load %arg9[%c48_55, %c0_56] : memref<392x4xf32, #tpu.memory_space<vmem>>, vector<8x4xf32>
    tpu.vector_store %arg9[%c48_55, %c0_56], %79 {strides = array<i32>} : memref<392x4xf32, #tpu.memory_space<vmem>>, vector<8x4xf32>,
    %c0_57 = arith.constant 0 : index
    %c1_58 = arith.constant 1 : index
    %81 = vector.load %arg8[%c0_57, %c1_58] : memref<8x8xf32, #tpu.memory_space<vmem>>, vector<8x4xf32>
    %c56 = arith.constant 56 : index
    %c0_59 = arith.constant 0 : index
    %82 = vector.load %arg5[%c56, %c0_59] : memref<392x4xf32, #tpu.memory_space<vmem>>, vector<8x4xf32>
    %83 = arith.mulf %81, %82 : vector<8x4xf32>
    %c56_60 = arith.constant 56 : index
    %c0_61 = arith.constant 0 : index
    %84 = vector.load %arg9[%c56_60, %c0_61] : memref<392x4xf32, #tpu.memory_space<vmem>>, vector<8x4xf32>
    tpu.vector_store %arg9[%c56_60, %c0_61], %83 {strides = array<i32>} : memref<392x4xf32, #tpu.memory_space<vmem>>, vector<8x4xf32>,
    %c0_62 = arith.constant 0 : index
    %c2_63 = arith.constant 2 : index
    %85 = vector.load %arg8[%c0_62, %c2_63] : memref<8x8xf32, #tpu.memory_space<vmem>>, vector<8x4xf32>
    %c64 = arith.constant 64 : index
    %c0_64 = arith.constant 0 : index
    %86 = vector.load %arg5[%c64, %c0_64] : memref<392x4xf32, #tpu.memory_space<vmem>>, vector<8x4xf32>
    %87 = arith.mulf %85, %86 : vector<8x4xf32>
    %c64_65 = arith.constant 64 : index
    %c0_66 = arith.constant 0 : index
    %88 = vector.load %arg9[%c64_65, %c0_66] : memref<392x4xf32, #tpu.memory_space<vmem>>, vector<8x4xf32>
    tpu.vector_store %arg9[%c64_65, %c0_66], %87 {strides = array<i32>} : memref<392x4xf32, #tpu.memory_space<vmem>>, vector<8x4xf32>,
    %c0_67 = arith.constant 0 : index
    %c3_68 = arith.constant 3 : index
    %89 = vector.load %arg8[%c0_67, %c3_68] : memref<8x8xf32, #tpu.memory_space<vmem>>, vector<8x4xf32>
    %c72 = arith.constant 72 : index
    %c0_69 = arith.constant 0 : index
    %90 = vector.load %arg5[%c72, %c0_69] : memref<392x4xf32, #tpu.memory_space<vmem>>, vector<8x4xf32>
    %91 = arith.mulf %89, %90 : vector<8x4xf32>
    %c72_70 = arith.constant 72 : index
    %c0_71 = arith.constant 0 : index
    %92 = vector.load %arg9[%c72_70, %c0_71] : memref<392x4xf32, #tpu.memory_space<vmem>>, vector<8x4xf32>
    tpu.vector_store %arg9[%c72_70, %c0_71], %91 {strides = array<i32>} : memref<392x4xf32, #tpu.memory_space<vmem>>, vector<8x4xf32>,
    %c0_72 = arith.constant 0 : index
    %c0_73 = arith.constant 0 : index
    %93 = vector.load %arg8[%c0_72, %c0_73] : memref<8x8xf32, #tpu.memory_space<vmem>>, vector<8x4xf32>
    %c80 = arith.constant 80 : index
    %c0_74 = arith.constant 0 : index
    %94 = vector.load %arg5[%c80, %c0_74] : memref<392x4xf32, #tpu.memory_space<vmem>>, vector<8x4xf32>
    %95 = arith.mulf %93, %94 : vector<8x4xf32>
    %c80_75 = arith.constant 80 : index
    %c0_76 = arith.constant 0 : index
    %96 = vector.load %arg9[%c80_75, %c0_76] : memref<392x4xf32, #tpu.memory_space<vmem>>, vector<8x4xf32>
    tpu.vector_store %arg9[%c80_75, %c0_76], %95 {strides = array<i32>} : memref<392x4xf32, #tpu.memory_space<vmem>>, vector<8x4xf32>,
    %c0_77 = arith.constant 0 : index
    %c1_78 = arith.constant 1 : index
    %97 = vector.load %arg8[%c0_77, %c1_78] : memref<8x8xf32, #tpu.memory_space<vmem>>, vector<8x4xf32>
    %c88 = arith.constant 88 : index
    %c0_79 = arith.constant 0 : index
    %98 = vector.load %arg5[%c88, %c0_79] : memref<392x4xf32, #tpu.memory_space<vmem>>, vector<8x4xf32>
    %99 = arith.mulf %97, %98 : vector<8x4xf32>
    %c88_80 = arith.constant 88 : index
    %c0_81 = arith.constant 0 : index
    %100 = vector.load %arg9[%c88_80, %c0_81] : memref<392x4xf32, #tpu.memory_space<vmem>>, vector<8x4xf32>
    tpu.vector_store %arg9[%c88_80, %c0_81], %99 {strides = array<i32>} : memref<392x4xf32, #tpu.memory_space<vmem>>, vector<8x4xf32>,
    %c0_82 = arith.constant 0 : index
    %c2_83 = arith.constant 2 : index
    %101 = vector.load %arg8[%c0_82, %c2_83] : memref<8x8xf32, #tpu.memory_space<vmem>>, vector<8x4xf32>
    %c96 = arith.constant 96 : index
    %c0_84 = arith.constant 0 : index
    %102 = vector.load %arg5[%c96, %c0_84] : memref<392x4xf32, #tpu.memory_space<vmem>>, vector<8x4xf32>
    %103 = arith.mulf %101, %102 : vector<8x4xf32>
    %c96_85 = arith.constant 96 : index
    %c0_86 = arith.constant 0 : index
    %104 = vector.load %arg9[%c96_85, %c0_86] : memref<392x4xf32, #tpu.memory_space<vmem>>, vector<8x4xf32>
    tpu.vector_store %arg9[%c96_85, %c0_86], %103 {strides = array<i32>} : memref<392x4xf32, #tpu.memory_space<vmem>>, vector<8x4xf32>,
    %c0_87 = arith.constant 0 : index
    %c3_88 = arith.constant 3 : index
    %105 = vector.load %arg8[%c0_87, %c3_88] : memref<8x8xf32, #tpu.memory_space<vmem>>, vector<8x4xf32>
    %c104 = arith.constant 104 : index
    %c0_89 = arith.constant 0 : index
    %106 = vector.load %arg5[%c104, %c0_89] : memref<392x4xf32, #tpu.memory_space<vmem>>, vector<8x4xf32>
    %107 = arith.mulf %105, %106 : vector<8x4xf32>
    %c104_90 = arith.constant 104 : index
    %c0_91 = arith.constant 0 : index
    %108 = vector.load %arg9[%c104_90, %c0_91] : memref<392x4xf32, #tpu.memory_space<vmem>>, vector<8x4xf32>
    tpu.vector_store %arg9[%c104_90, %c0_91], %107 {strides = array<i32>} : memref<392x4xf32, #tpu.memory_space<vmem>>, vector<8x4xf32>,
    %c0_92 = arith.constant 0 : index
    %c3_93 = arith.constant 3 : index
    %109 = vector.load %arg8[%c0_92, %c3_93] : memref<8x8xf32, #tpu.memory_space<vmem>>, vector<8x4xf32>
    %c112 = arith.constant 112 : index
    %c0_94 = arith.constant 0 : index
    %110 = vector.load %arg5[%c112, %c0_94] : memref<392x4xf32, #tpu.memory_space<vmem>>, vector<8x4xf32>
    %111 = arith.mulf %109, %110 : vector<8x4xf32>
    %c112_95 = arith.constant 112 : index
    %c0_96 = arith.constant 0 : index
    %112 = vector.load %arg9[%c112_95, %c0_96] : memref<392x4xf32, #tpu.memory_space<vmem>>, vector<8x4xf32>
    tpu.vector_store %arg9[%c112_95, %c0_96], %111 {strides = array<i32>} : memref<392x4xf32, #tpu.memory_space<vmem>>, vector<8x4xf32>,
    %c0_97 = arith.constant 0 : index
    %c0_98 = arith.constant 0 : index
    %113 = vector.load %arg8[%c0_97, %c0_98] : memref<8x8xf32, #tpu.memory_space<vmem>>, vector<8x4xf32>
    %c120 = arith.constant 120 : index
    %c0_99 = arith.constant 0 : index
    %114 = vector.load %arg5[%c120, %c0_99] : memref<392x4xf32, #tpu.memory_space<vmem>>, vector<8x4xf32>
    %115 = arith.mulf %113, %114 : vector<8x4xf32>
    %c120_100 = arith.constant 120 : index
    %c0_101 = arith.constant 0 : index
    %116 = vector.load %arg9[%c120_100, %c0_101] : memref<392x4xf32, #tpu.memory_space<vmem>>, vector<8x4xf32>
    tpu.vector_store %arg9[%c120_100, %c0_101], %115 {strides = array<i32>} : memref<392x4xf32, #tpu.memory_space<vmem>>, vector<8x4xf32>,
    %c0_102 = arith.constant 0 : index
    %c1_103 = arith.constant 1 : index
    %117 = vector.load %arg8[%c0_102, %c1_103] : memref<8x8xf32, #tpu.memory_space<vmem>>, vector<8x4xf32>
    %c128 = arith.constant 128 : index
    %c0_104 = arith.constant 0 : index
    %118 = vector.load %arg5[%c128, %c0_104] : memref<392x4xf32, #tpu.memory_space<vmem>>, vector<8x4xf32>
    %119 = arith.mulf %117, %118 : vector<8x4xf32>
    %c128_105 = arith.constant 128 : index
    %c0_106 = arith.constant 0 : index
    %120 = vector.load %arg9[%c128_105, %c0_106] : memref<392x4xf32, #tpu.memory_space<vmem>>, vector<8x4xf32>
    tpu.vector_store %arg9[%c128_105, %c0_106], %119 {strides = array<i32>} : memref<392x4xf32, #tpu.memory_space<vmem>>, vector<8x4xf32>,
    %c0_107 = arith.constant 0 : index
    %c2_108 = arith.constant 2 : index
    %121 = vector.load %arg8[%c0_107, %c2_108] : memref<8x8xf32, #tpu.memory_space<vmem>>, vector<8x4xf32>
    %c136 = arith.constant 136 : index
    %c0_109 = arith.constant 0 : index
    %122 = vector.load %arg5[%c136, %c0_109] : memref<392x4xf32, #tpu.memory_space<vmem>>, vector<8x4xf32>
    %123 = arith.mulf %121, %122 : vector<8x4xf32>
    %c136_110 = arith.constant 136 : index
    %c0_111 = arith.constant 0 : index
    %124 = vector.load %arg9[%c136_110, %c0_111] : memref<392x4xf32, #tpu.memory_space<vmem>>, vector<8x4xf32>
    tpu.vector_store %arg9[%c136_110, %c0_111], %123 {strides = array<i32>} : memref<392x4xf32, #tpu.memory_space<vmem>>, vector<8x4xf32>,
    %c0_112 = arith.constant 0 : index
    %c3_113 = arith.constant 3 : index
    %125 = vector.load %arg8[%c0_112, %c3_113] : memref<8x8xf32, #tpu.memory_space<vmem>>, vector<8x4xf32>
    %c144 = arith.constant 144 : index
    %c0_114 = arith.constant 0 : index
    %126 = vector.load %arg5[%c144, %c0_114] : memref<392x4xf32, #tpu.memory_space<vmem>>, vector<8x4xf32>
    %127 = arith.mulf %125, %126 : vector<8x4xf32>
    %c144_115 = arith.constant 144 : index
    %c0_116 = arith.constant 0 : index
    %128 = vector.load %arg9[%c144_115, %c0_116] : memref<392x4xf32, #tpu.memory_space<vmem>>, vector<8x4xf32>
    tpu.vector_store %arg9[%c144_115, %c0_116], %127 {strides = array<i32>} : memref<392x4xf32, #tpu.memory_space<vmem>>, vector<8x4xf32>,
    %c0_117 = arith.constant 0 : index
    %c0_118 = arith.constant 0 : index
    %129 = vector.load %arg8[%c0_117, %c0_118] : memref<8x8xf32, #tpu.memory_space<vmem>>, vector<8x4xf32>
    %c152 = arith.constant 152 : index
    %c0_119 = arith.constant 0 : index
    %130 = vector.load %arg5[%c152, %c0_119] : memref<392x4xf32, #tpu.memory_space<vmem>>, vector<8x4xf32>
    %131 = arith.mulf %129, %130 : vector<8x4xf32>
    %c152_120 = arith.constant 152 : index
    %c0_121 = arith.constant 0 : index
    %132 = vector.load %arg9[%c152_120, %c0_121] : memref<392x4xf32, #tpu.memory_space<vmem>>, vector<8x4xf32>
    tpu.vector_store %arg9[%c152_120, %c0_121], %131 {strides = array<i32>} : memref<392x4xf32, #tpu.memory_space<vmem>>, vector<8x4xf32>,
    %c0_122 = arith.constant 0 : index
    %c1_123 = arith.constant 1 : index
    %133 = vector.load %arg8[%c0_122, %c1_123] : memref<8x8xf32, #tpu.memory_space<vmem>>, vector<8x4xf32>
    %c160 = arith.constant 160 : index
    %c0_124 = arith.constant 0 : index
    %134 = vector.load %arg5[%c160, %c0_124] : memref<392x4xf32, #tpu.memory_space<vmem>>, vector<8x4xf32>
    %135 = arith.mulf %133, %134 : vector<8x4xf32>
    %c160_125 = arith.constant 160 : index
    %c0_126 = arith.constant 0 : index
    %136 = vector.load %arg9[%c160_125, %c0_126] : memref<392x4xf32, #tpu.memory_space<vmem>>, vector<8x4xf32>
    tpu.vector_store %arg9[%c160_125, %c0_126], %135 {strides = array<i32>} : memref<392x4xf32, #tpu.memory_space<vmem>>, vector<8x4xf32>,
    %c0_127 = arith.constant 0 : index
    %c1_128 = arith.constant 1 : index
    %137 = vector.load %arg8[%c0_127, %c1_128] : memref<8x8xf32, #tpu.memory_space<vmem>>, vector<8x4xf32>
    %c168 = arith.constant 168 : index
    %c0_129 = arith.constant 0 : index
    %138 = vector.load %arg5[%c168, %c0_129] : memref<392x4xf32, #tpu.memory_space<vmem>>, vector<8x4xf32>
    %139 = arith.mulf %137, %138 : vector<8x4xf32>
    %c168_130 = arith.constant 168 : index
    %c0_131 = arith.constant 0 : index
    %140 = vector.load %arg9[%c168_130, %c0_131] : memref<392x4xf32, #tpu.memory_space<vmem>>, vector<8x4xf32>
    tpu.vector_store %arg9[%c168_130, %c0_131], %139 {strides = array<i32>} : memref<392x4xf32, #tpu.memory_space<vmem>>, vector<8x4xf32>,
    %c0_132 = arith.constant 0 : index
    %c2_133 = arith.constant 2 : index
    %141 = vector.load %arg8[%c0_132, %c2_133] : memref<8x8xf32, #tpu.memory_space<vmem>>, vector<8x4xf32>
    %c176 = arith.constant 176 : index
    %c0_134 = arith.constant 0 : index
    %142 = vector.load %arg5[%c176, %c0_134] : memref<392x4xf32, #tpu.memory_space<vmem>>, vector<8x4xf32>
    %143 = arith.mulf %141, %142 : vector<8x4xf32>
    %c176_135 = arith.constant 176 : index
    %c0_136 = arith.constant 0 : index
    %144 = vector.load %arg9[%c176_135, %c0_136] : memref<392x4xf32, #tpu.memory_space<vmem>>, vector<8x4xf32>
    tpu.vector_store %arg9[%c176_135, %c0_136], %143 {strides = array<i32>} : memref<392x4xf32, #tpu.memory_space<vmem>>, vector<8x4xf32>,
    %c0_137 = arith.constant 0 : index
    %c3_138 = arith.constant 3 : index
    %145 = vector.load %arg8[%c0_137, %c3_138] : memref<8x8xf32, #tpu.memory_space<vmem>>, vector<8x4xf32>
    %c184 = arith.constant 184 : index
    %c0_139 = arith.constant 0 : index
    %146 = vector.load %arg5[%c184, %c0_139] : memref<392x4xf32, #tpu.memory_space<vmem>>, vector<8x4xf32>
    %147 = arith.mulf %145, %146 : vector<8x4xf32>
    %c184_140 = arith.constant 184 : index
    %c0_141 = arith.constant 0 : index
    %148 = vector.load %arg9[%c184_140, %c0_141] : memref<392x4xf32, #tpu.memory_space<vmem>>, vector<8x4xf32>
    tpu.vector_store %arg9[%c184_140, %c0_141], %147 {strides = array<i32>} : memref<392x4xf32, #tpu.memory_space<vmem>>, vector<8x4xf32>,
    %c0_142 = arith.constant 0 : index
    %c0_143 = arith.constant 0 : index
    %149 = vector.load %arg8[%c0_142, %c0_143] : memref<8x8xf32, #tpu.memory_space<vmem>>, vector<8x4xf32>
    %c192 = arith.constant 192 : index
    %c0_144 = arith.constant 0 : index
    %150 = vector.load %arg5[%c192, %c0_144] : memref<392x4xf32, #tpu.memory_space<vmem>>, vector<8x4xf32>
    %151 = arith.mulf %149, %150 : vector<8x4xf32>
    %c192_145 = arith.constant 192 : index
    %c0_146 = arith.constant 0 : index
    %152 = vector.load %arg9[%c192_145, %c0_146] : memref<392x4xf32, #tpu.memory_space<vmem>>, vector<8x4xf32>
    tpu.vector_store %arg9[%c192_145, %c0_146], %151 {strides = array<i32>} : memref<392x4xf32, #tpu.memory_space<vmem>>, vector<8x4xf32>,
    %c0_147 = arith.constant 0 : index
    %c1_148 = arith.constant 1 : index
    %153 = vector.load %arg8[%c0_147, %c1_148] : memref<8x8xf32, #tpu.memory_space<vmem>>, vector<8x4xf32>
    %c200 = arith.constant 200 : index
    %c0_149 = arith.constant 0 : index
    %154 = vector.load %arg5[%c200, %c0_149] : memref<392x4xf32, #tpu.memory_space<vmem>>, vector<8x4xf32>
    %155 = arith.mulf %153, %154 : vector<8x4xf32>
    %c200_150 = arith.constant 200 : index
    %c0_151 = arith.constant 0 : index
    %156 = vector.load %arg9[%c200_150, %c0_151] : memref<392x4xf32, #tpu.memory_space<vmem>>, vector<8x4xf32>
    tpu.vector_store %arg9[%c200_150, %c0_151], %155 {strides = array<i32>} : memref<392x4xf32, #tpu.memory_space<vmem>>, vector<8x4xf32>,
    %c0_152 = arith.constant 0 : index
    %c2_153 = arith.constant 2 : index
    %157 = vector.load %arg8[%c0_152, %c2_153] : memref<8x8xf32, #tpu.memory_space<vmem>>, vector<8x4xf32>
    %c208 = arith.constant 208 : index
    %c0_154 = arith.constant 0 : index
    %158 = vector.load %arg5[%c208, %c0_154] : memref<392x4xf32, #tpu.memory_space<vmem>>, vector<8x4xf32>
    %159 = arith.mulf %157, %158 : vector<8x4xf32>
    %c208_155 = arith.constant 208 : index
    %c0_156 = arith.constant 0 : index
    %160 = vector.load %arg9[%c208_155, %c0_156] : memref<392x4xf32, #tpu.memory_space<vmem>>, vector<8x4xf32>
    tpu.vector_store %arg9[%c208_155, %c0_156], %159 {strides = array<i32>} : memref<392x4xf32, #tpu.memory_space<vmem>>, vector<8x4xf32>,
    %c0_157 = arith.constant 0 : index
    %c3_158 = arith.constant 3 : index
    %161 = vector.load %arg8[%c0_157, %c3_158] : memref<8x8xf32, #tpu.memory_space<vmem>>, vector<8x4xf32>
    %c216 = arith.constant 216 : index
    %c0_159 = arith.constant 0 : index
    %162 = vector.load %arg5[%c216, %c0_159] : memref<392x4xf32, #tpu.memory_space<vmem>>, vector<8x4xf32>
    %163 = arith.mulf %161, %162 : vector<8x4xf32>
    %c216_160 = arith.constant 216 : index
    %c0_161 = arith.constant 0 : index
    %164 = vector.load %arg9[%c216_160, %c0_161] : memref<392x4xf32, #tpu.memory_space<vmem>>, vector<8x4xf32>
    tpu.vector_store %arg9[%c216_160, %c0_161], %163 {strides = array<i32>} : memref<392x4xf32, #tpu.memory_space<vmem>>, vector<8x4xf32>,
    %c0_162 = arith.constant 0 : index
    %c3_163 = arith.constant 3 : index
    %165 = vector.load %arg8[%c0_162, %c3_163] : memref<8x8xf32, #tpu.memory_space<vmem>>, vector<8x4xf32>
    %c224 = arith.constant 224 : index
    %c0_164 = arith.constant 0 : index
    %166 = vector.load %arg5[%c224, %c0_164] : memref<392x4xf32, #tpu.memory_space<vmem>>, vector<8x4xf32>
    %167 = arith.mulf %165, %166 : vector<8x4xf32>
    %c224_165 = arith.constant 224 : index
    %c0_166 = arith.constant 0 : index
    %168 = vector.load %arg9[%c224_165, %c0_166] : memref<392x4xf32, #tpu.memory_space<vmem>>, vector<8x4xf32>
    tpu.vector_store %arg9[%c224_165, %c0_166], %167 {strides = array<i32>} : memref<392x4xf32, #tpu.memory_space<vmem>>, vector<8x4xf32>,
    %c0_167 = arith.constant 0 : index
    %c0_168 = arith.constant 0 : index
    %169 = vector.load %arg8[%c0_167, %c0_168] : memref<8x8xf32, #tpu.memory_space<vmem>>, vector<8x4xf32>
    %c232 = arith.constant 232 : index
    %c0_169 = arith.constant 0 : index
    %170 = vector.load %arg5[%c232, %c0_169] : memref<392x4xf32, #tpu.memory_space<vmem>>, vector<8x4xf32>
    %171 = arith.mulf %169, %170 : vector<8x4xf32>
    %c232_170 = arith.constant 232 : index
    %c0_171 = arith.constant 0 : index
    %172 = vector.load %arg9[%c232_170, %c0_171] : memref<392x4xf32, #tpu.memory_space<vmem>>, vector<8x4xf32>
    tpu.vector_store %arg9[%c232_170, %c0_171], %171 {strides = array<i32>} : memref<392x4xf32, #tpu.memory_space<vmem>>, vector<8x4xf32>,
    %c0_172 = arith.constant 0 : index
    %c1_173 = arith.constant 1 : index
    %173 = vector.load %arg8[%c0_172, %c1_173] : memref<8x8xf32, #tpu.memory_space<vmem>>, vector<8x4xf32>
    %c240 = arith.constant 240 : index
    %c0_174 = arith.constant 0 : index
    %174 = vector.load %arg5[%c240, %c0_174] : memref<392x4xf32, #tpu.memory_space<vmem>>, vector<8x4xf32>
    %175 = arith.mulf %173, %174 : vector<8x4xf32>
    %c240_175 = arith.constant 240 : index
    %c0_176 = arith.constant 0 : index
    %176 = vector.load %arg9[%c240_175, %c0_176] : memref<392x4xf32, #tpu.memory_space<vmem>>, vector<8x4xf32>
    tpu.vector_store %arg9[%c240_175, %c0_176], %175 {strides = array<i32>} : memref<392x4xf32, #tpu.memory_space<vmem>>, vector<8x4xf32>,
    %c0_177 = arith.constant 0 : index
    %c2_178 = arith.constant 2 : index
    %177 = vector.load %arg8[%c0_177, %c2_178] : memref<8x8xf32, #tpu.memory_space<vmem>>, vector<8x4xf32>
    %c248 = arith.constant 248 : index
    %c0_179 = arith.constant 0 : index
    %178 = vector.load %arg5[%c248, %c0_179] : memref<392x4xf32, #tpu.memory_space<vmem>>, vector<8x4xf32>
    %179 = arith.mulf %177, %178 : vector<8x4xf32>
    %c248_180 = arith.constant 248 : index
    %c0_181 = arith.constant 0 : index
    %180 = vector.load %arg9[%c248_180, %c0_181] : memref<392x4xf32, #tpu.memory_space<vmem>>, vector<8x4xf32>
    tpu.vector_store %arg9[%c248_180, %c0_181], %179 {strides = array<i32>} : memref<392x4xf32, #tpu.memory_space<vmem>>, vector<8x4xf32>,
    %c0_182 = arith.constant 0 : index
    %c3_183 = arith.constant 3 : index
    %181 = vector.load %arg8[%c0_182, %c3_183] : memref<8x8xf32, #tpu.memory_space<vmem>>, vector<8x4xf32>
    %c256 = arith.constant 256 : index
    %c0_184 = arith.constant 0 : index
    %182 = vector.load %arg5[%c256, %c0_184] : memref<392x4xf32, #tpu.memory_space<vmem>>, vector<8x4xf32>
    %183 = arith.mulf %181, %182 : vector<8x4xf32>
    %c256_185 = arith.constant 256 : index
    %c0_186 = arith.constant 0 : index
    %184 = vector.load %arg9[%c256_185, %c0_186] : memref<392x4xf32, #tpu.memory_space<vmem>>, vector<8x4xf32>
    tpu.vector_store %arg9[%c256_185, %c0_186], %183 {strides = array<i32>} : memref<392x4xf32, #tpu.memory_space<vmem>>, vector<8x4xf32>,
    %c0_187 = arith.constant 0 : index
    %c0_188 = arith.constant 0 : index
    %185 = vector.load %arg8[%c0_187, %c0_188] : memref<8x8xf32, #tpu.memory_space<vmem>>, vector<8x4xf32>
    %c264 = arith.constant 264 : index
    %c0_189 = arith.constant 0 : index
    %186 = vector.load %arg5[%c264, %c0_189] : memref<392x4xf32, #tpu.memory_space<vmem>>, vector<8x4xf32>
    %187 = arith.mulf %185, %186 : vector<8x4xf32>
    %c264_190 = arith.constant 264 : index
    %c0_191 = arith.constant 0 : index
    %188 = vector.load %arg9[%c264_190, %c0_191] : memref<392x4xf32, #tpu.memory_space<vmem>>, vector<8x4xf32>
    tpu.vector_store %arg9[%c264_190, %c0_191], %187 {strides = array<i32>} : memref<392x4xf32, #tpu.memory_space<vmem>>, vector<8x4xf32>,
    %c0_192 = arith.constant 0 : index
    %c1_193 = arith.constant 1 : index
    %189 = vector.load %arg8[%c0_192, %c1_193] : memref<8x8xf32, #tpu.memory_space<vmem>>, vector<8x4xf32>
    %c272 = arith.constant 272 : index
    %c0_194 = arith.constant 0 : index
    %190 = vector.load %arg5[%c272, %c0_194] : memref<392x4xf32, #tpu.memory_space<vmem>>, vector<8x4xf32>
    %191 = arith.mulf %189, %190 : vector<8x4xf32>
    %c272_195 = arith.constant 272 : index
    %c0_196 = arith.constant 0 : index
    %192 = vector.load %arg9[%c272_195, %c0_196] : memref<392x4xf32, #tpu.memory_space<vmem>>, vector<8x4xf32>
    tpu.vector_store %arg9[%c272_195, %c0_196], %191 {strides = array<i32>} : memref<392x4xf32, #tpu.memory_space<vmem>>, vector<8x4xf32>,
    %c0_197 = arith.constant 0 : index
    %c1_198 = arith.constant 1 : index
    %193 = vector.load %arg8[%c0_197, %c1_198] : memref<8x8xf32, #tpu.memory_space<vmem>>, vector<8x4xf32>
    %c280 = arith.constant 280 : index
    %c0_199 = arith.constant 0 : index
    %194 = vector.load %arg5[%c280, %c0_199] : memref<392x4xf32, #tpu.memory_space<vmem>>, vector<8x4xf32>
    %195 = arith.mulf %193, %194 : vector<8x4xf32>
    %c280_200 = arith.constant 280 : index
    %c0_201 = arith.constant 0 : index
    %196 = vector.load %arg9[%c280_200, %c0_201] : memref<392x4xf32, #tpu.memory_space<vmem>>, vector<8x4xf32>
    tpu.vector_store %arg9[%c280_200, %c0_201], %195 {strides = array<i32>} : memref<392x4xf32, #tpu.memory_space<vmem>>, vector<8x4xf32>,
    %c0_202 = arith.constant 0 : index
    %c2_203 = arith.constant 2 : index
    %197 = vector.load %arg8[%c0_202, %c2_203] : memref<8x8xf32, #tpu.memory_space<vmem>>, vector<8x4xf32>
    %c288 = arith.constant 288 : index
    %c0_204 = arith.constant 0 : index
    %198 = vector.load %arg5[%c288, %c0_204] : memref<392x4xf32, #tpu.memory_space<vmem>>, vector<8x4xf32>
    %199 = arith.mulf %197, %198 : vector<8x4xf32>
    %c288_205 = arith.constant 288 : index
    %c0_206 = arith.constant 0 : index
    %200 = vector.load %arg9[%c288_205, %c0_206] : memref<392x4xf32, #tpu.memory_space<vmem>>, vector<8x4xf32>
    tpu.vector_store %arg9[%c288_205, %c0_206], %199 {strides = array<i32>} : memref<392x4xf32, #tpu.memory_space<vmem>>, vector<8x4xf32>,
    %c0_207 = arith.constant 0 : index
    %c3_208 = arith.constant 3 : index
    %201 = vector.load %arg8[%c0_207, %c3_208] : memref<8x8xf32, #tpu.memory_space<vmem>>, vector<8x4xf32>
    %c296 = arith.constant 296 : index
    %c0_209 = arith.constant 0 : index
    %202 = vector.load %arg5[%c296, %c0_209] : memref<392x4xf32, #tpu.memory_space<vmem>>, vector<8x4xf32>
    %203 = arith.mulf %201, %202 : vector<8x4xf32>
    %c296_210 = arith.constant 296 : index
    %c0_211 = arith.constant 0 : index
    %204 = vector.load %arg9[%c296_210, %c0_211] : memref<392x4xf32, #tpu.memory_space<vmem>>, vector<8x4xf32>
    tpu.vector_store %arg9[%c296_210, %c0_211], %203 {strides = array<i32>} : memref<392x4xf32, #tpu.memory_space<vmem>>, vector<8x4xf32>,
    %c0_212 = arith.constant 0 : index
    %c0_213 = arith.constant 0 : index
    %205 = vector.load %arg8[%c0_212, %c0_213] : memref<8x8xf32, #tpu.memory_space<vmem>>, vector<8x4xf32>
    %c304 = arith.constant 304 : index
    %c0_214 = arith.constant 0 : index
    %206 = vector.load %arg5[%c304, %c0_214] : memref<392x4xf32, #tpu.memory_space<vmem>>, vector<8x4xf32>
    %207 = arith.mulf %205, %206 : vector<8x4xf32>
    %c304_215 = arith.constant 304 : index
    %c0_216 = arith.constant 0 : index
    %208 = vector.load %arg9[%c304_215, %c0_216] : memref<392x4xf32, #tpu.memory_space<vmem>>, vector<8x4xf32>
    tpu.vector_store %arg9[%c304_215, %c0_216], %207 {strides = array<i32>} : memref<392x4xf32, #tpu.memory_space<vmem>>, vector<8x4xf32>,
    %c0_217 = arith.constant 0 : index
    %c1_218 = arith.constant 1 : index
    %209 = vector.load %arg8[%c0_217, %c1_218] : memref<8x8xf32, #tpu.memory_space<vmem>>, vector<8x4xf32>
    %c312 = arith.constant 312 : index
    %c0_219 = arith.constant 0 : index
    %210 = vector.load %arg5[%c312, %c0_219] : memref<392x4xf32, #tpu.memory_space<vmem>>, vector<8x4xf32>
    %211 = arith.mulf %209, %210 : vector<8x4xf32>
    %c312_220 = arith.constant 312 : index
    %c0_221 = arith.constant 0 : index
    %212 = vector.load %arg9[%c312_220, %c0_221] : memref<392x4xf32, #tpu.memory_space<vmem>>, vector<8x4xf32>
    tpu.vector_store %arg9[%c312_220, %c0_221], %211 {strides = array<i32>} : memref<392x4xf32, #tpu.memory_space<vmem>>, vector<8x4xf32>,
    %c0_222 = arith.constant 0 : index
    %c2_223 = arith.constant 2 : index
    %213 = vector.load %arg8[%c0_222, %c2_223] : memref<8x8xf32, #tpu.memory_space<vmem>>, vector<8x4xf32>
    %c320 = arith.constant 320 : index
    %c0_224 = arith.constant 0 : index
    %214 = vector.load %arg5[%c320, %c0_224] : memref<392x4xf32, #tpu.memory_space<vmem>>, vector<8x4xf32>
    %215 = arith.mulf %213, %214 : vector<8x4xf32>
    %c320_225 = arith.constant 320 : index
    %c0_226 = arith.constant 0 : index
    %216 = vector.load %arg9[%c320_225, %c0_226] : memref<392x4xf32, #tpu.memory_space<vmem>>, vector<8x4xf32>
    tpu.vector_store %arg9[%c320_225, %c0_226], %215 {strides = array<i32>} : memref<392x4xf32, #tpu.memory_space<vmem>>, vector<8x4xf32>,
    %c0_227 = arith.constant 0 : index
    %c3_228 = arith.constant 3 : index
    %217 = vector.load %arg8[%c0_227, %c3_228] : memref<8x8xf32, #tpu.memory_space<vmem>>, vector<8x4xf32>
    %c328 = arith.constant 328 : index
    %c0_229 = arith.constant 0 : index
    %218 = vector.load %arg5[%c328, %c0_229] : memref<392x4xf32, #tpu.memory_space<vmem>>, vector<8x4xf32>
    %219 = arith.mulf %217, %218 : vector<8x4xf32>
    %c328_230 = arith.constant 328 : index
    %c0_231 = arith.constant 0 : index
    %220 = vector.load %arg9[%c328_230, %c0_231] : memref<392x4xf32, #tpu.memory_space<vmem>>, vector<8x4xf32>
    tpu.vector_store %arg9[%c328_230, %c0_231], %219 {strides = array<i32>} : memref<392x4xf32, #tpu.memory_space<vmem>>, vector<8x4xf32>,
    %c0_232 = arith.constant 0 : index
    %c3_233 = arith.constant 3 : index
    %221 = vector.load %arg8[%c0_232, %c3_233] : memref<8x8xf32, #tpu.memory_space<vmem>>, vector<8x4xf32>
    %c336 = arith.constant 336 : index
    %c0_234 = arith.constant 0 : index
    %222 = vector.load %arg5[%c336, %c0_234] : memref<392x4xf32, #tpu.memory_space<vmem>>, vector<8x4xf32>
    %223 = arith.mulf %221, %222 : vector<8x4xf32>
    %c336_235 = arith.constant 336 : index
    %c0_236 = arith.constant 0 : index
    %224 = vector.load %arg9[%c336_235, %c0_236] : memref<392x4xf32, #tpu.memory_space<vmem>>, vector<8x4xf32>
    tpu.vector_store %arg9[%c336_235, %c0_236], %223 {strides = array<i32>} : memref<392x4xf32, #tpu.memory_space<vmem>>, vector<8x4xf32>,
    %c0_237 = arith.constant 0 : index
    %c0_238 = arith.constant 0 : index
    %225 = vector.load %arg8[%c0_237, %c0_238] : memref<8x8xf32, #tpu.memory_space<vmem>>, vector<8x4xf32>
    %c344 = arith.constant 344 : index
    %c0_239 = arith.constant 0 : index
    %226 = vector.load %arg5[%c344, %c0_239] : memref<392x4xf32, #tpu.memory_space<vmem>>, vector<8x4xf32>
    %227 = arith.mulf %225, %226 : vector<8x4xf32>
    %c344_240 = arith.constant 344 : index
    %c0_241 = arith.constant 0 : index
    %228 = vector.load %arg9[%c344_240, %c0_241] : memref<392x4xf32, #tpu.memory_space<vmem>>, vector<8x4xf32>
    tpu.vector_store %arg9[%c344_240, %c0_241], %227 {strides = array<i32>} : memref<392x4xf32, #tpu.memory_space<vmem>>, vector<8x4xf32>,
    %c0_242 = arith.constant 0 : index
    %c1_243 = arith.constant 1 : index
    %229 = vector.load %arg8[%c0_242, %c1_243] : memref<8x8xf32, #tpu.memory_space<vmem>>, vector<8x4xf32>
    %c352 = arith.constant 352 : index
    %c0_244 = arith.constant 0 : index
    %230 = vector.load %arg5[%c352, %c0_244] : memref<392x4xf32, #tpu.memory_space<vmem>>, vector<8x4xf32>
    %231 = arith.mulf %229, %230 : vector<8x4xf32>
    %c352_245 = arith.constant 352 : index
    %c0_246 = arith.constant 0 : index
    %232 = vector.load %arg9[%c352_245, %c0_246] : memref<392x4xf32, #tpu.memory_space<vmem>>, vector<8x4xf32>
    tpu.vector_store %arg9[%c352_245, %c0_246], %231 {strides = array<i32>} : memref<392x4xf32, #tpu.memory_space<vmem>>, vector<8x4xf32>,
    %c0_247 = arith.constant 0 : index
    %c2_248 = arith.constant 2 : index
    %233 = vector.load %arg8[%c0_247, %c2_248] : memref<8x8xf32, #tpu.memory_space<vmem>>, vector<8x4xf32>
    %c360 = arith.constant 360 : index
    %c0_249 = arith.constant 0 : index
    %234 = vector.load %arg5[%c360, %c0_249] : memref<392x4xf32, #tpu.memory_space<vmem>>, vector<8x4xf32>
    %235 = arith.mulf %233, %234 : vector<8x4xf32>
    %c360_250 = arith.constant 360 : index
    %c0_251 = arith.constant 0 : index
    %236 = vector.load %arg9[%c360_250, %c0_251] : memref<392x4xf32, #tpu.memory_space<vmem>>, vector<8x4xf32>
    tpu.vector_store %arg9[%c360_250, %c0_251], %235 {strides = array<i32>} : memref<392x4xf32, #tpu.memory_space<vmem>>, vector<8x4xf32>,
    %c0_252 = arith.constant 0 : index
    %c3_253 = arith.constant 3 : index
    %237 = vector.load %arg8[%c0_252, %c3_253] : memref<8x8xf32, #tpu.memory_space<vmem>>, vector<8x4xf32>
    %c368 = arith.constant 368 : index
    %c0_254 = arith.constant 0 : index
    %238 = vector.load %arg5[%c368, %c0_254] : memref<392x4xf32, #tpu.memory_space<vmem>>, vector<8x4xf32>
    %239 = arith.mulf %237, %238 : vector<8x4xf32>
    %c368_255 = arith.constant 368 : index
    %c0_256 = arith.constant 0 : index
    %240 = vector.load %arg9[%c368_255, %c0_256] : memref<392x4xf32, #tpu.memory_space<vmem>>, vector<8x4xf32>
    tpu.vector_store %arg9[%c368_255, %c0_256], %239 {strides = array<i32>} : memref<392x4xf32, #tpu.memory_space<vmem>>, vector<8x4xf32>,
    %c0_257 = arith.constant 0 : index
    %c0_258 = arith.constant 0 : index
    %241 = vector.load %arg8[%c0_257, %c0_258] : memref<8x8xf32, #tpu.memory_space<vmem>>, vector<8x4xf32>
    %c376 = arith.constant 376 : index
    %c0_259 = arith.constant 0 : index
    %242 = vector.load %arg5[%c376, %c0_259] : memref<392x4xf32, #tpu.memory_space<vmem>>, vector<8x4xf32>
    %243 = arith.mulf %241, %242 : vector<8x4xf32>
    %c376_260 = arith.constant 376 : index
    %c0_261 = arith.constant 0 : index
    %244 = vector.load %arg9[%c376_260, %c0_261] : memref<392x4xf32, #tpu.memory_space<vmem>>, vector<8x4xf32>
    tpu.vector_store %arg9[%c376_260, %c0_261], %243 {strides = array<i32>} : memref<392x4xf32, #tpu.memory_space<vmem>>, vector<8x4xf32>,
    %c0_262 = arith.constant 0 : index
    %c1_263 = arith.constant 1 : index
    %245 = vector.load %arg8[%c0_262, %c1_263] : memref<8x8xf32, #tpu.memory_space<vmem>>, vector<8x4xf32>
    %c384 = arith.constant 384 : index
    %c0_264 = arith.constant 0 : index
    %246 = vector.load %arg5[%c384, %c0_264] : memref<392x4xf32, #tpu.memory_space<vmem>>, vector<8x4xf32>
    %247 = arith.mulf %245, %246 : vector<8x4xf32>
    %c384_265 = arith.constant 384 : index
    %c0_266 = arith.constant 0 : index
    %248 = vector.load %arg9[%c384_265, %c0_266] : memref<392x4xf32, #tpu.memory_space<vmem>>, vector<8x4xf32>
    tpu.vector_store %arg9[%c384_265, %c0_266], %247 {strides = array<i32>} : memref<392x4xf32, #tpu.memory_space<vmem>>, vector<8x4xf32>,
    %c0_267 = arith.constant 0 : index
    %c0_268 = arith.constant 0 : index
    %249 = vector.load %arg4[%c0_267, %c0_268] : memref<4x392xf32, #tpu.memory_space<vmem>>, vector<4x392xf32>
    %c0_269 = arith.constant 0 : index
    %c0_270 = arith.constant 0 : index
    %250 = vector.load %arg9[%c0_269, %c0_270] : memref<392x4xf32, #tpu.memory_space<vmem>>, vector<392x4xf32>
    %cst_271 = arith.constant dense<0.000000e+00> : vector<4x4xf32>
    %251 = tpu.matmul %249, %250, %cst_271 {dimension_numbers = #tpu.dot_dimension_numbers<[1], [0], [0], [1], [0, 0, 1, 1], [], []>, precision = #tpu.contract_precision<fp32>} : vector<4x392xf32>, vector<392x4xf32>, vector<4x4xf32> -> vector<4x4xf32>
    %252 = arith.negf %251 : vector<4x4xf32>
    %253 = math.exp %252 : vector<4x4xf32>
    %cst_272 = arith.constant 1.000000e+00 : f32
    %254 = vector.broadcast %cst_272 : f32 to vector<4x4xf32>
    %255 = arith.addf %254, %253 : vector<4x4xf32>
    %256 = arith.divf %254, %255 : vector<4x4xf32>
    %257 = vector.shape_cast %256 : vector<4x4xf32> to vector<1x4x4xf32>
    %cst_273 = arith.constant dense<0.000000e+00> : vector<32x4xf32>
    %258 = vector.multi_reduction <add>, %1, %cst_273 [2] : vector<32x4x4xf32> to vector<32x4xf32>
    %cst_274 = arith.constant 4.000000e+00 : f32
    %259 = vector.broadcast %cst_274 : f32 to vector<32x4xf32>
    %260 = arith.divf %258, %259 : vector<32x4xf32>
    %c0_275 = arith.constant 0 : index
    %c0_276 = arith.constant 0 : index
    %261 = vector.load %arg6[%c0_275, %c0_276] : memref<32x1xf32, #tpu.memory_space<vmem>>, vector<32x1xf32>
    %262 = arith.mulf %261, %39 : vector<32x1xf32>
    %263 = vector.broadcast %262 : vector<32x1xf32> to vector<32x4xf32>
    %264 = arith.mulf %263, %260 : vector<32x4xf32>
    %cst_277 = arith.constant dense<0.000000e+00> : vector<4xf32>
    %265 = vector.multi_reduction <add>, %264, %cst_277 [0] : vector<32x4xf32> to vector<4xf32>
    %266 = vector.shape_cast %265 : vector<4xf32> to vector<1x4xf32>
    %267 = arith.negf %266 : vector<1x4xf32>
    %268 = math.exp %267 : vector<1x4xf32>
    %cst_278 = arith.constant 1.000000e+00 : f32
    %269 = vector.broadcast %cst_278 : f32 to vector<1x4xf32>
    %270 = arith.addf %269, %268 : vector<1x4xf32>
    %271 = arith.divf %269, %270 : vector<1x4xf32>
    %272 = vector.shape_cast %271 : vector<1x4xf32> to vector<1x4x1xf32>
    %273 = vector.broadcast %40 : vector<32x1x1xf32> to vector<32x4x4xf32>
    %274 = arith.mulf %1, %273 : vector<32x4x4xf32>
    %275 = vector.broadcast %257 : vector<1x4x4xf32> to vector<32x4x4xf32>
    %276 = arith.mulf %274, %275 : vector<32x4x4xf32>
    %cst_279 = arith.constant dense<0xFF800000> : vector<32x4xf32>
    %277 = vector.multi_reduction <maximumf>, %276, %cst_279 [1] : vector<32x4x4xf32> to vector<32x4xf32>
    %278 = vector.broadcast %40 : vector<32x1x1xf32> to vector<32x4x4xf32>
    %279 = arith.mulf %1, %278 : vector<32x4x4xf32>
    %280 = vector.broadcast %272 : vector<1x4x1xf32> to vector<32x4x4xf32>
    %281 = arith.mulf %279, %280 : vector<32x4x4xf32>
    %cst_280 = arith.constant dense<0xFF800000> : vector<32x4xf32>
    %282 = vector.multi_reduction <maximumf>, %281, %cst_280 [1] : vector<32x4x4xf32> to vector<32x4xf32>
    %283 = tpu.concatenate %277, %282 in 0 : vector<32x4xf32>, vector<32x4xf32> -> vector<64x4xf32>
    %c0_281 = arith.constant 0 : index
    %c0_282 = arith.constant 0 : index
    %c0_283 = arith.constant 0 : index
    %284 = vector.load %arg7[%c0_281, %c0_282, %c0_283] : memref<1x64x4xf32, #tpu.memory_space<vmem>>, vector<1x64x4xf32>
    %285 = vector.shape_cast %284 : vector<1x64x4xf32> to vector<64x4xf32>
    %286 = vector.shape_cast %283 : vector<64x4xf32> to vector<1x64x4xf32>
    tpu.vector_store %arg7[%c0_281, %c0_282, %c0_283], %286 {strides = array<i32>} : memref<1x64x4xf32, #tpu.memory_space<vmem>>, vector<1x64x4xf32>,
    return
  }
  func.func @transform_0(%arg0: i32) -> (i32, i32, i32, i32) {
    %c0_i32 = arith.constant 0 : i32
    %c0_i32_0 = arith.constant 0 : i32
    %c0_i32_1 = arith.constant 0 : i32
    %c0_i32_2 = arith.constant 0 : i32
    return %arg0, %c0_i32, %c0_i32_0, %c0_i32_1 : i32, i32, i32, i32
  }
  func.func @transform_1(%arg0: i32) -> (i32, i32) {
    %c0_i32 = arith.constant 0 : i32
    %c0_i32_0 = arith.constant 0 : i32
    %c0_i32_1 = arith.constant 0 : i32
    return %c0_i32, %c0_i32_0 : i32, i32
  }
  func.func @transform_2(%arg0: i32) -> (i32, i32) {
    %c0_i32 = arith.constant 0 : i32
    %c0_i32_0 = arith.constant 0 : i32
    %c0_i32_1 = arith.constant 0 : i32
    return %c0_i32, %c0_i32_0 : i32, i32
  }
  func.func @transform_3(%arg0: i32) -> (i32, i32) {
    %c0_i32 = arith.constant 0 : i32
    %c0_i32_0 = arith.constant 0 : i32
    %c0_i32_1 = arith.constant 0 : i32
    return %c0_i32, %c0_i32_0 : i32, i32
  }
  func.func @transform_4(%arg0: i32) -> (i32, i32) {
    %c0_i32 = arith.constant 0 : i32
    %c0_i32_0 = arith.constant 0 : i32
    %c0_i32_1 = arith.constant 0 : i32
    return %c0_i32, %c0_i32_0 : i32, i32
  }
  func.func @transform_5(%arg0: i32) -> (i32, i32) {
    %c0_i32 = arith.constant 0 : i32
    %c0_i32_0 = arith.constant 0 : i32
    %c0_i32_1 = arith.constant 0 : i32
    return %c0_i32, %c0_i32_0 : i32, i32
  }
  func.func @transform_6(%arg0: i32) -> (i32, i32, i32) {
    %c0_i32 = arith.constant 0 : i32
    %c0_i32_0 = arith.constant 0 : i32
    %c0_i32_1 = arith.constant 0 : i32
    return %arg0, %c0_i32, %c0_i32_0 : i32, i32, i32
  }
}

</mosaic_0001>

<bundles_post_ra>
// kernel: mask_encoder.6
= control target key start
LH: loop header
LB: loop body
LE: loop exit
PB: predicated region body
PF: predicated region fallthrough
CT: control target
= control target key end

     0   :  { %s2215_s12 = smov 0   ;;  %s2363_s0 = inlined_call_operand.vmem [shape: f32[2,8,1024], index: 0, kind: input, shape index: {}]   ;;  %s2364_s1 = inlined_call_operand.vmem [shape: f32[8,8], index: 1, kind: input, shape index: {}]   ;;  %s2365_s2 = inlined_call_operand.vmem [shape: f32[8,1], index: 2, kind: input, shape index: {}]   ;;  %s2366_s3 = inlined_call_operand.vmem [shape: f32[2,8,1024], index: 3, kind: output, shape index: {}]  }
   0x1 LB: > { %s2113_s13 = sadd.s32 4294967295, %s2191_s12   ;;  %p2117_p0 = scmp.ge.s32.totalorder %s2191_s12, 1  ;;  %s2191_s12 = sphi %s2215_s12, %s13_s12  }
   0x2   : > { %p137_p1 = scmp.lt.s32.totalorder %s2191_s12, 3 }
   0x4   : > { %p138_p2 = pnand %p2117_p0, %p137_p1 }
   0x5   : > { %p161_p3 = scmp.lt.s32.totalorder (!%p138_p2), %s2113_s13, 1  ;;  %v171_v0 = vld [vmem:[%s2364_s1] sm:$0xff] (!%p138_p2)  ;;  %vm186_vm0 = vcmask (!%p138_p2), 64512   ;;  %v2193_v2 = vmov (!%p138_p2), 0.0   ;;  %v2194_v5 = vmov (!%p138_p2), 0  }
   0x6   : > { %141 = sbr.rel (%p138_p2) target bundleno = 322 (0x142), region = 32  ;;  %v180_v1 = vld [vmem:[%s2365_s2] sm:$0xff] (!%p138_p2)  ;;  %256 = vmatprep.mubr.f32.mxu0 (!%p138_p2), %v2193_v2  ;;  %721 = vmatprep.mubr.f32.mxu1 (!%p138_p2), %v2193_v2  ;;  %v188_v3 = vsel (!%p138_p2), %vm186_vm0, %v171_v0, 0 }
   0x7   : > { %v2233_v4 = vand.u32 (!%p138_p2), 4294901760, %v188_v3  ;;  %2184 = vset.pattern.permute.xlu0 (!%p138_p2), %v2194_v5 }
   0x8   : > { %183 = vperm.xlu0 (!%p138_p2), %2184, %v180_v1  }
   0x9   : > { %v2237_v6 = vsub.f32 (!%p138_p2), %v188_v3, %v2233_v4 }
   0xb   : > { %v2250_v10 = vand.u32 (!%p138_p2), 4294901760, %v2237_v6 }
   0xd   : > { %s2368_s13 = smov (!%p161_p3, %s2113_s13), 1  ;;  %v260_v16 = vsub.f32 %v2237_v6, %v2250_v10 }
   0xe   : > { %s2124_s18 = sshll.u32 %s2368_s13, 6 }
   0xf   : > { %s2244_s21 = scalar_lea.vmem %s2363_s0, %s2124_s18  ;;  %v2271_v21 = vand.u32 4294901760, %v260_v16  ;;  %s170_s24 = scalar_lea.vmem %s2366_s3, %s2124_s18 }
  0x10   : > { %v173_v7 = vld [vmem:[%s2244_s21 + $0x8] sm:$0xff]  ;;  %v175_v8 = vld [vmem:[%s2244_s21 + $0x18] sm:$0xff]  ;;  %v172_v9 = vld [vmem:[%s2244_s21] sm:$0xff] }
  0x11   : > { %v2252_v11 = vand.u32 4294901760, %v173_v7  ;;  %v2254_v12 = vand.u32 4294901760, %v175_v8  ;;  %v2256_v13 = vand.u32 4294901760, %v172_v9  ;;  %v174_v14 = vld [vmem:[%s2244_s21 + $0x10] sm:$0xff]  ;;  %v177_v34 = vld [vmem:[%s2244_s21 + $0x28] sm:$0xff]  ;;  %v179_v35 = vld [vmem:[%s2244_s21 + $0x38] sm:$0xff] }
  0x12   : > { %v2259_v15 = vand.u32 4294901760, %v174_v14  ;;  %v176_v36 = vld [vmem:[%s2244_s21 + $0x20] sm:$0xff]  ;;  %v178_v37 = vld [vmem:[%s2244_s21 + $0x30] sm:$0xff]  ;;  %v2293_v38 = vand.u32 4294901760, %v177_v34  ;;  %v2295_v39 = vand.u32 4294901760, %v179_v35 }
  0x13   : > { %191 = vmatprep.subr.mxu0 %v2252_v11  ;;  %656 = vmatprep.subr.mxu1 %v2254_v12  ;;  %v275_v17 = vsub.f32 %v172_v9, %v2256_v13  ;;  %v269_v18 = vsub.f32 %v173_v7, %v2252_v11  ;;  %v734_v19 = vsub.f32 %v175_v8, %v2254_v12  ;;  %v2299_v40 = vand.u32 4294901760, %v176_v36 }
  0x14   : > { %193 = vmatpush1.msra.mxu0 %v2256_v13  ;;  %658 = vmatpush1.msra.mxu1 %v2259_v15  ;;  %v740_v20 = vsub.f32 %v174_v14, %v2259_v15  ;;  %v2301_v41 = vand.u32 4294901760, %v178_v37  ;;  %v1199_v42 = vsub.f32 %v177_v34, %v2293_v38  ;;  %v1664_v43 = vsub.f32 %v179_v35, %v2295_v39 }
  0x15   : > { %v270_v22 = vand.u32 4294901760, %v269_v18  ;;  %v735_v23 = vand.u32 4294901760, %v734_v19  ;;  %v276_v24 = vand.u32 4294901760, %v275_v17  ;;  %262 = vmatmul.mubr.f32.vlgmr.msra.gmra.mrb[0].mxu0 %v2271_v21  ;;  %727 = vmatmul.mubr.f32.vlgmr.msra.gmra.mrb[0].mxu1 %v2271_v21  ;;  %v1205_v44 = vsub.f32 %v176_v36, %v2299_v40 }
  0x16   : > { %v741_v25 = vand.u32 4294901760, %v740_v20  ;;  %342 = vmatprep.mubr.f32.mxu0 %v2193_v2  ;;  %807 = vmatprep.mubr.f32.mxu1 %v2193_v2  ;;  %v1670_v45 = vsub.f32 %v178_v37, %v2301_v41  ;;  %v1200_v46 = vand.u32 4294901760, %v1199_v42  ;;  %v1665_v47 = vand.u32 4294901760, %v1664_v43 }
  0x17   : > { %v271_v26 = vsub.f32 %v269_v18, %v270_v22  ;;  %v736_v27 = vsub.f32 %v734_v19, %v735_v23  ;;  %v277_v28 = vsub.f32 %v275_v17, %v276_v24  ;;  %v1206_v48 = vand.u32 4294901760, %v1205_v44 }
  0x18   : > { %v742_v29 = vsub.f32 %v740_v20, %v741_v25  ;;  %v1671_v49 = vand.u32 4294901760, %v1670_v45  ;;  %v1201_v50 = vsub.f32 %v1199_v42, %v1200_v46  ;;  %v1666_v51 = vsub.f32 %v1664_v43, %v1665_v47 }
  0x19   : > { %v272_v30 = vand.u32 4294901760, %v271_v26  ;;  %v737_v31 = vand.u32 4294901760, %v736_v27  ;;  %v278_v32 = vand.u32 4294901760, %v277_v28  ;;  %v1207_v52 = vsub.f32 %v1205_v44, %v1206_v48 }
  0x1a   : > { %v743_v33 = vand.u32 4294901760, %v742_v29  ;;  %v1672_v53 = vsub.f32 %v1670_v45, %v1671_v49  ;;  %v1202_v54 = vand.u32 4294901760, %v1201_v50  ;;  %v1667_v55 = vand.u32 4294901760, %v1666_v51 }
  0x1b   : > { %273 = vmatprep.subr.mxu0 %v272_v30  ;;  %738 = vmatprep.subr.mxu1 %v737_v31  ;;  %v1208_v56 = vand.u32 4294901760, %v1207_v52 }
  0x1c   : > { %279 = vmatpush1.msra.mxu0 %v278_v32  ;;  %744 = vmatpush1.msra.mxu1 %v743_v33  ;;  %v1673_v57 = vand.u32 4294901760, %v1672_v53 }
  0x1d   : > { %352 = vmatprep.subr.mxu0 %v269_v18  ;;  %817 = vmatprep.subr.mxu1 %v734_v19 }
  0x1e   : > { %344 = vmatmul.mubr.f32.vlgmr.msra.gmra.mrb[0].mxu0 %v2233_v4  ;;  %809 = vmatmul.mubr.f32.vlgmr.msra.gmra.mrb[0].mxu1 %v2233_v4 }
  0x1f   : > { %355 = vmatpush1.msra.mxu0 %v275_v17  ;;  %820 = vmatpush1.msra.mxu1 %v740_v20 }
  0x20   : > { %418 = vmatprep.mubr.f32.mxu0 %v2193_v2  ;;  %883 = vmatprep.mubr.f32.mxu1 %v2193_v2 }
  0x21   : > { %428 = vmatprep.subr.mxu0 %v2252_v11  ;;  %893 = vmatprep.subr.mxu1 %v2254_v12 }
  0x26   : > { %421 = vmatmul.mubr.f32.vlgmr.msra.gmra.mrb[0].mxu0 %v2237_v6  ;;  %886 = vmatmul.mubr.f32.vlgmr.msra.gmra.mrb[0].mxu1 %v2237_v6 }
  0x27   : > { %430 = vmatpush1.msra.mxu0 %v2256_v13  ;;  %895 = vmatpush1.msra.mxu1 %v2259_v15 }
  0x28   : > { %493 = vmatprep.mubr.f32.mxu0 %v2193_v2  ;;  %958 = vmatprep.mubr.f32.mxu1 %v2193_v2 }
  0x29   : > { %506 = vmatprep.subr.mxu0 %v270_v22  ;;  %971 = vmatprep.subr.mxu1 %v735_v23 }
  0x2e   : > { %497 = vmatmul.mubr.f32.vlgmr.msra.gmra.mrb[0].mxu0 %v2250_v10  ;;  %962 = vmatmul.mubr.f32.vlgmr.msra.gmra.mrb[0].mxu1 %v2250_v10 }
  0x2f   : > { %510 = vmatpush1.msra.mxu0 %v276_v24  ;;  %975 = vmatpush1.msra.mxu1 %v741_v25 }
  0x30   : > { %573 = vmatprep.mubr.f32.mxu0 %v2193_v2  ;;  %1038 = vmatprep.mubr.f32.mxu1 %v2193_v2 }
  0x31   : > { %582 = vmatprep.subr.mxu0 %v2252_v11  ;;  %1047 = vmatprep.subr.mxu1 %v2254_v12 }
  0x36   : > { %575 = vmatmul.mubr.f32.vlgmr.msra.gmra.mrb[0].mxu0 %v2233_v4  ;;  %1040 = vmatmul.mubr.f32.vlgmr.msra.gmra.mrb[0].mxu1 %v2233_v4 }
  0x37   : > { %584 = vmatpush1.msra.mxu0 %v2256_v13  ;;  %1049 = vmatpush1.msra.mxu1 %v2259_v15 }
  0x38   : > { %647 = vmatprep.mubr.f32.mxu0 %v2193_v2  ;;  %1112 = vmatprep.mubr.f32.mxu1 %v2193_v2 }
  0x39   : > { %1121 = vmatprep.subr.mxu0 %v2293_v38  ;;  %1586 = vmatprep.subr.mxu1 %v2295_v39 }
  0x3e   : > { %649 = vmatmul.mubr.f32.vlgmr.msra.gmra.mrb[0].mxu0 %v2233_v4  ;;  %1114 = vmatmul.mubr.f32.vlgmr.msra.gmra.mrb[0].mxu1 %v2233_v4 }
  0x3f   : > { %1123 = vmatpush1.msra.mxu0 %v2299_v40  ;;  %1186 = vmatprep.mubr.f32.mxu0 %v2193_v2 }
  0x40   : > { %1588 = vmatpush1.msra.mxu1 %v2301_v41  ;;  %1651 = vmatprep.mubr.f32.mxu1 %v2193_v2 }
  0x41   : > { %1203 = vmatprep.subr.mxu0 %v1202_v54  ;;  %1668 = vmatprep.subr.mxu1 %v1667_v55 }
  0x42   : > { %1192 = vmatmul.mubr.f32.vlgmr.msra.gmra.mrb[2].mxu0 %v2271_v21  ;;  %1657 = vmatmul.mubr.f32.vlgmr.msra.gmra.mrb[2].mxu1 %v2271_v21 }
  0x43   : > { %1209 = vmatpush1.msra.mxu0 %v1208_v56  ;;  %1674 = vmatpush1.msra.mxu1 %v1673_v57 }
  0x44   : > { %1272 = vmatprep.mubr.f32.mxu0 %v2193_v2  ;;  %1737 = vmatprep.mubr.f32.mxu1 %v2193_v2 }
  0x45   : > { %1282 = vmatprep.subr.mxu0 %v1199_v42  ;;  %1747 = vmatprep.subr.mxu1 %v1664_v43 }
  0x4a   : > { %1274 = vmatmul.mubr.f32.vlgmr.msra.gmra.mrb[2].mxu0 %v2233_v4  ;;  %1739 = vmatmul.mubr.f32.vlgmr.msra.gmra.mrb[2].mxu1 %v2233_v4 }
  0x4b   : > { %1285 = vmatpush1.msra.mxu0 %v1205_v44  ;;  %1750 = vmatpush1.msra.mxu1 %v1670_v45 }
  0x4c   : > { %1348 = vmatprep.mubr.f32.mxu0 %v2193_v2  ;;  %1813 = vmatprep.mubr.f32.mxu1 %v2193_v2 }
  0x4d   : > { %1358 = vmatprep.subr.mxu0 %v2293_v38  ;;  %1823 = vmatprep.subr.mxu1 %v2295_v39 }
  0x52   : > { %1351 = vmatmul.mubr.f32.vlgmr.msra.gmra.mrb[2].mxu0 %v2237_v6  ;;  %1816 = vmatmul.mubr.f32.vlgmr.msra.gmra.mrb[2].mxu1 %v2237_v6 }
  0x53   : > { %1360 = vmatpush1.msra.mxu0 %v2299_v40  ;;  %1825 = vmatpush1.msra.mxu1 %v2301_v41 }
  0x54   : > { %1423 = vmatprep.mubr.f32.mxu0 %v2193_v2  ;;  %1888 = vmatprep.mubr.f32.mxu1 %v2193_v2 }
  0x55   : > { %1436 = vmatprep.subr.mxu0 %v1200_v46  ;;  %1901 = vmatprep.subr.mxu1 %v1665_v47 }
  0x5a   : > { %1427 = vmatmul.mubr.f32.vlgmr.msra.gmra.mrb[2].mxu0 %v2250_v10  ;;  %1892 = vmatmul.mubr.f32.vlgmr.msra.gmra.mrb[2].mxu1 %v2250_v10 }
  0x5b   : > { %1440 = vmatpush1.msra.mxu0 %v1206_v48  ;;  %1905 = vmatpush1.msra.mxu1 %v1671_v49 }
  0x5c   : > { %1503 = vmatprep.mubr.f32.mxu0 %v2193_v2  ;;  %1968 = vmatprep.mubr.f32.mxu1 %v2193_v2 }
  0x5d   : > { %1512 = vmatprep.subr.mxu0 %v2293_v38  ;;  %1977 = vmatprep.subr.mxu1 %v2295_v39 }
  0x62   : > { %1505 = vmatmul.mubr.f32.vlgmr.msra.gmra.mrb[2].mxu0 %v2233_v4  ;;  %1970 = vmatmul.mubr.f32.vlgmr.msra.gmra.mrb[2].mxu1 %v2233_v4 }
  0x63   : > { %1514 = vmatpush1.msra.mxu0 %v2299_v40  ;;  %1979 = vmatpush1.msra.mxu1 %v2301_v41 }
  0x64   : > { %1577 = vmatprep.mubr.f32.mxu0 %v2193_v2  ;;  %2042 = vmatprep.mubr.f32.mxu1 %v2193_v2 }
  0x6a   : > { %1579 = vmatmul.mubr.f32.vlgmr.msra.gmra.mrb[2].mxu0 %v2233_v4  ;;  %2044 = vmatmul.mubr.f32.vlgmr.msra.gmra.mrb[2].mxu1 %v2233_v4 }
  0x87   : > { %v184_v58 = vpop.permute.xlu0 %183 }
 0x111   : > { %v650_v59 = vpop.f32.mrb[0].mxu0  ;;  %v1115_v60 = vpop.f32.mrb[0].mxu1 }
 0x112   : > { %v2126_v61 = vadd.f32 %v650_v59, %v184_v58  ;;  %v2128_v62 = vadd.f32 %v1115_v60, %v184_v58  ;;  %v652_v63 = vpop.f32.mrb[1].mxu0  ;;  %v1117_v0 = vpop.f32.mrb[1].mxu1 }
 0x113   : > { %v2127_v1 = vadd.f32 %v652_v63, %v184_v58  ;;  %v2129_v3 = vadd.f32 %v1117_v0, %v184_v58 }
 0x114   : > { %2050 = vst [vmem:[%s170_s24] sm:$0xff] %v2126_v61  ;;  %2052 = vst [vmem:[%s170_s24 + $0x10] sm:$0xff] %v2128_v62 }
 0x115   : > { %2051 = vst [vmem:[%s170_s24 + $0x8] sm:$0xff] %v2127_v1  ;;  %2053 = vst [vmem:[%s170_s24 + $0x18] sm:$0xff] %v2129_v3 }
 0x13d   : > { %v1580_v2 = vpop.f32.mrb[2].mxu0  ;;  %v2045_v4 = vpop.f32.mrb[2].mxu1 }
 0x13e   : > { %v2130_v5 = vadd.f32 %v1580_v2, %v184_v58  ;;  %v2132_v6 = vadd.f32 %v2045_v4, %v184_v58  ;;  %v1582_v7 = vpop.f32.mrb[3].mxu0  ;;  %v2047_v8 = vpop.f32.mrb[3].mxu1 }
 0x13f   : > { %v2131_v9 = vadd.f32 %v1582_v7, %v184_v58  ;;  %v2133_v10 = vadd.f32 %v2047_v8, %v184_v58 }
 0x140   : > { %2054 = vst [vmem:[%s170_s24 + $0x20] sm:$0xff] %v2130_v5  ;;  %2056 = vst [vmem:[%s170_s24 + $0x30] sm:$0xff] %v2132_v6 }
 0x141   : > { %2055 = vst [vmem:[%s170_s24 + $0x28] sm:$0xff] %v2131_v9  ;;  %2057 = vst [vmem:[%s170_s24 + $0x38] sm:$0xff] %v2133_v10 }
 0x142 PF: > { %s13_s12 = sadd.s32 1, %s2191_s12  }
 0x143   : > { %p10_p4 = scmp.ge.s32.totalorder %s13_s12, 4  }
 0x145   :  { %12 = sbr.rel (!%p10_p4) target bundleno = 1 (0x1), region = 62 }

// kernel: mask_encoder.7
= control target key start
LH: loop header
LB: loop body
LE: loop exit
PB: predicated region body
PF: predicated region fallthrough
CT: control target
= control target key end

     0   :  { %s977_s12 = smov 0   ;;  %s1112_s0 = inlined_call_operand.vmem [shape: f32[2,32,256], index: 0, kind: input, shape index: {}]   ;;  %s1113_s1 = inlined_call_operand.vmem [shape: f32[16,32], index: 1, kind: input, shape index: {}]   ;;  %s1114_s2 = inlined_call_operand.vmem [shape: f32[16,1], index: 2, kind: input, shape index: {}]   ;;  %s1115_s3 = inlined_call_operand.vmem [shape: f32[2,16,256], index: 3, kind: output, shape index: {}]  }
   0x1 LB: > { %s851_s13 = sadd.s32 4294967295, %s953_s12   ;;  %p855_p0 = scmp.ge.s32.totalorder %s953_s12, 1  ;;  %s953_s12 = sphi %s977_s12, %s13_s12  }
   0x2   : > { %p137_p1 = scmp.lt.s32.totalorder %s953_s12, 3 }
   0x4   : > { %p138_p2 = pnand %p855_p0, %p137_p1 }
   0x5   : > { %p161_p3 = scmp.lt.s32.totalorder (!%p138_p2), %s851_s13, 1  ;;  %v171_v0 = vld [vmem:[%s1113_s1] sm:$0xff] (!%p138_p2)  ;;  %vm193_vm0 = vcmask (!%p138_p2), 261120   ;;  %v172_v1 = vld [vmem:[%s1113_s1 + $0x8] sm:$0xff] (!%p138_p2)  ;;  %v955_v2 = vmov (!%p138_p2), 0.0   ;;  %v956_v8 = vmov (!%p138_p2), 0  }
   0x6   : > { %141 = sbr.rel (%p138_p2) target bundleno = 269 (0x10d), region = 32  ;;  %272 = vmatprep.mubr.f32.mxu1 (!%p138_p2), %v955_v2  ;;  %583 = vmatprep.mubr.f32.mxu0 (!%p138_p2), %v955_v2  ;;  %v195_v3 = vsel (!%p138_p2), %vm193_vm0, %v171_v0, 0  ;;  %v198_v4 = vsel (!%p138_p2), %vm193_vm0, %v172_v1, 0  ;;  %v181_v5 = vld [vmem:[%s1114_s2] sm:$0xff] (!%p138_p2)  ;;  %v182_v11 = vld [vmem:[%s1114_s2 + $0x8] sm:$0xff] (!%p138_p2) }
   0x7   : > { %v998_v6 = vand.u32 (!%p138_p2), 4294901760, %v195_v3  ;;  %v1000_v7 = vand.u32 (!%p138_p2), 4294901760, %v198_v4  ;;  %946 = vset.pattern.permute.xlu0 (!%p138_p2), %v956_v8 }
   0x8   : > { %185 = vperm.xlu0 (!%p138_p2), %946, %v181_v5  }
   0x9   : > { %v1004_v9 = vsub.f32 (!%p138_p2), %v195_v3, %v998_v6  ;;  %v1007_v10 = vsub.f32 (!%p138_p2), %v198_v4, %v1000_v7 }
   0xb   : > { %v275_v15 = vand.u32 (!%p138_p2), 4294901760, %v1004_v9  ;;  %v286_v16 = vand.u32 (!%p138_p2), 4294901760, %v1007_v10 }
   0xc   : > { %190 = vperm.xlu0 (!%p138_p2), %946, %v182_v11  }
   0xd   : > { %s1117_s13 = smov (!%p161_p3, %s851_s13), 1  ;;  %v276_v28 = vsub.f32 %v1004_v9, %v275_v15  ;;  %v287_v55 = vsub.f32 %v1007_v10, %v286_v16 }
   0xe   : > { %s862_s20 = sshll.u32 %s1117_s13, 6  ;;  %s863_s26 = sshll.u32 %s1117_s13, 5 }
   0xf   : > { %s165_s25 = scalar_lea.vmem %s1112_s0, %s862_s20  ;;  %v277_v40 = vand.u32 4294901760, %v276_v28  ;;  %v288_v8 = vand.u32 4294901760, %v287_v55  ;;  %s170_s29 = scalar_lea.vmem %s1115_s3, %s863_s26 }
  0x10   : > { %v174_v12 = vld [vmem:[%s165_s25 + $0x8] sm:$0xff]  ;;  %v176_v13 = vld [vmem:[%s165_s25 + $0x18] sm:$0xff]  ;;  %v173_v14 = vld [vmem:[%s165_s25] sm:$0xff] }
  0x11   : > { %v200_v17 = vand.u32 4294901760, %v174_v12  ;;  %v204_v18 = vand.u32 4294901760, %v176_v13  ;;  %v175_v19 = vld [vmem:[%s165_s25 + $0x10] sm:$0xff]  ;;  %v202_v20 = vand.u32 4294901760, %v173_v14  ;;  %v178_v21 = vld [vmem:[%s165_s25 + $0x28] sm:$0xff]  ;;  %v180_v22 = vld [vmem:[%s165_s25 + $0x38] sm:$0xff] }
  0x12   : > { %v206_v23 = vand.u32 4294901760, %v175_v19  ;;  %v208_v24 = vand.u32 4294901760, %v178_v21  ;;  %v212_v25 = vand.u32 4294901760, %v180_v22  ;;  %v177_v26 = vld [vmem:[%s165_s25 + $0x20] sm:$0xff]  ;;  %v179_v27 = vld [vmem:[%s165_s25 + $0x30] sm:$0xff] }
  0x13   : > { %v1020_v29 = vpack.c.bf16 %v204_v18, %v200_v17  ;;  %v1022_v30 = vsub.f32 %v174_v12, %v200_v17  ;;  %v1024_v31 = vsub.f32 %v176_v13, %v204_v18  ;;  %v1026_v32 = vsub.f32 %v173_v14, %v202_v20 }
  0x14   : > { %v1028_v33 = vpack.c.bf16 %v206_v23, %v202_v20  ;;  %v1030_v34 = vsub.f32 %v175_v19, %v206_v23  ;;  %v1032_v35 = vpack.c.bf16 %v212_v25, %v208_v24  ;;  %v1034_v36 = vsub.f32 %v178_v21, %v208_v24 }
  0x15   : > { %865 = vmatprep.subr.bf16.mxu1 %v1020_v29  ;;  %889 = vmatprep.subr.bf16.mxu0 %v1020_v29  ;;  %v1038_v37 = vsub.f32 %v180_v22, %v212_v25  ;;  %v210_v38 = vand.u32 4294901760, %v177_v26  ;;  %v214_v39 = vand.u32 4294901760, %v179_v27  ;;  %v297_v41 = vand.u32 4294901760, %v1022_v30 }
  0x16   : > { %867 = vmatpush1.bf16.msra.mxu1 %v1028_v33  ;;  %891 = vmatpush1.bf16.msra.mxu0 %v1028_v33  ;;  %v309_v42 = vand.u32 4294901760, %v1024_v31  ;;  %v303_v43 = vand.u32 4294901760, %v1026_v32  ;;  %v315_v44 = vand.u32 4294901760, %v1030_v34  ;;  %v321_v48 = vand.u32 4294901760, %v1034_v36 }
  0x17   : > { %869 = vmatprep.subr.bf16.mxu1 %v1032_v35  ;;  %893 = vmatprep.subr.bf16.mxu0 %v1032_v35  ;;  %v1048_v45 = vpack.c.bf16 %v214_v39, %v210_v38  ;;  %v1050_v46 = vsub.f32 %v177_v26, %v210_v38  ;;  %v1052_v47 = vsub.f32 %v179_v27, %v214_v39  ;;  %v333_v60 = vand.u32 4294901760, %v1038_v37 }
  0x18   : > { %v298_v49 = vsub.f32 %v1022_v30, %v297_v41  ;;  %v310_v50 = vsub.f32 %v1024_v31, %v309_v42  ;;  %v896_v51 = vpack.c.bf16 %v309_v42, %v297_v41  ;;  %v304_v52 = vsub.f32 %v1026_v32, %v303_v43 }
  0x19   : > { %v316_v53 = vsub.f32 %v1030_v34, %v315_v44  ;;  %v898_v54 = vpack.c.bf16 %v315_v44, %v303_v43  ;;  %v322_v56 = vsub.f32 %v1034_v36, %v321_v48  ;;  %v327_v63 = vand.u32 4294901760, %v1050_v46 }
  0x1a   : > { %871 = vmatpush1.bf16.msra.mxu1 %v1048_v45  ;;  %895 = vmatpush1.bf16.msra.mxu0 %v1048_v45  ;;  %v299_v57 = vand.u32 4294901760, %v298_v49  ;;  %v311_v58 = vand.u32 4294901760, %v310_v50  ;;  %v305_v59 = vand.u32 4294901760, %v304_v52  ;;  %v334_v1 = vsub.f32 %v1038_v37, %v333_v60 }
  0x1b   : > { %897 = vmatprep.subr.bf16.mxu0 %v896_v51  ;;  %v317_v61 = vand.u32 4294901760, %v316_v53  ;;  %v323_v62 = vand.u32 4294901760, %v322_v56  ;;  %v900_v3 = vpack.c.bf16 %v333_v60, %v321_v48  ;;  %v339_v4 = vand.u32 4294901760, %v1052_v47 }
  0x1c   : > { %v872_v0 = vpack.c.bf16 %v311_v58, %v299_v57  ;;  %v328_v11 = vsub.f32 %v1050_v46, %v327_v63  ;;  %v335_v12 = vand.u32 4294901760, %v334_v1  ;;  %v882_v21 = vpack.c.bf16 %v1030_v34, %v1026_v32 }
  0x1d   : > { %278 = vmatmul.mubr.f32.vlgmr.msra.gmra.mrb[0].mxu1 %v277_v40  ;;  %587 = vmatmul.mubr.f32.vlgmr.msra.gmra.mrb[0].mxu0 %v275_v15  ;;  %v874_v5 = vpack.c.bf16 %v317_v61, %v305_v59  ;;  %v340_v13 = vsub.f32 %v1052_v47, %v339_v4  ;;  %v902_v14 = vpack.c.bf16 %v339_v4, %v327_v63 }
  0x1e   : > { %873 = vmatprep.subr.bf16.mxu1 %v872_v0  ;;  %899 = vmatpush1.bf16.msra.mxu0 %v898_v54  ;;  %v329_v17 = vand.u32 4294901760, %v328_v11  ;;  %v876_v18 = vpack.c.bf16 %v335_v12, %v323_v62  ;;  %v880_v15 = vpack.c.bf16 %v1024_v31, %v1022_v30  ;;  %v886_v22 = vpack.c.bf16 %v1052_v47, %v1050_v46 }
  0x1f   : > { %875 = vmatpush1.bf16.msra.mxu1 %v874_v5  ;;  %283 = vmatprep.mubr.f32.mxu1 %v955_v2  ;;  %v341_v19 = vand.u32 4294901760, %v340_v13 }
  0x20   : > { %592 = vmatprep.mubr.f32.mxu0 %v955_v2  ;;  %901 = vmatprep.subr.bf16.mxu0 %v900_v3 }
  0x21   : > { %289 = vmatmul.mubr.f32.gmra.mrb[2].mxu1 %v288_v8  ;;  %596 = vmatmul.mubr.f32.gmra.mrb[2].mxu0 %v286_v16  ;;  %v878_v20 = vpack.c.bf16 %v341_v19, %v329_v17  ;;  %v884_v16 = vpack.c.bf16 %v1038_v37, %v1034_v36 }
  0x22   : > { %877 = vmatprep.subr.bf16.mxu1 %v876_v18  ;;  %903 = vmatpush1.bf16.msra.mxu0 %v902_v14 }
  0x23   : > { %399 = vmatprep.mubr.f32.mxu1 %v955_v2  ;;  %690 = vmatprep.mubr.f32.mxu0 %v955_v2 }
  0x24   : > { %879 = vmatpush1.bf16.msra.mxu1 %v878_v20  ;;  %905 = vmatprep.subr.bf16.mxu0 %v1020_v29 }
  0x25   : > { %881 = vmatprep.subr.bf16.mxu1 %v880_v15  ;;  %692 = vmatmul.mubr.f32.vlgmr.msra.gmra.mrb[0].mxu0 %v998_v6 }
  0x26   : > { %907 = vmatpush1.bf16.msra.mxu0 %v1028_v33  ;;  %697 = vmatprep.mubr.f32.mxu0 %v955_v2 }
  0x27   : > { %401 = vmatmul.mubr.f32.vlgmr.msra.gmra.mrb[0].mxu1 %v998_v6  ;;  %909 = vmatprep.subr.bf16.mxu0 %v1032_v35 }
  0x28   : > { %883 = vmatpush1.bf16.msra.mxu1 %v882_v21  ;;  %406 = vmatprep.mubr.f32.mxu1 %v955_v2 }
  0x29   : > { %885 = vmatprep.subr.bf16.mxu1 %v884_v16  ;;  %699 = vmatmul.mubr.f32.gmra.mrb[2].mxu0 %v1000_v7 }
  0x2a   : > { %911 = vmatpush1.bf16.msra.mxu0 %v1048_v45  ;;  %777 = vmatprep.mubr.f32.mxu0 %v955_v2 }
  0x2b   : > { %408 = vmatmul.mubr.f32.gmra.mrb[2].mxu1 %v1000_v7 }
  0x2c   : > { %887 = vmatpush1.bf16.msra.mxu1 %v886_v22  ;;  %494 = vmatprep.mubr.f32.mxu1 %v955_v2 }
  0x2d   : > { %779 = vmatmul.mubr.f32.vlgmr.msra.gmra.mrb[0].mxu0 %v998_v6 }
  0x2e   : > { %784 = vmatprep.mubr.f32.mxu0 %v955_v2 }
  0x2f   : > { %497 = vmatmul.mubr.f32.vlgmr.msra.gmra.mrb[0].mxu1 %v1004_v9 }
  0x30   : > { %502 = vmatprep.mubr.f32.mxu1 %v955_v2 }
  0x31   : > { %786 = vmatmul.mubr.f32.gmra.mrb[2].mxu0 %v1000_v7 }
  0x33   : > { %505 = vmatmul.mubr.f32.gmra.mrb[2].mxu1 %v1007_v10 }
  0x87   : > { %v186_v23 = vpop.permute.xlu0 %185 }
  0x8b   : > { %v191_v31 = vpop.permute.xlu0 %190 }
 0x100   : > { %v780_v24 = vpop.f32.mrb[0].mxu0 }
 0x101   : > { %v782_v25 = vpop.f32.mrb[1].mxu0 }
 0x102   : > { %v498_v26 = vpop.f32.mrb[0].mxu1 }
 0x103   : > { %v912_v27 = vadd.f32 %v498_v26, %v186_v23  ;;  %v500_v28 = vpop.f32.mrb[1].mxu1 }
 0x104   : > { %v914_v6 = vadd.f32 %v500_v28, %v186_v23  ;;  %v787_v29 = vpop.f32.mrb[2].mxu0 }
 0x105   : > { %v913_v9 = vadd.f32 %v912_v27, %v780_v24  ;;  %v789_v30 = vpop.f32.mrb[3].mxu0 }
 0x106   : > { %v915_v2 = vadd.f32 %v914_v6, %v782_v25  ;;  %v506_v7 = vpop.f32.mrb[2].mxu1 }
 0x107   : > { %792 = vst [vmem:[%s170_s29] sm:$0xff] %v913_v9  ;;  %v916_v10 = vadd.f32 %v506_v7, %v191_v31  ;;  %v508_v32 = vpop.f32.mrb[3].mxu1 }
 0x108   : > { %793 = vst [vmem:[%s170_s29 + $0x8] sm:$0xff] %v915_v2  ;;  %v918_v33 = vadd.f32 %v508_v32, %v191_v31 }
 0x109   : > { %v917_v34 = vadd.f32 %v916_v10, %v787_v29 }
 0x10a   : > { %v919_v35 = vadd.f32 %v918_v33, %v789_v30 }
 0x10b   : > { %794 = vst [vmem:[%s170_s29 + $0x10] sm:$0xff] %v917_v34 }
 0x10c   : > { %795 = vst [vmem:[%s170_s29 + $0x18] sm:$0xff] %v919_v35 }
 0x10d PF: > { %s13_s12 = sadd.s32 1, %s953_s12  }
 0x10e   : > { %p10_p4 = scmp.ge.s32.totalorder %s13_s12, 4  }
 0x110   :  { %12 = sbr.rel (!%p10_p4) target bundleno = 1 (0x1), region = 62 }

// kernel: mask_encoder.8
= control target key start
LH: loop header
LB: loop body
LE: loop exit
PB: predicated region body
PF: predicated region fallthrough
CT: control target
= control target key end

     0   :  { %s4117_s21 = smov 0   ;;  %s5515_s0 = inlined_call_operand.vmem [shape: f32[2,16,4,64], index: 0, kind: input, shape index: {}]   ;;  %s5516_s1 = inlined_call_operand.vmem [shape: f32[16,1], index: 1, kind: input, shape index: {}]   ;;  %s5517_s2 = inlined_call_operand.vmem [shape: f32[16,1], index: 2, kind: input, shape index: {}]   ;;  %s5518_s3 = inlined_call_operand.vmem [shape: f32[4,392], index: 3, kind: input, shape index: {}]   ;;  %s5519_s4 = inlined_call_operand.vmem [shape: f32[392,64], index: 4, kind: input, shape index: {}]   ;;  %s5520_s5 = inlined_call_operand.vmem [shape: f32[16,1], index: 5, kind: input, shape index: {}]   ;;  %s5521_s6 = inlined_call_operand.vmem [shape: f32[2,16,4,64], index: 6, kind: output, shape index: {}]  }
   0x1 LB: > { %s3271_s22 = sadd.s32 4294967295, %s3979_s21   ;;  %p3275_p0 = scmp.ge.s32.totalorder %s3979_s21, 1  ;;  %s3979_s21 = sphi %s4117_s21, %s16_s21  }
   0x2   : > { %p212_p1 = scmp.lt.s32.totalorder %s3979_s21, 3 }
   0x4   : > { %p213_p2 = pnand %p3275_p0, %p212_p1 }
   0x6   : > { %216 = sbr.rel (%p213_p2) target bundleno = 1389 (0x56d), region = 44 }
   0xd   : > { %p242_p3 = scmp.lt.s32.totalorder %s3271_s22, 1  ;;  %vm268_vm0 = vcmask 519168   ;;  %v350_v60 = vlaneseq  ;;  %vm416_vm1 = vcmask 1041409   ;;  %vm418_vm2 = vcmask 1042434   ;;  %s3983_s13 = smov 56  }
   0xe   : > { %vm420_vm3 = vcmask 1043459   ;;  %vm422_vm4 = vcmask 1044484   ;;  %vm424_vm5 = vcmask 1045509   ;;  %vm426_vm6 = vcmask 1046534   ;;  %s3984_s16 = smov 38   ;;  %s3985_s19 = smov 58  }
   0xf   : > { %s5651_s22 = smov (!%p242_p3, %s3271_s22), 1  ;;  %v351_v63 = vand.u32 127, %v350_v60  ;;  %vm428_vm7 = vcmask 1047559   ;;  %vm439_vm8 = vcmask 31744   ;;  %vm605_vm9 = vcmask 7168   ;;  %s3986_s25 = smov 40  }
  0x10   : > { %s3286_s23 = sshll.u32 %s5651_s22, 6  ;;  %s3987_s28 = smov 61   ;;  %vm962_vm10 = vcmask 523264   ;;  %vm972_vm11 = vcmask 1043456   ;;  %vm1611_vm12 = vcmask 64512  }
  0x11   : > { %s4133_s26 = scalar_lea.vmem %s5515_s0, %s3286_s23  ;;  %s3988_s9 = smov 42  }
  0x12   : > { %v4136_v0 = vld [vmem:[%s4133_s26 + $0x20] sm:$0xf]  ;;  %v4142_v2 = vld [vmem:[%s4133_s26 + $0x24] sm:$0xf]  ;;  %v4156_v8 = vld [vmem:[%s4133_s26 + $0x28] sm:$0xf] }
  0x13   : > { %v4139_v1 = vld [vmem:[%s4133_s26] sm:$0xf]  ;;  %v293_v3 = vsel %vm268_vm0, %v4136_v0, 0.0  ;;  %v4149_v5 = vld [vmem:[%s4133_s26 + $0x4] sm:$0xf]  ;;  %v296_v6 = vsel %vm268_vm0, %v4142_v2, 0.0 }
  0x14   : > { %v269_v4 = vsel %vm268_vm0, %v4139_v1, 0.0  ;;  %294 = vadd.xlane.f32.xlu1 %v293_v3  ;;  %v272_v7 = vsel %vm268_vm0, %v4149_v5, 0.0  ;;  %v4159_v9 = vld [vmem:[%s4133_s26 + $0x8] sm:$0xf]  ;;  %v299_v10 = vsel %vm268_vm0, %v4156_v8, 0.0  ;;  %v452_v24 = vsel %vm268_vm0, %v4149_v5, -inf }
  0x15   : > { %270 = vadd.xlane.f32.xlu0 %v269_v4  ;;  %v275_v11 = vsel %vm268_vm0, %v4159_v9, 0.0  ;;  %v4166_v12 = vld [vmem:[%s4133_s26 + $0x2c] sm:$0xf]  ;;  %v4176_v16 = vld [vmem:[%s4133_s26 + $0x30] sm:$0xf]  ;;  %v449_v25 = vsel %vm268_vm0, %v4139_v1, -inf }
  0x16   : > { %v4169_v13 = vld [vmem:[%s4133_s26 + $0xc] sm:$0xf]  ;;  %v302_v14 = vsel %vm268_vm0, %v4166_v12, 0.0  ;;  %v4179_v17 = vld [vmem:[%s4133_s26 + $0x10] sm:$0xf]  ;;  %v305_v18 = vsel %vm268_vm0, %v4176_v16, 0.0 }
  0x17   : > { %v278_v15 = vsel %vm268_vm0, %v4169_v13, 0.0  ;;  %v281_v19 = vsel %vm268_vm0, %v4179_v17, 0.0  ;;  %v4186_v20 = vld [vmem:[%s4133_s26 + $0x34] sm:$0xf]  ;;  %v476_v26 = vsel %vm268_vm0, %v4142_v2, -inf  ;;  %v473_v27 = vsel %vm268_vm0, %v4136_v0, -inf }
  0x18   : > { %297 = vadd.xlane.f32.xlu1 %v296_v6  ;;  %v4189_v21 = vld [vmem:[%s4133_s26 + $0x14] sm:$0xf]  ;;  %v308_v22 = vsel %vm268_vm0, %v4186_v20, 0.0  ;;  %v4204_v28 = vld [vmem:[%s4133_s26 + $0x38] sm:$0xf]  ;;  %v479_v32 = vsel %vm268_vm0, %v4156_v8, -inf }
  0x19   : > { %273 = vadd.xlane.f32.xlu0 %v272_v7  ;;  %v284_v23 = vsel %vm268_vm0, %v4189_v21, 0.0  ;;  %v4207_v29 = vld [vmem:[%s4133_s26 + $0x18] sm:$0xf]  ;;  %v311_v30 = vsel %vm268_vm0, %v4204_v28, 0.0  ;;  %v455_v33 = vsel %vm268_vm0, %v4159_v9, -inf  ;;  %v482_v38 = vsel %vm268_vm0, %v4166_v12, -inf }
  0x1a   : > { %v287_v31 = vsel %vm268_vm0, %v4207_v29, 0.0  ;;  %v4218_v34 = vld [vmem:[%s4133_s26 + $0x3c] sm:$0xf]  ;;  %v458_v39 = vsel %vm268_vm0, %v4169_v13, -inf  ;;  %v485_v40 = vsel %vm268_vm0, %v4176_v16, -inf  ;;  %v461_v41 = vsel %vm268_vm0, %v4179_v17, -inf }
  0x1b   : > { %v4221_v35 = vld [vmem:[%s4133_s26 + $0x1c] sm:$0xf]  ;;  %v314_v36 = vsel %vm268_vm0, %v4218_v34, 0.0  ;;  %v488_v42 = vsel %vm268_vm0, %v4186_v20, -inf  ;;  %v464_v43 = vsel %vm268_vm0, %v4189_v21, -inf  ;;  %v491_v44 = vsel %vm268_vm0, %v4204_v28, -inf }
  0x1c   : > { %300 = vadd.xlane.f32.xlu1 %v299_v10  ;;  %v290_v37 = vsel %vm268_vm0, %v4221_v35, 0.0  ;;  %v467_v45 = vsel %vm268_vm0, %v4207_v29, -inf  ;;  %v494_v46 = vsel %vm268_vm0, %v4218_v34, -inf  ;;  %v470_v47 = vsel %vm268_vm0, %v4221_v35, -inf  ;;  %s3989_s12 = smov 55   ;;  %s3990_s15 = smov 63  }
  0x1d   : > { %276 = vadd.xlane.f32.xlu0 %v275_v11  ;;  %v4251_v3 = vshrl.u32 %v350_v60, 7  ;;  %s3991_s18 = smov 37   ;;  %s3992_s24 = smov 45  }
  0x1e   : > { %s3995_s7 = smov 59   ;;  %s3996_s10 = smov 41  }
  0x1f   : > { %v4258_v7 = vsub.s32 %v351_v63, %v4251_v3  ;;  %s3998_s14 = smov 64   ;;  %s4013_s17 = smov 8  }
  0x20   : > { %303 = vadd.xlane.f32.xlu1 %v302_v14  ;;  %s4014_s20 = smov 54   ;;  %s4015_s26 = smov 73  }
  0x21   : > { %279 = vadd.xlane.f32.xlu0 %v278_v15  ;;  %s4016_s27 = smov 72   ;;  %s4018_s29 = smov 90  }
  0x22   : > { %s4019_s30 = smov 71   ;;  %s4021_s8 = smov 89  }
  0x23   : > { %s4024_s11 = smov 67  }
  0x24   : > { %306 = vadd.xlane.f32.xlu1 %v305_v18 }
  0x25   : > { %282 = vadd.xlane.f32.xlu0 %v281_v19 }
  0x28   : > { %309 = vadd.xlane.f32.xlu1 %v308_v22 }
  0x29   : > { %285 = vadd.xlane.f32.xlu0 %v284_v23 }
  0x2c   : > { %453 = vmax.xlane.f32.xlu1 %v452_v24 }
  0x2d   : > { %450 = vmax.xlane.f32.xlu0 %v449_v25 }
  0x30   : > { %477 = vmax.xlane.f32.xlu1 %v476_v26 }
  0x31   : > { %474 = vmax.xlane.f32.xlu0 %v473_v27 }
  0x34   : > { %312 = vadd.xlane.f32.xlu1 %v311_v30 }
  0x35   : > { %288 = vadd.xlane.f32.xlu0 %v287_v31 }
  0x38   : > { %480 = vmax.xlane.f32.xlu1 %v479_v32 }
  0x39   : > { %456 = vmax.xlane.f32.xlu0 %v455_v33 }
  0x3c   : > { %315 = vadd.xlane.f32.xlu1 %v314_v36 }
  0x3d   : > { %291 = vadd.xlane.f32.xlu0 %v290_v37 }
  0x40   : > { %483 = vmax.xlane.f32.xlu1 %v482_v38 }
  0x41   : > { %459 = vmax.xlane.f32.xlu0 %v458_v39 }
  0x44   : > { %486 = vmax.xlane.f32.xlu1 %v485_v40 }
  0x45   : > { %462 = vmax.xlane.f32.xlu0 %v461_v41 }
  0x48   : > { %489 = vmax.xlane.f32.xlu1 %v488_v42 }
  0x49   : > { %465 = vmax.xlane.f32.xlu0 %v464_v43 }
  0x4c   : > { %492 = vmax.xlane.f32.xlu1 %v491_v44 }
  0x4d   : > { %468 = vmax.xlane.f32.xlu0 %v467_v45 }
  0x50   : > { %495 = vmax.xlane.f32.xlu1 %v494_v46 }
  0x51   : > { %471 = vmax.xlane.f32.xlu0 %v470_v47 }
  0xa1   : > { %v295_v48 = vpop.xlane.xlu1 %294 }
  0xa2   : > { %v271_v49 = vpop.xlane.xlu0 %270  ;;  %v326_v22 = vmul.f32 0.015625, %v295_v48 }
  0xa3   : > { %v318_v23 = vmul.f32 0.015625, %v271_v49 }
  0xa4   : > { %v387_v42 = vrot.slane %v326_v22, %v4258_v7 }
  0xa5   : > { %v298_v50 = vpop.xlane.xlu1 %297  ;;  %v355_v43 = vrot.slane %v318_v23, %v4258_v7 }
  0xa6   : > { %v274_v51 = vpop.xlane.xlu0 %273  ;;  %v327_v10 = vmul.f32 0.015625, %v298_v50 }
  0xa7   : > { %v319_v11 = vmul.f32 0.015625, %v274_v51 }
  0xa8   : > { %v391_v30 = vrot.slane %v327_v10, %v4258_v7 }
  0xa9   : > { %v301_v52 = vpop.xlane.xlu1 %300  ;;  %v359_v31 = vrot.slane %v319_v11, %v4258_v7 }
  0xaa   : > { %v277_v53 = vpop.xlane.xlu0 %276  ;;  %v328_v14 = vmul.f32 0.015625, %v301_v52  ;;  %v430_v48 = vsel %vm416_vm1, %v391_v30, %v387_v42 }
  0xab   : > { %v320_v15 = vmul.f32 0.015625, %v277_v53  ;;  %v417_v49 = vsel %vm416_vm1, %v359_v31, %v355_v43 }
  0xac   : > { %v395_v36 = vrot.slane %v328_v14, %v4258_v7 }
  0xad   : > { %v304_v54 = vpop.xlane.xlu1 %303  ;;  %v363_v37 = vrot.slane %v320_v15, %v4258_v7 }
  0xae   : > { %v280_v55 = vpop.xlane.xlu0 %279  ;;  %v329_v24 = vmul.f32 0.015625, %v304_v54  ;;  %v431_v52 = vsel %vm418_vm2, %v395_v36, %v430_v48 }
  0xaf   : > { %v321_v25 = vmul.f32 0.015625, %v280_v55  ;;  %v419_v53 = vsel %vm418_vm2, %v363_v37, %v417_v49 }
  0xb0   : > { %v399_v44 = vrot.slane %v329_v24, %v4258_v7 }
  0xb1   : > { %v307_v56 = vpop.xlane.xlu1 %306  ;;  %v367_v45 = vrot.slane %v321_v25, %v4258_v7 }
  0xb2   : > { %v283_v57 = vpop.xlane.xlu0 %282  ;;  %v330_v26 = vmul.f32 0.015625, %v307_v56 }
  0xb3   : > { %v322_v27 = vmul.f32 0.015625, %v283_v57 }
  0xb4   : > { %v403_v46 = vrot.slane %v330_v26, %v4258_v7 }
  0xb5   : > { %v310_v58 = vpop.xlane.xlu1 %309  ;;  %v371_v47 = vrot.slane %v322_v27, %v4258_v7 }
  0xb6   : > { %v286_v59 = vpop.xlane.xlu0 %285  ;;  %v331_v32 = vmul.f32 0.015625, %v310_v58  ;;  %v432_v58 = vsel %vm420_vm3, %v399_v44, %v431_v52 }
  0xb7   : > { %v323_v33 = vmul.f32 0.015625, %v286_v59  ;;  %v421_v59 = vsel %vm420_vm3, %v367_v45, %v419_v53  ;;  %v433_v10 = vsel %vm422_vm4, %v403_v46, %v432_v58 }
  0xb8   : > { %v407_v50 = vrot.slane %v331_v32, %v4258_v7  ;;  %v423_v11 = vsel %vm422_vm4, %v371_v47, %v421_v59 }
  0xb9   : > { %v4247_v61 = vpop.xlane.xlu1 %453  ;;  %v375_v51 = vrot.slane %v323_v33, %v4258_v7 }
  0xba   : > { %v4249_v62 = vpop.xlane.xlu0 %450 }
  0xbd   : > { %v4253_v4 = vpop.xlane.xlu1 %477 }
  0xbe   : > { %v4255_v6 = vpop.xlane.xlu0 %474  ;;  %v552_v42 = vrot.slane %v4253_v4, %v4258_v7 }
  0xbf   : > { %v548_v43 = vrot.slane %v4255_v6, %v4258_v7 }
  0xc1   : > { %v313_v18 = vpop.xlane.xlu1 %312  ;;  %v584_v6 = vsel %vm416_vm1, %v552_v42, %v548_v43 }
  0xc2   : > { %v289_v19 = vpop.xlane.xlu0 %288  ;;  %v332_v38 = vmul.f32 0.015625, %v313_v18  ;;  %v434_v18 = vsel %vm424_vm5, %v407_v50, %v433_v10 }
  0xc3   : > { %v324_v39 = vmul.f32 0.015625, %v289_v19  ;;  %v425_v19 = vsel %vm424_vm5, %v375_v51, %v423_v11 }
  0xc4   : > { %v411_v54 = vrot.slane %v332_v38, %v4258_v7  ;;  %v520_v38 = vrot.slane %v4247_v61, %v4258_v7 }
  0xc5   : > { %v4264_v40 = vpop.xlane.xlu1 %480  ;;  %v379_v55 = vrot.slane %v324_v39, %v4258_v7  ;;  %v516_v39 = vrot.slane %v4249_v62, %v4258_v7 }
  0xc6   : > { %v4266_v41 = vpop.xlane.xlu0 %456  ;;  %v435_v24 = vsel %vm426_vm6, %v411_v54, %v434_v18  ;;  %v556_v44 = vrot.slane %v4264_v40, %v4258_v7 }
  0xc7   : > { %v427_v25 = vsel %vm426_vm6, %v379_v55, %v425_v19  ;;  %v524_v45 = vrot.slane %v4266_v41, %v4258_v7  ;;  %v577_v4 = vsel %vm416_vm1, %v520_v38, %v516_v39 }
  0xc8   : > { %v585_v41 = vsel %vm418_vm2, %v556_v44, %v584_v6 }
  0xc9   : > { %v316_v56 = vpop.xlane.xlu1 %315  ;;  %v578_v51 = vsel %vm418_vm2, %v524_v45, %v577_v4 }
  0xca   : > { %v292_v57 = vpop.xlane.xlu0 %291  ;;  %v333_v60 = vmul.f32 0.015625, %v316_v56 }
  0xcb   : > { %v325_v63 = vmul.f32 0.015625, %v292_v57 }
  0xcc   : > { %v415_v14 = vrot.slane %v333_v60, %v4258_v7 }
  0xcd   : > { %v383_v15 = vrot.slane %v325_v63, %v4258_v7  ;;  %v484_v22 = vpop.xlane.xlu1 %483 }
  0xce   : > { %v460_v23 = vpop.xlane.xlu0 %459  ;;  %v4293_v26 = vsel %vm428_vm7, %v415_v14, %v435_v24  ;;  %v560_v46 = vrot.slane %v484_v22, %v4258_v7  ;;  %v3981_v24 = vmov 0  }
  0xcf   : > { %5563 = vst [vmem:[#allocation4_spill] sm:$0xff] %v4293_v26  ;;  %v4296_v27 = vsel %vm428_vm7, %v383_v15, %v427_v25  ;;  %v443_v30 = vsel %vm439_vm8, %v4293_v26, 0.0  ;;  %v528_v47 = vrot.slane %v460_v23, %v4258_v7  ;;  %3954 = vset.pattern.permute.xlu1 %v3981_v24  ;;  %3953 = vset.pattern.permute.xlu0 %v3981_v24 }
  0xd0   : > { %5564 = vst [vmem:[#allocation5_spill] sm:$0xff] %v4296_v27  ;;  %v440_v31 = vsel %vm439_vm8, %v4296_v27, 0.0  ;;  %444 = vadd.xlane.f32.xlu1 %v443_v30  ;;  %v586_v54 = vsel %vm420_vm3, %v560_v46, %v585_v41  ;;  %v600_v30 = vld [vmem:[%s5516_s1 + $0x8] sm:$0xff] }
  0xd1   : > { %441 = vadd.xlane.f32.xlu0 %v440_v31  ;;  %v487_v32 = vpop.xlane.xlu1 %486  ;;  %v579_v55 = vsel %vm420_vm3, %v528_v47, %v578_v51  ;;  %v599_v31 = vld [vmem:[%s5516_s1] sm:$0xff] }
  0xd2   : > { %v463_v33 = vpop.xlane.xlu0 %462  ;;  %v564_v61 = vrot.slane %v487_v32, %v4258_v7 }
  0xd3   : > { %v532_v62 = vrot.slane %v463_v33, %v4258_v7 }
  0xd4   : > { %v587_v56 = vsel %vm422_vm4, %v564_v61, %v586_v54 }
  0xd5   : > { %v490_v36 = vpop.xlane.xlu1 %489  ;;  %v580_v57 = vsel %vm422_vm4, %v532_v62, %v579_v55 }
  0xd6   : > { %v466_v37 = vpop.xlane.xlu0 %465  ;;  %v568_v50 = vrot.slane %v490_v36, %v4258_v7 }
  0xd7   : > { %v536_v40 = vrot.slane %v466_v37, %v4258_v7 }
  0xd8   : > { %v588_v10 = vsel %vm424_vm5, %v568_v50, %v587_v56 }
  0xd9   : > { %v493_v48 = vpop.xlane.xlu1 %492  ;;  %v581_v11 = vsel %vm424_vm5, %v536_v40, %v580_v57  ;;  %v601_v57 = vld [vmem:[%s5517_s2] sm:$0xff] }
  0xda   : > { %v469_v49 = vpop.xlane.xlu0 %468  ;;  %v572_v52 = vrot.slane %v493_v48, %v4258_v7 }
  0xdb   : > { %v540_v53 = vrot.slane %v469_v49, %v4258_v7 }
  0xdc   : > { %v589_v14 = vsel %vm426_vm6, %v572_v52, %v588_v10 }
  0xdd   : > { %v496_v58 = vpop.xlane.xlu1 %495  ;;  %v582_v15 = vsel %vm426_vm6, %v540_v53, %v581_v11 }
  0xde   : > { %v472_v59 = vpop.xlane.xlu0 %471  ;;  %v576_v60 = vrot.slane %v496_v58, %v4258_v7  ;;  %v602_v58 = vld [vmem:[%s5517_s2 + $0x8] sm:$0xff] }
  0xdf   : > { %v544_v63 = vrot.slane %v472_v59, %v4258_v7 }
  0xe0   : > { %v590_v18 = vsel %vm428_vm7, %v576_v60, %v589_v14 }
  0xe1   : > { %v583_v19 = vsel %vm428_vm7, %v544_v63, %v582_v15  ;;  %v596_v22 = vsel %vm439_vm8, %v590_v18, -inf }
  0xe2   : > { %v593_v23 = vsel %vm439_vm8, %v583_v19, -inf  ;;  %597 = vmax.xlane.f32.xlu1 %v596_v22 }
  0xe3   : > { %594 = vmax.xlane.f32.xlu0 %v593_v23 }
 0x15d   : > { %v445_v7 = vpop.xlane.xlu1 %444 }
 0x15e   : > { %v442_v25 = vpop.xlane.xlu0 %441  ;;  %v448_v32 = vmul.f32 0.25, %v445_v7 }
 0x15f   : > { %v447_v33 = vmul.f32 0.25, %v442_v25  ;;  %v3982_v25 = vmov 1966171168  }
 0x160   : > { %v604_v36 = vmul.f32 %v600_v30, %v448_v32 }
 0x161   : > { %v603_v37 = vmul.f32 %v599_v31, %v447_v33 }
 0x162   : > { %v607_v38 = vsel %vm605_vm9, %v604_v36, 0.0 }
 0x163   : > { %v606_v39 = vsel %vm605_vm9, %v603_v37, 0.0  ;;  %v4358_v37 = vsub.s32 0, %v4251_v3 }
 0x164   : > { %v608_v42 = vadd.f32 %v607_v38, %v606_v39 }
 0x166   : > { %v609_v43 = vrot.slane %v608_v42, 4 }
 0x168   : > { %v610_v44 = vadd.f32 %v609_v43, %v608_v42 }
 0x16a   : > { %v611_v46 = vrot.slane %v610_v44, 2 }
 0x16c   : > { %v612_v4 = vadd.f32 %v611_v46, %v610_v44 }
 0x16e   : > { %v613_v40 = vrot.slane %v612_v4, 1 }
 0x16f   : > { %v598_v45 = vpop.xlane.xlu1 %597 }
 0x170   : > { %v595_v47 = vpop.xlane.xlu0 %594  ;;  %v621_v61 = vmul.f32 %v600_v30, %v598_v45  ;;  %v614_v52 = vadd.f32 %v613_v40, %v612_v4  ;;  %v654_v30 = vunpack.c.l.s4 %v3982_v25  ;;  %v1204_v25 = vld [vmem:[%s5519_s4 + $0x98] sm:$0xff] }
 0x171   : > { %v620_v62 = vmul.f32 %v599_v31, %v595_v47 }
 0x172   : > { %v623_v48 = vsel %vm605_vm9, %v621_v61, 0.0  ;;  %v615_v55 = vmax.f32 %v614_v52, 0.0  ;;  %v655_v31 = vunpack.c.0.s8 %v654_v30 }
 0x173   : > { %v622_v49 = vsel %vm605_vm9, %v620_v62, 0.0 }
 0x174   : > { %v624_v6 = vadd.f32 %v623_v48, %v622_v49  ;;  %v616_v60 = vmul.f32 %v615_v55, %v601_v57  ;;  %v617_v63 = vmul.f32 %v615_v55, %v602_v58  ;;  %v658_v32 = vsub.s32 %v655_v31, %v4251_v3 }
 0x176   : > { %v625_v50 = vrot.slane %v624_v6, 4 }
 0x178   : > { %v626_v41 = vadd.f32 %v625_v50, %v624_v6 }
 0x17a   : > { %v627_v51 = vrot.slane %v626_v41, 2 }
 0x17c   : > { %v628_v53 = vadd.f32 %v627_v51, %v626_v41 }
 0x17e   : > { %v629_v54 = vrot.slane %v628_v53, 1 }
 0x180   : > { %v630_v56 = vadd.f32 %v629_v54, %v628_v53 }
 0x182   : > { %v631_v59 = vmax.f32 %v630_v56, 0.0 }
 0x184   : > { %v632_v10 = vmul.f32 %v631_v59, %v601_v57  ;;  %v633_v11 = vmul.f32 %v631_v59, %v602_v58 }
 0x186   : > { %v636_v14 = vadd.f32 %v632_v10, %v616_v60  ;;  %v637_v15 = vadd.f32 %v633_v11, %v617_v63 }
 0x188   : > { %v3280_v18 = vmul.f32 -1.442695, %v636_v14  ;;  %v3281_v19 = vmul.f32 -1.442695, %v637_v15 }
 0x18a   : > { %3957 = vpow2.f32 %v3280_v18  ;;  %v1180_v18 = vld [vmem:[%s5519_s4 + $0x88] sm:$0xff] }
 0x18b   : > { %3959 = vpow2.f32 %v3281_v19 }
 0x194   : > { %v3958_v22 = vpop.eup %3957 }
 0x195   : > { %v3960_v23 = vpop.eup %3959  ;;  %v644_v24 = vadd.f32 1.0, %v3958_v22 }
 0x196   : > { %v645_v7 = vadd.f32 1.0, %v3960_v23  ;;  %v988_v23 = vld [vmem:[%s5519_s4 + $0x8] sm:$0xff] }
 0x197   : > { %3961 = vrcp.f32 %v644_v24 }
 0x198   : > { %3963 = vrcp.f32 %v645_v7 }
 0x1a1   : > { %v4353_v33 = vpop.eup %3961 }
 0x1a2   : > { %v4355_v36 = vpop.eup %3963  ;;  %v659_v38 = vrot.slane %v4353_v33, %v658_v32  ;;  %v652_v3 = vcombine.high %v4353_v33, %v4353_v33 }
 0x1a3   : > { %5565 = vst [vmem:[#allocation6_spill] sm:$0xff] %v4355_v36  ;;  %v708_v39 = vrot.slane %v4355_v36, %v658_v32  ;;  %v701_v42 = vcombine.high %v4355_v36, %v4355_v36 }
 0x1a4   : > { %v675_v43 = vrot.slane %v659_v38, %v658_v32  ;;  %v667_v44 = vcombine.high %v659_v38, %v659_v38  ;;  %v666_v51 = vrot.slane %v652_v3, %v658_v32  ;;  %v1012_v38 = vld [vmem:[%s5519_s4 + $0x18] sm:$0xff]  ;;  %v1240_v3 = vld [vmem:[%s5519_s4 + $0xb0] sm:$0xff] }
 0x1a5   : > { %v724_v45 = vrot.slane %v708_v39, %v658_v32  ;;  %v716_v46 = vcombine.high %v708_v39, %v708_v39  ;;  %v715_v61 = vrot.slane %v701_v42, %v658_v32 }
 0x1a6   : > { %v753_v47 = vrot.slane %v675_v43, %v4358_v37  ;;  %v689_v49 = vrot.slane %v667_v44, %v658_v32  ;;  %v697_v41 = vcombine.high %v675_v43, %v675_v43  ;;  %v682_v55 = vrot.slane %v666_v51, %v658_v32  ;;  %v1228_v43 = vld [vmem:[%s5519_s4 + $0xa8] sm:$0xff] }
 0x1a7   : > { %v785_v62 = vrot.slane %v724_v45, %v4358_v37  ;;  %v738_v48 = vrot.slane %v716_v46, %v658_v32  ;;  %v717_v50 = vcombine.high %v715_v61, %v715_v61  ;;  %v668_v60 = vcombine.high %v666_v51, %v666_v51  ;;  %v1252_v46 = vld [vmem:[%s5519_s4 + $0xb8] sm:$0xff] }
 0x1a8   : > { %815 = vperm.xlu0 %3953, %v753_v47   ;;  %v757_v40 = vrot.slane %v689_v49, %v4358_v37  ;;  %v761_v54 = vrot.slane %v697_v41, %v4358_v37  ;;  %v769_v58 = vrot.slane %v682_v55, %v4358_v37  ;;  %v699_v59 = vcombine.high %v689_v49, %v689_v49  ;;  %v1060_v47 = vld [vmem:[%s5519_s4 + $0x38] sm:$0xff]  ;;  %v1024_v49 = vld [vmem:[%s5519_s4 + $0x20] sm:$0xff] }
 0x1a9   : > { %847 = vperm.xlu1 %3954, %v785_v62   ;;  %v789_v4 = vrot.slane %v738_v48, %v4358_v37  ;;  %v748_v6 = vcombine.high %v738_v48, %v738_v48  ;;  %v745_v53 = vrot.slane %v717_v50, %v658_v32  ;;  %v696_v11 = vrot.slane %v668_v60, %v658_v32  ;;  %v1000_v62 = vld [vmem:[%s5519_s4 + $0x10] sm:$0xff]  ;;  %v1216_v48 = vld [vmem:[%s5519_s4 + $0xa0] sm:$0xff] }
 0x1aa   : > { %v765_v10 = vrot.slane %v699_v59, %v4358_v37  ;;  %v698_v15 = vcombine.high %v682_v55, %v682_v55  ;;  %v746_v7 = vcombine.high %v724_v45, %v724_v45  ;;  %v731_v31 = vrot.slane %v715_v61, %v658_v32  ;;  %v1168_v32 = vld [vmem:[%s5519_s4 + $0x80] sm:$0xff]  ;;  %v1036_v45 = vld [vmem:[%s5519_s4 + $0x28] sm:$0xff]  ;;  %v1192_v61 = vld [vmem:[%s5519_s4 + $0x90] sm:$0xff] }
 0x1ab   : > { %v797_v52 = vrot.slane %v748_v6, %v4358_v37  ;;  %v805_v56 = vrot.slane %v745_v53, %v4358_v37  ;;  %v749_v57 = vcombine.high %v745_v53, %v745_v53  ;;  %v773_v14 = vrot.slane %v696_v11, %v4358_v37 }
 0x1ac   : > { %851 = vperm.xlu0 %3953, %v789_v4   ;;  %v777_v19 = vrot.slane %v698_v15, %v4358_v37  ;;  %v700_v22 = vcombine.high %v696_v11, %v696_v11  ;;  %v793_v30 = vrot.slane %v746_v7, %v4358_v37  ;;  %v801_v39 = vrot.slane %v731_v31, %v4358_v37 }
 0x1ad   : > { %819 = vperm.xlu1 %3954, %v757_v40   ;;  %v813_v63 = vrot.slane %v749_v57, %v4358_v37  ;;  %v747_v42 = vcombine.high %v731_v31, %v731_v31 }
 0x1ae   : > { %v781_v24 = vrot.slane %v700_v22, %v4358_v37 }
 0x1af   : > { %v809_v44 = vrot.slane %v747_v42, %v4358_v37  ;;  %v976_v37 = vld [vmem:[%s5519_s4] sm:$0xff] }
 0x1b0   : > { %859 = vperm.xlu0 %3953, %v797_v52  }
 0x1b1   : > { %823 = vperm.xlu1 %3954, %v761_v54  }
 0x1b4   : > { %867 = vperm.xlu0 %3953, %v805_v56  }
 0x1b5   : > { %831 = vperm.xlu1 %3954, %v769_v58  }
 0x1b8   : > { %875 = vperm.xlu0 %3953, %v813_v63  }
 0x1b9   : > { %827 = vperm.xlu1 %3954, %v765_v10  }
 0x1bc   : > { %1182 = vrot.lane.b32.xlu0 %v1180_v18, %s3983_s13  ;;  %s3997_s13 = smov 62  }
 0x1bd   : > { %835 = vperm.xlu1 %3954, %v773_v14  }
 0x1c0   : > { %990 = vrot.lane.b32.xlu0 %v988_v23, %s3984_s16  ;;  %s4005_s16 = smov 3  }
 0x1c1   : > { %839 = vperm.xlu1 %3954, %v777_v19  }
 0x1c4   : > { %1206 = vrot.lane.b32.xlu0 %v1204_v25, %s3985_s19  ;;  %s3999_s19 = smov 43  }
 0x1c5   : > { %843 = vperm.xlu1 %3954, %v781_v24  }
 0x1c8   : > { %1014 = vrot.lane.b32.xlu0 %v1012_v38, %s3986_s25  ;;  %s3993_s25 = smov 57  }
 0x1c9   : > { %855 = vperm.xlu1 %3954, %v793_v30  }
 0x1cc   : > { %1230 = vrot.lane.b32.xlu0 %v1228_v43, %s3987_s28  ;;  %s3994_s28 = smov 39  }
 0x1cd   : > { %863 = vperm.xlu1 %3954, %v801_v39  }
 0x1d0   : > { %1038 = vrot.lane.b32.xlu0 %v1036_v45, %s3988_s9  ;;  %s4022_s9 = smov 88  }
 0x1d1   : > { %871 = vperm.xlu1 %3954, %v809_v44  }
 0x1d4   : > { %1254 = vrot.lane.b32.xlu0 %v1252_v46, %s3990_s15  ;;  %s4028_s15 = smov 65  }
 0x1d5   : > { %1170 = vrot.lane.b32.xlu1 %v1168_v32, %s3989_s12  ;;  %s4025_s12 = smov 87  }
 0x1d8   : > { %1062 = vrot.lane.b32.xlu0 %v1060_v47, %s3992_s24  ;;  %s4034_s24 = smov 126  }
 0x1d9   : > { %978 = vrot.lane.b32.xlu1 %v976_v37, %s3991_s18  ;;  %s4031_s18 = smov 127  }
 0x1dd   : > { %1194 = vrot.lane.b32.xlu1 %v1192_v61, %s3993_s25  ;;  %s4000_s25 = smov 46  }
 0x1e1   : > { %1002 = vrot.lane.b32.xlu1 %v1000_v62, %s3994_s28  ;;  %s4001_s28 = smov 1  }
 0x1e5   : > { %1218 = vrot.lane.b32.xlu1 %v1216_v48, %s3995_s7  ;;  %s4002_s7 = smov 2  }
 0x1e9   : > { %1026 = vrot.lane.b32.xlu1 %v1024_v49, %s3996_s10  ;;  %s4003_s10 = smov 47  }
 0x1ed   : > { %1242 = vrot.lane.b32.xlu1 %v1240_v3, %s3997_s13  ;;  %s4004_s13 = smov 48  }
 0x227   : > { %v816_v50 = vpop.permute.xlu0 %815 }
 0x228   : > { %v848_v4 = vpop.permute.xlu1 %847  ;;  %v4431_v51 = vmul.f32 %v816_v50, %v4139_v1 }
 0x229   : > { %v4463_v23 = vmul.f32 %v848_v4, %v4136_v0 }
 0x22a   : > { %5567 = vst [vmem:[#allocation8_spill] sm:$0xff] %v4431_v51  ;;  %v894_v55 = vsel %vm268_vm0, %v4431_v51, 0.0  ;;  %v927_v45 = vsel %vm268_vm0, %v4431_v51, -inf }
 0x22b   : > { %v852_v1 = vpop.permute.xlu0 %851  ;;  %5573 = vst [vmem:[#allocation14_spill] sm:$0xff] %v4463_v23  ;;  %v909_v38 = vsel %vm268_vm0, %v4463_v23, 0.0  ;;  %v939_v32 = vsel %vm268_vm0, %v4463_v23, -inf }
 0x22c   : > { %v820_v6 = vpop.permute.xlu1 %819  ;;  %v4469_v31 = vmul.f32 %v852_v1, %v4142_v2 }
 0x22d   : > { %v4428_v41 = vmul.f32 %v820_v6, %v4149_v5 }
 0x22e   : > { %5575 = vst [vmem:[#allocation16_spill] sm:$0xff] %v4469_v31 }
 0x22f   : > { %5566 = vst [vmem:[#allocation7_spill] sm:$0xff] %v4428_v41  ;;  %v895_v54 = vsel %vm268_vm0, %v4428_v41, 0.0  ;;  %v860_v15 = vpop.permute.xlu0 %859  ;;  %v928_v37 = vsel %vm268_vm0, %v4428_v41, -inf }
 0x230   : > { %v824_v40 = vpop.permute.xlu1 %823  ;;  %v896_v57 = vadd.f32 %v895_v54, %v894_v55  ;;  %v4478_v43 = vmul.f32 %v860_v15, %v4166_v12  ;;  %v911_v12 = vsel %vm268_vm0, %v4469_v31, 0.0 }
 0x231   : > { %v4434_v52 = vmul.f32 %v824_v40, %v4159_v9 }
 0x232   : > { %5576 = vst [vmem:[#allocation17_spill] sm:$0xff] %v4478_v43  ;;  %v915_v6 = vsel %vm268_vm0, %v4478_v43, 0.0  ;;  %v945_v54 = vsel %vm268_vm0, %v4478_v43, -inf }
 0x233   : > { %5568 = vst [vmem:[#allocation9_spill] sm:$0xff] %v4434_v52  ;;  %v897_v56 = vsel %vm268_vm0, %v4434_v52, 0.0  ;;  %v868_v25 = vpop.permute.xlu0 %867  ;;  %v929_v55 = vsel %vm268_vm0, %v4434_v52, -inf }
 0x234   : > { %v832_v53 = vpop.permute.xlu1 %831  ;;  %v898_v59 = vadd.f32 %v897_v56, %v896_v57  ;;  %v4513_v56 = vmul.f32 %v868_v25, %v4186_v20 }
 0x235   : > { %v4446_v9 = vmul.f32 %v832_v53, %v4179_v17 }
 0x236   : > { %5579 = vst [vmem:[#allocation20_spill] sm:$0xff] %v4513_v56 }
 0x237   : > { %5570 = vst [vmem:[#allocation11_spill] sm:$0xff] %v4446_v9  ;;  %v901_v14 = vsel %vm268_vm0, %v4446_v9, 0.0  ;;  %v931_v0 = vsel %vm268_vm0, %v4446_v9, -inf  ;;  %v876_v62 = vpop.permute.xlu0 %875 }
 0x238   : > { %v828_v58 = vpop.permute.xlu1 %827  ;;  %v932_v47 = vmax.f32 %v927_v45, %v931_v0 }
 0x239   : > { %v4443_v5 = vmul.f32 %v828_v58, %v4169_v13  ;;  %v4516_v58 = vmul.f32 %v876_v62, %v4218_v34  ;;  %v1096_v62 = vld [vmem:[%s5519_s4 + $0x50] sm:$0xff] }
 0x23b   : > { %5569 = vst [vmem:[#allocation10_spill] sm:$0xff] %v4443_v5  ;;  %v899_v60 = vsel %vm268_vm0, %v4443_v5, 0.0  ;;  %v930_v61 = vsel %vm268_vm0, %v4443_v5, -inf  ;;  %5580 = vst [vmem:[#allocation21_spill] sm:$0xff] %v4516_v58 }
 0x23c   : > { %v900_v63 = vadd.f32 %v899_v60, %v898_v59  ;;  %v836_v10 = vpop.permute.xlu1 %835  ;;  %v940_v59 = vmax.f32 %v932_v47, %v939_v32  ;;  %v1268_v47 = vld [vmem:[%s5519_s4 + $0xc8] sm:$0xff] }
 0x23d   : > { %v4451_v11 = vmul.f32 %v836_v10, %v4189_v21 }
 0x23e   : > { %v902_v18 = vadd.f32 %v901_v14, %v900_v63 }
 0x23f   : > { %5571 = vst [vmem:[#allocation12_spill] sm:$0xff] %v4451_v11  ;;  %v903_v19 = vsel %vm268_vm0, %v4451_v11, 0.0 }
 0x240   : > { %v840_v13 = vpop.permute.xlu1 %839  ;;  %v904_v21 = vadd.f32 %v903_v19, %v902_v18 }
 0x241   : > { %v4458_v17 = vmul.f32 %v840_v13, %v4207_v29 }
 0x243   : > { %5572 = vst [vmem:[#allocation13_spill] sm:$0xff] %v4458_v17  ;;  %v905_v22 = vsel %vm268_vm0, %v4458_v17, 0.0  ;;  %v935_v50 = vsel %vm268_vm0, %v4458_v17, -inf }
 0x244   : > { %v844_v24 = vpop.permute.xlu1 %843  ;;  %v906_v30 = vadd.f32 %v905_v22, %v904_v21  ;;  %v936_v63 = vmax.f32 %v929_v55, %v935_v50  ;;  %v919_v22 = vsel %vm268_vm0, %v4513_v56, 0.0  ;;  %v949_v21 = vsel %vm268_vm0, %v4513_v56, -inf  ;;  %v1328_v50 = vld [vmem:[%s5519_s4 + $0xf0] sm:$0xff]  ;;  %v1340_v55 = vld [vmem:[%s5519_s4 + $0xf8] sm:$0xff] }
 0x245   : > { %v4466_v7 = vmul.f32 %v844_v24, %v4221_v35  ;;  %v933_v35 = vsel %vm268_vm0, %v4451_v11, -inf  ;;  %v953_v24 = vsel %vm268_vm0, %v4516_v58, -inf }
 0x246   : > { %v934_v48 = vmax.f32 %v928_v37, %v933_v35  ;;  %v1072_v37 = vld [vmem:[%s5519_s4 + $0x40] sm:$0xff] }
 0x247   : > { %5574 = vst [vmem:[#allocation15_spill] sm:$0xff] %v4466_v7  ;;  %v907_v29 = vsel %vm268_vm0, %v4466_v7, 0.0  ;;  %v937_v2 = vsel %vm268_vm0, %v4466_v7, -inf }
 0x248   : > { %v908_v39 = vadd.f32 %v907_v29, %v906_v30  ;;  %v856_v42 = vpop.permute.xlu1 %855  ;;  %v938_v49 = vmax.f32 %v930_v61, %v937_v2  ;;  %v923_v2 = vsel %vm268_vm0, %v4516_v58, 0.0  ;;  %v1280_v61 = vld [vmem:[%s5519_s4 + $0xd0] sm:$0xff] }
 0x249   : > { %v4485_v44 = vmul.f32 %v856_v42, %v4156_v8  ;;  %v941_v8 = vsel %vm268_vm0, %v4469_v31, -inf }
 0x24a   : > { %v910_v46 = vadd.f32 %v909_v38, %v908_v39  ;;  %v942_v60 = vmax.f32 %v934_v48, %v941_v8  ;;  %v946_v10 = vmax.f32 %v938_v49, %v945_v54  ;;  %v1084_v8 = vld [vmem:[%s5519_s4 + $0x48] sm:$0xff]  ;;  %v1292_v48 = vld [vmem:[%s5519_s4 + $0xd8] sm:$0xff]  ;;  %v1304_v49 = vld [vmem:[%s5519_s4 + $0xe0] sm:$0xff] }
 0x24b   : > { %5577 = vst [vmem:[#allocation18_spill] sm:$0xff] %v4485_v44  ;;  %v913_v40 = vsel %vm268_vm0, %v4485_v44, 0.0  ;;  %v943_v1 = vsel %vm268_vm0, %v4485_v44, -inf  ;;  %v1144_v54 = vld [vmem:[%s5519_s4 + $0x70] sm:$0xff] }
 0x24c   : > { %v912_v3 = vadd.f32 %v911_v12, %v910_v46  ;;  %v864_v4 = vpop.permute.xlu1 %863  ;;  %v944_v34 = vmax.f32 %v936_v63, %v943_v1  ;;  %v950_v29 = vmax.f32 %v942_v60, %v949_v21  ;;  %v954_v38 = vmax.f32 %v946_v10, %v953_v24  ;;  %v1048_v12 = vld [vmem:[%s5519_s4 + $0x30] sm:$0xff]  ;;  %v1183_v1 = vpop.permute.xlu0 %1182 }
 0x24d   : > { %v4506_v53 = vmul.f32 %v864_v4, %v4176_v16  ;;  %v1120_v4 = vld [vmem:[%s5519_s4 + $0x60] sm:$0xff] }
 0x24e   : > { %v914_v57 = vadd.f32 %v913_v40, %v912_v3  ;;  %v1108_v3 = vld [vmem:[%s5519_s4 + $0x58] sm:$0xff]  ;;  %v1132_v40 = vld [vmem:[%s5519_s4 + $0x68] sm:$0xff] }
 0x24f   : > { %5578 = vst [vmem:[#allocation19_spill] sm:$0xff] %v4506_v53  ;;  %v947_v16 = vsel %vm268_vm0, %v4506_v53, -inf  ;;  %v917_v20 = vsel %vm268_vm0, %v4506_v53, 0.0 }
 0x250   : > { %v916_v14 = vadd.f32 %v915_v6, %v914_v57  ;;  %v872_v15 = vpop.permute.xlu1 %871  ;;  %v948_v19 = vmax.f32 %v940_v59, %v947_v16  ;;  %v1316_v6 = vld [vmem:[%s5519_s4 + $0xe8] sm:$0xff]  ;;  %v1156_v57 = vld [vmem:[%s5519_s4 + $0x78] sm:$0xff]  ;;  %v991_v16 = vpop.permute.xlu0 %990 }
 0x251   : > { %v4525_v18 = vmul.f32 %v872_v15, %v4204_v28 }
 0x252   : > { %v918_v13 = vadd.f32 %v917_v20, %v916_v14  ;;  %v955_v39 = vmax.f32 %v948_v19, %v950_v29 }
 0x253   : > { %5581 = vst [vmem:[#allocation22_spill] sm:$0xff] %v4525_v18  ;;  %v951_v25 = vsel %vm268_vm0, %v4525_v18, -inf  ;;  %v921_v0 = vsel %vm268_vm0, %v4525_v18, 0.0 }
 0x254   : > { %v952_v30 = vmax.f32 %v944_v34, %v951_v25  ;;  %v920_v28 = vadd.f32 %v919_v22, %v918_v13  ;;  %v1171_v59 = vpop.permute.xlu1 %1170  ;;  %v1207_v63 = vpop.permute.xlu0 %1206 }
 0x256   : > { %v956_v42 = vmax.f32 %v952_v30, %v954_v38  ;;  %v922_v35 = vadd.f32 %v921_v0, %v920_v28 }
 0x258   : > { %v4539_v32 = vmax.f32 %v955_v39, %v956_v42  ;;  %v924_v45 = vadd.f32 %v923_v2, %v922_v35  ;;  %v979_v60 = vpop.permute.xlu1 %978  ;;  %v1015_v14 = vpop.permute.xlu0 %1014  ;;  %v1264_v42 = vld [vmem:[%s5519_s4 + $0xc0] sm:$0xff] }
 0x25a   : > { %965 = vrot.lane.b32.xlu1 %v4539_v32, %s3998_s14  ;;  %v4542_v46 = vmul.f32 0.0625, %v924_v45 }
 0x25c   : > { %959 = vrot.lane.b32.xlu0 %v4542_v46, %s3998_s14  ;;  %v1195_v10 = vpop.permute.xlu1 %1194  ;;  %v1231_v20 = vpop.permute.xlu0 %1230  ;;  %s4027_s14 = smov 66  }
 0x25e   : > { %1050 = vrot.lane.b32.xlu1 %v1048_v12, %s3999_s19  ;;  %s4006_s19 = smov 5  }
 0x260   : > { %1074 = vrot.lane.b32.xlu0 %v1072_v37, %s4000_s25  ;;  %s4007_s25 = smov 49   ;;  %v1003_v15 = vpop.permute.xlu1 %1002  ;;  %v1039_v13 = vpop.permute.xlu0 %1038 }
 0x262   : > { %1270 = vrot.lane.b32.xlu1 %v1268_v47, %s4001_s28  ;;  %s4008_s28 = smov 50  }
 0x264   : > { %1282 = vrot.lane.b32.xlu0 %v1280_v61, %s4002_s7  ;;  %s4009_s7 = smov 6   ;;  %v1219_v34 = vpop.permute.xlu1 %1218  ;;  %v1255_v22 = vpop.permute.xlu0 %1254 }
 0x266   : > { %1086 = vrot.lane.b32.xlu1 %v1084_v8, %s4003_s10  ;;  %s4010_s10 = smov 7  }
 0x268   : > { %1098 = vrot.lane.b32.xlu0 %v1096_v62, %s4004_s13  ;;  %s4011_s13 = smov 51   ;;  %v1027_v19 = vpop.permute.xlu1 %1026  ;;  %v1063_v24 = vpop.permute.xlu0 %1062 }
 0x26a   : > { %1294 = vrot.lane.b32.xlu1 %v1292_v48, %s4005_s16  ;;  %s4012_s16 = smov 53  }
 0x26c   : > { %1306 = vrot.lane.b32.xlu0 %v1304_v49, %s4006_s19  ;;  %v1243_v21 = vpop.permute.xlu1 %1242  ;;  %s4032_s19 = smov 82  }
 0x26e   : > { %1110 = vrot.lane.b32.xlu1 %v1108_v3, %s4007_s25  ;;  %s4035_s25 = smov 125  }
 0x270   : > { %1122 = vrot.lane.b32.xlu0 %v1120_v4, %s4008_s28  ;;  %s4017_s28 = smov 91  }
 0x272   : > { %1318 = vrot.lane.b32.xlu1 %v1316_v6, %s4009_s7  ;;  %s4020_s7 = smov 70  }
 0x274   : > { %1330 = vrot.lane.b32.xlu0 %v1328_v50, %s4010_s10  ;;  %s4023_s10 = smov 69  }
 0x276   : > { %1134 = vrot.lane.b32.xlu1 %v1132_v40, %s4011_s13  ;;  %s4026_s13 = smov 86  }
 0x278   : > { %1146 = vrot.lane.b32.xlu0 %v1144_v54, %s4012_s16  ;;  %s4029_s16 = smov 85  }
 0x27a   : > { %1342 = vrot.lane.b32.xlu1 %v1340_v55, %s4013_s17  ;;  %s4030_s17 = smov 83  }
 0x27e   : > { %1158 = vrot.lane.b32.xlu1 %v1156_v57, %s4014_s20  ;;  %s4033_s20 = smov 81  }
 0x2cc   : > { %v966_v25 = vpop.permute.xlu1 %965 }
 0x2cd   : > { %v968_v30 = vsel %vm962_vm10, %v4539_v32, %v966_v25 }
 0x2ce   : > { %v970_v29 = vrot.slane %v968_v30, 4  ;;  %v960_v38 = vpop.permute.xlu0 %959 }
 0x2cf   : > { %v963_v28 = vsel %vm962_vm10, %v4542_v46, %v960_v38 }
 0x2d0   : > { %v4597_v0 = vsel %vm972_vm11, %v963_v28, %v970_v29  ;;  %v1051_v37 = vpop.permute.xlu1 %1050 }
 0x2d1   : > { %v1173_v39 = vmul.f32 %v1171_v59, %v4597_v0  ;;  %v1185_v35 = vmul.f32 %v1183_v1, %v4597_v0  ;;  %v1265_v2 = vmul.f32 %v1264_v42, %v4597_v0  ;;  %v981_v32 = vmul.f32 %v979_v60, %v4597_v0 }
 0x2d2   : > { %v993_v45 = vmul.f32 %v991_v16, %v4597_v0  ;;  %v1197_v46 = vmul.f32 %v1195_v10, %v4597_v0  ;;  %v1209_v12 = vmul.f32 %v1207_v63, %v4597_v0  ;;  %v1005_v47 = vmul.f32 %v1003_v15, %v4597_v0  ;;  %v1075_v49 = vpop.permute.xlu0 %1074 }
 0x2d3   : > { %1175 = vrot.lane.b32.xlu0 %v1173_v39, %s4015_s26  ;;  %1187 = vrot.lane.b32.xlu1 %v1185_v35, %s4016_s27  ;;  %1266 = vst.msk [vmem:[#allocation3 + $0xc0] sm:$0xff] %vm962_vm10, %v1265_v2  ;;  %v1017_v61 = vmul.f32 %v1015_v14, %v4597_v0  ;;  %v1221_v62 = vmul.f32 %v1219_v34, %v4597_v0  ;;  %s4036_s26 = smov 80   ;;  %s4037_s27 = smov 79   ;;  %v4635_v35 = vld [vmem:[%s5518_s3] sm:$0xff] }
 0x2d4   : > { %v1271_v8 = vpop.permute.xlu1 %1270  ;;  %v1233_v48 = vmul.f32 %v1231_v20, %v4597_v0  ;;  %v1029_v3 = vmul.f32 %v1027_v19, %v4597_v0  ;;  %v1041_v4 = vmul.f32 %v1039_v13, %v4597_v0  ;;  %v1245_v50 = vmul.f32 %v1243_v21, %v4597_v0 }
 0x2d5   : > { %v1257_v54 = vmul.f32 %v1255_v22, %v4597_v0  ;;  %v1053_v57 = vmul.f32 %v1051_v37, %v4597_v0  ;;  %v1065_v1 = vmul.f32 %v1063_v24, %v4597_v0  ;;  %v1273_v16 = vmul.f32 %v1271_v8, %v4597_v0 }
 0x2d6   : > { %v1283_v40 = vpop.permute.xlu0 %1282  ;;  %v1077_v60 = vmul.f32 %v1075_v49, %v4597_v0  ;;  %v1608_v2 = vcombine.high %v4635_v35, %v4635_v35  ;;  %v1376_v49 = vld [vmem:[%s5519_s4 + $0x110] sm:$0xff] }
 0x2d7   : > { %983 = vrot.lane.b32.xlu0 %v981_v32, %s4017_s28  ;;  %995 = vrot.lane.b32.xlu1 %v993_v45, %s4018_s29  ;;  %v1285_v15 = vmul.f32 %v1283_v40, %v4597_v0  ;;  %s4038_s28 = smov 123   ;;  %s4039_s29 = smov 122   ;;  %v1424_v40 = vld [vmem:[%s5519_s4 + $0x130] sm:$0xff] }
 0x2d8   : > { %v1087_v6 = vpop.permute.xlu1 %1086 }
 0x2d9   : > { %v1089_v10 = vmul.f32 %v1087_v6, %v4597_v0  ;;  %v1400_v6 = vld [vmem:[%s5519_s4 + $0x120] sm:$0xff] }
 0x2da   : > { %v1099_v59 = vpop.permute.xlu0 %1098 }
 0x2db   : > { %1199 = vrot.lane.b32.xlu0 %v1197_v46, %s4019_s30  ;;  %1211 = vrot.lane.b32.xlu1 %v1209_v12, %s4020_s7  ;;  %v1101_v13 = vmul.f32 %v1099_v59, %v4597_v0  ;;  %s4040_s30 = smov 78   ;;  %s4041_s7 = smov 77   ;;  %v4641_v12 = vand.u32 4294901760, %v1608_v2  ;;  %v1484_v59 = vld [vmem:[%s5519_s4 + $0x158] sm:$0xff] }
 0x2dc   : > { %v1295_v55 = vpop.permute.xlu1 %1294 }
 0x2dd   : > { %v1297_v34 = vmul.f32 %v1295_v55, %v4597_v0  ;;  %5582 = vst [vmem:[#allocation23_spill] sm:$0xff] %v4641_v12  ;;  %v4644_v37 = vsub.f32 %v1608_v2, %v4641_v12  ;;  %1951 = vmatprep.mubr.f32.mxu1 %v4641_v12  ;;  %v1448_v55 = vld [vmem:[%s5519_s4 + $0x140] sm:$0xff] }
 0x2de   : > { %v1307_v14 = vpop.permute.xlu0 %1306 }
 0x2df   : > { %1007 = vrot.lane.b32.xlu0 %v1005_v47, %s4021_s8  ;;  %1019 = vrot.lane.b32.xlu1 %v1017_v61, %s4022_s9  ;;  %v1309_v21 = vmul.f32 %v1307_v14, %v4597_v0  ;;  %v1352_v61 = vld [vmem:[%s5519_s4 + $0x100] sm:$0xff]  ;;  %v5522_v8 = vand.u32 4294901760, %v4644_v37  ;;  %s4057_s9 = smov 22   ;;  %s4069_s8 = smov 112  }
 0x2e0   : > { %v1111_v63 = vpop.permute.xlu1 %1110  ;;  %v1544_v14 = vld [vmem:[%s5519_s4 + $0x180] sm:$0xff] }
 0x2e1   : > { %v1113_v22 = vmul.f32 %v1111_v63, %v4597_v0  ;;  %v1520_v63 = vld [vmem:[%s5519_s4 + $0x170] sm:$0xff] }
 0x2e2   : > { %v1123_v19 = vpop.permute.xlu0 %1122 }
 0x2e3   : > { %1223 = vrot.lane.b32.xlu0 %v1221_v62, %s4023_s10  ;;  %1235 = vrot.lane.b32.xlu1 %v1233_v48, %s4024_s11  ;;  %v1125_v29 = vmul.f32 %v1123_v19, %v4597_v0  ;;  %s4042_s10 = smov 121   ;;  %s4043_s11 = smov 120   ;;  %v1364_v62 = vld [vmem:[%s5519_s4 + $0x108] sm:$0xff]  ;;  %v1713_v48 = vsub.f32 %v4644_v37, %v5522_v8 }
 0x2e4   : > { %v1319_v20 = vpop.permute.xlu1 %1318 }
 0x2e5   : > { %v1321_v25 = vmul.f32 %v1319_v20, %v4597_v0 }
 0x2e6   : > { %v1331_v30 = vpop.permute.xlu0 %1330 }
 0x2e7   : > { %1031 = vrot.lane.b32.xlu0 %v1029_v3, %s4025_s12  ;;  %1043 = vrot.lane.b32.xlu1 %v1041_v4, %s4026_s13  ;;  %v1333_v39 = vmul.f32 %v1331_v30, %v4597_v0  ;;  %s4044_s12 = smov 75   ;;  %v1714_v3 = vand.u32 4294901760, %v1713_v48  ;;  %v1388_v4 = vld [vmem:[%s5519_s4 + $0x118] sm:$0xff]  ;;  %s4052_s13 = smov 16  }
 0x2e8   : > { %v1135_v24 = vpop.permute.xlu1 %1134 }
 0x2e9   : > { %v1137_v28 = vmul.f32 %v1135_v24, %v4597_v0  ;;  %1715 = vmatprep.mubr.f32.mxu0 %v1714_v3 }
 0x2ea   : > { %v1147_v42 = vpop.permute.xlu0 %1146 }
 0x2eb   : > { %1247 = vrot.lane.b32.xlu0 %v1245_v50, %s4027_s14  ;;  %1259 = vrot.lane.b32.xlu1 %v1257_v54, %s4028_s15  ;;  %v1149_v45 = vmul.f32 %v1147_v42, %v4597_v0  ;;  %s4045_s15 = smov 74   ;;  %v1412_v50 = vld [vmem:[%s5519_s4 + $0x128] sm:$0xff]  ;;  %v1436_v54 = vld [vmem:[%s5519_s4 + $0x138] sm:$0xff]  ;;  %s4075_s14 = smov 105  }
 0x2ec   : > { %v1343_v38 = vpop.permute.xlu1 %1342 }
 0x2ed   : > { %v1345_v32 = vmul.f32 %v1343_v38, %v4597_v0 }
 0x2ef   : > { %1055 = vrot.lane.b32.xlu0 %v1053_v57, %s4029_s16  ;;  %1067 = vrot.lane.b32.xlu1 %v1065_v1, %s4030_s17  ;;  %s4046_s16 = smov 9   ;;  %v1460_v57 = vld [vmem:[%s5519_s4 + $0x148] sm:$0xff]  ;;  %v1472_v1 = vld [vmem:[%s5519_s4 + $0x150] sm:$0xff] }
 0x2f0   : > { %v1159_v46 = vpop.permute.xlu1 %1158 }
 0x2f1   : > { %v1161_v47 = vmul.f32 %v1159_v46, %v4597_v0 }
 0x2f3   : > { %1275 = vrot.lane.b32.xlu0 %v1273_v16, %s4031_s18  ;;  %1079 = vrot.lane.b32.xlu1 %v1077_v60, %s4032_s19  ;;  %s4053_s18 = smov 17   ;;  %s4054_s19 = smov 18   ;;  %v1496_v16 = vld [vmem:[%s5519_s4 + $0x160] sm:$0xff]  ;;  %v1508_v60 = vld [vmem:[%s5519_s4 + $0x168] sm:$0xff] }
 0x2f7   : > { %1091 = vrot.lane.b32.xlu0 %v1089_v10, %s4033_s20  ;;  %1287 = vrot.lane.b32.xlu1 %v1285_v15, %s4034_s24  ;;  %s4047_s24 = smov 10   ;;  %v1532_v10 = vld [vmem:[%s5519_s4 + $0x178] sm:$0xff] }
 0x2fb   : > { %1299 = vrot.lane.b32.xlu0 %v1297_v34, %s4035_s25  ;;  %1103 = vrot.lane.b32.xlu1 %v1101_v13, %s4036_s26  ;;  %s4048_s25 = smov 11   ;;  %s4063_s26 = smov 119  }
 0x2ff   : > { %1115 = vrot.lane.b32.xlu0 %v1113_v22, %s4037_s27  ;;  %1311 = vrot.lane.b32.xlu1 %v1309_v21, %s4038_s28  ;;  %s4055_s27 = smov 19   ;;  %s4056_s28 = smov 21  }
 0x303   : > { %1323 = vrot.lane.b32.xlu0 %v1321_v25, %s4039_s29  ;;  %1127 = vrot.lane.b32.xlu1 %v1125_v29, %s4040_s30  ;;  %s4049_s30 = smov 13   ;;  %s4066_s29 = smov 115  }
 0x307   : > { %1139 = vrot.lane.b32.xlu0 %v1137_v28, %s4041_s7  ;;  %1335 = vrot.lane.b32.xlu1 %v1333_v39, %s4042_s10  ;;  %s4050_s7 = smov 14   ;;  %s4058_s10 = smov 23  }
 0x30b   : > { %1347 = vrot.lane.b32.xlu0 %v1345_v32, %s4043_s11  ;;  %1151 = vrot.lane.b32.xlu1 %v1149_v45, %s4044_s12  ;;  %s4051_s12 = smov 15   ;;  %s4072_s11 = smov 109  }
 0x30f   : > { %1163 = vrot.lane.b32.xlu0 %v1161_v47, %s4045_s15  ;;  %1354 = vrot.lane.b32.xlu1 %v1352_v61, %s4046_s16  ;;  %s4059_s15 = smov 24   ;;  %s4060_s16 = smov 25  }
 0x313   : > { %1366 = vrot.lane.b32.xlu0 %v1364_v62, %s4047_s24  ;;  %1378 = vrot.lane.b32.xlu1 %v1376_v49, %s4048_s25  ;;  %s4061_s24 = smov 26   ;;  %s4062_s25 = smov 27  }
 0x317   : > { %1390 = vrot.lane.b32.xlu0 %v1388_v4, %s4049_s30  ;;  %1402 = vrot.lane.b32.xlu1 %v1400_v6, %s4050_s7  ;;  %s4067_s30 = smov 114   ;;  %s4068_s7 = smov 113  }
 0x31b   : > { %1414 = vrot.lane.b32.xlu0 %v1412_v50, %s4051_s12  ;;  %1426 = vrot.lane.b32.xlu1 %v1424_v40, %s4052_s13  ;;  %s4073_s12 = smov 107   ;;  %s4074_s13 = smov 106  }
 0x31f   : > { %1438 = vrot.lane.b32.xlu0 %v1436_v54, %s4053_s18  ;;  %1450 = vrot.lane.b32.xlu1 %v1448_v55, %s4054_s19  ;;  %s4078_s19 = smov 102  }
 0x323   : > { %1462 = vrot.lane.b32.xlu0 %v1460_v57, %s4055_s27  ;;  %1474 = vrot.lane.b32.xlu1 %v1472_v1, %s4056_s28  ;;  %s4064_s27 = smov 118   ;;  %s4065_s28 = smov 117  }
 0x327   : > { %1486 = vrot.lane.b32.xlu0 %v1484_v59, %s4057_s9  ;;  %1498 = vrot.lane.b32.xlu1 %v1496_v16, %s4058_s10  ;;  %s4070_s9 = smov 111   ;;  %s4071_s10 = smov 110  }
 0x32b   : > { %1510 = vrot.lane.b32.xlu0 %v1508_v60, %s4059_s15  ;;  %1522 = vrot.lane.b32.xlu1 %v1520_v63, %s4060_s16  ;;  %s4076_s15 = smov 104   ;;  %s4077_s16 = smov 103  }
 0x32f   : > { %1534 = vrot.lane.b32.xlu0 %v1532_v10, %s4061_s24  ;;  %1546 = vrot.lane.b32.xlu1 %v1544_v14, %s4062_s25  ;;  %s4079_s25 = smov 101  }
 0x345   : > { %v1176_v15 = vpop.permute.xlu0 %1175  ;;  %v1188_v20 = vpop.permute.xlu1 %1187 }
 0x346   : > { %1178 = vst.msk [vmem:[#allocation3 + $0x80] sm:$0xff] %vm962_vm10, %v1176_v15  ;;  %1190 = vst.msk [vmem:[#allocation3 + $0x88] sm:$0xff] %vm962_vm10, %v1188_v20 }
 0x349   : > { %v984_v34 = vpop.permute.xlu0 %983  ;;  %v996_v13 = vpop.permute.xlu1 %995 }
 0x34a   : > { %986 = vst.msk [vmem:[#allocation3] sm:$0xff] %vm962_vm10, %v984_v34  ;;  %998 = vst.msk [vmem:[#allocation3 + $0x8] sm:$0xff] %vm962_vm10, %v996_v13 }
 0x34d   : > { %v1200_v19 = vpop.permute.xlu0 %1199  ;;  %v1573_v22 = vld [vmem:[#allocation3 + $0x80] sm:$0xff]  ;;  %v1212_v21 = vpop.permute.xlu1 %1211  ;;  %v1574_v24 = vld [vmem:[#allocation3 + $0x88] sm:$0xff] }
 0x34e   : > { %1202 = vst.msk [vmem:[#allocation3 + $0x90] sm:$0xff] %vm962_vm10, %v1200_v19  ;;  %v1663_v25 = vand.u32 4294901760, %v1573_v22  ;;  %1214 = vst.msk [vmem:[#allocation3 + $0x98] sm:$0xff] %vm962_vm10, %v1212_v21  ;;  %v1666_v30 = vand.u32 4294901760, %v1574_v24 }
 0x350   : > { %v4709_v29 = vsub.f32 %v1573_v22, %v1663_v25  ;;  %v4711_v28 = vpack.c.bf16 %v1666_v30, %v1663_v25  ;;  %v4713_v42 = vsub.f32 %v1574_v24, %v1666_v30 }
 0x351   : > { %v1008_v38 = vpop.permute.xlu0 %1007  ;;  %v1557_v39 = vld [vmem:[#allocation3] sm:$0xff]  ;;  %v1020_v2 = vpop.permute.xlu1 %1019  ;;  %v1558_v32 = vld [vmem:[#allocation3 + $0x8] sm:$0xff] }
 0x352   : > { %1010 = vst.msk [vmem:[#allocation3 + $0x10] sm:$0xff] %vm962_vm10, %v1008_v38  ;;  %v1615_v45 = vand.u32 4294901760, %v1557_v39  ;;  %v1841_v46 = vand.u32 4294901760, %v4709_v29  ;;  %1022 = vst.msk [vmem:[#allocation3 + $0x18] sm:$0xff] %vm962_vm10, %v1020_v2  ;;  %3499 = vmatprep.subr.bf16.mxu0 %v4711_v28  ;;  %v1618_v47 = vand.u32 4294901760, %v1558_v32  ;;  %v1848_v61 = vand.u32 4294901760, %v4713_v42 }
 0x354   : > { %v4720_v62 = vsub.f32 %v1557_v39, %v1615_v45  ;;  %v1842_v48 = vsub.f32 %v4709_v29, %v1841_v46  ;;  %v4723_v3 = vpack.c.bf16 %v1618_v47, %v1615_v45  ;;  %v4725_v4 = vsub.f32 %v1558_v32, %v1618_v47 }
 0x355   : > { %v1224_v49 = vpop.permute.xlu0 %1223  ;;  %v1575_v6 = vld [vmem:[#allocation3 + $0x90] sm:$0xff]  ;;  %v1849_v50 = vsub.f32 %v4713_v42, %v1848_v61  ;;  %v4728_v40 = vpack.c.bf16 %v1848_v61, %v1841_v46  ;;  %v1236_v54 = vpop.permute.xlu1 %1235  ;;  %v1576_v55 = vld [vmem:[#allocation3 + $0x98] sm:$0xff] }
 0x356   : > { %1226 = vst.msk [vmem:[#allocation3 + $0xa0] sm:$0xff] %vm962_vm10, %v1224_v49  ;;  %v1669_v57 = vand.u32 4294901760, %v1575_v6  ;;  %v1843_v1 = vand.u32 4294901760, %v1842_v48  ;;  %v1729_v59 = vand.u32 4294901760, %v4720_v62  ;;  %1238 = vst.msk [vmem:[#allocation3 + $0xa8] sm:$0xff] %vm962_vm10, %v1236_v54  ;;  %3501 = vmatpush3.bf16.msra.mxu0 %v4723_v3  ;;  %v1672_v16 = vand.u32 4294901760, %v1576_v55 }
 0x357   : > { %5583 = vst [vmem:[#allocation24_spill] sm:$0xff] %v4728_v40  ;;  %v1850_v60 = vand.u32 4294901760, %v1849_v50  ;;  %v1736_v63 = vand.u32 4294901760, %v4725_v4 }
 0x358   : > { %v4735_v10 = vsub.f32 %v1575_v6, %v1669_v57  ;;  %v1730_v14 = vsub.f32 %v4720_v62, %v1729_v59  ;;  %v4738_v20 = vpack.c.bf16 %v1672_v16, %v1669_v57  ;;  %v4740_v34 = vsub.f32 %v1576_v55, %v1672_v16 }
 0x359   : > { %v1032_v15 = vpop.permute.xlu0 %1031  ;;  %v3530_v13 = vpack.c.bf16 %v1850_v60, %v1843_v1  ;;  %v1559_v19 = vld [vmem:[#allocation3 + $0x10] sm:$0xff]  ;;  %v1737_v22 = vsub.f32 %v4725_v4, %v1736_v63  ;;  %v1044_v21 = vpop.permute.xlu1 %1043  ;;  %v1560_v24 = vld [vmem:[#allocation3 + $0x18] sm:$0xff]  ;;  %v4745_v39 = vpack.c.bf16 %v1736_v63, %v1729_v59 }
 0x35a   : > { %1034 = vst.msk [vmem:[#allocation3 + $0x20] sm:$0xff] %vm962_vm10, %v1032_v15  ;;  %v1621_v25 = vand.u32 4294901760, %v1559_v19  ;;  %v1731_v30 = vand.u32 4294901760, %v1730_v14  ;;  %v1855_v38 = vand.u32 4294901760, %v4735_v10  ;;  %1046 = vst.msk [vmem:[#allocation3 + $0x28] sm:$0xff] %vm962_vm10, %v1044_v21  ;;  %3503 = vmatprep.subr.bf16.mxu0 %v4738_v20  ;;  %v1624_v2 = vand.u32 4294901760, %v1560_v24 }
 0x35b   : > { %5584 = vst [vmem:[#allocation25_spill] sm:$0xff] %v4745_v39  ;;  %3531 = vmatprep.subr.bf16.mxu1 %v3530_v13  ;;  %v1738_v32 = vand.u32 4294901760, %v1737_v22  ;;  %v1862_v45 = vand.u32 4294901760, %v4740_v34 }
 0x35c   : > { %v4750_v46 = vsub.f32 %v1559_v19, %v1621_v25  ;;  %v1856_v47 = vsub.f32 %v4735_v10, %v1855_v38  ;;  %v4753_v48 = vpack.c.bf16 %v1624_v2, %v1621_v25  ;;  %v4755_v49 = vsub.f32 %v1560_v24, %v1624_v2  ;;  %v4773_v2 = vld [vmem:[#allocation3 + $0xc0] sm:$0xff] }
 0x35d   : > { %v1248_v61 = vpop.permute.xlu0 %1247  ;;  %v3532_v6 = vpack.c.bf16 %v1738_v32, %v1731_v30  ;;  %v1577_v50 = vld [vmem:[#allocation3 + $0xa0] sm:$0xff]  ;;  %v1863_v54 = vsub.f32 %v4740_v34, %v1862_v45  ;;  %v1260_v55 = vpop.permute.xlu1 %1259  ;;  %v1578_v57 = vld [vmem:[#allocation3 + $0xa8] sm:$0xff]  ;;  %v4760_v60 = vpack.c.bf16 %v1862_v45, %v1855_v38 }
 0x35e   : > { %1250 = vst.msk [vmem:[#allocation3 + $0xb0] sm:$0xff] %vm962_vm10, %v1248_v61  ;;  %v1675_v1 = vand.u32 4294901760, %v1577_v50  ;;  %v1857_v59 = vand.u32 4294901760, %v1856_v47  ;;  %v1743_v16 = vand.u32 4294901760, %v4750_v46  ;;  %1262 = vst.msk [vmem:[#allocation3 + $0xb8] sm:$0xff] %vm962_vm10, %v1260_v55  ;;  %3505 = vmatpush3.bf16.msra.mxu0 %v4753_v48  ;;  %v1678_v63 = vand.u32 4294901760, %v1578_v57 }
 0x35f   : > { %5585 = vst [vmem:[#allocation26_spill] sm:$0xff] %v4760_v60  ;;  %3533 = vmatpush3.bf16.msra.mxu1 %v3532_v6  ;;  %v1864_v14 = vand.u32 4294901760, %v1863_v54  ;;  %v1750_v15 = vand.u32 4294901760, %v4755_v49 }
 0x360   : > { %v4765_v13 = vsub.f32 %v1577_v50, %v1675_v1  ;;  %v1744_v19 = vsub.f32 %v4750_v46, %v1743_v16  ;;  %v4768_v21 = vpack.c.bf16 %v1678_v63, %v1675_v1  ;;  %v4770_v24 = vsub.f32 %v1578_v57, %v1678_v63 }
 0x361   : > { %v1056_v22 = vpop.permute.xlu0 %1055  ;;  %v3534_v25 = vpack.c.bf16 %v1864_v14, %v1857_v59  ;;  %v1561_v30 = vld [vmem:[#allocation3 + $0x20] sm:$0xff]  ;;  %v1751_v38 = vsub.f32 %v4755_v49, %v1750_v15  ;;  %v1068_v32 = vpop.permute.xlu1 %1067  ;;  %v1562_v45 = vld [vmem:[#allocation3 + $0x28] sm:$0xff]  ;;  %v4777_v50 = vpack.c.bf16 %v1750_v15, %v1743_v16  ;;  %v5530_v63 = vand.u32 4294901760, %v4773_v2 }
 0x362   : > { %1058 = vst.msk [vmem:[#allocation3 + $0x30] sm:$0xff] %vm962_vm10, %v1056_v22  ;;  %v1627_v47 = vand.u32 4294901760, %v1561_v30  ;;  %v1745_v61 = vand.u32 4294901760, %v1744_v19  ;;  %v1869_v6 = vand.u32 4294901760, %v4765_v13  ;;  %1070 = vst.msk [vmem:[#allocation3 + $0x38] sm:$0xff] %vm962_vm10, %v1068_v32  ;;  %3507 = vmatprep.subr.bf16.mxu0 %v4768_v21  ;;  %v1630_v54 = vand.u32 4294901760, %v1562_v45 }
 0x363   : > { %5586 = vst [vmem:[#allocation27_spill] sm:$0xff] %v4777_v50  ;;  %3535 = vmatprep.subr.bf16.mxu1 %v3534_v25  ;;  %v1752_v55 = vand.u32 4294901760, %v1751_v38  ;;  %v1876_v57 = vand.u32 4294901760, %v4770_v24 }
 0x364   : > { %v4782_v1 = vsub.f32 %v1561_v30, %v1627_v47  ;;  %v1870_v59 = vsub.f32 %v4765_v13, %v1869_v6  ;;  %v4786_v19 = vpack.c.bf16 %v1630_v54, %v1627_v47  ;;  %v4788_v16 = vsub.f32 %v1562_v45, %v1630_v54 }
 0x365   : > { %v1276_v14 = vpop.permute.xlu0 %1275  ;;  %v3536_v15 = vpack.c.bf16 %v1752_v55, %v1745_v61  ;;  %v1579_v22 = vld [vmem:[#allocation3 + $0xb0] sm:$0xff]  ;;  %v1877_v32 = vsub.f32 %v4770_v24, %v1876_v57  ;;  %v1080_v25 = vpop.permute.xlu1 %1079  ;;  %v1580_v38 = vld [vmem:[#allocation3 + $0xb8] sm:$0xff]  ;;  %v4793_v18 = vpack.c.bf16 %v1876_v57, %v1869_v6 }
 0x366   : > { %1278 = vst.msk [vmem:[#allocation3 + $0xc8] sm:$0xff] %vm962_vm10, %v1276_v14  ;;  %v1681_v8 = vand.u32 4294901760, %v1579_v22  ;;  %v1871_v30 = vand.u32 4294901760, %v1870_v59  ;;  %v1757_v58 = vand.u32 4294901760, %v4782_v1  ;;  %1082 = vst.msk [vmem:[#allocation3 + $0x40] sm:$0xff] %vm962_vm10, %v1080_v25  ;;  %3509 = vmatpush3.bf16.msra.mxu0 %v4786_v19  ;;  %v1684_v45 = vand.u32 4294901760, %v1580_v38 }
 0x367   : > { %5587 = vst [vmem:[#allocation28_spill] sm:$0xff] %v4793_v18  ;;  %3537 = vmatpush3.bf16.msra.mxu1 %v3536_v15  ;;  %v1878_v47 = vand.u32 4294901760, %v1877_v32  ;;  %v1764_v61 = vand.u32 4294901760, %v4788_v16  ;;  %v4804_v59 = vsub.f32 %v4773_v2, %v5530_v63 }
 0x368   : > { %v4798_v54 = vsub.f32 %v1579_v22, %v1681_v8  ;;  %v1758_v55 = vsub.f32 %v4782_v1, %v1757_v58  ;;  %v4806_v57 = vpack.c.bf16 %v1684_v45, %v1681_v8  ;;  %v4808_v14 = vsub.f32 %v1580_v38, %v1684_v45 }
 0x369   : > { %v1092_v6 = vpop.permute.xlu0 %1091  ;;  %v3538_v25 = vpack.c.bf16 %v1878_v47, %v1871_v30  ;;  %v1563_v15 = vld [vmem:[#allocation3 + $0x30] sm:$0xff]  ;;  %v1765_v32 = vsub.f32 %v4788_v16, %v1764_v61  ;;  %v1288_v22 = vpop.permute.xlu1 %1287  ;;  %v1564_v56 = vld [vmem:[#allocation3 + $0x38] sm:$0xff]  ;;  %v4813_v31 = vpack.c.bf16 %v1764_v61, %v1757_v58 }
 0x36a   : > { %1094 = vst.msk [vmem:[#allocation3 + $0x48] sm:$0xff] %vm962_vm10, %v1092_v6  ;;  %v1633_v53 = vand.u32 4294901760, %v1563_v15  ;;  %v1759_v43 = vand.u32 4294901760, %v1758_v55  ;;  %v1883_v44 = vand.u32 4294901760, %v4798_v54  ;;  %1290 = vst.msk [vmem:[#allocation3 + $0xd0] sm:$0xff] %vm962_vm10, %v1288_v22  ;;  %3511 = vmatprep.subr.bf16.mxu0 %v4806_v57  ;;  %v1636_v8 = vand.u32 4294901760, %v1564_v56 }
 0x36b   : > { %5588 = vst [vmem:[#allocation29_spill] sm:$0xff] %v4813_v31  ;;  %3539 = vmatprep.subr.bf16.mxu1 %v3538_v25  ;;  %v1766_v38 = vand.u32 4294901760, %v1765_v32  ;;  %v1890_v30 = vand.u32 4294901760, %v4808_v14  ;;  %v5538_v6 = vand.u32 4294901760, %v4804_v59 }
 0x36c   : > { %v4818_v45 = vsub.f32 %v1563_v15, %v1633_v53  ;;  %v1884_v47 = vsub.f32 %v4798_v54, %v1883_v44  ;;  %v4822_v63 = vpack.c.bf16 %v1636_v8, %v1633_v53  ;;  %v4824_v58 = vsub.f32 %v1564_v56, %v1636_v8 }
 0x36d   : > { %v1300_v55 = vpop.permute.xlu0 %1299  ;;  %v3540_v61 = vpack.c.bf16 %v1766_v38, %v1759_v43  ;;  %v1582_v22 = vld [vmem:[#allocation3 + $0xc8] sm:$0xff]  ;;  %v1891_v23 = vsub.f32 %v4808_v14, %v1890_v30  ;;  %v1104_v25 = vpop.permute.xlu1 %1103  ;;  %v1565_v15 = vld [vmem:[#allocation3 + $0x40] sm:$0xff]  ;;  %v4829_v11 = vpack.c.bf16 %v1890_v30, %v1883_v44  ;;  %v5590_v8 = vand.u32 4294901760, %v4773_v2 }
 0x36e   : > { %1302 = vst.msk [vmem:[#allocation3 + $0xd8] sm:$0xff] %vm962_vm10, %v1300_v55  ;;  %v1690_v32 = vand.u32 4294901760, %v1582_v22  ;;  %v1885_v7 = vand.u32 4294901760, %v1884_v47  ;;  %v1771_v17 = vand.u32 4294901760, %v4818_v45  ;;  %1106 = vst.msk [vmem:[#allocation3 + $0x50] sm:$0xff] %vm962_vm10, %v1104_v25  ;;  %3513 = vmatpush3.bf16.msra.mxu0 %v4822_v63  ;;  %v1639_v43 = vand.u32 4294901760, %v1565_v15 }
 0x36f   : > { %5589 = vst [vmem:[#allocation30_spill] sm:$0xff] %v4829_v11  ;;  %3541 = vmatpush3.bf16.msra.mxu1 %v3540_v61  ;;  %v1892_v53 = vand.u32 4294901760, %v1891_v23  ;;  %v1778_v56 = vand.u32 4294901760, %v4824_v58  ;;  %v1898_v44 = vsub.f32 %v4804_v59, %v5538_v6 }
 0x370   : > { %v4836_v38 = vpack.c.bf16 %v1690_v32, %v5590_v8  ;;  %v4838_v55 = vsub.f32 %v1582_v22, %v1690_v32  ;;  %v1772_v47 = vsub.f32 %v4818_v45, %v1771_v17  ;;  %v4844_v61 = vsub.f32 %v1565_v15, %v1639_v43 }
 0x371   : > { %v1116_v30 = vpop.permute.xlu0 %1115  ;;  %v3542_v25 = vpack.c.bf16 %v1892_v53, %v1885_v7  ;;  %v1566_v9 = vld [vmem:[#allocation3 + $0x48] sm:$0xff]  ;;  %v1779_v23 = vsub.f32 %v4824_v58, %v1778_v56  ;;  %v4847_v5 = vpack.c.bf16 %v1778_v56, %v1771_v17  ;;  %v1312_v2 = vpop.permute.xlu1 %1311  ;;  %v1583_v8 = vld [vmem:[#allocation3 + $0xd0] sm:$0xff]  ;;  %v1899_v26 = vand.u32 4294901760, %v1898_v44 }
 0x372   : > { %5591 = vst [vmem:[#allocation31_spill] sm:$0xff] %v4836_v38  ;;  %1118 = vst.msk [vmem:[#allocation3 + $0x58] sm:$0xff] %vm962_vm10, %v1116_v30  ;;  %3515 = vmatprep.subr.bf16.mxu0 %v4836_v38  ;;  %v1642_v22 = vand.u32 4294901760, %v1566_v9  ;;  %v1773_v32 = vand.u32 4294901760, %v1772_v47  ;;  %v5542_v52 = vand.u32 4294901760, %v4838_v55  ;;  %v1693_v15 = vand.u32 4294901760, %v1583_v8 }
 0x373   : > { %5592 = vst [vmem:[#allocation32_spill] sm:$0xff] %v4847_v5  ;;  %1314 = vst.msk [vmem:[#allocation3 + $0xe0] sm:$0xff] %vm962_vm10, %v1312_v2  ;;  %3543 = vmatprep.subr.bf16.mxu1 %v3542_v25  ;;  %v1780_v7 = vand.u32 4294901760, %v1779_v23  ;;  %v1785_v53 = vand.u32 4294901760, %v4844_v61 }
 0x374   : > { %v4854_v6 = vpack.c.bf16 %v1642_v22, %v1639_v43  ;;  %v4856_v17 = vsub.f32 %v1566_v9, %v1642_v22  ;;  %v1905_v56 = vsub.f32 %v4838_v55, %v5542_v52  ;;  %v4861_v51 = vsub.f32 %v1583_v8, %v1693_v15 }
 0x375   : > { %v1324_v30 = vpop.permute.xlu0 %1323  ;;  %v3544_v47 = vpack.c.bf16 %v1780_v7, %v1773_v32  ;;  %v1584_v41 = vld [vmem:[#allocation3 + $0xd8] sm:$0xff]  ;;  %v1128_v25 = vpop.permute.xlu1 %1127  ;;  %v1567_v2 = vld [vmem:[#allocation3 + $0x50] sm:$0xff]  ;;  %v1786_v9 = vsub.f32 %v4844_v61, %v1785_v53 }
 0x376   : > { %5593 = vst [vmem:[#allocation33_spill] sm:$0xff] %v4854_v6  ;;  %1326 = vst.msk [vmem:[#allocation3 + $0xe8] sm:$0xff] %vm962_vm10, %v1324_v30  ;;  %3517 = vmatpush3.bf16.msra.mxu0 %v4854_v6  ;;  %v1696_v23 = vand.u32 4294901760, %v1584_v41  ;;  %v1906_v43 = vand.u32 4294901760, %v1905_v56  ;;  %v1792_v22 = vand.u32 4294901760, %v4856_v17  ;;  %v1645_v32 = vand.u32 4294901760, %v1567_v2 }
 0x377   : > { %1130 = vst.msk [vmem:[#allocation3 + $0x60] sm:$0xff] %vm962_vm10, %v1128_v25  ;;  %3545 = vmatpush3.bf16.msra.mxu1 %v3544_v47  ;;  %v1911_v8 = vand.u32 4294901760, %v4861_v51 }
 0x378   : > { %v4869_v7 = vpack.c.bf16 %v1696_v23, %v1693_v15  ;;  %v4871_v44 = vsub.f32 %v1584_v41, %v1696_v23  ;;  %v3546_v30 = vpack.c.bf16 %v1906_v43, %v1899_v26  ;;  %v1793_v52 = vsub.f32 %v4856_v17, %v1792_v22 }
 0x379   : > { %v1140_v27 = vpop.permute.xlu0 %1139  ;;  %v1568_v56 = vld [vmem:[#allocation3 + $0x58] sm:$0xff]  ;;  %v4874_v5 = vsub.f32 %v1567_v2, %v1645_v32  ;;  %v1912_v11 = vsub.f32 %v4861_v51, %v1911_v8  ;;  %v4877_v31 = vpack.c.bf16 %v1792_v22, %v1785_v53  ;;  %v1336_v47 = vpop.permute.xlu1 %1335  ;;  %v1787_v41 = vand.u32 4294901760, %v1786_v9 }
 0x37a   : > { %5594 = vst [vmem:[#allocation34_spill] sm:$0xff] %v4869_v7  ;;  %1142 = vst.msk [vmem:[#allocation3 + $0x68] sm:$0xff] %vm962_vm10, %v1140_v27  ;;  %3519 = vmatprep.subr.bf16.mxu0 %v4869_v7  ;;  %3547 = vmatprep.subr.bf16.mxu1 %v3546_v30  ;;  %v1648_v15 = vand.u32 4294901760, %v1568_v56  ;;  %v1794_v25 = vand.u32 4294901760, %v1793_v52  ;;  %v1585_v26 = vld [vmem:[#allocation3 + $0xe0] sm:$0xff]  ;;  %v1918_v23 = vand.u32 4294901760, %v4871_v44 }
 0x37b   : > { %5595 = vst [vmem:[#allocation35_spill] sm:$0xff] %v4877_v31  ;;  %1338 = vst.msk [vmem:[#allocation3 + $0xf0] sm:$0xff] %vm962_vm10, %v1336_v47  ;;  %v1699_v43 = vand.u32 4294901760, %v1585_v26  ;;  %v1799_v2 = vand.u32 4294901760, %v4874_v5  ;;  %v4885_v53 = vand.u32 4294901760, %v4635_v35  ;;  %v1913_v50 = vand.u32 4294901760, %v1912_v11 }
 0x37c   : > { %v4887_v22 = vpack.c.bf16 %v1648_v15, %v1645_v32  ;;  %v4889_v27 = vsub.f32 %v1568_v56, %v1648_v15  ;;  %v3548_v31 = vpack.c.bf16 %v1794_v25, %v1787_v41  ;;  %v1919_v30 = vsub.f32 %v4871_v44, %v1918_v23 }
 0x37d   : > { %v1348_v9 = vpop.permute.xlu0 %1347  ;;  %v1586_v52 = vld [vmem:[#allocation3 + $0xe8] sm:$0xff]  ;;  %v4892_v18 = vsub.f32 %v1585_v26, %v1699_v43  ;;  %v4894_v12 = vpack.c.bf16 %v1918_v23, %v1911_v8  ;;  %v1152_v47 = vpop.permute.xlu1 %1151  ;;  %v1800_v15 = vsub.f32 %v4874_v5, %v1799_v2  ;;  %v4904_v8 = vsub.f32 %v4635_v35, %v4885_v53 }
 0x37e   : > { %5596 = vst [vmem:[#allocation36_spill] sm:$0xff] %v4887_v22  ;;  %1350 = vst.msk [vmem:[#allocation3 + $0xf8] sm:$0xff] %vm962_vm10, %v1348_v9  ;;  %3521 = vmatpush3.bf16.msra.mxu0 %v4887_v22  ;;  %3549 = vmatpush3.bf16.msra.mxu1 %v3548_v31  ;;  %v1702_v32 = vand.u32 4294901760, %v1586_v52  ;;  %v1920_v60 = vand.u32 4294901760, %v1919_v30  ;;  %v1569_v56 = vld [vmem:[#allocation3 + $0x60] sm:$0xff]  ;;  %v1806_v41 = vand.u32 4294901760, %v4889_v27 }
 0x37f   : > { %5597 = vst [vmem:[#allocation37_spill] sm:$0xff] %v4894_v12  ;;  %1154 = vst.msk [vmem:[#allocation3 + $0x70] sm:$0xff] %vm962_vm10, %v1152_v47  ;;  %v1651_v25 = vand.u32 4294901760, %v1569_v56  ;;  %v1925_v11 = vand.u32 4294901760, %v4892_v18 }
 0x380   : > { %5598 = vst [vmem:[#allocation38_spill] sm:$0xff] %v4904_v8  ;;  %v4906_v26 = vpack.c.bf16 %v1702_v32, %v1699_v43  ;;  %v4908_v23 = vsub.f32 %v1586_v52, %v1702_v32  ;;  %v3550_v31 = vpack.c.bf16 %v1920_v60, %v1913_v50  ;;  %v1807_v30 = vsub.f32 %v4889_v27, %v1806_v41 }
 0x381   : > { %v1164_v9 = vpop.permute.xlu0 %1163  ;;  %v1570_v12 = vld [vmem:[#allocation3 + $0x68] sm:$0xff]  ;;  %v4911_v39 = vsub.f32 %v1569_v56, %v1651_v25  ;;  %v1926_v47 = vsub.f32 %v4892_v18, %v1925_v11  ;;  %v4914_v40 = vpack.c.bf16 %v1806_v41, %v1799_v2  ;;  %v1355_v22 = vpop.permute.xlu1 %1354  ;;  %v1801_v43 = vand.u32 4294901760, %v1800_v15 }
 0x382   : > { %5599 = vst [vmem:[#allocation39_spill] sm:$0xff] %v4906_v26  ;;  %1166 = vst.msk [vmem:[#allocation3 + $0x78] sm:$0xff] %vm962_vm10, %v1164_v9  ;;  %3523 = vmatprep.subr.bf16.mxu0 %v4906_v26  ;;  %3551 = vmatprep.subr.bf16.mxu1 %v3550_v31  ;;  %v1654_v35 = vand.u32 4294901760, %v1570_v12  ;;  %v1808_v52 = vand.u32 4294901760, %v1807_v30  ;;  %v1587_v60 = vld [vmem:[#allocation3 + $0xf0] sm:$0xff]  ;;  %v1932_v50 = vand.u32 4294901760, %v4908_v23  ;;  %v1357_v32 = vmul.f32 %v1355_v22, %v4597_v0 }
 0x383   : > { %5600 = vst [vmem:[#allocation40_spill] sm:$0xff] %v4911_v39  ;;  %5601 = vst [vmem:[#allocation41_spill] sm:$0xff] %v4914_v40  ;;  %v1705_v56 = vand.u32 4294901760, %v1587_v60  ;;  %v1813_v7 = vand.u32 4294901760, %v4911_v39  ;;  %v1927_v6 = vand.u32 4294901760, %v1926_v47  ;;  %v5604_v47 = vand.u32 4294901760, %v4904_v8 }
 0x384   : > { %v4922_v41 = vpack.c.bf16 %v1654_v35, %v1651_v25  ;;  %v4924_v9 = vsub.f32 %v1570_v12, %v1654_v35  ;;  %v3552_v40 = vpack.c.bf16 %v1808_v52, %v1801_v43  ;;  %v1933_v31 = vsub.f32 %v4908_v23, %v1932_v50  ;;  %1359 = vrot.lane.b32.xlu0 %v1357_v32, %s4063_s26 }
 0x385   : > { %v1367_v15 = vpop.permute.xlu0 %1366  ;;  %v1588_v30 = vld [vmem:[#allocation3 + $0xf8] sm:$0xff]  ;;  %v4927_v26 = vsub.f32 %v1587_v60, %v1705_v56  ;;  %v1814_v22 = vsub.f32 %v4911_v39, %v1813_v7  ;;  %v4930_v36 = vpack.c.bf16 %v1932_v50, %v1925_v11  ;;  %v1379_v25 = vpop.permute.xlu1 %1378  ;;  %v1719_v39 = vsub.f32 %v4904_v8, %v5604_v47 }
 0x386   : > { %5602 = vst [vmem:[#allocation42_spill] sm:$0xff] %v4922_v41  ;;  %v1369_v2 = vmul.f32 %v1367_v15, %v4597_v0  ;;  %3525 = vmatpush3.bf16.msra.mxu0 %v4922_v41  ;;  %3553 = vmatpush3.bf16.msra.mxu1 %v3552_v40  ;;  %v1708_v12 = vand.u32 4294901760, %v1588_v30  ;;  %v1934_v35 = vand.u32 4294901760, %v1933_v31  ;;  %v1571_v43 = vld [vmem:[#allocation3 + $0x70] sm:$0xff]  ;;  %v1820_v52 = vand.u32 4294901760, %v4924_v9 }
 0x387   : > { %5603 = vst [vmem:[#allocation43_spill] sm:$0xff] %v4930_v36  ;;  %v1381_v32 = vmul.f32 %v1379_v25, %v4597_v0  ;;  %v1657_v60 = vand.u32 4294901760, %v1571_v43  ;;  %v5562_v11 = vand.u32 4294901760, %v4927_v26  ;;  %v1815_v38 = vand.u32 4294901760, %v1814_v22 }
 0x388   : > { %1371 = vrot.lane.b32.xlu1 %v1369_v2, %s4064_s27  ;;  %v4940_v50 = vpack.c.bf16 %v1708_v12, %v1705_v56  ;;  %v4942_v15 = vsub.f32 %v1588_v30, %v1708_v12  ;;  %v3554_v40 = vpack.c.bf16 %v1934_v35, %v1927_v6  ;;  %v1821_v31 = vsub.f32 %v4924_v9, %v1820_v52 }
 0x389   : > { %1383 = vrot.lane.b32.xlu0 %v1381_v32, %s4065_s28  ;;  %v1391_v36 = vpop.permute.xlu0 %1390  ;;  %v1572_v25 = vld [vmem:[#allocation3 + $0x78] sm:$0xff]  ;;  %v4945_v41 = vsub.f32 %v1571_v43, %v1657_v60  ;;  %v1940_v47 = vsub.f32 %v4927_v26, %v5562_v11  ;;  %v4950_v8 = vpack.c.bf16 %v1820_v52, %v1813_v7  ;;  %v1403_v2 = vpop.permute.xlu1 %1402 }
 0x38a   : > { %v1393_v56 = vmul.f32 %v1391_v36, %v4597_v0  ;;  %3527 = vmatprep.subr.bf16.mxu0 %v4940_v50  ;;  %3555 = vmatprep.subr.bf16.mxu1 %v3554_v40  ;;  %v1660_v6 = vand.u32 4294901760, %v1572_v25  ;;  %v1822_v30 = vand.u32 4294901760, %v1821_v31  ;;  %v1946_v12 = vand.u32 4294901760, %v4942_v15 }
 0x38b   : > { %v1405_v35 = vmul.f32 %v1403_v2, %v4597_v0  ;;  %v1827_v22 = vand.u32 4294901760, %v4945_v41  ;;  %v3562_v40 = vpack.c.bf16 %v4713_v42, %v4709_v29  ;;  %v1720_v31 = vand.u32 4294901760, %v1719_v39 }
 0x38c   : > { %1395 = vrot.lane.b32.xlu1 %v1393_v56, %s4066_s29  ;;  %v4957_v43 = vpack.c.bf16 %v1660_v6, %v1657_v60  ;;  %v4959_v7 = vsub.f32 %v1572_v25, %v1660_v6  ;;  %v3556_v52 = vpack.c.bf16 %v1822_v30, %v1815_v38  ;;  %v1947_v36 = vsub.f32 %v4942_v15, %v1946_v12 }
 0x38d   : > { %1407 = vrot.lane.b32.xlu0 %v1405_v35, %s4067_s30  ;;  %v1415_v32 = vpop.permute.xlu0 %1414  ;;  %v1941_v2 = vand.u32 4294901760, %v1940_v47  ;;  %v1427_v56 = vpop.permute.xlu1 %1426  ;;  %v1828_v38 = vsub.f32 %v4945_v41, %v1827_v22  ;;  %v3564_v42 = vpack.c.bf16 %v4725_v4, %v4720_v62  ;;  %v3566_v30 = vpack.c.bf16 %v4740_v34, %v4735_v10  ;;  %s5462_s30 = scalar_lea.vmem %s5521_s6, %s3286_s23 }
 0x38e   : > { %v1417_v11 = vmul.f32 %v1415_v32, %v4597_v0  ;;  %3529 = vmatpush3.bf16.msra.mxu0 %v4957_v43  ;;  %3557 = vmatpush3.bf16.msra.mxu1 %v3556_v52  ;;  %v1948_v60 = vand.u32 4294901760, %v1947_v36  ;;  %v1834_v25 = vand.u32 4294901760, %v4959_v7  ;;  %v1429_v6 = vmul.f32 %v1427_v56, %v4597_v0 }
 0x38f   : > { %3563 = vmatprep.subr.bf16.mxu0 %v3562_v40  ;;  %v3568_v32 = vpack.c.bf16 %v4755_v49, %v4750_v46  ;;  %v3570_v34 = vpack.c.bf16 %v4770_v24, %v4765_v13  ;;  %v3572_v46 = vpack.c.bf16 %v4788_v16, %v4782_v1  ;;  %v3574_v13 = vpack.c.bf16 %v4808_v14, %v4798_v54 }
 0x390   : > { %1419 = vrot.lane.b32.xlu1 %v1417_v11, %s4068_s7  ;;  %v3558_v29 = vpack.c.bf16 %v1948_v60, %v1941_v2  ;;  %v1835_v39 = vsub.f32 %v4959_v7, %v1834_v25  ;;  %v1829_v11 = vand.u32 4294901760, %v1828_v38  ;;  %v3576_v1 = vpack.c.bf16 %v4824_v58, %v4818_v45 }
 0x391   : > { %1431 = vrot.lane.b32.xlu0 %v1429_v6, %s4069_s8  ;;  %v1439_v47 = vpop.permute.xlu0 %1438  ;;  %1721 = vmatmul.mubr.f32.vlgmr.msra.gmra.mrb[0].mxu0 %v1720_v31  ;;  %v1451_v52 = vpop.permute.xlu1 %1450  ;;  %v5605_v16 = vand.u32 4294901760, %v4644_v37  ;;  %v3578_v14 = vpack.c.bf16 %v4838_v55, %v4804_v59  ;;  %v3582_v58 = vpack.c.bf16 %v4871_v44, %v4861_v51  ;;  %v3584_v51 = vpack.c.bf16 %v4889_v27, %v4874_v5  ;;  %v5608_v5 = vld [vmem:[#allocation40_spill] sm:$0xff] }
 0x392   : > { %v1441_v35 = vmul.f32 %v1439_v47, %v4597_v0  ;;  %3559 = vmatprep.subr.bf16.mxu1 %v3558_v29  ;;  %3565 = vmatpush3.bf16.msra.mxu0 %v3564_v42  ;;  %v1836_v36 = vand.u32 4294901760, %v1835_v39  ;;  %v1453_v62 = vmul.f32 %v1451_v52, %v4597_v0  ;;  %v3588_v27 = vpack.c.bf16 %v4924_v9, %v5608_v5  ;;  %v5614_v9 = vld [vmem:[#allocation38_spill] sm:$0xff] }
 0x393   : > { %3567 = vmatprep.subr.bf16.mxu0 %v3566_v30  ;;  %2088 = vmatprep.mubr.f32.mxu0 %v4644_v37  ;;  %v3580_v37 = vpack.c.bf16 %v4856_v17, %v4844_v61  ;;  %v3149_v61 = vld [vmem:[%s5520_s5] sm:$0xff]  ;;  %v3150_v17 = vld [vmem:[%s5520_s5 + $0x8] sm:$0xff] }
 0x394   : > { %1443 = vrot.lane.b32.xlu1 %v1441_v35, %s4070_s9  ;;  %v3560_v4 = vpack.c.bf16 %v1836_v36, %v1829_v11  ;;  %v3151_v44 = vmul.f32 %v4353_v33, %v3149_v61  ;;  %v5606_v30 = vld [vmem:[#allocation31_spill] sm:$0xff]  ;;  %v5607_v35 = vld [vmem:[#allocation6_spill] sm:$0xff]  ;;  %v3590_v11 = vpack.c.bf16 %v4942_v15, %v4927_v26  ;;  %v3592_v33 = vpack.c.bf16 %v4959_v7, %v4945_v41  ;;  %v5611_v36 = vld [vmem:[#allocation36_spill] sm:$0xff] }
 0x395   : > { %1455 = vrot.lane.b32.xlu0 %v1453_v62, %s4071_s10  ;;  %v1463_v10 = vpop.permute.xlu0 %1462  ;;  %v1475_v31 = vpop.permute.xlu1 %1474  ;;  %v3152_v52 = vmul.f32 %v5607_v35, %v3150_v17  ;;  %v5612_v62 = vld [vmem:[#allocation39_spill] sm:$0xff] }
 0x396   : > { %v1465_v40 = vmul.f32 %v1463_v10, %v4597_v0  ;;  %3561 = vmatpush3.bf16.msra.mxu1 %v3560_v4  ;;  %3569 = vmatpush3.bf16.msra.mxu0 %v3568_v32  ;;  %v1477_v2 = vmul.f32 %v1475_v31, %v4597_v0  ;;  %v5613_v4 = vld [vmem:[#allocation24_spill] sm:$0xff]  ;;  %v5615_v32 = vld [vmem:[#allocation42_spill] sm:$0xff]  ;;  %v5616_v10 = vld [vmem:[#allocation25_spill] sm:$0xff] }
 0x397   : > { %3571 = vmatprep.subr.bf16.mxu0 %v3570_v34  ;;  %3595 = vmatprep.subr.bf16.mxu1 %v4711_v28  ;;  %v5617_v34 = vld [vmem:[#allocation26_spill] sm:$0xff]  ;;  %v5619_v31 = vld [vmem:[#allocation27_spill] sm:$0xff] }
 0x398   : > { %1467 = vrot.lane.b32.xlu1 %v1465_v40, %s4072_s11  ;;  %v5618_v40 = vld [vmem:[#allocation23_spill] sm:$0xff] }
 0x399   : > { %1479 = vrot.lane.b32.xlu0 %v1477_v2, %s4073_s12  ;;  %v1487_v49 = vpop.permute.xlu0 %1486  ;;  %1953 = vmatmul.mubr.f32.vlgmr.msra.gmra.mrb[0].mxu1 %v4885_v53  ;;  %v1499_v56 = vpop.permute.xlu1 %1498  ;;  %v5620_v2 = vld [vmem:[#allocation28_spill] sm:$0xff] }
 0x39a   : > { %v1489_v24 = vmul.f32 %v1487_v49, %v4597_v0  ;;  %3573 = vmatpush3.bf16.msra.mxu0 %v3572_v46  ;;  %3597 = vmatpush3.bf16.msra.mxu1 %v4723_v3  ;;  %v1501_v60 = vmul.f32 %v1499_v56, %v4597_v0  ;;  %v5621_v46 = vand.u32 4294901760, %v5614_v9  ;;  %v5622_v49 = vld [vmem:[#allocation29_spill] sm:$0xff]  ;;  %v5625_v56 = vand.u32 4294901760, %v4838_v55 }
 0x39b   : > { %3575 = vmatprep.subr.bf16.mxu0 %v3574_v13  ;;  %3599 = vmatprep.subr.bf16.mxu1 %v4738_v20  ;;  %v5623_v13 = vld [vmem:[#allocation30_spill] sm:$0xff]  ;;  %v5629_v55 = vld [vmem:[#allocation41_spill] sm:$0xff] }
 0x39c   : > { %1491 = vrot.lane.b32.xlu1 %v1489_v24, %s4074_s13  ;;  %2195 = vmatprep.mubr.f32.mxu1 %v5605_v16  ;;  %v5062_v24 = vld [vmem:[%s5518_s3 + $0x8] sm:$0xff]  ;;  %v5628_v16 = vld [vmem:[#allocation37_spill] sm:$0xff] }
 0x39d   : > { %1503 = vrot.lane.b32.xlu0 %v1501_v60, %s4075_s14  ;;  %v1511_v54 = vpop.permute.xlu0 %1510  ;;  %v1523_v6 = vpop.permute.xlu1 %1522 }
 0x39e   : > { %v1513_v38 = vmul.f32 %v1511_v54, %v4597_v0  ;;  %3577 = vmatpush3.bf16.msra.mxu0 %v3576_v1  ;;  %3601 = vmatpush3.bf16.msra.mxu1 %v4753_v48  ;;  %v1525_v29 = vmul.f32 %v1523_v6, %v4597_v0  ;;  %v5626_v1 = vld [vmem:[#allocation32_spill] sm:$0xff]  ;;  %v5631_v54 = vand.u32 4294901760, %v4927_v26 }
 0x39f   : > { %3579 = vmatprep.subr.bf16.mxu0 %v3578_v14  ;;  %3603 = vmatprep.subr.bf16.mxu1 %v4768_v21 }
 0x3a0   : > { %1515 = vrot.lane.b32.xlu1 %v1513_v38, %s4076_s15 }
 0x3a1   : > { %1527 = vrot.lane.b32.xlu0 %v1525_v29, %s4077_s16  ;;  %v1535_v45 = vpop.permute.xlu0 %1534  ;;  %v1547_v39 = vpop.permute.xlu1 %1546 }
 0x3a2   : > { %v1537_v42 = vmul.f32 %v1535_v45, %v4597_v0  ;;  %3581 = vmatpush3.bf16.msra.mxu0 %v3580_v37  ;;  %3605 = vmatpush3.bf16.msra.mxu1 %v4786_v19  ;;  %v1549_v47 = vmul.f32 %v1547_v39, %v4597_v0  ;;  %v3586_v0 = vpack.c.bf16 %v4908_v23, %v4892_v18  ;;  %v5609_v18 = vld [vmem:[#allocation33_spill] sm:$0xff]  ;;  %v5610_v23 = vld [vmem:[#allocation34_spill] sm:$0xff] }
 0x3a3   : > { %3583 = vmatprep.subr.bf16.mxu0 %v3582_v58  ;;  %3607 = vmatprep.subr.bf16.mxu1 %v4806_v57 }
 0x3a4   : > { %1539 = vrot.lane.b32.xlu1 %v1537_v42, %s4078_s19 }
 0x3a5   : > { %1551 = vrot.lane.b32.xlu0 %v1549_v47, %s4079_s25 }
 0x3a6   : > { %3585 = vmatpush3.bf16.msra.mxu0 %v3584_v51  ;;  %3609 = vmatpush3.bf16.msra.mxu1 %v4822_v63 }
 0x3a7   : > { %3587 = vmatprep.subr.bf16.mxu0 %v3586_v0  ;;  %3611 = vmatprep.subr.bf16.mxu1 %v5606_v30 }
 0x3a8   : > { %3155 = vperm.xlu1 %3954, %v3151_v44  }
 0x3a9   : > { %3160 = vperm.xlu0 %3953, %v3152_v52  }
 0x3aa   : > { %3589 = vmatpush3.bf16.msra.mxu0 %v3588_v27  ;;  %3613 = vmatpush3.bf16.msra.mxu1 %v5609_v18 }
 0x3ab   : > { %3591 = vmatprep.subr.bf16.mxu0 %v3590_v11  ;;  %3615 = vmatprep.subr.bf16.mxu1 %v5610_v23 }
 0x3ae   : > { %3593 = vmatpush3.bf16.msra.mxu0 %v3592_v33  ;;  %3617 = vmatpush3.bf16.msra.mxu1 %v5611_v36 }
 0x3af   : > { %3619 = vmatprep.subr.bf16.mxu1 %v5612_v62  ;;  %3627 = vmatprep.subr.bf16.mxu0 %v5613_v4 }
 0x3b1   : > { %2091 = vmatmul.mubr.f32.vlgmr.msra.gmra.mrb[2].mxu0 %v5614_v9 }
 0x3b2   : > { %3621 = vmatpush3.bf16.msra.mxu1 %v5615_v32  ;;  %3629 = vmatpush3.bf16.msra.mxu0 %v5616_v10 }
 0x3b3   : > { %3623 = vmatprep.subr.bf16.mxu1 %v4940_v50  ;;  %3631 = vmatprep.subr.bf16.mxu0 %v5617_v34 }
 0x3b4   : > { %2365 = vmatprep.mubr.f32.mxu0 %v5618_v40 }
 0x3b6   : > { %3625 = vmatpush3.bf16.msra.mxu1 %v4957_v43  ;;  %3633 = vmatpush3.bf16.msra.mxu0 %v5619_v31 }
 0x3b7   : > { %3635 = vmatprep.subr.bf16.mxu0 %v5620_v2  ;;  %3659 = vmatprep.subr.bf16.mxu1 %v4711_v28  ;;  %v5624_v28 = vand.u32 4294901760, %v4804_v59 }
 0x3b9   : > { %2199 = vmatmul.mubr.f32.vlgmr.msra.gmra.mrb[2].mxu1 %v5621_v46  ;;  %v3642_v60 = vpack.c.bf16 %v5625_v56, %v5624_v28  ;;  %v5200_v46 = vand.u32 4294901760, %v5062_v24 }
 0x3ba   : > { %3637 = vmatpush3.bf16.msra.mxu0 %v5622_v49  ;;  %3661 = vmatpush3.bf16.msra.mxu1 %v4723_v3  ;;  %v1609_v3 = vcombine.high %v5062_v24, %v5062_v24 }
 0x3bb   : > { %3639 = vmatprep.subr.bf16.mxu0 %v5623_v13  ;;  %3663 = vmatprep.subr.bf16.mxu1 %v4738_v20  ;;  %v5627_v20 = vld [vmem:[#allocation35_spill] sm:$0xff] }
 0x3bc   : > { %2469 = vmatprep.mubr.f32.mxu1 %v5618_v40  ;;  %v1612_v59 = vsel %vm1611_vm12, %v1609_v3, 0 }
 0x3be   : > { %3641 = vmatpush3.bf16.msra.mxu0 %v5626_v1  ;;  %3665 = vmatpush3.bf16.msra.mxu1 %v4753_v48  ;;  %v5079_v48 = vand.u32 4294901760, %v1612_v59 }
 0x3bf   : > { %3643 = vmatprep.subr.bf16.mxu0 %v3642_v60  ;;  %3667 = vmatprep.subr.bf16.mxu1 %v4768_v21  ;;  %v5630_v21 = vld [vmem:[#allocation43_spill] sm:$0xff] }
 0x3c2   : > { %3645 = vmatpush3.bf16.msra.mxu0 %v5627_v20  ;;  %3669 = vmatpush3.bf16.msra.mxu1 %v4786_v19  ;;  %v3654_v19 = vpack.c.bf16 %v1946_v12, %v5631_v54 }
 0x3c3   : > { %3647 = vmatprep.subr.bf16.mxu0 %v5628_v16  ;;  %3671 = vmatprep.subr.bf16.mxu1 %v4806_v57  ;;  %v5090_v57 = vsub.f32 %v1612_v59, %v5079_v48  ;;  %v5230_v59 = vsub.f32 %v5062_v24, %v5200_v46 }
 0x3c5   : > { %v2559_v26 = vand.u32 4294901760, %v5090_v57 }
 0x3c6   : > { %3649 = vmatpush3.bf16.msra.mxu0 %v5629_v55  ;;  %3673 = vmatpush3.bf16.msra.mxu1 %v4822_v63  ;;  %v3656_v63 = vpack.c.bf16 %v1834_v25, %v1827_v22 }
 0x3c7   : > { %3651 = vmatprep.subr.bf16.mxu0 %v5630_v21  ;;  %3675 = vmatprep.subr.bf16.mxu1 %v5606_v30  ;;  %v2560_v15 = vsub.f32 %v5090_v57, %v2559_v26 }
 0x3c9   : > { %v2561_v41 = vand.u32 4294901760, %v2560_v15  ;;  %v2565_v15 = vand.u32 4294901760, %v5230_v59 }
 0x3ca   : > { %3653 = vmatpush3.bf16.msra.mxu0 %v4950_v8  ;;  %3677 = vmatpush3.bf16.msra.mxu1 %v5609_v18  ;;  %v4080_v8 = vmov 0.0|0.0  }
 0x3cb   : > { %3655 = vmatprep.subr.bf16.mxu0 %v3654_v19  ;;  %3679 = vmatprep.subr.bf16.mxu1 %v5610_v23 }
 0x3ce   : > { %3657 = vmatpush3.bf16.msra.mxu0 %v3656_v63  ;;  %3681 = vmatpush3.bf16.msra.mxu1 %v5611_v36 }
 0x3cf   : > { %3683 = vmatprep.subr.bf16.mxu1 %v5612_v62  ;;  %3762 = vmatprep.subr.bf16.mxu0 %v4080_v8 }
 0x3d1   : > { %2367 = vmatmul.mubr.f32.vlgmr.msra.gmra.mrb[4].mxu0 %v4885_v53 }
 0x3d2   : > { %3685 = vmatpush3.bf16.msra.mxu1 %v5615_v32  ;;  %2922 = vmatprep.mubr.f32.mxu0 %v2559_v26 }
 0x3d3   : > { %3687 = vmatprep.subr.bf16.mxu1 %v4940_v50 }
 0x3d6   : > { %3689 = vmatpush3.bf16.msra.mxu1 %v4957_v43 }
 0x3d7   : > { %3690 = vmatprep.subr.bf16.mxu1 %v4080_v8 }
 0x3d9   : > { %2471 = vmatmul.mubr.f32.vlgmr.msra.gmra.mrb[4].mxu1 %v4885_v53 }
 0x3da   : > { %2562 = vmatprep.mubr.f32.mxu1 %v2561_v41 }
 0x3f6   : > { %v1360_v12 = vpop.permute.xlu0 %1359 }
 0x3f7   : > { %1362 = vst.msk [vmem:[#allocation3 + $0x100] sm:$0xff] %vm962_vm10, %v1360_v12 }
 0x3fa   : > { %v1372_v22 = vpop.permute.xlu1 %1371 }
 0x3fb   : > { %v1384_v7 = vpop.permute.xlu0 %1383  ;;  %1374 = vst.msk [vmem:[#allocation3 + $0x108] sm:$0xff] %vm962_vm10, %v1372_v22 }
 0x3fc   : > { %1386 = vst.msk [vmem:[#allocation3 + $0x110] sm:$0xff] %vm962_vm10, %v1384_v7 }
 0x3fe   : > { %v1396_v25 = vpop.permute.xlu1 %1395  ;;  %v5113_v50 = vld [vmem:[#allocation3 + $0x100] sm:$0xff] }
 0x3ff   : > { %v1408_v14 = vpop.permute.xlu0 %1407  ;;  %1398 = vst.msk [vmem:[#allocation3 + $0x118] sm:$0xff] %vm962_vm10, %v1396_v25  ;;  %v2477_v6 = vand.u32 4294901760, %v5113_v50 }
 0x400   : > { %1410 = vst.msk [vmem:[#allocation3 + $0x120] sm:$0xff] %vm962_vm10, %v1408_v14 }
 0x401   : > { %v5220_v20 = vsub.f32 %v5113_v50, %v2477_v6 }
 0x402   : > { %v1420_v43 = vpop.permute.xlu1 %1419  ;;  %v5115_v53 = vld [vmem:[#allocation3 + $0x108] sm:$0xff] }
 0x403   : > { %v1432_v38 = vpop.permute.xlu0 %1431  ;;  %1422 = vst.msk [vmem:[#allocation3 + $0x128] sm:$0xff] %vm962_vm10, %v1420_v43  ;;  %v2480_v29 = vand.u32 4294901760, %v5115_v53  ;;  %v5121_v37 = vld [vmem:[#allocation3 + $0x110] sm:$0xff]  ;;  %v2576_v41 = vand.u32 4294901760, %v5220_v20 }
 0x404   : > { %1434 = vst.msk [vmem:[#allocation3 + $0x130] sm:$0xff] %vm962_vm10, %v1432_v38  ;;  %v2483_v47 = vand.u32 4294901760, %v5121_v37  ;;  %v2566_v38 = vsub.f32 %v5230_v59, %v2565_v15 }
 0x405   : > { %v5125_v45 = vpack.c.bf16 %v2480_v29, %v2477_v6  ;;  %v5205_v28 = vsub.f32 %v5115_v53, %v2480_v29  ;;  %v2577_v6 = vsub.f32 %v5220_v20, %v2576_v41 }
 0x406   : > { %v1444_v58 = vpop.permute.xlu1 %1443  ;;  %v5127_v42 = vld [vmem:[#allocation3 + $0x118] sm:$0xff]  ;;  %v5259_v12 = vsub.f32 %v5121_v37, %v2483_v47 }
 0x407   : > { %v1456_v39 = vpop.permute.xlu0 %1455  ;;  %1446 = vst.msk [vmem:[#allocation3 + $0x138] sm:$0xff] %vm962_vm10, %v1444_v58  ;;  %3692 = vmatpush1.bf16.msra.mxu1 %v5125_v45  ;;  %3764 = vmatpush1.bf16.msra.mxu0 %v5125_v45  ;;  %v2486_v61 = vand.u32 4294901760, %v5127_v42  ;;  %v5137_v51 = vld [vmem:[#allocation3 + $0x120] sm:$0xff]  ;;  %v2583_v19 = vand.u32 4294901760, %v5205_v28 }
 0x408   : > { %1458 = vst.msk [vmem:[#allocation3 + $0x140] sm:$0xff] %vm962_vm10, %v1456_v39  ;;  %3693 = vmatprep.subr.bf16.mxu1 %v4080_v8  ;;  %3765 = vmatprep.subr.bf16.mxu0 %v4080_v8  ;;  %v2489_v35 = vand.u32 4294901760, %v5137_v51  ;;  %v2590_v58 = vand.u32 4294901760, %v5259_v12 }
 0x409   : > { %v5143_v17 = vpack.c.bf16 %v2486_v61, %v2483_v47  ;;  %v5242_v63 = vsub.f32 %v5127_v42, %v2486_v61  ;;  %v2584_v14 = vsub.f32 %v5205_v28, %v2583_v19  ;;  %v4081_v47 = vmov 0.0  }
 0x40a   : > { %v1468_v0 = vpop.permute.xlu1 %1467  ;;  %v5145_v44 = vld [vmem:[#allocation3 + $0x128] sm:$0xff]  ;;  %v5287_v29 = vsub.f32 %v5137_v51, %v2489_v35 }
 0x40b   : > { %v1480_v30 = vpop.permute.xlu0 %1479  ;;  %1470 = vst.msk [vmem:[#allocation3 + $0x148] sm:$0xff] %vm962_vm10, %v1468_v0  ;;  %3695 = vmatpush1.bf16.msra.mxu1 %v5143_v17  ;;  %3767 = vmatpush1.bf16.msra.mxu0 %v5143_v17  ;;  %v2492_v52 = vand.u32 4294901760, %v5145_v44  ;;  %v5155_v5 = vld [vmem:[#allocation3 + $0x130] sm:$0xff]  ;;  %v2597_v43 = vand.u32 4294901760, %v5242_v63  ;;  %v2585_v39 = vand.u32 4294901760, %v2584_v14 }
 0x40c   : > { %1482 = vst.msk [vmem:[#allocation3 + $0x150] sm:$0xff] %vm962_vm10, %v1480_v30  ;;  %3696 = vmatprep.subr.bf16.mxu1 %v4080_v8  ;;  %3768 = vmatprep.subr.bf16.mxu0 %v4080_v8  ;;  %v2495_v33 = vand.u32 4294901760, %v5155_v5  ;;  %v2567_v30 = vand.u32 4294901760, %v2566_v38  ;;  %v5633_v38 = vld [vmem:[#allocation4_spill] sm:$0xff] }
 0x40d   : > { %v5161_v27 = vpack.c.bf16 %v2492_v52, %v2489_v35  ;;  %v5271_v50 = vsub.f32 %v5145_v44, %v2492_v52  ;;  %v2598_v61 = vsub.f32 %v5242_v63, %v2597_v43  ;;  %v2578_v35 = vand.u32 4294901760, %v2577_v6 }
 0x40e   : > { %v1492_v11 = vpop.permute.xlu1 %1491  ;;  %v5163_v18 = vld [vmem:[#allocation3 + $0x138] sm:$0xff]  ;;  %v5306_v0 = vsub.f32 %v5155_v5, %v2495_v33  ;;  %v2591_v52 = vsub.f32 %v5259_v12, %v2590_v58 }
 0x40f   : > { %v1504_v23 = vpop.permute.xlu0 %1503  ;;  %1494 = vst.msk [vmem:[#allocation3 + $0x158] sm:$0xff] %vm962_vm10, %v1492_v11  ;;  %3698 = vmatpush1.bf16.msra.mxu1 %v5161_v27  ;;  %3770 = vmatpush1.bf16.msra.mxu0 %v5161_v27  ;;  %v2498_v36 = vand.u32 4294901760, %v5163_v18  ;;  %v5173_v62 = vld [vmem:[#allocation3 + $0x140] sm:$0xff]  ;;  %v2611_v51 = vand.u32 4294901760, %v5271_v50  ;;  %v2604_v11 = vand.u32 4294901760, %v5287_v29 }
 0x410   : > { %1506 = vst.msk [vmem:[#allocation3 + $0x160] sm:$0xff] %vm962_vm10, %v1504_v23  ;;  %3699 = vmatprep.subr.bf16.mxu1 %v4080_v8  ;;  %3771 = vmatprep.subr.bf16.mxu0 %v4080_v8  ;;  %v2501_v34 = vand.u32 4294901760, %v5173_v62  ;;  %v3715_v23 = vpack.c.bf16 %v2585_v39, %v2578_v35 }
 0x411   : > { %v5179_v4 = vpack.c.bf16 %v2498_v36, %v2495_v33  ;;  %v5295_v42 = vsub.f32 %v5163_v18, %v2498_v36  ;;  %v3787_v36 = vpack.c.bf16 %v2583_v19, %v2576_v41  ;;  %v2612_v14 = vsub.f32 %v5271_v50, %v2611_v51 }
 0x412   : > { %v1516_v9 = vpop.permute.xlu1 %1515  ;;  %v5181_v32 = vld [vmem:[#allocation3 + $0x148] sm:$0xff]  ;;  %v2618_v19 = vand.u32 4294901760, %v5306_v0  ;;  %v2592_v41 = vand.u32 4294901760, %v2591_v52  ;;  %v2605_v39 = vsub.f32 %v5287_v29, %v2604_v11 }
 0x413   : > { %v1528_v10 = vpop.permute.xlu0 %1527  ;;  %1518 = vst.msk [vmem:[#allocation3 + $0x168] sm:$0xff] %vm962_vm10, %v1516_v9  ;;  %3701 = vmatpush1.bf16.msra.mxu1 %v5179_v4  ;;  %3773 = vmatpush1.bf16.msra.mxu0 %v5179_v4  ;;  %v2504_v40 = vand.u32 4294901760, %v5181_v32  ;;  %v5191_v31 = vld [vmem:[#allocation3 + $0x150] sm:$0xff]  ;;  %v2625_v9 = vand.u32 4294901760, %v5295_v42 }
 0x414   : > { %1530 = vst.msk [vmem:[#allocation3 + $0x170] sm:$0xff] %vm962_vm10, %v1528_v10  ;;  %3702 = vmatprep.subr.bf16.mxu1 %v4080_v8  ;;  %3774 = vmatprep.subr.bf16.mxu0 %v4080_v8  ;;  %v2507_v60 = vand.u32 4294901760, %v5191_v31  ;;  %v5632_v10 = vld [vmem:[#allocation5_spill] sm:$0xff] }
 0x415   : > { %v5197_v2 = vpack.c.bf16 %v2504_v40, %v2501_v34  ;;  %v5319_v5 = vsub.f32 %v5181_v32, %v2504_v40  ;;  %v5330_v32 = vsub.f32 %v5173_v62, %v2501_v34  ;;  %v3790_v62 = vpack.c.bf16 %v2597_v43, %v2590_v58 }
 0x416   : > { %v1540_v49 = vpop.permute.xlu1 %1539  ;;  %v5202_v13 = vld [vmem:[#allocation3 + $0x158] sm:$0xff]  ;;  %v2626_v34 = vsub.f32 %v5295_v42, %v2625_v9  ;;  %v2606_v43 = vand.u32 4294901760, %v2605_v39 }
 0x417   : > { %v1552_v56 = vpop.permute.xlu0 %1551  ;;  %1542 = vst.msk [vmem:[#allocation3 + $0x178] sm:$0xff] %vm962_vm10, %v1540_v49  ;;  %3704 = vmatpush1.bf16.msra.mxu1 %v5197_v2  ;;  %3776 = vmatpush1.bf16.msra.mxu0 %v5197_v2  ;;  %v2510_v1 = vand.u32 4294901760, %v5202_v13  ;;  %v5215_v3 = vld [vmem:[#allocation3 + $0x160] sm:$0xff]  ;;  %v2639_v52 = vand.u32 4294901760, %v5319_v5  ;;  %v2632_v58 = vand.u32 4294901760, %v5330_v32 }
 0x418   : > { %1554 = vst.msk [vmem:[#allocation3 + $0x180] sm:$0xff] %vm962_vm10, %v1552_v56  ;;  %3705 = vmatprep.subr.bf16.mxu1 %v4080_v8  ;;  %3777 = vmatprep.subr.bf16.mxu0 %v4080_v8  ;;  %v2513_v21 = vand.u32 4294901760, %v5215_v3  ;;  %v2599_v56 = vand.u32 4294901760, %v2598_v61 }
 0x419   : > { %v5226_v16 = vpack.c.bf16 %v2510_v1, %v2507_v60  ;;  %v5337_v61 = vsub.f32 %v5202_v13, %v2510_v1  ;;  %v5349_v13 = vsub.f32 %v5191_v31, %v2507_v60  ;;  %v2619_v1 = vsub.f32 %v5306_v0, %v2618_v19 }
 0x41a   : > { %v5232_v55 = vld [vmem:[#allocation3 + $0x168] sm:$0xff]  ;;  %v3718_v35 = vpack.c.bf16 %v2599_v56, %v2592_v41  ;;  %v2640_v56 = vsub.f32 %v5319_v5, %v2639_v52 }
 0x41b   : > { %3707 = vmatpush1.bf16.msra.mxu1 %v5226_v16  ;;  %3779 = vmatpush1.bf16.msra.mxu0 %v5226_v16  ;;  %v2516_v54 = vand.u32 4294901760, %v5232_v55  ;;  %v5246_v24 = vld [vmem:[#allocation3 + $0x170] sm:$0xff] }
 0x41c   : > { %3708 = vmatprep.subr.bf16.mxu1 %v4080_v8  ;;  %3780 = vmatprep.subr.bf16.mxu0 %v4080_v8  ;;  %v2519_v7 = vand.u32 4294901760, %v5246_v24 }
 0x41d   : > { %v5252_v26 = vpack.c.bf16 %v2516_v54, %v2513_v21  ;;  %v5359_v31 = vsub.f32 %v5232_v55, %v2516_v54  ;;  %v3796_v54 = vpack.c.bf16 %v2625_v9, %v2618_v19 }
 0x41e   : > { %v5261_v22 = vld [vmem:[#allocation3 + $0x178] sm:$0xff] }
 0x41f   : > { %3710 = vmatpush1.bf16.msra.mxu1 %v5252_v26  ;;  %3782 = vmatpush1.bf16.msra.mxu0 %v5252_v26  ;;  %v2522_v25 = vand.u32 4294901760, %v5261_v22  ;;  %v5289_v37 = vld [vmem:[#allocation3 + $0x180] sm:$0xff]  ;;  %v2667_v39 = vand.u32 4294901760, %v5359_v31 }
 0x420   : > { %3711 = vmatprep.subr.bf16.mxu1 %v4080_v8  ;;  %3783 = vmatprep.subr.bf16.mxu0 %v4080_v8  ;;  %v5309_v44 = vand.u32 4294901760, %v5289_v37 }
 0x421   : > { %v5280_v53 = vpack.c.bf16 %v2522_v25, %v2519_v7  ;;  %v5375_v41 = vsub.f32 %v5261_v22, %v2522_v25  ;;  %v3799_v22 = vpack.c.bf16 %v2639_v52, %v2632_v58 }
 0x423   : > { %3713 = vmatpush1.bf16.msra.mxu1 %v5280_v53  ;;  %3785 = vmatpush1.bf16.msra.mxu0 %v5280_v53 }
 0x424   : > { %2524 = vmatprep.subr.mxu1 %v4081_v47  ;;  %2886 = vmatprep.subr.mxu0 %v4081_v47 }
 0x427   : > { %2526 = vmatpush1.msra.mxu1 %v5309_v44  ;;  %2888 = vmatpush1.msra.mxu0 %v5309_v44  ;;  %v3156_v18 = vpop.permute.xlu1 %3155 }
 0x428   : > { %v3161_v33 = vpop.permute.xlu0 %3160  ;;  %v3163_v49 = vmul.f32 %v3156_v18, %v5632_v10  ;;  %3714 = vmatprep.subr.bf16.mxu1 %v4080_v8  ;;  %3786 = vmatprep.subr.bf16.mxu0 %v4080_v8  ;;  %v2613_v18 = vand.u32 4294901760, %v2612_v14  ;;  %v2653_v10 = vand.u32 4294901760, %v5337_v61  ;;  %v2620_v14 = vand.u32 4294901760, %v2619_v1 }
 0x429   : > { %v3164_v6 = vmul.f32 %v3161_v33, %v5633_v38  ;;  %2568 = vmatmul.mubr.f32.vlgmr.msra.gmra.mrb[6].mxu1 %v2567_v30  ;;  %2926 = vmatmul.mubr.f32.vlgmr.msra.gmra.mrb[6].mxu0 %v2565_v15  ;;  %v2627_v33 = vand.u32 4294901760, %v2626_v34  ;;  %v2646_v38 = vand.u32 4294901760, %v5349_v13  ;;  %v2681_v1 = vand.u32 4294901760, %v5375_v41 }
 0x42a   : > { %v3165_v40 = vsel %vm439_vm8, %v3163_v49, 0.0  ;;  %3716 = vmatpush1.bf16.msra.mxu1 %v3715_v23  ;;  %3788 = vmatpush1.bf16.msra.mxu0 %v3787_v36  ;;  %v3793_v36 = vpack.c.bf16 %v2611_v51, %v2604_v11  ;;  %v3721_v49 = vpack.c.bf16 %v2613_v18, %v2606_v43  ;;  %v2633_v11 = vsub.f32 %v5330_v32, %v2632_v58 }
 0x42b   : > { %v3166_v15 = vsel %vm439_vm8, %v3164_v6, 0.0  ;;  %3717 = vmatprep.subr.bf16.mxu1 %v4080_v8  ;;  %3789 = vmatprep.subr.bf16.mxu0 %v4080_v8  ;;  %v5366_v6 = vsub.f32 %v5215_v3, %v2513_v21  ;;  %v3724_v55 = vpack.c.bf16 %v2627_v33, %v2620_v14  ;;  %v2641_v21 = vand.u32 4294901760, %v2640_v56 }
 0x42c   : > { %v3167_v30 = vadd.f32 %v3166_v15, %v3165_v40  ;;  %2723 = vmatprep.mubr.f32.mxu1 %v5079_v48  ;;  %3047 = vmatprep.mubr.f32.mxu0 %v5079_v48  ;;  %v2654_v40 = vsub.f32 %v5337_v61, %v2653_v10  ;;  %v2647_v15 = vsub.f32 %v5349_v13, %v2646_v38  ;;  %v2634_v9 = vand.u32 4294901760, %v2633_v11 }
 0x42d   : > { %v2660_v19 = vand.u32 4294901760, %v5366_v6  ;;  %v2668_v18 = vsub.f32 %v5359_v31, %v2667_v39  ;;  %v3802_v58 = vpack.c.bf16 %v2653_v10, %v2646_v38 }
 0x42e   : > { %v3168_v23 = vrot.slane %v3167_v30, 4  ;;  %3719 = vmatpush1.bf16.msra.mxu1 %v3718_v35  ;;  %3791 = vmatpush1.bf16.msra.mxu0 %v3790_v62  ;;  %v5382_v62 = vsub.f32 %v5246_v24, %v2519_v7  ;;  %v2655_v25 = vand.u32 4294901760, %v2654_v40  ;;  %v3727_v35 = vpack.c.bf16 %v2641_v21, %v2634_v9 }
 0x42f   : > { %3720 = vmatprep.subr.bf16.mxu1 %v4080_v8  ;;  %3792 = vmatprep.subr.bf16.mxu0 %v4080_v8  ;;  %v2648_v24 = vand.u32 4294901760, %v2647_v15  ;;  %v2669_v33 = vand.u32 4294901760, %v2668_v18  ;;  %v3742_v15 = vpack.c.bf16 %v5242_v63, %v5259_v12 }
 0x430   : > { %v3169_v60 = vadd.f32 %v3168_v23, %v3167_v30  ;;  %v2661_v23 = vsub.f32 %v5366_v6, %v2660_v19  ;;  %v2674_v43 = vand.u32 4294901760, %v5382_v62 }
 0x431   : > { %v3730_v52 = vpack.c.bf16 %v2655_v25, %v2648_v24 }
 0x432   : > { %v3170_v51 = vrot.slane %v3169_v60, 2  ;;  %3722 = vmatpush1.bf16.msra.mxu1 %v3721_v49  ;;  %3794 = vmatpush1.bf16.msra.mxu0 %v3793_v36  ;;  %v5395_v36 = vsub.f32 %v5289_v37, %v5309_v44  ;;  %v2662_v49 = vand.u32 4294901760, %v2661_v23  ;;  %v2675_v56 = vsub.f32 %v5382_v62, %v2674_v43  ;;  %v5634_v23 = vld [vmem:[#allocation8_spill] sm:$0xff] }
 0x433   : > { %3723 = vmatprep.subr.bf16.mxu1 %v4080_v8  ;;  %3795 = vmatprep.subr.bf16.mxu0 %v4080_v8 }
 0x434   : > { %v3171_v3 = vadd.f32 %v3170_v51, %v3169_v60  ;;  %v2682_v60 = vsub.f32 %v5375_v41, %v2681_v1  ;;  %v3733_v14 = vpack.c.bf16 %v2669_v33, %v2662_v49  ;;  %v3805_v51 = vpack.c.bf16 %v2667_v39, %v2660_v19 }
 0x435   : > { %v2688_v38 = vand.u32 4294901760, %v5395_v36  ;;  %v2676_v37 = vand.u32 4294901760, %v2675_v56  ;;  %v3739_v39 = vpack.c.bf16 %v5205_v28, %v5220_v20  ;;  %v5638_v56 = vld [vmem:[#allocation11_spill] sm:$0xff] }
 0x436   : > { %v3172_v34 = vrot.slane %v3171_v3, 1  ;;  %3725 = vmatpush1.bf16.msra.mxu1 %v3724_v55  ;;  %3797 = vmatpush1.bf16.msra.mxu0 %v3796_v54  ;;  %v2683_v10 = vand.u32 4294901760, %v2682_v60  ;;  %v3808_v55 = vpack.c.bf16 %v2681_v1, %v2674_v43  ;;  %v5637_v60 = vld [vmem:[#allocation10_spill] sm:$0xff] }
 0x437   : > { %3726 = vmatprep.subr.bf16.mxu1 %v4080_v8  ;;  %3798 = vmatprep.subr.bf16.mxu0 %v4080_v8  ;;  %v2689_v54 = vsub.f32 %v5395_v36, %v2688_v38 }
 0x438   : > { %v3173_v30 = vadd.f32 %v3172_v34, %v3171_v3  ;;  %v3736_v11 = vpack.c.bf16 %v2683_v10, %v2676_v37 }
 0x439   : > { %v2690_v21 = vand.u32 4294901760, %v2689_v54  ;;  %v5642_v54 = vld [vmem:[#allocation14_spill] sm:$0xff] }
 0x43a   : > { %v3283_v7 = vmul.f32 -1.442695, %v3173_v30  ;;  %3728 = vmatpush1.bf16.msra.mxu1 %v3727_v35  ;;  %3800 = vmatpush1.bf16.msra.mxu0 %v3799_v22 }
 0x43b   : > { %3729 = vmatprep.subr.bf16.mxu1 %v4080_v8  ;;  %3801 = vmatprep.subr.bf16.mxu0 %v4080_v8 }
 0x43c   : > { %3965 = vpow2.f32 %v3283_v7 }
 0x43e   : > { %3731 = vmatpush1.bf16.msra.mxu1 %v3730_v52  ;;  %3803 = vmatpush1.bf16.msra.mxu0 %v3802_v58  ;;  %v5635_v52 = vld [vmem:[#allocation7_spill] sm:$0xff] }
 0x43f   : > { %3732 = vmatprep.subr.bf16.mxu1 %v4080_v8  ;;  %3804 = vmatprep.subr.bf16.mxu0 %v4080_v8 }
 0x442   : > { %3734 = vmatpush1.bf16.msra.mxu1 %v3733_v14  ;;  %3806 = vmatpush1.bf16.msra.mxu0 %v3805_v51  ;;  %v5639_v51 = vld [vmem:[#allocation12_spill] sm:$0xff] }
 0x443   : > { %3735 = vmatprep.subr.bf16.mxu1 %v4080_v8  ;;  %3807 = vmatprep.subr.bf16.mxu0 %v4080_v8 }
 0x446   : > { %v3966_v40 = vpop.eup %3965  ;;  %3737 = vmatpush1.bf16.msra.mxu1 %v3736_v11  ;;  %3809 = vmatpush1.bf16.msra.mxu0 %v3808_v55  ;;  %v5641_v11 = vld [vmem:[#allocation15_spill] sm:$0xff] }
 0x447   : > { %v3177_v3 = vadd.f32 1.0, %v3966_v40  ;;  %2685 = vmatprep.subr.mxu1 %v4081_v47  ;;  %3011 = vmatprep.subr.mxu0 %v4081_v47 }
 0x449   : > { %3967 = vrcp.f32 %v3177_v3  ;;  %v5643_v3 = vld [vmem:[#allocation16_spill] sm:$0xff] }
 0x44a   : > { %2691 = vmatpush1.msra.mxu1 %v2690_v21  ;;  %3015 = vmatpush1.msra.mxu0 %v2688_v38  ;;  %v5640_v38 = vld [vmem:[#allocation13_spill] sm:$0xff] }
 0x44b   : > { %3738 = vmatprep.subr.bf16.mxu1 %v4080_v8  ;;  %3810 = vmatprep.subr.bf16.mxu0 %v4080_v8 }
 0x44c   : > { %2725 = vmatmul.mubr.f32.vlgmr.msra.gmra.mrb[6].mxu1 %v5200_v46  ;;  %3049 = vmatmul.mubr.f32.vlgmr.msra.gmra.mrb[6].mxu0 %v5200_v46 }
 0x44d   : > { %3740 = vmatpush1.bf16.msra.mxu1 %v3739_v39  ;;  %3812 = vmatpush1.bf16.msra.mxu0 %v5125_v45  ;;  %v3745_v45 = vpack.c.bf16 %v5271_v50, %v5287_v29  ;;  %v5644_v39 = vld [vmem:[#allocation18_spill] sm:$0xff] }
 0x44e   : > { %3741 = vmatprep.subr.bf16.mxu1 %v4080_v8  ;;  %3813 = vmatprep.subr.bf16.mxu0 %v4080_v8 }
 0x44f   : > { %2830 = vmatprep.mubr.f32.mxu1 %v5090_v57  ;;  %3136 = vmatprep.mubr.f32.mxu0 %v5079_v48  ;;  %v3748_v48 = vpack.c.bf16 %v5295_v42, %v5306_v0  ;;  %v3751_v57 = vpack.c.bf16 %v5319_v5, %v5330_v32 }
 0x451   : > { %3743 = vmatpush1.bf16.msra.mxu1 %v3742_v15  ;;  %3815 = vmatpush1.bf16.msra.mxu0 %v5143_v17  ;;  %v3754_v17 = vpack.c.bf16 %v5337_v61, %v5349_v13 }
 0x452   : > { %3744 = vmatprep.subr.bf16.mxu1 %v4080_v8  ;;  %3816 = vmatprep.subr.bf16.mxu0 %v4080_v8 }
 0x453   : > { %v3968_v28 = vpop.eup %3967 }
 0x454   : > { %3181 = vbcast.lane.b32.xlu1 %v3968_v28, 256  ;;  %v5645_v28 = vld [vmem:[#allocation17_spill] sm:$0xff] }
 0x455   : > { %3746 = vmatpush1.bf16.msra.mxu1 %v3745_v45  ;;  %3818 = vmatpush1.bf16.msra.mxu0 %v5161_v27  ;;  %v3757_v27 = vpack.c.bf16 %v5359_v31, %v5366_v6 }
 0x456   : > { %3747 = vmatprep.subr.bf16.mxu1 %v4080_v8  ;;  %3819 = vmatprep.subr.bf16.mxu0 %v4080_v8 }
 0x459   : > { %3749 = vmatpush1.bf16.msra.mxu1 %v3748_v48  ;;  %3821 = vmatpush1.bf16.msra.mxu0 %v5179_v4  ;;  %v5646_v48 = vld [vmem:[#allocation19_spill] sm:$0xff] }
 0x45a   : > { %3750 = vmatprep.subr.bf16.mxu1 %v4080_v8  ;;  %3822 = vmatprep.subr.bf16.mxu0 %v4080_v8 }
 0x45d   : > { %3752 = vmatpush1.bf16.msra.mxu1 %v3751_v57  ;;  %3824 = vmatpush1.bf16.msra.mxu0 %v5197_v2 }
 0x45e   : > { %3753 = vmatprep.subr.bf16.mxu1 %v4080_v8  ;;  %3825 = vmatprep.subr.bf16.mxu0 %v4080_v8 }
 0x461   : > { %3755 = vmatpush1.bf16.msra.mxu1 %v3754_v17  ;;  %3827 = vmatpush1.bf16.msra.mxu0 %v5226_v16  ;;  %v3760_v16 = vpack.c.bf16 %v5375_v41, %v5382_v62  ;;  %v5647_v17 = vld [vmem:[#allocation20_spill] sm:$0xff] }
 0x462   : > { %3756 = vmatprep.subr.bf16.mxu1 %v4080_v8  ;;  %3828 = vmatprep.subr.bf16.mxu0 %v4080_v8 }
 0x464   : > { %v3320_v4 = vpop.f32.mrb[0].mxu0 }
 0x465   : > { %3758 = vmatpush1.bf16.msra.mxu1 %v3757_v27  ;;  %3830 = vmatpush1.bf16.msra.mxu0 %v5252_v26  ;;  %v3321_v2 = vpop.f32.mrb[1].mxu0 }
 0x466   : > { %3759 = vmatprep.subr.bf16.mxu1 %v4080_v8  ;;  %3831 = vmatprep.subr.bf16.mxu0 %v4080_v8  ;;  %v3322_v20 = vadd.f32 %v3321_v2, %v3320_v4  ;;  %v5648_v4 = vld [vmem:[#allocation22_spill] sm:$0xff] }
 0x469   : > { %3761 = vmatpush1.bf16.msra.mxu1 %v3760_v16  ;;  %3833 = vmatpush1.bf16.msra.mxu0 %v5280_v53 }
 0x46a   : > { %2794 = vmatprep.subr.mxu1 %v4081_v47  ;;  %3102 = vmatprep.subr.mxu0 %v4081_v47 }
 0x46c   : > { %v3355_v63 = vpop.f32.mrb[0].mxu1 }
 0x46d   : > { %2797 = vmatpush1.msra.mxu1 %v5395_v36  ;;  %3104 = vmatpush1.msra.mxu0 %v5309_v44  ;;  %v3356_v26 = vpop.f32.mrb[1].mxu1  ;;  %v5636_v36 = vld [vmem:[#allocation9_spill] sm:$0xff] }
 0x46e   : > { %2833 = vmatmul.mubr.f32.vlgmr.msra.gmra.mrb[6].mxu1 %v5230_v59  ;;  %3138 = vmatmul.mubr.f32.vlgmr.msra.gmra.mrb[6].mxu0 %v5200_v46  ;;  %v3357_v8 = vadd.f32 %v3356_v26, %v3355_v63 }
 0x470   : > { %v1955_v12 = vadd.f32 %v3357_v8, %v3322_v20  ;;  %v5649_v20 = vld [vmem:[#allocation21_spill] sm:$0xff] }
 0x484   : > { %v3390_v50 = vpop.f32.mrb[2].mxu0 }
 0x485   : > { %v3391_v29 = vpop.f32.mrb[3].mxu0 }
 0x486   : > { %v3392_v42 = vadd.f32 %v3391_v29, %v3390_v50 }
 0x488   : > { %v2093_v53 = vadd.f32 %v3392_v42, %v1955_v12 }
 0x48c   : > { %v3425_v0 = vpop.f32.mrb[2].mxu1 }
 0x48d   : > { %v3426_v5 = vpop.f32.mrb[3].mxu1 }
 0x48e   : > { %v3427_v32 = vadd.f32 %v3426_v5, %v3425_v0 }
 0x490   : > { %v2201_v47 = vadd.f32 %v3427_v32, %v2093_v53 }
 0x4a4   : > { %v3460_v61 = vpop.f32.mrb[4].mxu0 }
 0x4a5   : > { %v3461_v13 = vpop.f32.mrb[5].mxu0 }
 0x4a6   : > { %v3462_v31 = vadd.f32 %v3461_v13, %v3460_v61 }
 0x4a8   : > { %v2369_v6 = vadd.f32 %v3462_v31, %v2201_v47 }
 0x4ac   : > { %v3495_v44 = vpop.f32.mrb[4].mxu1 }
 0x4ad   : > { %v3496_v41 = vpop.f32.mrb[5].mxu1 }
 0x4ae   : > { %v3497_v62 = vadd.f32 %v3496_v41, %v3495_v44 }
 0x4b0   : > { %v2473_v59 = vadd.f32 %v3497_v62, %v2369_v6 }
 0x4c6   : > { %v3182_v24 = vpop.permute.xlu1 %3181 }
 0x541   : > { %v2834_v46 = vpop.f32.mrb[6].mxu1  ;;  %v3139_v34 = vpop.f32.mrb[6].mxu0 }
 0x542   : > { %v3834_v9 = vadd.f32 %v2834_v46, %v2473_v59  ;;  %v2836_v19 = vpop.f32.mrb[7].mxu1  ;;  %v3141_v22 = vpop.f32.mrb[7].mxu0 }
 0x544   : > { %v3835_v25 = vadd.f32 %v3834_v9, %v3139_v34 }
 0x546   : > { %v3282_v30 = vmul.f32 -1.442695, %v3835_v25 }
 0x548   : > { %3969 = vpow2.f32 %v3282_v30 }
 0x552   : > { %v3970_v35 = vpop.eup %3969 }
 0x553   : > { %v3146_v18 = vadd.f32 1.0, %v3970_v35 }
 0x555   : > { %3971 = vrcp.f32 %v3146_v18 }
 0x55f   : > { %v3972_v1 = vpop.eup %3971 }
 0x560   : > { %v3183_v7 = vadd.f32 %v3972_v1, %v3182_v24 }
 0x562   : > { %v3184_v43 = vmul.f32 %v3183_v7, %v5634_v23  ;;  %v3185_v58 = vmul.f32 %v3183_v7, %v5635_v52  ;;  %v3186_v33 = vmul.f32 %v3183_v7, %v5636_v36  ;;  %v3187_v49 = vmul.f32 %v3183_v7, %v5637_v60 }
 0x563   : > { %v3188_v14 = vmul.f32 %v3183_v7, %v5638_v56  ;;  %v3189_v10 = vmul.f32 %v3183_v7, %v5639_v51  ;;  %v3190_v37 = vmul.f32 %v3183_v7, %v5640_v38  ;;  %v3191_v55 = vmul.f32 %v3183_v7, %v5641_v11 }
 0x564   : > { %v3192_v40 = vmul.f32 %v3183_v7, %v5642_v54  ;;  %v3193_v21 = vmul.f32 %v3183_v7, %v5643_v3  ;;  %v3194_v15 = vmul.f32 %v3183_v7, %v5644_v39  ;;  %v3195_v45 = vmul.f32 %v3183_v7, %v5645_v28  ;;  %3200 = vst.msk [vmem:[%s5462_s30] sm:$0xf] %vm268_vm0, %v3184_v43 }
 0x565   : > { %3201 = vst.msk [vmem:[%s5462_s30 + $0x4] sm:$0xf] %vm268_vm0, %v3185_v58  ;;  %3202 = vst.msk [vmem:[%s5462_s30 + $0x8] sm:$0xf] %vm268_vm0, %v3186_v33  ;;  %v3196_v57 = vmul.f32 %v3183_v7, %v5646_v48  ;;  %v3197_v27 = vmul.f32 %v3183_v7, %v5647_v17  ;;  %v3198_v2 = vmul.f32 %v3183_v7, %v5648_v4 }
 0x566   : > { %3203 = vst.msk [vmem:[%s5462_s30 + $0xc] sm:$0xf] %vm268_vm0, %v3187_v49  ;;  %v3199_v16 = vmul.f32 %v3183_v7, %v5649_v20  ;;  %3204 = vst.msk [vmem:[%s5462_s30 + $0x10] sm:$0xf] %vm268_vm0, %v3188_v14 }
 0x567   : > { %3205 = vst.msk [vmem:[%s5462_s30 + $0x14] sm:$0xf] %vm268_vm0, %v3189_v10  ;;  %3206 = vst.msk [vmem:[%s5462_s30 + $0x18] sm:$0xf] %vm268_vm0, %v3190_v37 }
 0x568   : > { %3207 = vst.msk [vmem:[%s5462_s30 + $0x1c] sm:$0xf] %vm268_vm0, %v3191_v55  ;;  %3208 = vst.msk [vmem:[%s5462_s30 + $0x20] sm:$0xf] %vm268_vm0, %v3192_v40 }
 0x569   : > { %3209 = vst.msk [vmem:[%s5462_s30 + $0x24] sm:$0xf] %vm268_vm0, %v3193_v21  ;;  %3210 = vst.msk [vmem:[%s5462_s30 + $0x28] sm:$0xf] %vm268_vm0, %v3194_v15 }
 0x56a   : > { %3211 = vst.msk [vmem:[%s5462_s30 + $0x2c] sm:$0xf] %vm268_vm0, %v3195_v45  ;;  %3212 = vst.msk [vmem:[%s5462_s30 + $0x30] sm:$0xf] %vm268_vm0, %v3196_v57 }
 0x56b   : > { %3213 = vst.msk [vmem:[%s5462_s30 + $0x34] sm:$0xf] %vm268_vm0, %v3197_v27  ;;  %3214 = vst.msk [vmem:[%s5462_s30 + $0x38] sm:$0xf] %vm268_vm0, %v3198_v2 }
 0x56c   : > { %3215 = vst.msk [vmem:[%s5462_s30 + $0x3c] sm:$0xf] %vm268_vm0, %v3199_v16 }
 0x56d PF: > { %s16_s21 = sadd.s32 1, %s3979_s21  }
 0x56e   : > { %p13_p4 = scmp.ge.s32.totalorder %s16_s21, 4  }
 0x570   :  { %15 = sbr.rel (!%p13_p4) target bundleno = 1 (0x1), region = 74 }

// kernel: mask_encoder.9
= control target key start
LH: loop header
LB: loop body
LE: loop exit
PB: predicated region body
PF: predicated region fallthrough
CT: control target
= control target key end

     0   :  { %s1171_s12 = smov 0   ;;  %s1302_s0 = inlined_call_operand.vmem [shape: f32[2,64,64], index: 0, kind: input, shape index: {}]   ;;  %s1303_s1 = inlined_call_operand.vmem [shape: f32[16,64], index: 1, kind: input, shape index: {}]   ;;  %s1304_s2 = inlined_call_operand.vmem [shape: f32[16,1], index: 2, kind: input, shape index: {}]   ;;  %s1305_s3 = inlined_call_operand.vmem [shape: f32[2,16,64], index: 3, kind: output, shape index: {}]  }
   0x1 LB: > { %s837_s13 = sadd.s32 4294967295, %s1148_s12   ;;  %p841_p0 = scmp.ge.s32.totalorder %s1148_s12, 1  ;;  %s1148_s12 = sphi %s1171_s12, %s13_s12  }
   0x2   : > { %p137_p1 = scmp.lt.s32.totalorder %s1148_s12, 3 }
   0x4   : > { %p138_p2 = pnand %p841_p0, %p137_p1 }
   0x5   : > { %p161_p3 = scmp.lt.s32.totalorder (!%p138_p2), %s837_s13, 1  ;;  %v171_v0 = vld [vmem:[%s1303_s1] sm:$0xff] (!%p138_p2)  ;;  %vm193_vm0 = vcmask (!%p138_p2), 523264   ;;  %v172_v1 = vld [vmem:[%s1303_s1 + $0x8] sm:$0xff] (!%p138_p2)  ;;  %v1150_v4 = vmov (!%p138_p2), 0  }
   0x6   : > { %141 = sbr.rel (%p138_p2) target bundleno = 287 (0x11f), region = 32  ;;  %v181_v2 = vld [vmem:[%s1304_s2] sm:$0xff] (!%p138_p2)  ;;  %v195_v3 = vsel (!%p138_p2), %vm193_vm0, %v171_v0, 0  ;;  %1141 = vset.pattern.permute.xlu0 (!%p138_p2), %v1150_v4  ;;  %v198_v6 = vsel (!%p138_p2), %vm193_vm0, %v172_v1, 0  ;;  %v182_v7 = vld [vmem:[%s1304_s2 + $0x8] sm:$0xff] (!%p138_p2) }
   0x7   : > { %v1191_v5 = vand.u32 (!%p138_p2), 4294901760, %v195_v3  ;;  %185 = vperm.xlu0 (!%p138_p2), %1141, %v181_v2   ;;  %v1205_v13 = vand.u32 (!%p138_p2), 4294901760, %v198_v6 }
   0x9   : > { %v1199_v8 = vsub.f32 (!%p138_p2), %v195_v3, %v1191_v5  ;;  %v1220_v33 = vsub.f32 (!%p138_p2), %v198_v6, %v1205_v13 }
   0xb   : > { %v275_v12 = vand.u32 (!%p138_p2), 4294901760, %v1199_v8  ;;  %190 = vperm.xlu0 (!%p138_p2), %1141, %v182_v7   ;;  %v285_v45 = vand.u32 (!%p138_p2), 4294901760, %v1220_v33 }
   0xd   : > { %s1307_s13 = smov (!%p161_p3, %s837_s13), 1  ;;  %v276_v22 = vsub.f32 %v1199_v8, %v275_v12  ;;  %983 = vmatprep.mubr.f32.mxu0 %v275_v12  ;;  %v286_v55 = vsub.f32 %v1220_v33, %v285_v45 }
   0xe   : > { %s848_s22 = sshll.u32 %s1307_s13, 6  ;;  %s849_s26 = sshll.u32 %s1307_s13, 4 }
   0xf   : > { %s165_s25 = scalar_lea.vmem %s1302_s0, %s848_s22  ;;  %v277_v29 = vand.u32 4294901760, %v276_v22  ;;  %v287_v0 = vand.u32 4294901760, %v286_v55  ;;  %s170_s29 = scalar_lea.vmem %s1305_s3, %s849_s26 }
  0x10   : > { %v173_v9 = vld [vmem:[%s165_s25] sm:$0xff]  ;;  %v174_v10 = vld [vmem:[%s165_s25 + $0x8] sm:$0xff]  ;;  %v175_v11 = vld [vmem:[%s165_s25 + $0x10] sm:$0xff] }
  0x11   : > { %v201_v14 = vand.u32 4294901760, %v173_v9  ;;  %v204_v15 = vand.u32 4294901760, %v174_v10  ;;  %v176_v16 = vld [vmem:[%s165_s25 + $0x18] sm:$0xff]  ;;  %v207_v17 = vand.u32 4294901760, %v175_v11  ;;  %v177_v18 = vld [vmem:[%s165_s25 + $0x20] sm:$0xff]  ;;  %v178_v19 = vld [vmem:[%s165_s25 + $0x28] sm:$0xff]  ;;  %926 = vmatprep.mubr.f32.mxu1 %v277_v29 }
  0x12   : > { %v210_v20 = vand.u32 4294901760, %v176_v16  ;;  %v179_v21 = vld [vmem:[%s165_s25 + $0x30] sm:$0xff]  ;;  %v213_v24 = vand.u32 4294901760, %v177_v18  ;;  %v216_v25 = vand.u32 4294901760, %v178_v19  ;;  %v180_v26 = vld [vmem:[%s165_s25 + $0x38] sm:$0xff] }
  0x13   : > { %v1208_v23 = vpack.c.bf16 %v204_v15, %v201_v14  ;;  %v1210_v27 = vsub.f32 %v173_v9, %v201_v14  ;;  %v1214_v30 = vsub.f32 %v174_v10, %v204_v15  ;;  %v219_v31 = vand.u32 4294901760, %v179_v21 }
  0x14   : > { %v1212_v28 = vpack.c.bf16 %v210_v20, %v207_v17  ;;  %v1222_v34 = vsub.f32 %v175_v11, %v207_v17  ;;  %v222_v35 = vand.u32 4294901760, %v180_v26  ;;  %v1227_v37 = vsub.f32 %v176_v16, %v210_v20 }
  0x15   : > { %1025 = vmatprep.subr.bf16.mxu1 %v1208_v23  ;;  %1073 = vmatprep.subr.bf16.mxu0 %v1208_v23  ;;  %v296_v32 = vand.u32 4294901760, %v1210_v27  ;;  %v303_v36 = vand.u32 4294901760, %v1214_v30  ;;  %v1229_v38 = vsub.f32 %v177_v18, %v213_v24  ;;  %v1233_v39 = vpack.c.bf16 %v216_v25, %v213_v24 }
  0x16   : > { %1027 = vmatpush3.bf16.msra.mxu1 %v1208_v23  ;;  %1075 = vmatpush3.bf16.msra.mxu0 %v1208_v23  ;;  %v310_v41 = vand.u32 4294901760, %v1222_v34  ;;  %v1237_v42 = vsub.f32 %v178_v19, %v216_v25  ;;  %v317_v44 = vand.u32 4294901760, %v1227_v37  ;;  %v1244_v46 = vpack.c.bf16 %v222_v35, %v219_v31 }
  0x17   : > { %1029 = vmatprep.subr.bf16.mxu1 %v1212_v28  ;;  %1077 = vmatprep.subr.bf16.mxu0 %v1212_v28  ;;  %v297_v40 = vsub.f32 %v1210_v27, %v296_v32  ;;  %v304_v43 = vsub.f32 %v1214_v30, %v303_v36  ;;  %v324_v48 = vand.u32 4294901760, %v1229_v38  ;;  %v1248_v49 = vsub.f32 %v179_v21, %v219_v31 }
  0x18   : > { %v311_v47 = vsub.f32 %v1222_v34, %v310_v41  ;;  %v318_v52 = vsub.f32 %v1227_v37, %v317_v44  ;;  %v331_v53 = vand.u32 4294901760, %v1237_v42  ;;  %v1254_v54 = vsub.f32 %v180_v26, %v222_v35 }
  0x19   : > { %v298_v50 = vand.u32 4294901760, %v297_v40  ;;  %v305_v51 = vand.u32 4294901760, %v304_v43  ;;  %v1088_v56 = vpack.c.bf16 %v303_v36, %v296_v32  ;;  %v325_v58 = vsub.f32 %v1229_v38, %v324_v48 }
  0x1a   : > { %1031 = vmatpush3.bf16.msra.mxu1 %v1212_v28  ;;  %1079 = vmatpush3.bf16.msra.mxu0 %v1212_v28  ;;  %v312_v57 = vand.u32 4294901760, %v311_v47  ;;  %v338_v59 = vand.u32 4294901760, %v1248_v49  ;;  %v319_v61 = vand.u32 4294901760, %v318_v52  ;;  %v332_v62 = vsub.f32 %v1237_v42, %v331_v53 }
  0x1b   : > { %1033 = vmatprep.subr.bf16.mxu1 %v1233_v39  ;;  %1081 = vmatprep.subr.bf16.mxu0 %v1233_v39  ;;  %v1040_v60 = vpack.c.bf16 %v305_v51, %v298_v50  ;;  %v345_v63 = vand.u32 4294901760, %v1254_v54  ;;  %v1092_v1 = vpack.c.bf16 %v317_v44, %v310_v41  ;;  %v326_v4 = vand.u32 4294901760, %v325_v58 }
  0x1c   : > { %v339_v2 = vsub.f32 %v1248_v49, %v338_v59  ;;  %v1044_v3 = vpack.c.bf16 %v319_v61, %v312_v57  ;;  %v333_v6 = vand.u32 4294901760, %v332_v62  ;;  %v1096_v10 = vpack.c.bf16 %v331_v53, %v324_v48 }
  0x1d   : > { %v346_v7 = vsub.f32 %v1254_v54, %v345_v63  ;;  %v1100_v15 = vpack.c.bf16 %v345_v63, %v338_v59  ;;  %v1056_v16 = vpack.c.bf16 %v1214_v30, %v1210_v27  ;;  %v1060_v17 = vpack.c.bf16 %v1227_v37, %v1222_v34 }
  0x1e   : > { %1035 = vmatpush3.bf16.msra.mxu1 %v1233_v39  ;;  %1083 = vmatpush3.bf16.msra.mxu0 %v1233_v39  ;;  %v1048_v9 = vpack.c.bf16 %v333_v6, %v326_v4  ;;  %v340_v11 = vand.u32 4294901760, %v339_v2  ;;  %v1064_v18 = vpack.c.bf16 %v1237_v42, %v1229_v38  ;;  %v1068_v19 = vpack.c.bf16 %v1254_v54, %v1248_v49 }
  0x1f   : > { %1037 = vmatprep.subr.bf16.mxu1 %v1244_v46  ;;  %1085 = vmatprep.subr.bf16.mxu0 %v1244_v46  ;;  %v347_v12 = vand.u32 4294901760, %v346_v7 }
  0x21   : > { %v1052_v14 = vpack.c.bf16 %v347_v12, %v340_v11 }
  0x22   : > { %1039 = vmatpush3.bf16.msra.mxu1 %v1244_v46  ;;  %1087 = vmatpush3.bf16.msra.mxu0 %v1244_v46 }
  0x23   : > { %1041 = vmatprep.subr.bf16.mxu1 %v1040_v60  ;;  %1089 = vmatprep.subr.bf16.mxu0 %v1088_v56 }
  0x25   : > { %927 = vmatmul.mubr.f32.vlgmr.msra.gmra.mrb[0].mxu1 %v287_v0  ;;  %984 = vmatmul.mubr.f32.vlgmr.msra.gmra.mrb[0].mxu0 %v285_v45 }
  0x26   : > { %1043 = vmatpush3.bf16.msra.mxu1 %v1040_v60  ;;  %1091 = vmatpush3.bf16.msra.mxu0 %v1088_v56 }
  0x27   : > { %1045 = vmatprep.subr.bf16.mxu1 %v1044_v3  ;;  %1093 = vmatprep.subr.bf16.mxu0 %v1092_v1 }
  0x28   : > { %945 = vmatprep.mubr.f32.mxu1 %v1191_v5  ;;  %1002 = vmatprep.mubr.f32.mxu0 %v1191_v5 }
  0x2a   : > { %1047 = vmatpush3.bf16.msra.mxu1 %v1044_v3  ;;  %1095 = vmatpush3.bf16.msra.mxu0 %v1092_v1 }
  0x2b   : > { %1049 = vmatprep.subr.bf16.mxu1 %v1048_v9  ;;  %1097 = vmatprep.subr.bf16.mxu0 %v1096_v10 }
  0x2e   : > { %1051 = vmatpush3.bf16.msra.mxu1 %v1048_v9  ;;  %1099 = vmatpush3.bf16.msra.mxu0 %v1096_v10 }
  0x2f   : > { %1053 = vmatprep.subr.bf16.mxu1 %v1052_v14  ;;  %1101 = vmatprep.subr.bf16.mxu0 %v1100_v15 }
  0x32   : > { %1055 = vmatpush3.bf16.msra.mxu1 %v1052_v14  ;;  %1103 = vmatpush3.bf16.msra.mxu0 %v1100_v15 }
  0x33   : > { %1057 = vmatprep.subr.bf16.mxu1 %v1056_v16  ;;  %1105 = vmatprep.subr.bf16.mxu0 %v1208_v23 }
  0x35   : > { %946 = vmatmul.mubr.f32.vlgmr.msra.gmra.mrb[0].mxu1 %v1205_v13  ;;  %1003 = vmatmul.mubr.f32.vlgmr.msra.gmra.mrb[0].mxu0 %v1205_v13 }
  0x36   : > { %1059 = vmatpush3.bf16.msra.mxu1 %v1056_v16  ;;  %1107 = vmatpush3.bf16.msra.mxu0 %v1208_v23 }
  0x37   : > { %1061 = vmatprep.subr.bf16.mxu1 %v1060_v17  ;;  %1109 = vmatprep.subr.bf16.mxu0 %v1212_v28 }
  0x38   : > { %964 = vmatprep.mubr.f32.mxu1 %v1199_v8  ;;  %1021 = vmatprep.mubr.f32.mxu0 %v1191_v5 }
  0x3a   : > { %1063 = vmatpush3.bf16.msra.mxu1 %v1060_v17  ;;  %1111 = vmatpush3.bf16.msra.mxu0 %v1212_v28 }
  0x3b   : > { %1065 = vmatprep.subr.bf16.mxu1 %v1064_v18  ;;  %1113 = vmatprep.subr.bf16.mxu0 %v1233_v39 }
  0x3e   : > { %1067 = vmatpush3.bf16.msra.mxu1 %v1064_v18  ;;  %1115 = vmatpush3.bf16.msra.mxu0 %v1233_v39 }
  0x3f   : > { %1069 = vmatprep.subr.bf16.mxu1 %v1068_v19  ;;  %1117 = vmatprep.subr.bf16.mxu0 %v1244_v46 }
  0x42   : > { %1071 = vmatpush3.bf16.msra.mxu1 %v1068_v19  ;;  %1119 = vmatpush3.bf16.msra.mxu0 %v1244_v46 }
  0x45   : > { %965 = vmatmul.mubr.f32.vlgmr.msra.gmra.mrb[0].mxu1 %v1220_v33  ;;  %1022 = vmatmul.mubr.f32.vlgmr.msra.gmra.mrb[0].mxu0 %v1205_v13 }
  0x86   : > { %v186_v5 = vpop.permute.xlu0 %185 }
  0x8a   : > { %v191_v8 = vpop.permute.xlu0 %190 }
 0x118   : > { %v966_v20 = vpop.f32.mrb[0].mxu1  ;;  %v1023_v21 = vpop.f32.mrb[0].mxu0 }
 0x119   : > { %v1120_v22 = vadd.f32 %v966_v20, %v191_v8  ;;  %v494_v23 = vpop.f32.mrb[1].mxu1  ;;  %v770_v24 = vpop.f32.mrb[1].mxu0 }
 0x11a   : > { %v1122_v25 = vadd.f32 %v494_v23, %v186_v5 }
 0x11b   : > { %v1121_v26 = vadd.f32 %v1120_v22, %v1023_v21 }
 0x11c   : > { %v1123_v27 = vadd.f32 %v1122_v25, %v770_v24 }
 0x11d   : > { %781 = vst.msk [vmem:[%s170_s29 + $0x8] sm:$0xff] %vm193_vm0, %v1121_v26 }
 0x11e   : > { %780 = vst.msk [vmem:[%s170_s29] sm:$0xff] %vm193_vm0, %v1123_v27 }
 0x11f PF: > { %s13_s12 = sadd.s32 1, %s1148_s12  }
 0x120   : > { %p10_p4 = scmp.ge.s32.totalorder %s13_s12, 4  }
 0x122   :  { %12 = sbr.rel (!%p10_p4) target bundleno = 1 (0x1), region = 62 }

// kernel: mask_encoder.10
= control target key start
LH: loop header
LB: loop body
LE: loop exit
PB: predicated region body
PF: predicated region fallthrough
CT: control target
= control target key end

     0   :  { %s1323_s12 = smov 0   ;;  %s1492_s0 = inlined_call_operand.vmem [shape: f32[2,64,16], index: 0, kind: input, shape index: {}]   ;;  %s1493_s1 = inlined_call_operand.vmem [shape: f32[32,64], index: 1, kind: input, shape index: {}]   ;;  %s1494_s2 = inlined_call_operand.vmem [shape: f32[32,1], index: 2, kind: input, shape index: {}]   ;;  %s1495_s3 = inlined_call_operand.vmem [shape: f32[2,32,16], index: 3, kind: output, shape index: {}]  }
   0x1 LB: > { %s946_s13 = sadd.s32 4294967295, %s1300_s12   ;;  %p950_p0 = scmp.ge.s32.totalorder %s1300_s12, 1  ;;  %s1300_s12 = sphi %s1323_s12, %s13_s12  }
   0x2   : > { %p137_p1 = scmp.lt.s32.totalorder %s1300_s12, 3 }
   0x4   : > { %p138_p2 = pnand %p950_p0, %p137_p1 }
   0x5   : > { %p161_p3 = scmp.lt.s32.totalorder (!%p138_p2), %s946_s13, 1  ;;  %v171_v0 = vld [vmem:[%s1493_s1] sm:$0xff] (!%p138_p2)  ;;  %vm207_vm0 = vcmask (!%p138_p2), 523264   ;;  %v172_v1 = vld [vmem:[%s1493_s1 + $0x8] sm:$0xff] (!%p138_p2)  ;;  %v1302_v3 = vmov (!%p138_p2), 0   ;;  %v185_v5 = vld [vmem:[%s1494_s2 + $0x10] sm:$0xff] (!%p138_p2) }
   0x6   : > { %141 = sbr.rel (%p138_p2) target bundleno = 291 (0x123), region = 32  ;;  %v209_v2 = vsel (!%p138_p2), %vm207_vm0, %v171_v0, 0  ;;  %1292 = vset.pattern.permute.xlu0 (!%p138_p2), %v1302_v3  ;;  %1293 = vset.pattern.permute.xlu1 (!%p138_p2), %v1302_v3  ;;  %v183_v4 = vld [vmem:[%s1494_s2] sm:$0xff] (!%p138_p2)  ;;  %v173_v7 = vld [vmem:[%s1493_s1 + $0x10] sm:$0xff] (!%p138_p2)  ;;  %v174_v8 = vld [vmem:[%s1493_s1 + $0x18] sm:$0xff] (!%p138_p2)  ;;  %v212_v9 = vsel (!%p138_p2), %vm207_vm0, %v172_v1, 0 }
   0x7   : > { %v1346_v6 = vand.u32 (!%p138_p2), 4294901760, %v209_v2  ;;  %189 = vperm.xlu0 (!%p138_p2), %1292, %v183_v4   ;;  %199 = vperm.xlu1 (!%p138_p2), %1293, %v185_v5   ;;  %v184_v10 = vld [vmem:[%s1494_s2 + $0x8] sm:$0xff] (!%p138_p2)  ;;  %v186_v11 = vld [vmem:[%s1494_s2 + $0x18] sm:$0xff] (!%p138_p2)  ;;  %v215_v13 = vsel (!%p138_p2), %vm207_vm0, %v173_v7, 0  ;;  %v218_v14 = vsel (!%p138_p2), %vm207_vm0, %v174_v8, 0  ;;  %v1371_v19 = vand.u32 (!%p138_p2), 4294901760, %v212_v9 }
   0x8   : > { %v1374_v30 = vand.u32 (!%p138_p2), 4294901760, %v215_v13  ;;  %v1376_v31 = vand.u32 (!%p138_p2), 4294901760, %v218_v14  ;;  %vm886_vm1 = vcmask (!%p138_p2), 130048  }
   0x9   : > { %v1363_v12 = vsub.f32 (!%p138_p2), %v209_v2, %v1346_v6  ;;  %v1387_v39 = vsub.f32 (!%p138_p2), %v212_v9, %v1371_v19 }
   0xa   : > { %v1412_v53 = vsub.f32 (!%p138_p2), %v215_v13, %v1374_v30  ;;  %v1416_v55 = vsub.f32 (!%p138_p2), %v218_v14, %v1376_v31 }
   0xb   : > { %v295_v18 = vand.u32 (!%p138_p2), 4294901760, %v1363_v12  ;;  %194 = vperm.xlu0 (!%p138_p2), %1292, %v184_v10   ;;  %204 = vperm.xlu1 (!%p138_p2), %1293, %v186_v11   ;;  %v305_v54 = vand.u32 (!%p138_p2), 4294901760, %v1387_v39 }
   0xc   : > { %v315_v0 = vand.u32 (!%p138_p2), 4294901760, %v1412_v53  ;;  %v325_v3 = vand.u32 (!%p138_p2), 4294901760, %v1416_v55 }
   0xd   : > { %s1497_s13 = smov (!%p161_p3, %s946_s13), 1  ;;  %v296_v29 = vsub.f32 %v1363_v12, %v295_v18  ;;  %1113 = vmatprep.mubr.f32.mxu0 %v295_v18  ;;  %v306_v2 = vsub.f32 %v1387_v39, %v305_v54 }
   0xe   : > { %s957_s30 = sshll.u32 %s1497_s13, 6  ;;  %v316_v14 = vsub.f32 %v1412_v53, %v315_v0  ;;  %s958_s7 = sshll.u32 %s1497_s13, 5 }
   0xf   : > { %s165_s6 = scalar_lea.vmem %s1492_s0, %s957_s30  ;;  %v297_v37 = vand.u32 4294901760, %v296_v29  ;;  %s170_s10 = scalar_lea.vmem %s1495_s3, %s958_s7 }
  0x10   : > { %v175_v15 = vld [vmem:[%s165_s6] sm:$0xff]  ;;  %v176_v16 = vld [vmem:[%s165_s6 + $0x8] sm:$0xff]  ;;  %v177_v17 = vld [vmem:[%s165_s6 + $0x10] sm:$0xff] }
  0x11   : > { %v221_v20 = vand.u32 4294901760, %v175_v15  ;;  %v224_v21 = vand.u32 4294901760, %v176_v16  ;;  %v178_v22 = vld [vmem:[%s165_s6 + $0x18] sm:$0xff]  ;;  %v227_v23 = vand.u32 4294901760, %v177_v17  ;;  %v179_v24 = vld [vmem:[%s165_s6 + $0x20] sm:$0xff]  ;;  %v180_v25 = vld [vmem:[%s165_s6 + $0x28] sm:$0xff]  ;;  %1047 = vmatprep.mubr.f32.mxu1 %v297_v37 }
  0x12   : > { %v230_v26 = vand.u32 4294901760, %v178_v22  ;;  %v181_v27 = vld [vmem:[%s165_s6 + $0x30] sm:$0xff]  ;;  %v182_v28 = vld [vmem:[%s165_s6 + $0x38] sm:$0xff]  ;;  %v233_v33 = vand.u32 4294901760, %v179_v24  ;;  %v236_v34 = vand.u32 4294901760, %v180_v25 }
  0x13   : > { %v1378_v32 = vpack.c.bf16 %v224_v21, %v221_v20  ;;  %v1380_v35 = vsub.f32 %v175_v15, %v221_v20  ;;  %v1384_v38 = vsub.f32 %v176_v16, %v224_v21  ;;  %v239_v40 = vand.u32 4294901760, %v181_v27 }
  0x14   : > { %v1382_v36 = vpack.c.bf16 %v230_v26, %v227_v23  ;;  %v242_v41 = vand.u32 4294901760, %v182_v28  ;;  %v1392_v43 = vsub.f32 %v177_v17, %v227_v23  ;;  %v1397_v45 = vsub.f32 %v178_v22, %v230_v26 }
  0x15   : > { %1164 = vmatprep.subr.bf16.mxu1 %v1378_v32  ;;  %1212 = vmatprep.subr.bf16.mxu0 %v1378_v32  ;;  %v336_v42 = vand.u32 4294901760, %v1380_v35  ;;  %v343_v44 = vand.u32 4294901760, %v1384_v38  ;;  %v1399_v46 = vsub.f32 %v179_v24, %v233_v33  ;;  %v1401_v47 = vsub.f32 %v180_v25, %v236_v34 }
  0x16   : > { %1166 = vmatpush3.bf16.msra.mxu1 %v1378_v32  ;;  %1214 = vmatpush3.bf16.msra.mxu0 %v1378_v32  ;;  %v1405_v48 = vpack.c.bf16 %v236_v34, %v233_v33  ;;  %v350_v50 = vand.u32 4294901760, %v1392_v43  ;;  %v357_v52 = vand.u32 4294901760, %v1397_v45  ;;  %v1420_v56 = vpack.c.bf16 %v242_v41, %v239_v40 }
  0x17   : > { %1168 = vmatprep.subr.bf16.mxu1 %v1382_v36  ;;  %1216 = vmatprep.subr.bf16.mxu0 %v1382_v36  ;;  %v337_v49 = vsub.f32 %v1380_v35, %v336_v42  ;;  %v344_v51 = vsub.f32 %v1384_v38, %v343_v44  ;;  %v364_v58 = vand.u32 4294901760, %v1399_v46  ;;  %v371_v59 = vand.u32 4294901760, %v1401_v47 }
  0x18   : > { %v351_v57 = vsub.f32 %v1392_v43, %v350_v50  ;;  %v358_v62 = vsub.f32 %v1397_v45, %v357_v52  ;;  %v1428_v63 = vsub.f32 %v181_v27, %v239_v40  ;;  %v1431_v1 = vsub.f32 %v182_v28, %v242_v41 }
  0x19   : > { %v338_v60 = vand.u32 4294901760, %v337_v49  ;;  %v345_v61 = vand.u32 4294901760, %v344_v51  ;;  %v1227_v4 = vpack.c.bf16 %v343_v44, %v336_v42  ;;  %v365_v7 = vsub.f32 %v1399_v46, %v364_v58 }
  0x1a   : > { %1170 = vmatpush3.bf16.msra.mxu1 %v1382_v36  ;;  %1218 = vmatpush3.bf16.msra.mxu0 %v1382_v36  ;;  %v352_v5 = vand.u32 4294901760, %v351_v57  ;;  %v372_v8 = vsub.f32 %v1401_v47, %v371_v59  ;;  %v359_v10 = vand.u32 4294901760, %v358_v62  ;;  %v378_v11 = vand.u32 4294901760, %v1428_v63 }
  0x1b   : > { %1172 = vmatprep.subr.bf16.mxu1 %v1405_v48  ;;  %1220 = vmatprep.subr.bf16.mxu0 %v1405_v48  ;;  %v1179_v9 = vpack.c.bf16 %v345_v61, %v338_v60  ;;  %v385_v13 = vand.u32 4294901760, %v1431_v1  ;;  %v307_v15 = vand.u32 4294901760, %v306_v2  ;;  %v326_v16 = vsub.f32 %v1416_v55, %v325_v3 }
  0x1c   : > { %v1231_v17 = vpack.c.bf16 %v357_v52, %v350_v50  ;;  %v366_v18 = vand.u32 4294901760, %v365_v7  ;;  %v1183_v20 = vpack.c.bf16 %v359_v10, %v352_v5  ;;  %v373_v21 = vand.u32 4294901760, %v372_v8 }
  0x1d   : > { %v379_v22 = vsub.f32 %v1428_v63, %v378_v11  ;;  %v386_v23 = vsub.f32 %v1431_v1, %v385_v13  ;;  %v317_v24 = vand.u32 4294901760, %v316_v14  ;;  %v327_v25 = vand.u32 4294901760, %v326_v16 }
  0x1e   : > { %1174 = vmatpush3.bf16.msra.mxu1 %v1405_v48  ;;  %1222 = vmatpush3.bf16.msra.mxu0 %v1405_v48  ;;  %v1187_v26 = vpack.c.bf16 %v373_v21, %v366_v18  ;;  %v1235_v27 = vpack.c.bf16 %v371_v59, %v364_v58  ;;  %v1239_v34 = vpack.c.bf16 %v385_v13, %v378_v11 }
  0x1f   : > { %1176 = vmatprep.subr.bf16.mxu1 %v1420_v56  ;;  %1224 = vmatprep.subr.bf16.mxu0 %v1420_v56  ;;  %v380_v28 = vand.u32 4294901760, %v379_v22  ;;  %v387_v29 = vand.u32 4294901760, %v386_v23  ;;  %v1195_v37 = vpack.c.bf16 %v1384_v38, %v1380_v35  ;;  %v1199_v40 = vpack.c.bf16 %v1397_v45, %v1392_v43 }
  0x20   : > { %v1203_v35 = vpack.c.bf16 %v1401_v47, %v1399_v46 }
  0x21   : > { %v1191_v33 = vpack.c.bf16 %v387_v29, %v380_v28 }
  0x22   : > { %1178 = vmatpush3.bf16.msra.mxu1 %v1420_v56  ;;  %1226 = vmatpush3.bf16.msra.mxu0 %v1420_v56 }
  0x23   : > { %1180 = vmatprep.subr.bf16.mxu1 %v1179_v9  ;;  %1228 = vmatprep.subr.bf16.mxu0 %v1227_v4 }
  0x25   : > { %1048 = vmatmul.mubr.f32.vlgmr.msra.gmra.mrb[0].mxu1 %v307_v15  ;;  %1114 = vmatmul.mubr.f32.vlgmr.msra.gmra.mrb[0].mxu0 %v305_v54 }
  0x26   : > { %1182 = vmatpush3.bf16.msra.mxu1 %v1179_v9  ;;  %1230 = vmatpush3.bf16.msra.mxu0 %v1227_v4 }
  0x27   : > { %1184 = vmatprep.subr.bf16.mxu1 %v1183_v20  ;;  %1232 = vmatprep.subr.bf16.mxu0 %v1231_v17 }
  0x28   : > { %1050 = vmatprep.mubr.f32.mxu1 %v317_v24  ;;  %1116 = vmatprep.mubr.f32.mxu0 %v315_v0 }
  0x29   : > { %1051 = vmatmul.mubr.f32.gmra.mrb[2].mxu1 %v327_v25  ;;  %1117 = vmatmul.mubr.f32.gmra.mrb[2].mxu0 %v325_v3 }
  0x2a   : > { %1186 = vmatpush3.bf16.msra.mxu1 %v1183_v20  ;;  %1234 = vmatpush3.bf16.msra.mxu0 %v1231_v17 }
  0x2b   : > { %1188 = vmatprep.subr.bf16.mxu1 %v1187_v26  ;;  %1236 = vmatprep.subr.bf16.mxu0 %v1235_v27 }
  0x2c   : > { %1069 = vmatprep.mubr.f32.mxu1 %v1346_v6  ;;  %1135 = vmatprep.mubr.f32.mxu0 %v1346_v6 }
  0x2e   : > { %1190 = vmatpush3.bf16.msra.mxu1 %v1187_v26  ;;  %1238 = vmatpush3.bf16.msra.mxu0 %v1235_v27 }
  0x2f   : > { %1192 = vmatprep.subr.bf16.mxu1 %v1191_v33  ;;  %1240 = vmatprep.subr.bf16.mxu0 %v1239_v34 }
  0x32   : > { %1194 = vmatpush3.bf16.msra.mxu1 %v1191_v33  ;;  %1242 = vmatpush3.bf16.msra.mxu0 %v1239_v34 }
  0x33   : > { %1196 = vmatprep.subr.bf16.mxu1 %v1195_v37  ;;  %1244 = vmatprep.subr.bf16.mxu0 %v1378_v32 }
  0x35   : > { %1070 = vmatmul.mubr.f32.vlgmr.msra.gmra.mrb[0].mxu1 %v1371_v19  ;;  %1136 = vmatmul.mubr.f32.vlgmr.msra.gmra.mrb[0].mxu0 %v1371_v19 }
  0x36   : > { %1198 = vmatpush3.bf16.msra.mxu1 %v1195_v37  ;;  %1246 = vmatpush3.bf16.msra.mxu0 %v1378_v32  ;;  %v1207_v32 = vpack.c.bf16 %v1431_v1, %v1428_v63 }
  0x37   : > { %1200 = vmatprep.subr.bf16.mxu1 %v1199_v40  ;;  %1248 = vmatprep.subr.bf16.mxu0 %v1382_v36 }
  0x38   : > { %1072 = vmatprep.mubr.f32.mxu1 %v1374_v30  ;;  %1138 = vmatprep.mubr.f32.mxu0 %v1374_v30 }
  0x39   : > { %1073 = vmatmul.mubr.f32.gmra.mrb[2].mxu1 %v1376_v31  ;;  %1139 = vmatmul.mubr.f32.gmra.mrb[2].mxu0 %v1376_v31 }
  0x3a   : > { %1202 = vmatpush3.bf16.msra.mxu1 %v1199_v40  ;;  %1250 = vmatpush3.bf16.msra.mxu0 %v1382_v36 }
  0x3b   : > { %1204 = vmatprep.subr.bf16.mxu1 %v1203_v35  ;;  %1252 = vmatprep.subr.bf16.mxu0 %v1405_v48 }
  0x3c   : > { %1091 = vmatprep.mubr.f32.mxu1 %v1363_v12  ;;  %1157 = vmatprep.mubr.f32.mxu0 %v1346_v6 }
  0x3e   : > { %1206 = vmatpush3.bf16.msra.mxu1 %v1203_v35  ;;  %1254 = vmatpush3.bf16.msra.mxu0 %v1405_v48 }
  0x3f   : > { %1208 = vmatprep.subr.bf16.mxu1 %v1207_v32  ;;  %1256 = vmatprep.subr.bf16.mxu0 %v1420_v56 }
  0x42   : > { %1210 = vmatpush3.bf16.msra.mxu1 %v1207_v32  ;;  %1258 = vmatpush3.bf16.msra.mxu0 %v1420_v56 }
  0x45   : > { %1092 = vmatmul.mubr.f32.vlgmr.msra.gmra.mrb[0].mxu1 %v1387_v39  ;;  %1158 = vmatmul.mubr.f32.vlgmr.msra.gmra.mrb[0].mxu0 %v1371_v19 }
  0x46   : > { %1094 = vmatprep.mubr.f32.mxu1 %v1412_v53  ;;  %1160 = vmatprep.mubr.f32.mxu0 %v1374_v30 }
  0x49   : > { %1095 = vmatmul.mubr.f32.gmra.mrb[2].mxu1 %v1416_v55  ;;  %1161 = vmatmul.mubr.f32.gmra.mrb[2].mxu0 %v1376_v31 }
  0x86   : > { %v190_v6 = vpop.permute.xlu0 %189  ;;  %v200_v12 = vpop.permute.xlu1 %199 }
  0x8a   : > { %v195_v36 = vpop.permute.xlu0 %194  ;;  %v205_v39 = vpop.permute.xlu1 %204 }
 0x118   : > { %v1093_v38 = vpop.f32.mrb[0].mxu1  ;;  %v1159_v41 = vpop.f32.mrb[0].mxu0 }
 0x119   : > { %v1259_v42 = vadd.f32 %v1093_v38, %v195_v36  ;;  %v546_v43 = vpop.f32.mrb[1].mxu1  ;;  %v864_v44 = vpop.f32.mrb[1].mxu0 }
 0x11a   : > { %v1261_v19 = vadd.f32 %v546_v43, %v190_v6 }
 0x11b   : > { %v1260_v30 = vadd.f32 %v1259_v42, %v1159_v41 }
 0x11c   : > { %v1262_v45 = vadd.f32 %v1261_v19, %v864_v44  ;;  %v1096_v46 = vpop.f32.mrb[2].mxu1  ;;  %v1162_v31 = vpop.f32.mrb[2].mxu0 }
 0x11d   : > { %888 = vst.msk [vmem:[%s170_s10 + $0x8] sm:$0xff] %vm886_vm1, %v1260_v30  ;;  %v1263_v47 = vadd.f32 %v1096_v46, %v205_v39  ;;  %v560_v48 = vpop.f32.mrb[3].mxu1  ;;  %v876_v49 = vpop.f32.mrb[3].mxu0 }
 0x11e   : > { %887 = vst.msk [vmem:[%s170_s10] sm:$0xff] %vm886_vm1, %v1262_v45  ;;  %v1265_v50 = vadd.f32 %v560_v48, %v200_v12 }
 0x11f   : > { %v1264_v51 = vadd.f32 %v1263_v47, %v1162_v31 }
 0x120   : > { %v1266_v52 = vadd.f32 %v1265_v50, %v876_v49 }
 0x121   : > { %890 = vst.msk [vmem:[%s170_s10 + $0x18] sm:$0xff] %vm886_vm1, %v1264_v51 }
 0x122   : > { %889 = vst.msk [vmem:[%s170_s10 + $0x10] sm:$0xff] %vm886_vm1, %v1266_v52 }
 0x123 PF: > { %s13_s12 = sadd.s32 1, %s1300_s12  }
 0x124   : > { %p10_p4 = scmp.ge.s32.totalorder %s13_s12, 4  }
 0x126   :  { %12 = sbr.rel (!%p10_p4) target bundleno = 1 (0x1), region = 62 }

// kernel: mask_encoder.11
= control target key start
LH: loop header
LB: loop body
LE: loop exit
PB: predicated region body
PF: predicated region fallthrough
CT: control target
= control target key end

     0   :  { %s4924_s21 = smov 0   ;;  %s7384_s0 = inlined_call_operand.vmem [shape: f32[2,32,4,4], index: 0, kind: input, shape index: {}]   ;;  %s7385_s1 = inlined_call_operand.vmem [shape: f32[32,2], index: 1, kind: input, shape index: {}]   ;;  %s7386_s2 = inlined_call_operand.vmem [shape: f32[32,2], index: 2, kind: input, shape index: {}]   ;;  %s7387_s3 = inlined_call_operand.vmem [shape: f32[4,392], index: 3, kind: input, shape index: {}]   ;;  %s7388_s4 = inlined_call_operand.vmem [shape: f32[392,4], index: 4, kind: input, shape index: {}]   ;;  %s7389_s5 = inlined_call_operand.vmem [shape: f32[32,1], index: 5, kind: input, shape index: {}]   ;;  %s7390_s6 = inlined_call_operand.vmem [shape: f32[2,64,4], index: 6, kind: output, shape index: {}]  }
   0x1 LB: > { %s4228_s22 = sadd.s32 4294967295, %s4877_s21   ;;  %p4232_p0 = scmp.ge.s32.totalorder %s4877_s21, 1  ;;  %s4877_s21 = sphi %s4924_s21, %s16_s21  }
   0x2   : > { %p212_p1 = scmp.lt.s32.totalorder %s4877_s21, 3 }
   0x4   : > { %p213_p2 = pnand %p4232_p0, %p212_p1 }
   0x6   : > { %216 = sbr.rel (%p213_p2) target bundleno = 1547 (0x60b), region = 44 }
   0xd   : > { %p242_p3 = scmp.lt.s32.totalorder %s4228_s22, 1  ;;  %vm284_vm0 = vcmask 27648   ;;  %vm576_vm1 = vcmask 1041409   ;;  %vm578_vm2 = vcmask 1042434   ;;  %vm580_vm3 = vcmask 1043459   ;;  %s4880_s27 = smov 1  }
   0xe   : > { %vm582_vm4 = vcmask 1044484   ;;  %vm584_vm5 = vcmask 1045509   ;;  %vm586_vm6 = vcmask 1046534   ;;  %vm588_vm7 = vcmask 1047559   ;;  %s4881_s30 = smov 2   ;;  %s4883_s9 = smov 127  }
   0xf   : > { %s7687_s22 = smov (!%p242_p3, %s4228_s22), 1  ;;  %vm615_vm8 = vcmask 31744   ;;  %vm944_vm9 = vcmask 15360   ;;  %vm1374_vm10 = vcmask 1043456   ;;  %vm1376_vm11 = vcmask 64512   ;;  %s4884_s14 = smov 126  }
  0x10   : > { %s4245_s23 = sshll.u32 %s7687_s22, 7  ;;  %s4885_s18 = smov 125  }
  0x11   : > { %s4938_s26 = scalar_lea.vmem %s7384_s0, %s4245_s23  ;;  %s4879_s23 = smov 3  }
  0x12   : > { %v260_v0 = vld [vmem:[%s4938_s26 + $0x20] sm:$0xf]  ;;  %v261_v2 = vld [vmem:[%s4938_s26 + $0x24] sm:$0xf]  ;;  %v4949_v8 = vld [vmem:[%s4938_s26 + $0x28] sm:$0xf] }
  0x13   : > { %v252_v1 = vld [vmem:[%s4938_s26] sm:$0xf]  ;;  %v309_v3 = vsel %vm284_vm0, %v260_v0, 0.0  ;;  %v253_v5 = vld [vmem:[%s4938_s26 + $0x4] sm:$0xf]  ;;  %v312_v6 = vsel %vm284_vm0, %v261_v2, 0.0 }
  0x14   : > { %v285_v4 = vsel %vm284_vm0, %v252_v1, 0.0  ;;  %310 = vadd.xlane.f32.xlu1 %v309_v3  ;;  %v288_v7 = vsel %vm284_vm0, %v253_v5, 0.0  ;;  %v4952_v9 = vld [vmem:[%s4938_s26 + $0x8] sm:$0xf]  ;;  %v315_v10 = vsel %vm284_vm0, %v4949_v8, 0.0  ;;  %v635_v36 = vsel %vm284_vm0, %v253_v5, -inf }
  0x15   : > { %286 = vadd.xlane.f32.xlu0 %v285_v4  ;;  %v291_v11 = vsel %vm284_vm0, %v4952_v9, 0.0  ;;  %v4959_v12 = vld [vmem:[%s4938_s26 + $0x2c] sm:$0xf]  ;;  %v4969_v16 = vld [vmem:[%s4938_s26 + $0x44] sm:$0xf]  ;;  %v632_v37 = vsel %vm284_vm0, %v252_v1, -inf }
  0x16   : > { %v4962_v13 = vld [vmem:[%s4938_s26 + $0xc] sm:$0xf]  ;;  %v318_v14 = vsel %vm284_vm0, %v4959_v12, 0.0  ;;  %v4972_v17 = vld [vmem:[%s4938_s26 + $0x40] sm:$0xf]  ;;  %v336_v18 = vsel %vm284_vm0, %v4969_v16, 0.0 }
  0x17   : > { %v294_v15 = vsel %vm284_vm0, %v4962_v13, 0.0  ;;  %v333_v19 = vsel %vm284_vm0, %v4972_v17, 0.0  ;;  %v4979_v20 = vld [vmem:[%s4938_s26 + $0x30] sm:$0xf]  ;;  %v4989_v24 = vld [vmem:[%s4938_s26 + $0x14] sm:$0xf] }
  0x18   : > { %313 = vadd.xlane.f32.xlu1 %v312_v6  ;;  %v4982_v21 = vld [vmem:[%s4938_s26 + $0x10] sm:$0xf]  ;;  %v321_v22 = vsel %vm284_vm0, %v4979_v20, 0.0  ;;  %v4992_v25 = vld [vmem:[%s4938_s26 + $0x48] sm:$0xf]  ;;  %v300_v26 = vsel %vm284_vm0, %v4989_v24, 0.0 }
  0x19   : > { %289 = vadd.xlane.f32.xlu0 %v288_v7  ;;  %v297_v23 = vsel %vm284_vm0, %v4982_v21, 0.0  ;;  %v339_v27 = vsel %vm284_vm0, %v4992_v25, 0.0  ;;  %v4999_v28 = vld [vmem:[%s4938_s26 + $0x4c] sm:$0xf]  ;;  %v5002_v29 = vld [vmem:[%s4938_s26 + $0x34] sm:$0xf] }
  0x1a   : > { %v342_v30 = vsel %vm284_vm0, %v4999_v28, 0.0  ;;  %v324_v31 = vsel %vm284_vm0, %v5002_v29, 0.0  ;;  %v5009_v32 = vld [vmem:[%s4938_s26 + $0x64] sm:$0xf]  ;;  %v5012_v33 = vld [vmem:[%s4938_s26 + $0x60] sm:$0xf] }
  0x1b   : > { %v360_v34 = vsel %vm284_vm0, %v5009_v32, 0.0  ;;  %v357_v35 = vsel %vm284_vm0, %v5012_v33, 0.0  ;;  %v659_v38 = vsel %vm284_vm0, %v261_v2, -inf  ;;  %v656_v39 = vsel %vm284_vm0, %v260_v0, -inf  ;;  %v5023_v40 = vld [vmem:[%s4938_s26 + $0x38] sm:$0xf] }
  0x1c   : > { %316 = vadd.xlane.f32.xlu1 %v315_v10  ;;  %v5026_v41 = vld [vmem:[%s4938_s26 + $0x18] sm:$0xf]  ;;  %v327_v42 = vsel %vm284_vm0, %v5023_v40, 0.0  ;;  %v5033_v44 = vld [vmem:[%s4938_s26 + $0x68] sm:$0xf]  ;;  %v662_v48 = vsel %vm284_vm0, %v4949_v8, -inf }
  0x1d   : > { %292 = vadd.xlane.f32.xlu0 %v291_v11  ;;  %v303_v43 = vsel %vm284_vm0, %v5026_v41, 0.0  ;;  %v5036_v45 = vld [vmem:[%s4938_s26 + $0x50] sm:$0xf]  ;;  %v363_v46 = vsel %vm284_vm0, %v5033_v44, 0.0  ;;  %v638_v49 = vsel %vm284_vm0, %v4952_v9, -inf  ;;  %v665_v58 = vsel %vm284_vm0, %v4959_v12, -inf }
  0x1e   : > { %v345_v47 = vsel %vm284_vm0, %v5036_v45, 0.0  ;;  %v5047_v50 = vld [vmem:[%s4938_s26 + $0x3c] sm:$0xf]  ;;  %v279_v54 = vld [vmem:[%s4938_s26 + $0x6c] sm:$0xf]  ;;  %v641_v59 = vsel %vm284_vm0, %v4962_v13, -inf }
  0x1f   : > { %v5050_v51 = vld [vmem:[%s4938_s26 + $0x1c] sm:$0xf]  ;;  %v330_v52 = vsel %vm284_vm0, %v5047_v50, 0.0  ;;  %v5058_v55 = vld [vmem:[%s4938_s26 + $0x54] sm:$0xf]  ;;  %v366_v56 = vsel %vm284_vm0, %v279_v54, 0.0 }
  0x20   : > { %319 = vadd.xlane.f32.xlu1 %v318_v14  ;;  %v306_v53 = vsel %vm284_vm0, %v5050_v51, 0.0  ;;  %v348_v57 = vsel %vm284_vm0, %v5058_v55, 0.0  ;;  %v683_v60 = vsel %vm284_vm0, %v4969_v16, -inf  ;;  %v680_v61 = vsel %vm284_vm0, %v4972_v17, -inf  ;;  %v5072_v62 = vld [vmem:[%s4938_s26 + $0x70] sm:$0xf] }
  0x21   : > { %295 = vadd.xlane.f32.xlu0 %v294_v15  ;;  %7497 = vst [vmem:[#allocation4_spill] sm:$0xff] %v5072_v62  ;;  %v5075_v63 = vld [vmem:[%s4938_s26 + $0x58] sm:$0xf]  ;;  %v369_v0 = vsel %vm284_vm0, %v5072_v62, 0.0  ;;  %v668_v2 = vsel %vm284_vm0, %v4979_v20, -inf  ;;  %v644_v3 = vsel %vm284_vm0, %v4982_v21, -inf }
  0x22   : > { %v351_v1 = vsel %vm284_vm0, %v5075_v63, 0.0  ;;  %v5086_v4 = vld [vmem:[%s4938_s26 + $0x5c] sm:$0xf]  ;;  %v686_v6 = vsel %vm284_vm0, %v4992_v25, -inf  ;;  %v5093_v7 = vld [vmem:[%s4938_s26 + $0x74] sm:$0xf] }
  0x23   : > { %v354_v5 = vsel %vm284_vm0, %v5086_v4, 0.0  ;;  %7498 = vst [vmem:[#allocation5_spill] sm:$0xff] %v5093_v7  ;;  %v647_v8 = vsel %vm284_vm0, %v4989_v24, -inf  ;;  %v372_v9 = vsel %vm284_vm0, %v5093_v7, 0.0  ;;  %v689_v10 = vsel %vm284_vm0, %v4999_v28, -inf  ;;  %s4246_s19 = sshll.u32 %s7687_s22, 6 }
  0x24   : > { %337 = vadd.xlane.f32.xlu1 %v336_v18  ;;  %v671_v11 = vsel %vm284_vm0, %v5002_v29, -inf  ;;  %v707_v12 = vsel %vm284_vm0, %v5009_v32, -inf  ;;  %v704_v13 = vsel %vm284_vm0, %v5012_v33, -inf  ;;  %v5108_v14 = vld [vmem:[%s4938_s26 + $0x78] sm:$0xf]  ;;  %v650_v15 = vsel %vm284_vm0, %v5026_v41, -inf  ;;  %s7105_s24 = scalar_lea.vmem %s7390_s6, %s4246_s19 }
  0x25   : > { %334 = vadd.xlane.f32.xlu0 %v333_v19  ;;  %7499 = vst [vmem:[#allocation6_spill] sm:$0xff] %v5108_v14  ;;  %v375_v16 = vsel %vm284_vm0, %v5108_v14, 0.0  ;;  %v692_v17 = vsel %vm284_vm0, %v5036_v45, -inf  ;;  %v674_v18 = vsel %vm284_vm0, %v5023_v40, -inf  ;;  %v5119_v19 = vld [vmem:[%s4938_s26 + $0x7c] sm:$0xf] }
  0x26   : > { %7500 = vst [vmem:[#allocation7_spill] sm:$0xff] %v5119_v19  ;;  %v378_v20 = vsel %vm284_vm0, %v5119_v19, 0.0  ;;  %v710_v21 = vsel %vm284_vm0, %v5033_v44, -inf  ;;  %v713_v24 = vsel %vm284_vm0, %v279_v54, -inf  ;;  %v695_v25 = vsel %vm284_vm0, %v5058_v55, -inf }
  0x27   : > { %v719_v28 = vsel %vm284_vm0, %v5093_v7, -inf  ;;  %v701_v29 = vsel %vm284_vm0, %v5086_v4, -inf }
  0x28   : > { %322 = vadd.xlane.f32.xlu1 %v321_v22  ;;  %v677_v22 = vsel %vm284_vm0, %v5047_v50, -inf }
  0x29   : > { %298 = vadd.xlane.f32.xlu0 %v297_v23  ;;  %v653_v23 = vsel %vm284_vm0, %v5050_v51, -inf }
  0x2c   : > { %301 = vadd.xlane.f32.xlu1 %v300_v26  ;;  %v716_v26 = vsel %vm284_vm0, %v5072_v62, -inf }
  0x2d   : > { %340 = vadd.xlane.f32.xlu0 %v339_v27  ;;  %v698_v27 = vsel %vm284_vm0, %v5075_v63, -inf }
  0x30   : > { %343 = vadd.xlane.f32.xlu1 %v342_v30  ;;  %v722_v30 = vsel %vm284_vm0, %v5108_v14, -inf }
  0x31   : > { %325 = vadd.xlane.f32.xlu0 %v324_v31  ;;  %v725_v31 = vsel %vm284_vm0, %v5119_v19, -inf }
  0x34   : > { %361 = vadd.xlane.f32.xlu1 %v360_v34 }
  0x35   : > { %358 = vadd.xlane.f32.xlu0 %v357_v35 }
  0x38   : > { %636 = vmax.xlane.f32.xlu1 %v635_v36 }
  0x39   : > { %633 = vmax.xlane.f32.xlu0 %v632_v37 }
  0x3c   : > { %660 = vmax.xlane.f32.xlu1 %v659_v38 }
  0x3d   : > { %657 = vmax.xlane.f32.xlu0 %v656_v39 }
  0x40   : > { %328 = vadd.xlane.f32.xlu1 %v327_v42 }
  0x41   : > { %304 = vadd.xlane.f32.xlu0 %v303_v43 }
  0x44   : > { %364 = vadd.xlane.f32.xlu1 %v363_v46 }
  0x45   : > { %346 = vadd.xlane.f32.xlu0 %v345_v47 }
  0x48   : > { %663 = vmax.xlane.f32.xlu1 %v662_v48 }
  0x49   : > { %639 = vmax.xlane.f32.xlu0 %v638_v49 }
  0x4c   : > { %331 = vadd.xlane.f32.xlu1 %v330_v52 }
  0x4d   : > { %307 = vadd.xlane.f32.xlu0 %v306_v53 }
  0x50   : > { %367 = vadd.xlane.f32.xlu1 %v366_v56 }
  0x51   : > { %349 = vadd.xlane.f32.xlu0 %v348_v57 }
  0x54   : > { %666 = vmax.xlane.f32.xlu1 %v665_v58 }
  0x55   : > { %642 = vmax.xlane.f32.xlu0 %v641_v59 }
  0x58   : > { %684 = vmax.xlane.f32.xlu1 %v683_v60 }
  0x59   : > { %681 = vmax.xlane.f32.xlu0 %v680_v61 }
  0x5c   : > { %370 = vadd.xlane.f32.xlu1 %v369_v0 }
  0x5d   : > { %352 = vadd.xlane.f32.xlu0 %v351_v1 }
  0x60   : > { %669 = vmax.xlane.f32.xlu1 %v668_v2 }
  0x61   : > { %645 = vmax.xlane.f32.xlu0 %v644_v3 }
  0x64   : > { %355 = vadd.xlane.f32.xlu1 %v354_v5 }
  0x65   : > { %687 = vmax.xlane.f32.xlu0 %v686_v6 }
  0x68   : > { %648 = vmax.xlane.f32.xlu1 %v647_v8 }
  0x69   : > { %373 = vadd.xlane.f32.xlu0 %v372_v9 }
  0x6c   : > { %690 = vmax.xlane.f32.xlu1 %v689_v10 }
  0x6d   : > { %672 = vmax.xlane.f32.xlu0 %v671_v11 }
  0x70   : > { %708 = vmax.xlane.f32.xlu1 %v707_v12 }
  0x71   : > { %705 = vmax.xlane.f32.xlu0 %v704_v13 }
  0x74   : > { %651 = vmax.xlane.f32.xlu1 %v650_v15  ;;  %v446_v15 = vlaneseq }
  0x75   : > { %376 = vadd.xlane.f32.xlu0 %v375_v16 }
  0x78   : > { %693 = vmax.xlane.f32.xlu1 %v692_v17 }
  0x79   : > { %675 = vmax.xlane.f32.xlu0 %v674_v18  ;;  %v447_v18 = vand.u32 127, %v446_v15 }
  0x7c   : > { %379 = vadd.xlane.f32.xlu1 %v378_v20  ;;  %v5200_v20 = vshrl.u32 %v446_v15, 7 }
  0x7d   : > { %711 = vmax.xlane.f32.xlu0 %v710_v21 }
  0x80   : > { %678 = vmax.xlane.f32.xlu1 %v677_v22 }
  0x81   : > { %654 = vmax.xlane.f32.xlu0 %v653_v23 }
  0x84   : > { %714 = vmax.xlane.f32.xlu1 %v713_v24 }
  0x85   : > { %696 = vmax.xlane.f32.xlu0 %v695_v25  ;;  %v5207_v25 = vsub.s32 %v447_v18, %v5200_v20 }
  0x88   : > { %717 = vmax.xlane.f32.xlu1 %v716_v26 }
  0x89   : > { %699 = vmax.xlane.f32.xlu0 %v698_v27 }
  0x8c   : > { %720 = vmax.xlane.f32.xlu1 %v719_v28 }
  0x8d   : > { %702 = vmax.xlane.f32.xlu0 %v701_v29 }
  0x90   : > { %726 = vmax.xlane.f32.xlu1 %v725_v31 }
  0x91   : > { %723 = vmax.xlane.f32.xlu0 %v722_v30 }
  0xa1   : > { %v311_v32 = vpop.xlane.xlu1 %310 }
  0xa2   : > { %v287_v33 = vpop.xlane.xlu0 %286  ;;  %v390_v26 = vmul.f32 0.25, %v311_v32 }
  0xa3   : > { %v382_v28 = vmul.f32 0.25, %v287_v33 }
  0xa5   : > { %v314_v34 = vpop.xlane.xlu1 %313 }
  0xa6   : > { %v290_v35 = vpop.xlane.xlu0 %289  ;;  %v391_v23 = vmul.f32 0.25, %v314_v34 }
  0xa7   : > { %v383_v24 = vmul.f32 0.25, %v290_v35 }
  0xa8   : > { %v487_v34 = vrot.slane %v391_v23, %v5207_v25 }
  0xa9   : > { %v317_v36 = vpop.xlane.xlu1 %316  ;;  %v455_v35 = vrot.slane %v383_v24, %v5207_v25 }
  0xaa   : > { %v293_v37 = vpop.xlane.xlu0 %292  ;;  %v392_v29 = vmul.f32 0.25, %v317_v36  ;;  %v451_v36 = vrot.slane %v382_v28, %v5207_v25 }
  0xab   : > { %v384_v27 = vmul.f32 0.25, %v293_v37  ;;  %v483_v37 = vrot.slane %v390_v26, %v5207_v25 }
  0xad   : > { %v320_v38 = vpop.xlane.xlu1 %319  ;;  %v459_v33 = vrot.slane %v384_v27, %v5207_v25  ;;  %v590_v26 = vsel %vm576_vm1, %v487_v34, %v483_v37  ;;  %v577_v27 = vsel %vm576_vm1, %v455_v35, %v451_v36 }
  0xae   : > { %v296_v39 = vpop.xlane.xlu0 %295  ;;  %v393_v30 = vmul.f32 0.25, %v320_v38  ;;  %v491_v38 = vrot.slane %v392_v29, %v5207_v25 }
  0xaf   : > { %v385_v31 = vmul.f32 0.25, %v296_v39 }
  0xb0   : > { %v495_v39 = vrot.slane %v393_v30, %v5207_v25  ;;  %v579_v30 = vsel %vm578_vm2, %v459_v33, %v577_v27 }
  0xb1   : > { %v338_v40 = vpop.xlane.xlu1 %337 }
  0xb2   : > { %v335_v42 = vpop.xlane.xlu0 %334  ;;  %v399_v14 = vmul.f32 0.25, %v338_v40  ;;  %v463_v40 = vrot.slane %v385_v31, %v5207_v25 }
  0xb3   : > { %v398_v7 = vmul.f32 0.25, %v335_v42 }
  0xb5   : > { %v323_v43 = vpop.xlane.xlu1 %322  ;;  %v515_v18 = vrot.slane %v398_v7, %v5207_v25 }
  0xb6   : > { %v299_v44 = vpop.xlane.xlu0 %298  ;;  %v394_v32 = vmul.f32 0.25, %v323_v43  ;;  %v519_v43 = vrot.slane %v399_v14, %v5207_v25 }
  0xb7   : > { %v386_v62 = vmul.f32 0.25, %v299_v44 }
  0xb8   : > { %v499_v28 = vrot.slane %v394_v32, %v5207_v25  ;;  %v597_v32 = vsel %vm576_vm1, %v519_v43, %v515_v18 }
  0xb9   : > { %v5144_v45 = vpop.xlane.xlu1 %301  ;;  %v467_v23 = vrot.slane %v386_v62, %v5207_v25  ;;  %v591_v62 = vsel %vm578_vm2, %v491_v38, %v590_v26 }
  0xba   : > { %v5146_v46 = vpop.xlane.xlu0 %340  ;;  %v387_v29 = vmul.f32 0.25, %v5144_v45  ;;  %v592_v45 = vsel %vm580_vm3, %v495_v39, %v591_v62 }
  0xbb   : > { %v400_v24 = vmul.f32 0.25, %v5146_v46  ;;  %v581_v46 = vsel %vm580_vm3, %v463_v40, %v579_v30  ;;  %v593_v36 = vsel %vm582_vm4, %v499_v28, %v592_v45 }
  0xbd   : > { %v5148_v47 = vpop.xlane.xlu1 %343 }
  0xbe   : > { %v5150_v48 = vpop.xlane.xlu0 %325  ;;  %v401_v31 = vmul.f32 0.25, %v5148_v47  ;;  %v523_v47 = vrot.slane %v400_v24, %v5207_v25 }
  0xbf   : > { %v395_v14 = vmul.f32 0.25, %v5150_v48  ;;  %v583_v48 = vsel %vm582_vm4, %v467_v23, %v581_v46 }
  0xc0   : > { %v527_v38 = vrot.slane %v401_v31, %v5207_v25  ;;  %v598_v27 = vsel %vm578_vm2, %v523_v47, %v597_v32 }
  0xc1   : > { %v5152_v49 = vpop.xlane.xlu1 %361  ;;  %v503_v40 = vrot.slane %v395_v14, %v5207_v25 }
  0xc2   : > { %v5154_v52 = vpop.xlane.xlu0 %358  ;;  %v407_v7 = vmul.f32 0.25, %v5152_v49  ;;  %v471_v49 = vrot.slane %v387_v29, %v5207_v25  ;;  %v5277_v31 = vsel %vm580_vm3, %v527_v38, %v598_v27 }
  0xc3   : > { %v406_v34 = vmul.f32 0.25, %v5154_v52 }
  0xc4   : > { %v551_v39 = vrot.slane %v407_v7, %v5207_v25 }
  0xc5   : > { %v5156_v53 = vpop.xlane.xlu1 %636  ;;  %v547_v18 = vrot.slane %v406_v34, %v5207_v25 }
  0xc6   : > { %v5158_v54 = vpop.xlane.xlu0 %633  ;;  %v767_v23 = vrot.slane %v5156_v53, %v5207_v25 }
  0xc9   : > { %v5160_v56 = vpop.xlane.xlu1 %660 }
  0xca   : > { %v5162_v57 = vpop.xlane.xlu0 %657  ;;  %v799_v28 = vrot.slane %v5160_v56, %v5207_v25 }
  0xcd   : > { %v5164_v58 = vpop.xlane.xlu1 %328 }
  0xce   : > { %v5166_v59 = vpop.xlane.xlu0 %304  ;;  %v396_v33 = vmul.f32 0.25, %v5164_v58  ;;  %v763_v58 = vrot.slane %v5158_v54, %v5207_v25 }
  0xcf   : > { %v388_v52 = vmul.f32 0.25, %v5166_v59 }
  0xd0   : > { %v507_v53 = vrot.slane %v396_v33, %v5207_v25  ;;  %v888_v7 = vsel %vm576_vm1, %v767_v23, %v763_v58 }
  0xd1   : > { %v5168_v60 = vpop.xlane.xlu1 %364  ;;  %v475_v30 = vrot.slane %v388_v52, %v5207_v25 }
  0xd2   : > { %v5170_v61 = vpop.xlane.xlu0 %346  ;;  %v408_v43 = vmul.f32 0.25, %v5168_v60  ;;  %v795_v60 = vrot.slane %v5162_v57, %v5207_v25  ;;  %v594_v57 = vsel %vm584_vm5, %v503_v40, %v593_v36 }
  0xd3   : > { %v5273_v54 = vmul.f32 0.25, %v5170_v61  ;;  %v595_v33 = vsel %vm586_vm6, %v507_v53, %v594_v57 }
  0xd4   : > { %v555_v14 = vrot.slane %v408_v43, %v5207_v25  ;;  %v895_v45 = vsel %vm576_vm1, %v799_v28, %v795_v60 }
  0xd5   : > { %v5172_v0 = vpop.xlane.xlu1 %663 }
  0xd6   : > { %v5174_v1 = vpop.xlane.xlu0 %639  ;;  %v803_v56 = vrot.slane %v5172_v0, %v5207_v25 }
  0xd7   : > { %v771_v61 = vrot.slane %v5174_v1, %v5207_v25 }
  0xd8   : > { %v896_v36 = vsel %vm578_vm2, %v803_v56, %v895_v45 }
  0xd9   : > { %v5176_v2 = vpop.xlane.xlu1 %331  ;;  %v889_v38 = vsel %vm578_vm2, %v771_v61, %v888_v7 }
  0xda   : > { %v5178_v3 = vpop.xlane.xlu0 %307  ;;  %v397_v29 = vmul.f32 0.25, %v5176_v2  ;;  %v604_v2 = vsel %vm576_vm1, %v551_v39, %v547_v18 }
  0xdb   : > { %v389_v59 = vmul.f32 0.25, %v5178_v3  ;;  %v585_v3 = vsel %vm584_vm5, %v471_v49, %v583_v48  ;;  %v531_v48 = vrot.slane %v5273_v54, %v5207_v25  ;;  %v605_v52 = vsel %vm578_vm2, %v555_v14, %v604_v2 }
  0xdc   : > { %v511_v32 = vrot.slane %v397_v29, %v5207_v25  ;;  %v587_v49 = vsel %vm586_vm6, %v475_v30, %v585_v3 }
  0xdd   : > { %v5180_v5 = vpop.xlane.xlu1 %367  ;;  %v479_v62 = vrot.slane %v389_v59, %v5207_v25 }
  0xde   : > { %v5182_v6 = vpop.xlane.xlu0 %349  ;;  %v409_v0 = vmul.f32 0.25, %v5180_v5  ;;  %v5324_v58 = vsel %vm588_vm7, %v511_v32, %v595_v33 }
  0xdf   : > { %v5294_v47 = vmul.f32 0.25, %v5182_v6  ;;  %v5316_v18 = vsel %vm588_vm7, %v479_v62, %v587_v49  ;;  %7502 = vst [vmem:[#allocation9_spill] sm:$0xff] %v5324_v58 }
  0xe0   : > { %7501 = vst [vmem:[#allocation8_spill] sm:$0xff] %v5316_v18 }
  0xe1   : > { %v5184_v8 = vpop.xlane.xlu1 %666 }
  0xe2   : > { %v5186_v9 = vpop.xlane.xlu0 %642  ;;  %v807_v5 = vrot.slane %v5184_v8, %v5207_v25  ;;  %v559_v8 = vrot.slane %v409_v0, %v5207_v25 }
  0xe3   : > { %v775_v1 = vrot.slane %v5186_v9, %v5207_v25 }
  0xe4   : > { %v897_v28 = vsel %vm580_vm3, %v807_v5, %v896_v36  ;;  %v606_v49 = vsel %vm580_vm3, %v559_v8, %v605_v52  ;;  %v616_v5 = vsel %vm615_vm8, %v5316_v18, 0.0 }
  0xe5   : > { %v5188_v10 = vpop.xlane.xlu1 %684 }
  0xe6   : > { %v5190_v11 = vpop.xlane.xlu0 %681  ;;  %v831_v2 = vrot.slane %v5188_v10, %v5207_v25 }
  0xe9   : > { %v5192_v12 = vpop.xlane.xlu1 %370 }
  0xea   : > { %v5194_v13 = vpop.xlane.xlu0 %352 }
  0xeb   : > { %v404_v60 = vmul.f32 0.25, %v5194_v13 }
  0xed   : > { %v5196_v16 = vpop.xlane.xlu1 %669  ;;  %v539_v45 = vrot.slane %v404_v60, %v5207_v25 }
  0xee   : > { %v5198_v17 = vpop.xlane.xlu0 %645  ;;  %v811_v9 = vrot.slane %v5196_v16, %v5207_v25  ;;  %v890_v16 = vsel %vm580_vm3, %v775_v1, %v889_v38 }
  0xef   : > { %v779_v6 = vrot.slane %v5198_v17, %v5207_v25  ;;  %v535_v17 = vrot.slane %v5294_v47, %v5207_v25 }
  0xf0   : > { %v898_v53 = vsel %vm582_vm4, %v811_v9, %v897_v28  ;;  %v619_v9 = vsel %vm615_vm8, %v5324_v58, 0.0 }
  0xf1   : > { %v5202_v21 = vpop.xlane.xlu1 %355  ;;  %v891_v29 = vsel %vm582_vm4, %v779_v6, %v890_v16  ;;  %v600_v6 = vsel %vm582_vm4, %v531_v48, %v5277_v31 }
  0xf2   : > { %v5204_v22 = vpop.xlane.xlu0 %687  ;;  %v405_v30 = vmul.f32 0.25, %v5202_v21 }
  0xf3   : > { %v835_v36 = vrot.slane %v5204_v22, %v5207_v25 }
  0xf5   : > { %v5209_v19 = vpop.xlane.xlu1 %648 }
  0xf6   : > { %v5211_v15 = vpop.xlane.xlu0 %373  ;;  %v783_v40 = vrot.slane %v5209_v19, %v5207_v25  ;;  %v410_v19 = vmul.f32 0.25, %v5192_v12 }
  0xf8   : > { %v892_v14 = vsel %vm584_vm5, %v783_v40, %v891_v29  ;;  %v601_v40 = vsel %vm584_vm5, %v535_v17, %v600_v6 }
  0xf9   : > { %v5221_v42 = vpop.xlane.xlu1 %690  ;;  %v602_v31 = vsel %vm586_vm6, %v539_v45, %v601_v40  ;;  %v935_v40 = vld [vmem:[%s7385_s1 + $0x18] sm:$0xff] }
  0xfa   : > { %v5223_v44 = vpop.xlane.xlu0 %672  ;;  %v839_v52 = vrot.slane %v5221_v42, %v5207_v25 }
  0xfb   : > { %v815_v23 = vrot.slane %v5223_v44, %v5207_v25  ;;  %v411_v44 = vmul.f32 0.25, %v5211_v15  ;;  %v563_v15 = vrot.slane %v410_v19, %v5207_v25 }
  0xfd   : > { %v5240_v37 = vpop.xlane.xlu1 %708  ;;  %v899_v13 = vsel %vm584_vm5, %v815_v23, %v898_v53  ;;  %v567_v61 = vrot.slane %v411_v44, %v5207_v25  ;;  %v607_v38 = vsel %vm582_vm4, %v563_v15, %v606_v49 }
  0xfe   : > { %v5242_v35 = vpop.xlane.xlu0 %705 }
 0x101   : > { %v5262_v24 = vpop.xlane.xlu1 %651 }
 0x102   : > { %v377_v26 = vpop.xlane.xlu0 %376  ;;  %v787_v59 = vrot.slane %v5262_v24, %v5207_v25 }
 0x103   : > { %v412_v54 = vmul.f32 0.25, %v377_v26  ;;  %v827_v26 = vrot.slane %v5190_v11, %v5207_v25  ;;  %v543_v11 = vrot.slane %v405_v30, %v5207_v25 }
 0x104   : > { %v893_v21 = vsel %vm586_vm6, %v787_v59, %v892_v14 }
 0x105   : > { %v5288_v46 = vpop.xlane.xlu1 %693  ;;  %v571_v32 = vrot.slane %v412_v54, %v5207_v25  ;;  %v902_v22 = vsel %vm576_vm1, %v831_v2, %v827_v26  ;;  %v5378_v19 = vsel %vm588_vm7, %v543_v11, %v602_v31 }
 0x106   : > { %v676_v34 = vpop.xlane.xlu0 %675  ;;  %v843_v8 = vrot.slane %v5288_v46, %v5207_v25  ;;  %7503 = vst [vmem:[#allocation10_spill] sm:$0xff] %v5378_v19  ;;  %v903_v59 = vsel %vm578_vm2, %v835_v36, %v902_v22  ;;  %v863_v46 = vrot.slane %v5240_v37, %v5207_v25  ;;  %v933_v36 = vld [vmem:[%s7385_s1 + $0x8] sm:$0xff] }
 0x107   : > { %v819_v27 = vrot.slane %v676_v34, %v5207_v25  ;;  %v904_v60 = vsel %vm580_vm3, %v839_v52, %v903_v59 }
 0x108   : > { %v905_v44 = vsel %vm582_vm4, %v843_v8, %v904_v60 }
 0x109   : > { %v380_v39 = vpop.xlane.xlu1 %379  ;;  %v900_v7 = vsel %vm586_vm6, %v819_v27, %v899_v13  ;;  %v859_v27 = vrot.slane %v5242_v35, %v5207_v25 }
 0x10a   : > { %v5313_v43 = vpop.xlane.xlu0 %711  ;;  %v413_v24 = vmul.f32 0.25, %v380_v39  ;;  %v608_v39 = vsel %vm584_vm5, %v567_v61, %v607_v38 }
 0x10b   : > { %v609_v48 = vsel %vm586_vm6, %v571_v32, %v608_v39  ;;  %v867_v29 = vrot.slane %v5313_v43, %v5207_v25  ;;  %v909_v14 = vsel %vm576_vm1, %v863_v46, %v859_v27 }
 0x10c   : > { %v575_v33 = vrot.slane %v413_v24, %v5207_v25 }
 0x10d   : > { %v679_v3 = vpop.xlane.xlu1 %678 }
 0x10e   : > { %v655_v12 = vpop.xlane.xlu0 %654  ;;  %v823_v56 = vrot.slane %v679_v3, %v5207_v25  ;;  %v5381_v17 = vsel %vm588_vm7, %v575_v33, %v609_v48  ;;  %v622_v3 = vsel %vm615_vm8, %v5378_v19, 0.0 }
 0x10f   : > { %v791_v57 = vrot.slane %v655_v12, %v5207_v25  ;;  %7504 = vst [vmem:[#allocation11_spill] sm:$0xff] %v5381_v17  ;;  %v625_v37 = vsel %vm615_vm8, %v5381_v17, 0.0 }
 0x110   : > { %v901_v62 = vsel %vm588_vm7, %v823_v56, %v900_v7 }
 0x111   : > { %v894_v34 = vsel %vm588_vm7, %v791_v57, %v893_v21  ;;  %v715_v10 = vpop.xlane.xlu1 %714  ;;  %v923_v47 = vsel %vm615_vm8, %v901_v62, -inf  ;;  %v910_v57 = vsel %vm578_vm2, %v867_v29, %v909_v14 }
 0x112   : > { %v697_v0 = vpop.xlane.xlu0 %696  ;;  %v920_v1 = vsel %vm615_vm8, %v894_v34, -inf  ;;  %924 = vmax.xlane.f32.xlu0 %v923_v47  ;;  %v871_v53 = vrot.slane %v715_v10, %v5207_v25 }
 0x113   : > { %921 = vmax.xlane.f32.xlu1 %v920_v1  ;;  %v847_v42 = vrot.slane %v697_v0, %v5207_v25 }
 0x114   : > { %v911_v2 = vsel %vm580_vm3, %v871_v53, %v910_v57 }
 0x115   : > { %v718_v23 = vpop.xlane.xlu1 %717  ;;  %v906_v43 = vsel %vm584_vm5, %v847_v42, %v905_v44 }
 0x116   : > { %v700_v16 = vpop.xlane.xlu0 %699  ;;  %617 = vadd.xlane.f32.xlu0 %v616_v5  ;;  %v875_v35 = vrot.slane %v718_v23, %v5207_v25 }
 0x117   : > { %620 = vadd.xlane.f32.xlu1 %v619_v9  ;;  %v851_v28 = vrot.slane %v700_v16, %v5207_v25  ;;  %v934_v9 = vld [vmem:[%s7385_s1 + $0x10] sm:$0xff] }
 0x118   : > { %v912_v26 = vsel %vm582_vm4, %v875_v35, %v911_v2 }
 0x119   : > { %v721_v30 = vpop.xlane.xlu1 %720  ;;  %v907_v56 = vsel %vm586_vm6, %v851_v28, %v906_v43 }
 0x11a   : > { %v703_v54 = vpop.xlane.xlu0 %702  ;;  %623 = vadd.xlane.f32.xlu0 %v622_v3  ;;  %v879_v24 = vrot.slane %v721_v30, %v5207_v25 }
 0x11b   : > { %v855_v12 = vrot.slane %v703_v54, %v5207_v25  ;;  %626 = vadd.xlane.f32.xlu1 %v625_v37 }
 0x11c   : > { %v913_v34 = vsel %vm584_vm5, %v879_v24, %v912_v26 }
 0x11d   : > { %v908_v13 = vsel %vm588_vm7, %v855_v12, %v907_v56  ;;  %v727_v7 = vpop.xlane.xlu1 %726 }
 0x11e   : > { %v724_v15 = vpop.xlane.xlu0 %723  ;;  %v926_v21 = vsel %vm615_vm8, %v908_v13, -inf  ;;  %v887_v62 = vrot.slane %v727_v7, %v5207_v25 }
 0x11f   : > { %v883_v61 = vrot.slane %v724_v15, %v5207_v25  ;;  %927 = vmax.xlane.f32.xlu0 %v926_v21  ;;  %v932_v25 = vld [vmem:[%s7385_s1] sm:$0xff] }
 0x121   : > { %v914_v45 = vsel %vm586_vm6, %v883_v61, %v913_v34 }
 0x122   : > { %v915_v32 = vsel %vm588_vm7, %v887_v62, %v914_v45  ;;  %v936_v62 = vld [vmem:[%s7386_s2] sm:$0xff] }
 0x123   : > { %v929_v10 = vsel %vm615_vm8, %v915_v32, -inf  ;;  %v937_v32 = vld [vmem:[%s7386_s2 + $0x8] sm:$0xff] }
 0x124   : > { %930 = vmax.xlane.f32.xlu1 %v929_v10 }
 0x19f   : > { %v925_v47 = vpop.xlane.xlu0 %924 }
 0x1a0   : > { %v922_v0 = vpop.xlane.xlu1 %921  ;;  %v976_v31 = vmul.f32 %v933_v36, %v925_v47 }
 0x1a1   : > { %v975_v16 = vmul.f32 %v932_v25, %v922_v0 }
 0x1a2   : > { %v980_v29 = vsel %vm944_vm9, %v976_v31, 0.0  ;;  %v1379_v31 = vld [vmem:[%s7388_s4] sm:$0xff] }
 0x1a3   : > { %v618_v49 = vpop.xlane.xlu0 %617  ;;  %v979_v60 = vsel %vm944_vm9, %v975_v16, 0.0 }
 0x1a4   : > { %v621_v1 = vpop.xlane.xlu1 %620  ;;  %v628_v33 = vmul.f32 0.25, %v618_v49  ;;  %v981_v3 = vadd.f32 %v980_v29, %v979_v60 }
 0x1a5   : > { %v629_v11 = vmul.f32 0.25, %v621_v1 }
 0x1a6   : > { %v940_v6 = vmul.f32 %v932_v25, %v628_v33 }
 0x1a7   : > { %v941_v5 = vmul.f32 %v933_v36, %v629_v11  ;;  %v624_v52 = vpop.xlane.xlu0 %623  ;;  %v938_v11 = vld [vmem:[%s7386_s2 + $0x10] sm:$0xff] }
 0x1a8   : > { %v627_v38 = vpop.xlane.xlu1 %626  ;;  %v945_v22 = vsel %vm944_vm9, %v940_v6, 0.0  ;;  %v630_v23 = vmul.f32 0.25, %v624_v52 }
 0x1a9   : > { %v946_v39 = vsel %vm944_vm9, %v941_v5, 0.0  ;;  %v631_v8 = vmul.f32 0.25, %v627_v38  ;;  %v939_v38 = vld [vmem:[%s7386_s2 + $0x18] sm:$0xff] }
 0x1aa   : > { %v942_v48 = vmul.f32 %v934_v9, %v630_v23  ;;  %v947_v59 = vadd.f32 %v946_v39, %v945_v22 }
 0x1ab   : > { %v943_v42 = vmul.f32 %v935_v40, %v631_v8 }
 0x1ac   : > { %v928_v46 = vpop.xlane.xlu0 %927  ;;  %v948_v27 = vsel %vm944_vm9, %v942_v48, 0.0  ;;  %v1539_v48 = vld [vmem:[%s7388_s4 + $0x80] sm:$0xff] }
 0x1ad   : > { %v977_v28 = vmul.f32 %v934_v9, %v928_v46  ;;  %v949_v44 = vadd.f32 %v948_v27, %v947_v59  ;;  %v950_v53 = vsel %vm944_vm9, %v943_v42, 0.0  ;;  %v1551_v42 = vld [vmem:[%s7388_s4 + $0x88] sm:$0xff]  ;;  %v1563_v59 = vld [vmem:[%s7388_s4 + $0x90] sm:$0xff] }
 0x1af   : > { %v982_v30 = vsel %vm944_vm9, %v977_v28, 0.0  ;;  %v951_v54 = vadd.f32 %v950_v53, %v949_v44 }
 0x1b0   : > { %v983_v43 = vadd.f32 %v982_v30, %v981_v3 }
 0x1b1   : > { %v931_v37 = vpop.xlane.xlu1 %930  ;;  %v952_v35 = vrot.slane %v951_v54, 4 }
 0x1b2   : > { %v978_v12 = vmul.f32 %v935_v40, %v931_v37 }
 0x1b3   : > { %v953_v14 = vadd.f32 %v952_v35, %v951_v54 }
 0x1b4   : > { %v984_v24 = vsel %vm944_vm9, %v978_v12, 0.0 }
 0x1b5   : > { %v985_v56 = vadd.f32 %v984_v24, %v983_v43  ;;  %v954_v57 = vrot.slane %v953_v14, 2 }
 0x1b7   : > { %v986_v13 = vrot.slane %v985_v56, 4  ;;  %v955_v2 = vadd.f32 %v954_v57, %v953_v14 }
 0x1b9   : > { %v987_v15 = vadd.f32 %v986_v13, %v985_v56  ;;  %v956_v7 = vrot.slane %v955_v2, 1 }
 0x1bb   : > { %v988_v21 = vrot.slane %v987_v15, 2  ;;  %v957_v26 = vadd.f32 %v956_v7, %v955_v2 }
 0x1bd   : > { %v989_v61 = vadd.f32 %v988_v21, %v987_v15  ;;  %v958_v34 = vmax.f32 %v957_v26, 0.0  ;;  %v5472_v21 = vsub.s32 0, %v5200_v20  ;;  %v5475_v26 = vsub.s32 1, %v5200_v20 }
 0x1bf   : > { %v990_v45 = vrot.slane %v989_v61, 1  ;;  %v959_v10 = vmul.f32 %v958_v34, %v936_v62  ;;  %v960_v1 = vmul.f32 %v958_v34, %v937_v32  ;;  %v961_v36 = vmul.f32 %v958_v34, %v938_v11 }
 0x1c0   : > { %v962_v9 = vmul.f32 %v958_v34, %v939_v38  ;;  %v5481_v34 = vsub.s32 3, %v5200_v20 }
 0x1c1   : > { %v991_v0 = vadd.f32 %v990_v45, %v989_v61  ;;  %v963_v47 = vsel %vm944_vm9, %v959_v10, 0.0  ;;  %v966_v25 = vsel %vm944_vm9, %v960_v1, 0.0  ;;  %v969_v52 = vsel %vm944_vm9, %v961_v36, 0.0 }
 0x1c2   : > { %964 = vadd.xlane.f32.xlu0 %v963_v47  ;;  %v972_v22 = vsel %vm944_vm9, %v962_v9, 0.0  ;;  %v5478_v61 = vsub.s32 2, %v5200_v20  ;;  %v5484_v45 = vsub.s32 4, %v5200_v20  ;;  %v5492_v47 = vsub.s32 6, %v5200_v20 }
 0x1c3   : > { %v992_v49 = vmax.f32 %v991_v0, 0.0  ;;  %v5489_v0 = vsub.s32 5, %v5200_v20  ;;  %v5495_v1 = vsub.s32 7, %v5200_v20 }
 0x1c5   : > { %v993_v33 = vmul.f32 %v992_v49, %v936_v62  ;;  %v994_v6 = vmul.f32 %v992_v49, %v937_v32  ;;  %v995_v39 = vmul.f32 %v992_v49, %v938_v11  ;;  %v996_v23 = vmul.f32 %v992_v49, %v939_v38 }
 0x1c6   : > { %967 = vadd.xlane.f32.xlu0 %v966_v25 }
 0x1c7   : > { %v997_v5 = vsel %vm944_vm9, %v993_v33, 0.0  ;;  %v1000_v40 = vsel %vm944_vm9, %v994_v6, 0.0  ;;  %v1003_v8 = vsel %vm944_vm9, %v995_v39, 0.0  ;;  %v1006_v16 = vsel %vm944_vm9, %v996_v23, 0.0 }
 0x1c8   : > { %998 = vadd.xlane.f32.xlu1 %v997_v5 }
 0x1ca   : > { %970 = vadd.xlane.f32.xlu0 %v969_v52 }
 0x1cc   : > { %1001 = vadd.xlane.f32.xlu1 %v1000_v40  ;;  %v4849_v40 = vld [vmem:[%s4938_s26] sm:$0xf] }
 0x1ce   : > { %973 = vadd.xlane.f32.xlu0 %v972_v22  ;;  %v4850_v22 = vld [vmem:[%s4938_s26 + $0x4] sm:$0xf] }
 0x1d0   : > { %1004 = vadd.xlane.f32.xlu1 %v1003_v8 }
 0x1d4   : > { %1007 = vadd.xlane.f32.xlu1 %v1006_v16 }
 0x1e4   : > { %1381 = vrot.lane.b32.xlu0 %v1379_v31, %s4879_s23 }
 0x1e5   : > { %1541 = vrot.lane.b32.xlu1 %v1539_v48, %s4880_s27  ;;  %v4851_v48 = vld [vmem:[%s4938_s26 + $0x8] sm:$0xf] }
 0x1e9   : > { %1553 = vrot.lane.b32.xlu1 %v1551_v42, %s4881_s30 }
 0x1ed   : > { %1565 = vrot.lane.b32.xlu1 %v1563_v59, %s4879_s23 }
 0x24f   : > { %v965_v46 = vpop.xlane.xlu0 %964 }
 0x253   : > { %v968_v27 = vpop.xlane.xlu0 %967 }
 0x255   : > { %v999_v28 = vpop.xlane.xlu1 %998 }
 0x256   : > { %v1009_v60 = vadd.f32 %v999_v28, %v965_v46 }
 0x257   : > { %v971_v30 = vpop.xlane.xlu0 %970 }
 0x258   : > { %v4237_v29 = vmul.f32 -1.442695, %v1009_v60  ;;  %v4853_v60 = vld [vmem:[%s4938_s26 + $0x10] sm:$0xf] }
 0x259   : > { %v1002_v44 = vpop.xlane.xlu1 %1001 }
 0x25a   : > { %4825 = vpow2.f32 %v4237_v29  ;;  %v1010_v53 = vadd.f32 %v1002_v44, %v968_v27  ;;  %v4852_v27 = vld [vmem:[%s4938_s26 + $0xc] sm:$0xf] }
 0x25b   : > { %v974_v12 = vpop.xlane.xlu0 %973 }
 0x25c   : > { %v4238_v54 = vmul.f32 -1.442695, %v1010_v53 }
 0x25d   : > { %v1005_v3 = vpop.xlane.xlu1 %1004 }
 0x25e   : > { %4827 = vpow2.f32 %v4238_v54  ;;  %v1011_v37 = vadd.f32 %v1005_v3, %v971_v30  ;;  %v4854_v30 = vld [vmem:[%s4938_s26 + $0x14] sm:$0xf] }
 0x260   : > { %v4239_v35 = vmul.f32 -1.442695, %v1011_v37 }
 0x261   : > { %v1008_v43 = vpop.xlane.xlu1 %1007 }
 0x262   : > { %4829 = vpow2.f32 %v4239_v35  ;;  %v1012_v14 = vadd.f32 %v1008_v43, %v974_v12  ;;  %v4855_v43 = vld [vmem:[%s4938_s26 + $0x20] sm:$0xf] }
 0x264   : > { %v4826_v24 = vpop.eup %4825  ;;  %v4240_v56 = vmul.f32 -1.442695, %v1012_v14 }
 0x265   : > { %v1025_v57 = vadd.f32 1.0, %v4826_v24  ;;  %v4856_v24 = vld [vmem:[%s4938_s26 + $0x24] sm:$0xf] }
 0x266   : > { %4831 = vpow2.f32 %v4240_v56 }
 0x267   : > { %4833 = vrcp.f32 %v1025_v57  ;;  %v4857_v57 = vld [vmem:[%s4938_s26 + $0x28] sm:$0xf] }
 0x268   : > { %v4828_v13 = vpop.eup %4827 }
 0x269   : > { %v1026_v2 = vadd.f32 1.0, %v4828_v13  ;;  %v4858_v13 = vld [vmem:[%s4938_s26 + $0x2c] sm:$0xf] }
 0x26b   : > { %4835 = vrcp.f32 %v1026_v2 }
 0x26c   : > { %v4830_v15 = vpop.eup %4829 }
 0x26d   : > { %v1027_v7 = vadd.f32 1.0, %v4830_v15  ;;  %v4859_v15 = vld [vmem:[%s4938_s26 + $0x30] sm:$0xf] }
 0x26f   : > { %4837 = vrcp.f32 %v1027_v7 }
 0x270   : > { %v4832_v62 = vpop.eup %4831 }
 0x271   : > { %v5486_v32 = vpop.eup %4833  ;;  %v1028_v10 = vadd.f32 1.0, %v4832_v62 }
 0x272   : > { %v1044_v49 = vrot.slane %v5486_v32, %v5472_v21  ;;  %v1048_v11 = vrot.slane %v5486_v32, %v5475_v26  ;;  %v1052_v33 = vrot.slane %v5486_v32, %v5478_v61  ;;  %v1056_v25 = vrot.slane %v5486_v32, %v5481_v34 }
 0x273   : > { %4839 = vrcp.f32 %v1028_v10  ;;  %v1060_v36 = vrot.slane %v5486_v32, %v5484_v45  ;;  %v1064_v20 = vrot.slane %v5486_v32, %v5489_v0  ;;  %v1068_v6 = vrot.slane %v5486_v32, %v5492_v47 }
 0x274   : > { %v1072_v38 = vrot.slane %v5486_v32, %v5495_v1  ;;  %v5520_v39 = vmul.f32 %v4849_v40, %v1044_v49  ;;  %v5523_v8 = vmul.f32 %v4850_v22, %v1048_v11  ;;  %v5532_v42 = vmul.f32 %v4851_v48, %v1052_v33  ;;  %v4860_v49 = vld [vmem:[%s4938_s26 + $0x34] sm:$0xf]  ;;  %v4861_v33 = vld [vmem:[%s4938_s26 + $0x38] sm:$0xf]  ;;  %v4862_v22 = vld [vmem:[%s4938_s26 + $0x40] sm:$0xf] }
 0x275   : > { %v5507_v5 = vpop.eup %4835  ;;  %v5539_v28 = vmul.f32 %v4852_v27, %v1056_v25  ;;  %v5542_v29 = vmul.f32 %v4853_v60, %v1060_v36  ;;  %v5549_v54 = vmul.f32 %v4854_v30, %v1064_v20  ;;  %v5552_v3 = vmul.f32 %v1068_v6, %v5026_v41  ;;  %v4865_v60 = vld [vmem:[%s4938_s26 + $0x4c] sm:$0xf] }
 0x276   : > { %v1076_v52 = vrot.slane %v5507_v5, %v5472_v21  ;;  %v1080_v9 = vrot.slane %v5507_v5, %v5475_v26  ;;  %7505 = vst [vmem:[#allocation12_spill] sm:$0xff] %v5520_v39  ;;  %7506 = vst [vmem:[#allocation13_spill] sm:$0xff] %v5523_v8  ;;  %v1084_v23 = vrot.slane %v5507_v5, %v5478_v61 }
 0x277   : > { %v1088_v16 = vrot.slane %v5507_v5, %v5481_v34  ;;  %v1092_v31 = vrot.slane %v5507_v5, %v5484_v45  ;;  %7507 = vst [vmem:[#allocation14_spill] sm:$0xff] %v5532_v42  ;;  %v1096_v59 = vrot.slane %v5507_v5, %v5489_v0  ;;  %v1100_v46 = vrot.slane %v5507_v5, %v5492_v47 }
 0x278   : > { %7508 = vst [vmem:[#allocation15_spill] sm:$0xff] %v5539_v28  ;;  %7509 = vst [vmem:[#allocation16_spill] sm:$0xff] %v5542_v29  ;;  %v1104_v53 = vrot.slane %v5507_v5, %v5495_v1  ;;  %v5555_v37 = vmul.f32 %v1072_v38, %v5050_v51  ;;  %v5562_v14 = vmul.f32 %v4855_v43, %v1076_v52 }
 0x279   : > { %v5544_v44 = vpop.eup %4837  ;;  %7511 = vst [vmem:[#allocation18_spill] sm:$0xff] %v5549_v54  ;;  %7512 = vst [vmem:[#allocation19_spill] sm:$0xff] %v5552_v3  ;;  %v5565_v56 = vmul.f32 %v4856_v24, %v1080_v9  ;;  %v5570_v51 = vmul.f32 %v4857_v57, %v1084_v23  ;;  %v5573_v2 = vmul.f32 %v4858_v13, %v1088_v16  ;;  %v4863_v16 = vld [vmem:[%s4938_s26 + $0x44] sm:$0xf]  ;;  %v1233_v24 = vsel %vm284_vm0, %v5520_v39, 0.0 }
 0x27a   : > { %7510 = vst [vmem:[#allocation17_spill] sm:$0xff] %v5544_v44  ;;  %7513 = vst [vmem:[#allocation20_spill] sm:$0xff] %v5555_v37  ;;  %v1108_v35 = vrot.slane %v5544_v44, %v5472_v21  ;;  %v1112_v12 = vrot.slane %v5544_v44, %v5475_v26  ;;  %v1116_v41 = vrot.slane %v5544_v44, %v5478_v61 }
 0x27b   : > { %7514 = vst [vmem:[#allocation21_spill] sm:$0xff] %v5562_v14  ;;  %7515 = vst [vmem:[#allocation22_spill] sm:$0xff] %v5565_v56  ;;  %v5576_v7 = vmul.f32 %v4859_v15, %v1092_v31  ;;  %v1120_v62 = vrot.slane %v5544_v44, %v5481_v34  ;;  %v1124_v10 = vrot.slane %v5544_v44, %v5484_v45 }
 0x27c   : > { %7516 = vst [vmem:[#allocation23_spill] sm:$0xff] %v5570_v51  ;;  %7517 = vst [vmem:[#allocation24_spill] sm:$0xff] %v5573_v2  ;;  %v5583_v11 = vmul.f32 %v4860_v49, %v1096_v59  ;;  %v5586_v25 = vmul.f32 %v4861_v33, %v1100_v46  ;;  %v1128_v20 = vrot.slane %v5544_v44, %v5489_v0  ;;  %v4864_v59 = vld [vmem:[%s4938_s26 + $0x48] sm:$0xf]  ;;  %v7539_v33 = vld [vmem:[#allocation6_spill] sm:$0xff] }
 0x27d   : > { %7518 = vst [vmem:[#allocation25_spill] sm:$0xff] %v5576_v7  ;;  %v5588_v36 = vpop.eup %4839  ;;  %v1132_v6 = vrot.slane %v5544_v44, %v5492_v47  ;;  %v1136_v38 = vrot.slane %v5544_v44, %v5495_v1  ;;  %v5597_v52 = vmul.f32 %v1104_v53, %v5047_v50  ;;  %v5604_v23 = vmul.f32 %v4862_v22, %v1108_v35  ;;  %v4866_v53 = vld [vmem:[%s4938_s26 + $0x50] sm:$0xf] }
 0x27e   : > { %7519 = vst [vmem:[#allocation26_spill] sm:$0xff] %v5583_v11  ;;  %7520 = vst [vmem:[#allocation27_spill] sm:$0xff] %v5586_v25  ;;  %v1140_v9 = vrot.slane %v5588_v36, %v5472_v21  ;;  %v1144_v40 = vrot.slane %v5588_v36, %v5475_v26  ;;  %v5607_v31 = vmul.f32 %v4863_v16, %v1112_v12  ;;  %v1238_v22 = vsel %vm284_vm0, %v5539_v28, 0.0 }
 0x27f   : > { %7521 = vst [vmem:[#allocation28_spill] sm:$0xff] %v5588_v36  ;;  %7522 = vst [vmem:[#allocation29_spill] sm:$0xff] %v5597_v52  ;;  %v1148_v48 = vrot.slane %v5588_v36, %v5478_v61  ;;  %v1152_v50 = vrot.slane %v5588_v36, %v5481_v34  ;;  %v1156_v21 = vrot.slane %v5588_v36, %v5484_v45  ;;  %v1240_v16 = vsel %vm284_vm0, %v5542_v29, 0.0 }
 0x280   : > { %7523 = vst [vmem:[#allocation30_spill] sm:$0xff] %v5604_v23  ;;  %7524 = vst [vmem:[#allocation31_spill] sm:$0xff] %v5607_v31  ;;  %v5616_v46 = vmul.f32 %v4864_v59, %v1116_v41  ;;  %v1160_v26 = vrot.slane %v5588_v36, %v5489_v0  ;;  %v1164_v27 = vrot.slane %v5588_v36, %v5492_v47  ;;  %v4867_v47 = vld [vmem:[%s4938_s26 + $0x60] sm:$0xf]  ;;  %v1234_v41 = vsel %vm284_vm0, %v5523_v8, 0.0 }
 0x281   : > { %v1168_v61 = vrot.slane %v5588_v36, %v5495_v1  ;;  %v5625_v34 = vmul.f32 %v4865_v60, %v1120_v62  ;;  %v5628_v30 = vmul.f32 %v4866_v53, %v1124_v10  ;;  %v5631_v45 = vmul.f32 %v1128_v20, %v5058_v55  ;;  %v4868_v1 = vld [vmem:[%s4938_s26 + $0x64] sm:$0xf]  ;;  %v4869_v55 = vld [vmem:[%s4938_s26 + $0x68] sm:$0xf]  ;;  %v7537_v10 = vld [vmem:[#allocation5_spill] sm:$0xff] }
 0x282   : > { %7525 = vst [vmem:[#allocation32_spill] sm:$0xff] %v5616_v46  ;;  %v5634_v35 = vmul.f32 %v1132_v6, %v5075_v63  ;;  %v5637_v0 = vmul.f32 %v1136_v38, %v5086_v4  ;;  %v5640_v12 = vmul.f32 %v4867_v47, %v1140_v9  ;;  %v5643_v43 = vmul.f32 %v4868_v1, %v1144_v40  ;;  %v4870_v63 = vld [vmem:[%s4938_s26 + $0x6c] sm:$0xf]  ;;  %v7535_v4 = vld [vmem:[#allocation4_spill] sm:$0xff]  ;;  %s4882_s26 = smov 4  }
 0x283   : > { %7526 = vst [vmem:[#allocation33_spill] sm:$0xff] %v5625_v34  ;;  %7527 = vst [vmem:[#allocation34_spill] sm:$0xff] %v5628_v30  ;;  %v5650_v57 = vmul.f32 %v4869_v55, %v1148_v48  ;;  %v5653_v13 = vmul.f32 %v4870_v63, %v1152_v50  ;;  %v5656_v15 = vmul.f32 %v1156_v21, %v7535_v4  ;;  %v7541_v6 = vld [vmem:[#allocation7_spill] sm:$0xff]  ;;  %v1236_v9 = vsel %vm284_vm0, %v5532_v42, 0.0 }
 0x284   : > { %7528 = vst [vmem:[#allocation35_spill] sm:$0xff] %v5631_v45  ;;  %7529 = vst [vmem:[#allocation36_spill] sm:$0xff] %v5634_v35  ;;  %v1235_v62 = vadd.f32 %v1234_v41, %v1233_v24  ;;  %v5659_v49 = vmul.f32 %v1160_v26, %v7537_v10  ;;  %v5662_v20 = vmul.f32 %v1164_v27, %v7539_v33  ;;  %v1242_v48 = vsel %vm284_vm0, %v5549_v54, 0.0 }
 0x285   : > { %7530 = vst [vmem:[#allocation37_spill] sm:$0xff] %v5637_v0  ;;  %7531 = vst [vmem:[#allocation38_spill] sm:$0xff] %v5640_v12  ;;  %v5665_v38 = vmul.f32 %v1168_v61, %v7541_v6  ;;  %v1244_v50 = vsel %vm284_vm0, %v5552_v3, 0.0  ;;  %v1246_v21 = vsel %vm284_vm0, %v5555_v37, 0.0  ;;  %v1248_v59 = vsel %vm284_vm0, %v5562_v14, 0.0 }
 0x286   : > { %7532 = vst [vmem:[#allocation39_spill] sm:$0xff] %v5643_v43  ;;  %7533 = vst [vmem:[#allocation40_spill] sm:$0xff] %v5650_v57  ;;  %v1237_v40 = vadd.f32 %v1236_v9, %v1235_v62  ;;  %v1250_v26 = vsel %vm284_vm0, %v5565_v56, 0.0  ;;  %v1252_v61 = vsel %vm284_vm0, %v5570_v51, 0.0  ;;  %v1254_v60 = vsel %vm284_vm0, %v5573_v2, 0.0 }
 0x287   : > { %7534 = vst [vmem:[#allocation41_spill] sm:$0xff] %v5653_v13  ;;  %7536 = vst [vmem:[#allocation4_spill] sm:$0xff] %v5656_v15  ;;  %v1298_v53 = vsel %vm284_vm0, %v5520_v39, -inf  ;;  %v1299_v47 = vsel %vm284_vm0, %v5523_v8, -inf  ;;  %v1300_v1 = vsel %vm284_vm0, %v5532_v42, -inf  ;;  %v1301_v24 = vsel %vm284_vm0, %v5539_v28, -inf }
 0x288   : > { %7538 = vst [vmem:[#allocation5_spill] sm:$0xff] %v5659_v49  ;;  %7540 = vst [vmem:[#allocation6_spill] sm:$0xff] %v5662_v20  ;;  %v1239_v27 = vadd.f32 %v1238_v22, %v1237_v40  ;;  %v1302_v41 = vsel %vm284_vm0, %v5542_v29, -inf  ;;  %v1304_v4 = vsel %vm284_vm0, %v5549_v54, -inf  ;;  %v1306_v62 = vsel %vm284_vm0, %v5552_v3, -inf }
 0x289   : > { %7542 = vst [vmem:[#allocation7_spill] sm:$0xff] %v5665_v38  ;;  %v1303_v63 = vmax.f32 %v1298_v53, %v1302_v41  ;;  %v1305_v10 = vmax.f32 %v1299_v47, %v1304_v4  ;;  %v1307_v33 = vmax.f32 %v1300_v1, %v1306_v62  ;;  %v1308_v6 = vsel %vm284_vm0, %v5555_v37, -inf }
 0x28a   : > { %v1241_v55 = vadd.f32 %v1240_v16, %v1239_v27  ;;  %v1310_v9 = vsel %vm284_vm0, %v5562_v14, -inf  ;;  %v1309_v22 = vmax.f32 %v1301_v24, %v1308_v6  ;;  %v1312_v16 = vsel %vm284_vm0, %v5565_v56, -inf }
 0x28b   : > { %v1311_v28 = vmax.f32 %v1303_v63, %v1310_v9  ;;  %v1313_v27 = vmax.f32 %v1305_v10, %v1312_v16  ;;  %v1314_v53 = vsel %vm284_vm0, %v5570_v51, -inf  ;;  %v1316_v47 = vsel %vm284_vm0, %v5573_v2, -inf }
 0x28c   : > { %v1243_v40 = vadd.f32 %v1242_v48, %v1241_v55  ;;  %v1318_v1 = vsel %vm284_vm0, %v5576_v7, -inf  ;;  %v1315_v4 = vmax.f32 %v1307_v33, %v1314_v53  ;;  %v1317_v62 = vmax.f32 %v1309_v22, %v1316_v47 }
 0x28d   : > { %v1319_v14 = vmax.f32 %v1311_v28, %v1318_v1  ;;  %v1320_v48 = vsel %vm284_vm0, %v5583_v11, -inf  ;;  %v1322_v24 = vsel %vm284_vm0, %v5586_v25, -inf  ;;  %v1324_v55 = vsel %vm284_vm0, %v5597_v52, -inf }
 0x28e   : > { %v1245_v41 = vadd.f32 %v1244_v50, %v1243_v40  ;;  %v1326_v63 = vsel %vm284_vm0, %v5604_v23, -inf  ;;  %v1321_v6 = vmax.f32 %v1313_v27, %v1320_v48  ;;  %v1323_v9 = vmax.f32 %v1315_v4, %v1322_v24 }
 0x28f   : > { %v1325_v16 = vmax.f32 %v1317_v62, %v1324_v55  ;;  %v1327_v50 = vmax.f32 %v1319_v14, %v1326_v63  ;;  %v1328_v28 = vsel %vm284_vm0, %v5607_v31, -inf  ;;  %v1330_v33 = vsel %vm284_vm0, %v5616_v46, -inf }
 0x290   : > { %v1247_v10 = vadd.f32 %v1246_v21, %v1245_v41  ;;  %v1332_v40 = vsel %vm284_vm0, %v5625_v34, -inf  ;;  %v1329_v53 = vmax.f32 %v1321_v6, %v1328_v28  ;;  %v1331_v47 = vmax.f32 %v1323_v9, %v1330_v33 }
 0x291   : > { %v1333_v1 = vmax.f32 %v1325_v16, %v1332_v40  ;;  %v1334_v21 = vsel %vm284_vm0, %v5628_v30, -inf  ;;  %v1336_v27 = vsel %vm284_vm0, %v5631_v45, -inf  ;;  %v1338_v14 = vsel %vm284_vm0, %v5634_v35, -inf }
 0x292   : > { %v1249_v22 = vadd.f32 %v1248_v59, %v1247_v10  ;;  %v1340_v41 = vsel %vm284_vm0, %v5637_v0, -inf  ;;  %v1335_v62 = vmax.f32 %v1327_v50, %v1334_v21  ;;  %v1337_v48 = vmax.f32 %v1329_v53, %v1336_v27 }
 0x293   : > { %v1339_v24 = vmax.f32 %v1331_v47, %v1338_v14  ;;  %v1341_v59 = vmax.f32 %v1333_v1, %v1340_v41  ;;  %v1342_v55 = vsel %vm284_vm0, %v5640_v12, -inf  ;;  %v1344_v63 = vsel %vm284_vm0, %v5643_v43, -inf }
 0x294   : > { %v1251_v4 = vadd.f32 %v1250_v26, %v1249_v22  ;;  %v1346_v10 = vsel %vm284_vm0, %v5650_v57, -inf  ;;  %v1343_v9 = vmax.f32 %v1335_v62, %v1342_v55  ;;  %v1345_v16 = vmax.f32 %v1337_v48, %v1344_v63 }
 0x295   : > { %v1347_v28 = vmax.f32 %v1339_v24, %v1346_v10  ;;  %v1348_v26 = vsel %vm284_vm0, %v5653_v13, -inf  ;;  %v1350_v50 = vsel %vm284_vm0, %v5656_v15, -inf  ;;  %v1352_v33 = vsel %vm284_vm0, %v5659_v49, -inf }
 0x296   : > { %v1253_v6 = vadd.f32 %v1252_v61, %v1251_v4  ;;  %v1354_v40 = vsel %vm284_vm0, %v5662_v20, -inf  ;;  %v1349_v53 = vmax.f32 %v1341_v59, %v1348_v26  ;;  %v1351_v47 = vmax.f32 %v1343_v9, %v1350_v50  ;;  %v1395_v9 = vld [vmem:[%s7388_s4 + $0x10] sm:$0xff] }
 0x297   : > { %v1353_v1 = vmax.f32 %v1345_v16, %v1352_v33  ;;  %v1256_v61 = vsel %vm284_vm0, %v5576_v7, 0.0  ;;  %v1355_v21 = vmax.f32 %v1347_v28, %v1354_v40  ;;  %v1356_v27 = vsel %vm284_vm0, %v5665_v38, -inf  ;;  %v1579_v33 = vld [vmem:[%s7388_s4 + $0xa0] sm:$0xff] }
 0x298   : > { %v1255_v22 = vadd.f32 %v1254_v60, %v1253_v6  ;;  %v1357_v41 = vmax.f32 %v1349_v53, %v1356_v27  ;;  %v1258_v62 = vsel %vm284_vm0, %v5583_v11, 0.0  ;;  %v1260_v60 = vsel %vm284_vm0, %v5586_v25, 0.0 }
 0x299   : > { %v1358_v4 = vmax.f32 %v1351_v47, %v1353_v1  ;;  %v1262_v63 = vsel %vm284_vm0, %v5597_v52, 0.0  ;;  %v1264_v6 = vsel %vm284_vm0, %v5604_v23, 0.0  ;;  %v1266_v28 = vsel %vm284_vm0, %v5607_v31, 0.0  ;;  %v1419_v47 = vld [vmem:[%s7388_s4 + $0x20] sm:$0xff] }
 0x29a   : > { %v1257_v14 = vadd.f32 %v1256_v61, %v1255_v22  ;;  %v1359_v24 = vmax.f32 %v1355_v21, %v1357_v41  ;;  %v1268_v50 = vsel %vm284_vm0, %v5616_v46, 0.0  ;;  %v1270_v22 = vsel %vm284_vm0, %v5625_v34, 0.0 }
 0x29b   : > { %v1272_v1 = vsel %vm284_vm0, %v5628_v30, 0.0  ;;  %v1274_v21 = vsel %vm284_vm0, %v5631_v45, 0.0  ;;  %v1276_v41 = vsel %vm284_vm0, %v5634_v35, 0.0 }
 0x29c   : > { %v1259_v48 = vadd.f32 %v1258_v62, %v1257_v14  ;;  %v5757_v55 = vmax.f32 %v1358_v4, %v1359_v24  ;;  %v1615_v14 = vld [vmem:[%s7388_s4 + $0xb8] sm:$0xff]  ;;  %v1278_v62 = vsel %vm284_vm0, %v5637_v0, 0.0 }
 0x29d   : > { %v1447_v24 = vld [vmem:[%s7388_s4 + $0x38] sm:$0xff] }
 0x29e   : > { %v1261_v59 = vadd.f32 %v1260_v60, %v1259_v48  ;;  %1367 = vrot.lane.b32.xlu0 %v5757_v55, %s4882_s26  ;;  %v1280_v60 = vsel %vm284_vm0, %v5640_v12, 0.0 }
 0x2a0   : > { %v1263_v10 = vadd.f32 %v1262_v63, %v1261_v59  ;;  %v1282_v63 = vsel %vm284_vm0, %v5643_v43, 0.0 }
 0x2a2   : > { %v1265_v16 = vadd.f32 %v1264_v6, %v1263_v10  ;;  %1397 = vrot.lane.b32.xlu0 %v1395_v9, %s4880_s27  ;;  %v1459_v6 = vld [vmem:[%s7388_s4 + $0x40] sm:$0xff]  ;;  %v1284_v9 = vsel %vm284_vm0, %v5650_v57, 0.0 }
 0x2a4   : > { %v1267_v26 = vadd.f32 %v1266_v28, %v1265_v16  ;;  %v1286_v28 = vsel %vm284_vm0, %v5653_v13, 0.0 }
 0x2a6   : > { %v1269_v40 = vadd.f32 %v1268_v50, %v1267_v26  ;;  %1581 = vrot.lane.b32.xlu0 %v1579_v33, %s4880_s27  ;;  %v1643_v50 = vld [vmem:[%s7388_s4 + $0xd0] sm:$0xff]  ;;  %v1288_v33 = vsel %vm284_vm0, %v5656_v15, 0.0 }
 0x2a8   : > { %v1271_v53 = vadd.f32 %v1270_v22, %v1269_v40  ;;  %v1290_v22 = vsel %vm284_vm0, %v5659_v49, 0.0 }
 0x2aa   : > { %v1273_v61 = vadd.f32 %v1272_v1, %v1271_v53  ;;  %1421 = vrot.lane.b32.xlu0 %v1419_v47, %s4879_s23  ;;  %v1487_v47 = vld [vmem:[%s7388_s4 + $0x58] sm:$0xff]  ;;  %v1292_v1 = vsel %vm284_vm0, %v5662_v20, 0.0 }
 0x2ac   : > { %v1275_v27 = vadd.f32 %v1274_v21, %v1273_v61  ;;  %v1294_v21 = vsel %vm284_vm0, %v5665_v38, 0.0 }
 0x2ae   : > { %v1277_v4 = vadd.f32 %v1276_v41, %v1275_v27  ;;  %1617 = vrot.lane.b32.xlu0 %v1615_v14, %s4879_s23  ;;  %v1499_v14 = vld [vmem:[%s7388_s4 + $0x60] sm:$0xff] }
 0x2b0   : > { %v1279_v48 = vadd.f32 %v1278_v62, %v1277_v4  ;;  %v1407_v4 = vld [vmem:[%s7388_s4 + $0x18] sm:$0xff]  ;;  %v1683_v62 = vld [vmem:[%s7388_s4 + $0xf0] sm:$0xff] }
 0x2b2   : > { %v1281_v59 = vadd.f32 %v1280_v60, %v1279_v48  ;;  %1449 = vrot.lane.b32.xlu0 %v1447_v24, %s4880_s27  ;;  %v1591_v48 = vld [vmem:[%s7388_s4 + $0xa8] sm:$0xff]  ;;  %v1523_v24 = vld [vmem:[%s7388_s4 + $0x70] sm:$0xff] }
 0x2b3   : > { %v1603_v60 = vld [vmem:[%s7388_s4 + $0xb0] sm:$0xff] }
 0x2b4   : > { %v1283_v10 = vadd.f32 %v1282_v63, %v1281_v59  ;;  %v1435_v59 = vld [vmem:[%s7388_s4 + $0x30] sm:$0xff]  ;;  %v1631_v63 = vld [vmem:[%s7388_s4 + $0xc8] sm:$0xff] }
 0x2b6   : > { %v1285_v16 = vadd.f32 %v1284_v9, %v1283_v10  ;;  %1461 = vrot.lane.b32.xlu0 %v1459_v6, %s4881_s30  ;;  %v1471_v10 = vld [vmem:[%s7388_s4 + $0x48] sm:$0xff]  ;;  %v1655_v6 = vld [vmem:[%s7388_s4 + $0xd8] sm:$0xff]  ;;  %v1667_v9 = vld [vmem:[%s7388_s4 + $0xe0] sm:$0xff] }
 0x2b8   : > { %v1287_v26 = vadd.f32 %v1286_v28, %v1285_v16  ;;  %v1511_v16 = vld [vmem:[%s7388_s4 + $0x68] sm:$0xff]  ;;  %v1695_v28 = vld [vmem:[%s7388_s4 + $0xf8] sm:$0xff] }
 0x2ba   : > { %v1289_v40 = vadd.f32 %v1288_v33, %v1287_v26  ;;  %1645 = vrot.lane.b32.xlu0 %v1643_v50, %s4881_s30  ;;  %v1542_v26 = vpop.permute.xlu1 %1541  ;;  %v1382_v50 = vpop.permute.xlu0 %1381 }
 0x2bc   : > { %v1291_v53 = vadd.f32 %v1290_v22, %v1289_v40 }
 0x2be   : > { %v1293_v61 = vadd.f32 %v1292_v1, %v1291_v53  ;;  %1489 = vrot.lane.b32.xlu0 %v1487_v47, %s4880_s27  ;;  %v1554_v33 = vpop.permute.xlu1 %1553 }
 0x2c0   : > { %v1295_v27 = vadd.f32 %v1294_v21, %v1293_v61 }
 0x2c2   : > { %v1297_v41 = vmul.f32 0.03125, %v1295_v27  ;;  %1501 = vrot.lane.b32.xlu0 %v1499_v14, %s4881_s30  ;;  %v1566_v22 = vpop.permute.xlu1 %1565 }
 0x2c4   : > { %1362 = vrot.lane.b32.xlu1 %v1297_v41, %s4882_s26 }
 0x2c6   : > { %1685 = vrot.lane.b32.xlu0 %v1683_v62, %s4880_s27 }
 0x2c8   : > { %1409 = vrot.lane.b32.xlu1 %v1407_v4, %s4881_s30 }
 0x2ca   : > { %1525 = vrot.lane.b32.xlu0 %v1523_v24, %s4879_s23 }
 0x2cc   : > { %1593 = vrot.lane.b32.xlu1 %v1591_v48, %s4880_s27 }
 0x2d0   : > { %1605 = vrot.lane.b32.xlu1 %v1603_v60, %s4881_s30 }
 0x2d4   : > { %1437 = vrot.lane.b32.xlu1 %v1435_v59, %s4880_s27 }
 0x2d8   : > { %1633 = vrot.lane.b32.xlu1 %v1631_v63, %s4880_s27  ;;  %v1431_v63 = vld [vmem:[%s7388_s4 + $0x28] sm:$0xff] }
 0x2dc   : > { %1473 = vrot.lane.b32.xlu1 %v1471_v10, %s4879_s23  ;;  %v1627_v10 = vld [vmem:[%s7388_s4 + $0xc0] sm:$0xff] }
 0x2e0   : > { %1657 = vrot.lane.b32.xlu1 %v1655_v6, %s4879_s23 }
 0x2e4   : > { %1669 = vrot.lane.b32.xlu1 %v1667_v9, %s4879_s23  ;;  %v1483_v9 = vld [vmem:[%s7388_s4 + $0x50] sm:$0xff] }
 0x2e8   : > { %1513 = vrot.lane.b32.xlu1 %v1511_v16, %s4879_s23  ;;  %v1679_v16 = vld [vmem:[%s7388_s4 + $0xe8] sm:$0xff] }
 0x2ec   : > { %1697 = vrot.lane.b32.xlu1 %v1695_v28, %s4881_s30  ;;  %v1535_v28 = vld [vmem:[%s7388_s4 + $0x78] sm:$0xff] }
 0x310   : > { %v1368_v40 = vpop.permute.xlu0 %1367 }
 0x311   : > { %v1370_v53 = vsel %vm615_vm8, %v5757_v55, %v1368_v40  ;;  %v1391_v55 = vld [vmem:[%s7388_s4 + $0x8] sm:$0xff]  ;;  %v1771_v40 = vld [vmem:[%s7388_s4 + $0x130] sm:$0xff] }
 0x312   : > { %v1372_v1 = vrot.slane %v1370_v53, 4 }
 0x314   : > { %v1398_v47 = vpop.permute.xlu0 %1397 }
 0x318   : > { %v1582_v14 = vpop.permute.xlu0 %1581 }
 0x31c   : > { %v1422_v48 = vpop.permute.xlu0 %1421 }
 0x320   : > { %v1618_v53 = vpop.permute.xlu0 %1617 }
 0x336   : > { %v1363_v61 = vpop.permute.xlu1 %1362 }
 0x337   : > { %v1365_v21 = vsel %vm615_vm8, %v1297_v41, %v1363_v61  ;;  %v1575_v41 = vld [vmem:[%s7388_s4 + $0x98] sm:$0xff] }
 0x338   : > { %v1375_v27 = vsel %vm1374_vm10, %v1365_v21, %v1372_v1 }
 0x339   : > { %1377 = vst.msk [vmem:[#allocation2] sm:$0xff] %vm1376_vm11, %v1375_v27  ;;  %v1823_v27 = vld [vmem:[%s7388_s4 + $0x158] sm:$0xff] }
 0x33a   : > { %v1410_v4 = vpop.permute.xlu1 %1409 }
 0x33e   : > { %v1594_v62 = vpop.permute.xlu1 %1593 }
 0x340   : > { %v5884_v24 = vld [vmem:[#allocation2] sm:$0xff] }
 0x341   : > { %v1544_v60 = vmul.f32 %v1542_v26, %v5884_v24  ;;  %v1556_v6 = vmul.f32 %v1554_v33, %v5884_v24  ;;  %v5910_v26 = vld [vmem:[#allocation2] sm:$0xff]  ;;  %v1719_v33 = vld [vmem:[%s7388_s4 + $0x108] sm:$0xff]  ;;  %v1384_v1 = vmul.f32 %v1382_v50, %v5884_v24  ;;  %v1392_v61 = vmul.f32 %v1391_v55, %v5884_v24 }
 0x342   : > { %v1606_v59 = vpop.permute.xlu1 %1605  ;;  %v1576_v21 = vmul.f32 %v1575_v41, %v5884_v24  ;;  %v1432_v38 = vmul.f32 %v1431_v63, %v5884_v24  ;;  %v1628_v20 = vmul.f32 %v1627_v10, %v5884_v24  ;;  %v1484_v50 = vmul.f32 %v1483_v9, %v5884_v24 }
 0x343   : > { %1546 = vrot.lane.b32.xlu1 %v1544_v60, %s4883_s9  ;;  %1558 = vrot.lane.b32.xlu0 %v1556_v6, %s4884_s14  ;;  %v1863_v60 = vld [vmem:[%s7388_s4 + $0x178] sm:$0xff]  ;;  %v1680_v6 = vmul.f32 %v1679_v16, %v5884_v24  ;;  %v1568_v55 = vmul.f32 %v1566_v22, %v5884_v24  ;;  %1393 = vst.msk [vmem:[#allocation3 + $0x8] sm:$0xff] %vm615_vm8, %v1392_v61 }
 0x344   : > { %1577 = vst.msk [vmem:[#allocation3 + $0x98] sm:$0xff] %vm615_vm8, %v1576_v21  ;;  %v1536_v41 = vmul.f32 %v1535_v28, %v5884_v24  ;;  %v1720_v49 = vmul.f32 %v5910_v26, %v1719_v33  ;;  %v1772_v15 = vmul.f32 %v5910_v26, %v1771_v40  ;;  %1433 = vst.msk [vmem:[#allocation3 + $0x28] sm:$0xff] %vm615_vm8, %v1432_v38 }
 0x345   : > { %1629 = vst.msk [vmem:[#allocation3 + $0xc0] sm:$0xff] %vm615_vm8, %v1628_v20  ;;  %1485 = vst.msk [vmem:[#allocation3 + $0x50] sm:$0xff] %vm615_vm8, %v1484_v50  ;;  %v1824_v22 = vmul.f32 %v5910_v26, %v1823_v27  ;;  %v1864_v63 = vmul.f32 %v1863_v60, %v5910_v26  ;;  %v1400_v38 = vmul.f32 %v1398_v47, %v5884_v24  ;;  %v1450_v20 = vpop.permute.xlu0 %1449 }
 0x346   : > { %v1438_v13 = vpop.permute.xlu1 %1437  ;;  %1681 = vst.msk [vmem:[#allocation3 + $0xe8] sm:$0xff] %vm615_vm8, %v1680_v6  ;;  %1537 = vst.msk [vmem:[#allocation3 + $0x78] sm:$0xff] %vm615_vm8, %v1536_v41  ;;  %v1412_v10 = vmul.f32 %v1410_v4, %v5884_v24  ;;  %v1584_v9 = vmul.f32 %v1582_v14, %v5884_v24  ;;  %v1424_v47 = vmul.f32 %v1422_v48, %v5884_v24 }
 0x347   : > { %1386 = vrot.lane.b32.xlu1 %v1384_v1, %s4885_s18  ;;  %1570 = vrot.lane.b32.xlu0 %v1568_v55, %s4885_s18  ;;  %1721 = vst.msk [vmem:[#allocation3 + $0x108] sm:$0xff] %vm615_vm8, %v1720_v49  ;;  %1773 = vst.msk [vmem:[#allocation3 + $0x130] sm:$0xff] %vm615_vm8, %v1772_v15  ;;  %v1596_v49 = vmul.f32 %v1594_v62, %v5884_v24  ;;  %v1608_v28 = vmul.f32 %v1606_v59, %v5884_v24 }
 0x348   : > { %1825 = vst.msk [vmem:[#allocation3 + $0x158] sm:$0xff] %vm615_vm8, %v1824_v22  ;;  %1865 = vst.msk [vmem:[#allocation3 + $0x178] sm:$0xff] %vm615_vm8, %v1864_v63  ;;  %v1620_v4 = vmul.f32 %v1618_v53, %v5884_v24  ;;  %v1440_v40 = vmul.f32 %v1438_v13, %v5884_v24  ;;  %v1452_v62 = vmul.f32 %v1450_v20, %v5884_v24 }
 0x349   : > { %v1462_v15 = vpop.permute.xlu0 %1461 }
 0x34a   : > { %v1634_v16 = vpop.permute.xlu1 %1633  ;;  %v1464_v61 = vmul.f32 %v1462_v15, %v5884_v24  ;;  %v1723_v15 = vld [vmem:[%s7388_s4 + $0x110] sm:$0xff] }
 0x34b   : > { %1402 = vrot.lane.b32.xlu1 %v1400_v38, %s4883_s9  ;;  %1414 = vrot.lane.b32.xlu0 %v1412_v10, %s4884_s14  ;;  %v1636_v48 = vmul.f32 %v1634_v16, %v5884_v24 }
 0x34d   : > { %v1646_v14 = vpop.permute.xlu0 %1645 }
 0x34e   : > { %v1474_v33 = vpop.permute.xlu1 %1473  ;;  %v1648_v13 = vmul.f32 %v1646_v14, %v5884_v24 }
 0x34f   : > { %1586 = vrot.lane.b32.xlu1 %v1584_v9, %s4883_s9  ;;  %1598 = vrot.lane.b32.xlu0 %v1596_v49, %s4883_s9  ;;  %v1476_v53 = vmul.f32 %v1474_v33, %v5884_v24  ;;  %v1707_v49 = vld [vmem:[%s7388_s4 + $0x100] sm:$0xff] }
 0x351   : > { %v1490_v59 = vpop.permute.xlu0 %1489 }
 0x352   : > { %v1658_v1 = vpop.permute.xlu1 %1657  ;;  %v1492_v50 = vmul.f32 %v1490_v59, %v5884_v24  ;;  %v1787_v59 = vld [vmem:[%s7388_s4 + $0x140] sm:$0xff] }
 0x353   : > { %1426 = vrot.lane.b32.xlu1 %v1424_v47, %s4885_s18  ;;  %1610 = vrot.lane.b32.xlu0 %v1608_v28, %s4884_s14  ;;  %v1660_v60 = vmul.f32 %v1658_v1, %v5884_v24  ;;  %v1735_v47 = vld [vmem:[%s7388_s4 + $0x118] sm:$0xff]  ;;  %v6006_v28 = vld [vmem:[%s7387_s3] sm:$0xff] }
 0x354   : > { %v1931_v33 = vcombine.high %v6006_v28, %v6006_v28  ;;  %v1775_v1 = vld [vmem:[%s7388_s4 + $0x138] sm:$0xff] }
 0x355   : > { %v1502_v27 = vpop.permute.xlu0 %1501 }
 0x356   : > { %v1670_v21 = vpop.permute.xlu1 %1669  ;;  %v1504_v22 = vmul.f32 %v1502_v27, %v5884_v24  ;;  %v6015_v14 = vand.u32 4294901760, %v1931_v33  ;;  %v4886_v27 = vmov 0  }
 0x357   : > { %1622 = vrot.lane.b32.xlu1 %v1620_v4, %s4885_s18  ;;  %1442 = vrot.lane.b32.xlu0 %v1440_v40, %s4883_s9  ;;  %v1672_v55 = vmul.f32 %v1670_v21, %v5884_v24  ;;  %v1747_v4 = vld [vmem:[%s7388_s4 + $0x120] sm:$0xff]  ;;  %v1759_v40 = vld [vmem:[%s7388_s4 + $0x128] sm:$0xff] }
 0x358   : > { %7543 = vst [vmem:[#allocation42_spill] sm:$0xff] %v6015_v14  ;;  %2273 = vmatprep.mubr.f32.mxu1 %v6015_v14  ;;  %4821 = vset.pattern.permute.xlu0 %v4886_v27 }
 0x359   : > { %v1686_v41 = vpop.permute.xlu0 %1685  ;;  %4822 = vset.pattern.permute.xlu1 %v4886_v27 }
 0x35a   : > { %v1514_v6 = vpop.permute.xlu1 %1513  ;;  %v1688_v20 = vmul.f32 %v1686_v41, %v5884_v24 }
 0x35b   : > { %1454 = vrot.lane.b32.xlu1 %v1452_v62, %s4883_s9  ;;  %1638 = vrot.lane.b32.xlu0 %v1636_v48, %s4883_s9  ;;  %v1516_v63 = vmul.f32 %v1514_v6, %v5884_v24  ;;  %v6021_v62 = vsub.f32 %v1931_v33, %v6015_v14  ;;  %v1851_v6 = vld [vmem:[%s7388_s4 + $0x170] sm:$0xff] }
 0x35d   : > { %v1526_v10 = vpop.permute.xlu0 %1525  ;;  %v7409_v48 = vand.u32 4294901760, %v6021_v62 }
 0x35e   : > { %v1698_v38 = vpop.permute.xlu1 %1697  ;;  %v1528_v16 = vmul.f32 %v1526_v10, %v5884_v24 }
 0x35f   : > { %1466 = vrot.lane.b32.xlu1 %v1464_v61, %s4884_s14  ;;  %1478 = vrot.lane.b32.xlu0 %v1476_v53, %s4885_s18  ;;  %v1700_v9 = vmul.f32 %v1698_v38, %v5884_v24  ;;  %v2035_v61 = vsub.f32 %v6021_v62, %v7409_v48  ;;  %v1799_v53 = vld [vmem:[%s7388_s4 + $0x148] sm:$0xff]  ;;  %v1899_v38 = vld [vmem:[#allocation3 + $0x98] sm:$0xff] }
 0x361   : > { %v2036_v21 = vand.u32 4294901760, %v2035_v61  ;;  %v6073_v61 = vld [vmem:[#allocation3 + $0x50] sm:$0xff] }
 0x362   : > { %v7549_v30 = vand.u32 4294901760, %v6073_v61 }
 0x363   : > { %1650 = vrot.lane.b32.xlu1 %v1648_v13, %s4884_s14  ;;  %1662 = vrot.lane.b32.xlu0 %v1660_v60, %s4885_s18  ;;  %v1811_v13 = vld [vmem:[%s7388_s4 + $0x150] sm:$0xff]  ;;  %v1827_v60 = vld [vmem:[%s7388_s4 + $0x160] sm:$0xff] }
 0x364   : > { %2037 = vmatprep.mubr.f32.mxu0 %v2036_v21 }
 0x367   : > { %1494 = vrot.lane.b32.xlu1 %v1492_v50, %s4883_s9  ;;  %1674 = vrot.lane.b32.xlu0 %v1672_v55, %s4885_s18  ;;  %v1839_v50 = vld [vmem:[%s7388_s4 + $0x168] sm:$0xff]  ;;  %v1867_v55 = vld [vmem:[%s7388_s4 + $0x180] sm:$0xff] }
 0x36b   : > { %1506 = vrot.lane.b32.xlu1 %v1504_v22, %s4884_s14  ;;  %1518 = vrot.lane.b32.xlu0 %v1516_v63, %s4885_s18  ;;  %v1881_v63 = vld [vmem:[#allocation3 + $0x8] sm:$0xff] }
 0x36f   : > { %1690 = vrot.lane.b32.xlu1 %v1688_v20, %s4883_s9  ;;  %1702 = vrot.lane.b32.xlu0 %v1700_v9, %s4884_s14  ;;  %v1940_v9 = vand.u32 4294901760, %v1881_v63 }
 0x373   : > { %1530 = vrot.lane.b32.xlu1 %v1528_v16, %s4885_s18  ;;  %1709 = vrot.lane.b32.xlu0 %v1707_v49, %s4879_s23  ;;  %v1994_v16 = vand.u32 4294901760, %v1899_v38 }
 0x375   : > { %v6076_v21 = vsub.f32 %v1899_v38, %v1994_v16 }
 0x377   : > { %1725 = vrot.lane.b32.xlu1 %v1723_v15, %s4880_s27  ;;  %1737 = vrot.lane.b32.xlu0 %v1735_v47, %s4880_s27  ;;  %v6066_v47 = vld [vmem:[#allocation3 + $0x28] sm:$0xff] }
 0x37b   : > { %1749 = vrot.lane.b32.xlu1 %v1747_v4, %s4881_s30  ;;  %1761 = vrot.lane.b32.xlu0 %v1759_v40, %s4879_s23 }
 0x37f   : > { %1777 = vrot.lane.b32.xlu1 %v1775_v1, %s4880_s27  ;;  %1789 = vrot.lane.b32.xlu0 %v1787_v59, %s4881_s30  ;;  %v6069_v1 = vsub.f32 %v1881_v63, %v1940_v9  ;;  %v6071_v59 = vld [vmem:[#allocation3 + $0xc0] sm:$0xff] }
 0x380   : > { %v7562_v58 = vand.u32 4294901760, %v6071_v59 }
 0x383   : > { %1801 = vrot.lane.b32.xlu1 %v1799_v53, %s4879_s23  ;;  %1813 = vrot.lane.b32.xlu0 %v1811_v13, %s4879_s23  ;;  %v6078_v13 = vld [vmem:[#allocation3 + $0xe8] sm:$0xff] }
 0x387   : > { %1829 = vrot.lane.b32.xlu1 %v1827_v60, %s4880_s27  ;;  %1841 = vrot.lane.b32.xlu0 %v1839_v50, %s4881_s30  ;;  %v6083_v50 = vld [vmem:[#allocation3 + $0x78] sm:$0xff] }
 0x388   : > { %v7558_v29 = vand.u32 4294901760, %v6083_v50 }
 0x38b   : > { %1853 = vrot.lane.b32.xlu1 %v1851_v6, %s4879_s23  ;;  %1869 = vrot.lane.b32.xlu0 %v1867_v55, %s4880_s27 }
 0x3b5   : > { %v1547_v41 = vpop.permute.xlu1 %1546  ;;  %v1559_v22 = vpop.permute.xlu0 %1558 }
 0x3b6   : > { %1549 = vst.msk [vmem:[#allocation3 + $0x80] sm:$0xff] %vm615_vm8, %v1547_v41  ;;  %1561 = vst.msk [vmem:[#allocation3 + $0x88] sm:$0xff] %vm615_vm8, %v1559_v22 }
 0x3b9   : > { %v1387_v20 = vpop.permute.xlu1 %1386  ;;  %v1571_v10 = vpop.permute.xlu0 %1570 }
 0x3ba   : > { %1389 = vst.msk [vmem:[#allocation3] sm:$0xff] %vm615_vm8, %v1387_v20  ;;  %1573 = vst.msk [vmem:[#allocation3 + $0x90] sm:$0xff] %vm615_vm8, %v1571_v10 }
 0x3bd   : > { %v1403_v49 = vpop.permute.xlu1 %1402  ;;  %v1896_v15 = vld [vmem:[#allocation3 + $0x80] sm:$0xff]  ;;  %v1415_v33 = vpop.permute.xlu0 %1414  ;;  %v1897_v4 = vld [vmem:[#allocation3 + $0x88] sm:$0xff] }
 0x3be   : > { %1405 = vst.msk [vmem:[#allocation3 + $0x10] sm:$0xff] %vm615_vm8, %v1403_v49  ;;  %v1985_v40 = vand.u32 4294901760, %v1896_v15  ;;  %1417 = vst.msk [vmem:[#allocation3 + $0x18] sm:$0xff] %vm615_vm8, %v1415_v33  ;;  %v1988_v53 = vand.u32 4294901760, %v1897_v4  ;;  %v7544_v33 = vand.u32 4294901760, %v6066_v47 }
 0x3c0   : > { %v6080_v27 = vsub.f32 %v1896_v15, %v1985_v40  ;;  %v6085_v55 = vpack.c.bf16 %v1988_v53, %v1985_v40  ;;  %v6087_v22 = vsub.f32 %v1897_v4, %v1988_v53  ;;  %v6108_v48 = vsub.f32 %v6066_v47, %v7544_v33 }
 0x3c1   : > { %v1587_v6 = vpop.permute.xlu1 %1586  ;;  %v1880_v41 = vld [vmem:[#allocation3] sm:$0xff]  ;;  %v1599_v38 = vpop.permute.xlu0 %1598  ;;  %v1898_v49 = vld [vmem:[#allocation3 + $0x90] sm:$0xff] }
 0x3c2   : > { %1589 = vst.msk [vmem:[#allocation3 + $0xa0] sm:$0xff] %vm615_vm8, %v1587_v6  ;;  %v1937_v10 = vand.u32 4294901760, %v1880_v41  ;;  %v2163_v15 = vand.u32 4294901760, %v6080_v27  ;;  %1601 = vst.msk [vmem:[#allocation3 + $0xa8] sm:$0xff] %vm615_vm8, %v1599_v38  ;;  %4458 = vmatprep.subr.bf16.mxu0 %v6085_v55  ;;  %v1991_v4 = vand.u32 4294901760, %v1898_v49  ;;  %v2170_v40 = vand.u32 4294901760, %v6087_v22 }
 0x3c4   : > { %v6100_v20 = vpack.c.bf16 %v1940_v9, %v1937_v10  ;;  %v6102_v63 = vsub.f32 %v1880_v41, %v1937_v10  ;;  %v2164_v60 = vsub.f32 %v6080_v27, %v2163_v15  ;;  %v6110_v57 = vpack.c.bf16 %v1994_v16, %v1991_v4 }
 0x3c5   : > { %v1427_v38 = vpop.permute.xlu1 %1426  ;;  %v6112_v43 = vsub.f32 %v1898_v49, %v1991_v4  ;;  %v1882_v12 = vld [vmem:[#allocation3 + $0x10] sm:$0xff]  ;;  %v2171_v53 = vsub.f32 %v6087_v22, %v2170_v40  ;;  %v6115_v6 = vpack.c.bf16 %v2170_v40, %v2163_v15  ;;  %v1611_v9 = vpop.permute.xlu0 %1610  ;;  %v1883_v41 = vld [vmem:[#allocation3 + $0x18] sm:$0xff]  ;;  %v7546_v16 = vand.u32 4294901760, %v6069_v1 }
 0x3c6   : > { %1429 = vst.msk [vmem:[#allocation3 + $0x20] sm:$0xff] %vm615_vm8, %v1427_v38  ;;  %4460 = vmatpush3.bf16.msra.mxu0 %v6100_v20  ;;  %v1943_v10 = vand.u32 4294901760, %v1882_v12  ;;  %v2165_v0 = vand.u32 4294901760, %v2164_v60  ;;  %v7430_v33 = vand.u32 4294901760, %v6102_v63  ;;  %1613 = vst.msk [vmem:[#allocation3 + $0xb0] sm:$0xff] %vm615_vm8, %v1611_v9  ;;  %v1946_v15 = vand.u32 4294901760, %v1883_v41 }
 0x3c7   : > { %7545 = vst [vmem:[#allocation43_spill] sm:$0xff] %v6115_v6  ;;  %v2059_v49 = vsub.f32 %v6069_v1, %v7546_v16  ;;  %4462 = vmatprep.subr.bf16.mxu0 %v6110_v57  ;;  %v2172_v4 = vand.u32 4294901760, %v2171_v53  ;;  %v7547_v38 = vand.u32 4294901760, %v6076_v21  ;;  %v7548_v16 = vand.u32 4294901760, %v6071_v59 }
 0x3c8   : > { %v6129_v45 = vsub.f32 %v1882_v12, %v1943_v10  ;;  %v2052_v60 = vsub.f32 %v6102_v63, %v7430_v33  ;;  %v6142_v53 = vsub.f32 %v6073_v61, %v7549_v30  ;;  %v6144_v34 = vpack.c.bf16 %v1946_v15, %v1943_v10 }
 0x3c9   : > { %v2185_v35 = vsub.f32 %v6076_v21, %v7547_v38  ;;  %v6137_v9 = vsub.f32 %v6071_v59, %v7548_v16  ;;  %v1623_v40 = vpop.permute.xlu1 %1622  ;;  %v6146_v38 = vsub.f32 %v1883_v41, %v1946_v15  ;;  %v4489_v12 = vpack.c.bf16 %v2172_v4, %v2165_v0  ;;  %v1900_v46 = vld [vmem:[#allocation3 + $0xa0] sm:$0xff]  ;;  %v1443_v16 = vpop.permute.xlu0 %1442  ;;  %v1901_v23 = vld [vmem:[#allocation3 + $0xa8] sm:$0xff] }
 0x3ca   : > { %v7550_v31 = vand.u32 4294901760, %v6112_v43  ;;  %1625 = vst.msk [vmem:[#allocation3 + $0xb8] sm:$0xff] %vm615_vm8, %v1623_v40  ;;  %v1997_v52 = vand.u32 4294901760, %v1900_v46  ;;  %v2053_v25 = vand.u32 4294901760, %v2052_v60  ;;  %v2060_v11 = vand.u32 4294901760, %v2059_v49  ;;  %1445 = vst.msk [vmem:[#allocation3 + $0x30] sm:$0xff] %vm615_vm8, %v1443_v16  ;;  %4464 = vmatpush3.bf16.msra.mxu0 %v6144_v34 }
 0x3cb   : > { %v2065_v30 = vand.u32 4294901760, %v6129_v45  ;;  %4490 = vmatprep.subr.bf16.mxu1 %v4489_v12  ;;  %v2000_v0 = vand.u32 4294901760, %v1901_v23  ;;  %v2186_v10 = vand.u32 4294901760, %v2185_v35  ;;  %v2072_v15 = vand.u32 4294901760, %v6146_v38 }
 0x3cc   : > { %v2178_v33 = vsub.f32 %v6112_v43, %v7550_v31  ;;  %v6156_v31 = vsub.f32 %v1900_v46, %v1997_v52  ;;  %v4491_v4 = vpack.c.bf16 %v2060_v11, %v2053_v25 }
 0x3cd   : > { %v2066_v40 = vsub.f32 %v6129_v45, %v2065_v30  ;;  %v1455_v49 = vpop.permute.xlu1 %1454  ;;  %v6160_v7 = vpack.c.bf16 %v2000_v0, %v1997_v52  ;;  %v6162_v2 = vsub.f32 %v1901_v23, %v2000_v0  ;;  %v1884_v51 = vld [vmem:[#allocation3 + $0x20] sm:$0xff]  ;;  %v2073_v12 = vsub.f32 %v6146_v38, %v2072_v15  ;;  %v1639_v35 = vpop.permute.xlu0 %1638  ;;  %v1902_v11 = vld [vmem:[#allocation3 + $0xb0] sm:$0xff] }
 0x3ce   : > { %v2179_v41 = vand.u32 4294901760, %v2178_v33  ;;  %1457 = vst.msk [vmem:[#allocation3 + $0x38] sm:$0xff] %vm615_vm8, %v1455_v49  ;;  %4492 = vmatpush3.bf16.msra.mxu1 %v4491_v4  ;;  %v1949_v46 = vand.u32 4294901760, %v1884_v51  ;;  %v2191_v25 = vand.u32 4294901760, %v6156_v31  ;;  %v6167_v56 = vpack.c.bf16 %v2072_v15, %v2065_v30  ;;  %1641 = vst.msk [vmem:[#allocation3 + $0xc8] sm:$0xff] %vm615_vm8, %v1639_v35 }
 0x3cf   : > { %v2067_v33 = vand.u32 4294901760, %v2066_v40  ;;  %4466 = vmatprep.subr.bf16.mxu0 %v6160_v7  ;;  %v2074_v52 = vand.u32 4294901760, %v2073_v12  ;;  %v2003_v23 = vand.u32 4294901760, %v1902_v11  ;;  %v2198_v0 = vand.u32 4294901760, %v6162_v2 }
 0x3d0   : > { %v4493_v16 = vpack.c.bf16 %v2186_v10, %v2179_v41  ;;  %7551 = vst [vmem:[#allocation44_spill] sm:$0xff] %v6167_v56  ;;  %v7552_v41 = vand.u32 4294901760, %v6078_v13  ;;  %v7553_v4 = vand.u32 4294901760, %v6066_v47  ;;  %v6181_v30 = vsub.f32 %v1884_v51, %v1949_v46 }
 0x3d1   : > { %v2192_v15 = vsub.f32 %v6156_v31, %v2191_v25  ;;  %v4495_v12 = vpack.c.bf16 %v2074_v52, %v2067_v33  ;;  %v1903_v35 = vld [vmem:[#allocation3 + $0xb8] sm:$0xff]  ;;  %v6185_v60 = vsub.f32 %v1902_v11, %v2003_v23  ;;  %v2199_v37 = vsub.f32 %v6162_v2, %v2198_v0  ;;  %v1479_v47 = vpop.permute.xlu0 %1478 }
 0x3d2   : > { %4494 = vmatprep.subr.bf16.mxu1 %v4493_v16  ;;  %v6175_v10 = vsub.f32 %v6078_v13, %v7552_v41  ;;  %v6179_v40 = vpack.c.bf16 %v7553_v4, %v1949_v46  ;;  %v1467_v16 = vpop.permute.xlu1 %1466  ;;  %v6188_v3 = vpack.c.bf16 %v2198_v0, %v2191_v25  ;;  %v2006_v51 = vand.u32 4294901760, %v1903_v35  ;;  %v1886_v41 = vld [vmem:[#allocation3 + $0x30] sm:$0xff]  ;;  %1481 = vst.msk [vmem:[#allocation3 + $0x48] sm:$0xff] %vm615_vm8, %v1479_v47 }
 0x3d3   : > { %1469 = vst.msk [vmem:[#allocation3 + $0x40] sm:$0xff] %vm615_vm8, %v1467_v16  ;;  %v2193_v46 = vand.u32 4294901760, %v2192_v15  ;;  %v7457_v4 = vand.u32 4294901760, %v6181_v30  ;;  %v7556_v49 = vand.u32 4294901760, %v6108_v48  ;;  %4496 = vmatpush3.bf16.msra.mxu1 %v4495_v12  ;;  %v2200_v11 = vand.u32 4294901760, %v2199_v37 }
 0x3d4   : > { %7554 = vst [vmem:[#allocation45_spill] sm:$0xff] %v6179_v40  ;;  %7555 = vst [vmem:[#allocation46_spill] sm:$0xff] %v6188_v3  ;;  %4468 = vmatpush3.bf16.msra.mxu0 %v6179_v40  ;;  %v1955_v25 = vand.u32 4294901760, %v1886_v41  ;;  %v2205_v52 = vand.u32 4294901760, %v6185_v60  ;;  %v6199_v16 = vpack.c.bf16 %v2006_v51, %v2003_v23  ;;  %v6201_v54 = vsub.f32 %v1903_v35, %v2006_v51 }
 0x3d5   : > { %v2087_v33 = vsub.f32 %v6108_v48, %v7556_v49  ;;  %v2080_v15 = vsub.f32 %v6181_v30, %v7457_v4  ;;  %v6209_v49 = vsub.f32 %v6083_v50, %v7558_v29  ;;  %v4497_v37 = vpack.c.bf16 %v2200_v11, %v2193_v46  ;;  %v1887_v47 = vld [vmem:[#allocation3 + $0x38] sm:$0xff]  ;;  %v1663_v35 = vpop.permute.xlu0 %1662  ;;  %v1905_v39 = vld [vmem:[#allocation3 + $0xc8] sm:$0xff] }
 0x3d6   : > { %7557 = vst [vmem:[#allocation47_spill] sm:$0xff] %v6199_v16  ;;  %v1651_v12 = vpop.permute.xlu1 %1650  ;;  %v6211_v42 = vsub.f32 %v1886_v41, %v1955_v25  ;;  %v2206_v0 = vsub.f32 %v6185_v60, %v2205_v52  ;;  %4470 = vmatprep.subr.bf16.mxu0 %v6199_v16  ;;  %v1958_v51 = vand.u32 4294901760, %v1887_v47  ;;  %v2212_v29 = vand.u32 4294901760, %v6201_v54  ;;  %1665 = vst.msk [vmem:[#allocation3 + $0xd8] sm:$0xff] %vm615_vm8, %v1663_v35 }
 0x3d7   : > { %1653 = vst.msk [vmem:[#allocation3 + $0xd0] sm:$0xff] %vm615_vm8, %v1651_v12  ;;  %v2081_v4 = vand.u32 4294901760, %v2080_v15  ;;  %v2088_v8 = vand.u32 4294901760, %v2087_v33  ;;  %4498 = vmatprep.subr.bf16.mxu1 %v4497_v37  ;;  %v2012_v46 = vand.u32 4294901760, %v1905_v39  ;;  %v7559_v11 = vand.u32 4294901760, %v6137_v9 }
 0x3d8   : > { %v2093_v41 = vand.u32 4294901760, %v6211_v42  ;;  %v7560_v12 = vand.u32 4294901760, %v6142_v53  ;;  %v6228_v15 = vpack.c.bf16 %v1958_v51, %v1955_v25  ;;  %v6230_v33 = vsub.f32 %v1887_v47, %v1958_v51 }
 0x3d9   : > { %v2220_v23 = vsub.f32 %v6137_v9, %v7559_v11  ;;  %v4499_v19 = vpack.c.bf16 %v2088_v8, %v2081_v4  ;;  %v2213_v35 = vsub.f32 %v6201_v54, %v2212_v29  ;;  %v6235_v18 = vpack.c.bf16 %v2012_v46, %v7562_v58  ;;  %v1675_v25 = vpop.permute.xlu0 %1674  ;;  %v1889_v8 = vld [vmem:[#allocation3 + $0x48] sm:$0xff] }
 0x3da   : > { %v6226_v17 = vsub.f32 %v6142_v53, %v7560_v12  ;;  %7561 = vst [vmem:[#allocation48_spill] sm:$0xff] %v6228_v15  ;;  %v1495_v37 = vpop.permute.xlu1 %1494  ;;  %v6237_v3 = vsub.f32 %v1905_v39, %v2012_v46  ;;  %v1888_v11 = vld [vmem:[#allocation3 + $0x40] sm:$0xff]  ;;  %v2207_v56 = vand.u32 4294901760, %v2206_v0  ;;  %v6239_v14 = vpack.c.bf16 %v2212_v29, %v2205_v52  ;;  %4472 = vmatpush3.bf16.msra.mxu0 %v6228_v15 }
 0x3db   : > { %7563 = vst [vmem:[#allocation49_spill] sm:$0xff] %v6235_v18  ;;  %1497 = vst.msk [vmem:[#allocation3 + $0x58] sm:$0xff] %vm615_vm8, %v1495_v37  ;;  %4500 = vmatpush3.bf16.msra.mxu1 %v4499_v19  ;;  %v1961_v4 = vand.u32 4294901760, %v1888_v11  ;;  %v2214_v47 = vand.u32 4294901760, %v2213_v35  ;;  %v2094_v51 = vsub.f32 %v6211_v42, %v2093_v41  ;;  %v2100_v58 = vand.u32 4294901760, %v6230_v33  ;;  %4474 = vmatprep.subr.bf16.mxu0 %v6235_v18 }
 0x3dc   : > { %7564 = vst [vmem:[#allocation50_spill] sm:$0xff] %v6239_v14  ;;  %1677 = vst.msk [vmem:[#allocation3 + $0xe0] sm:$0xff] %vm615_vm8, %v1675_v25  ;;  %v1964_v39 = vand.u32 4294901760, %v1889_v8  ;;  %v7470_v59 = vand.u32 4294901760, %v6237_v3  ;;  %v6249_v52 = vand.u32 4294901760, %v6006_v28  ;;  %v7567_v18 = vand.u32 4294901760, %v6175_v10 }
 0x3dd   : > { %v6252_v19 = vsub.f32 %v1888_v11, %v1961_v4  ;;  %v4501_v29 = vpack.c.bf16 %v2214_v47, %v2207_v56  ;;  %v2101_v46 = vsub.f32 %v6230_v33, %v2100_v58  ;;  %v6255_v12 = vpack.c.bf16 %v2100_v58, %v2093_v41  ;;  %v1519_v56 = vpop.permute.xlu0 %1518  ;;  %v1907_v41 = vld [vmem:[#allocation3 + $0xd8] sm:$0xff] }
 0x3de   : > { %v1507_v35 = vpop.permute.xlu1 %1506  ;;  %v6257_v37 = vpack.c.bf16 %v1964_v39, %v1961_v4  ;;  %v6259_v25 = vsub.f32 %v1889_v8, %v1964_v39  ;;  %v1906_v14 = vld [vmem:[#allocation3 + $0xd0] sm:$0xff]  ;;  %v2227_v6 = vsub.f32 %v6237_v3, %v7470_v59  ;;  %v6267_v11 = vsub.f32 %v6175_v10, %v7567_v18  ;;  %1521 = vst.msk [vmem:[#allocation3 + $0x68] sm:$0xff] %vm615_vm8, %v1519_v56 }
 0x3df   : > { %7565 = vst [vmem:[#allocation51_spill] sm:$0xff] %v6255_v12  ;;  %1509 = vst.msk [vmem:[#allocation3 + $0x60] sm:$0xff] %vm615_vm8, %v1507_v35  ;;  %4502 = vmatprep.subr.bf16.mxu1 %v4501_v29  ;;  %v2015_v47 = vand.u32 4294901760, %v1906_v14  ;;  %v2095_v4 = vand.u32 4294901760, %v2094_v51  ;;  %v2102_v58 = vand.u32 4294901760, %v2101_v46  ;;  %v2107_v8 = vand.u32 4294901760, %v6252_v19 }
 0x3e0   : > { %7566 = vst [vmem:[#allocation52_spill] sm:$0xff] %v6257_v37  ;;  %4476 = vmatpush3.bf16.msra.mxu0 %v6257_v37  ;;  %v2018_v39 = vand.u32 4294901760, %v1907_v41  ;;  %v2221_v59 = vand.u32 4294901760, %v2220_v23  ;;  %v2228_v0 = vand.u32 4294901760, %v2227_v6  ;;  %v2114_v18 = vand.u32 4294901760, %v6259_v25 }
 0x3e1   : > { %v6274_v12 = vsub.f32 %v1906_v14, %v2015_v47  ;;  %v4503_v35 = vpack.c.bf16 %v2102_v58, %v2095_v4  ;;  %v2108_v29 = vsub.f32 %v6252_v19, %v2107_v8  ;;  %v6279_v51 = vsub.f32 %v6006_v28, %v6249_v52  ;;  %v1703_v14 = vpop.permute.xlu0 %1702 }
 0x3e2   : > { %v1691_v46 = vpop.permute.xlu1 %1690  ;;  %v6281_v15 = vpack.c.bf16 %v2018_v39, %v2015_v47  ;;  %v6283_v56 = vsub.f32 %v1907_v41, %v2018_v39  ;;  %v4505_v37 = vpack.c.bf16 %v2228_v0, %v2221_v59  ;;  %v1891_v44 = vld [vmem:[#allocation3 + $0x58] sm:$0xff]  ;;  %v2115_v6 = vsub.f32 %v6259_v25, %v2114_v18  ;;  %1705 = vst.msk [vmem:[#allocation3 + $0xf8] sm:$0xff] %vm615_vm8, %v1703_v14 }
 0x3e3   : > { %7568 = vst [vmem:[#allocation53_spill] sm:$0xff] %v6274_v12  ;;  %7569 = vst [vmem:[#allocation54_spill] sm:$0xff] %v6279_v51  ;;  %4504 = vmatpush3.bf16.msra.mxu1 %v4503_v35  ;;  %v1970_v23 = vand.u32 4294901760, %v1891_v44  ;;  %v2109_v4 = vand.u32 4294901760, %v2108_v29  ;;  %v1908_v58 = vld [vmem:[#allocation3 + $0xe0] sm:$0xff]  ;;  %v2233_v16 = vand.u32 4294901760, %v6274_v12  ;;  %v6288_v28 = vpack.c.bf16 %v2114_v18, %v2107_v8 }
 0x3e4   : > { %7570 = vst [vmem:[#allocation55_spill] sm:$0xff] %v6281_v15  ;;  %7571 = vst [vmem:[#allocation56_spill] sm:$0xff] %v6283_v56  ;;  %4478 = vmatprep.subr.bf16.mxu0 %v6281_v15  ;;  %4506 = vmatprep.subr.bf16.mxu1 %v4505_v37  ;;  %v2116_v59 = vand.u32 4294901760, %v2115_v6  ;;  %v2021_v0 = vand.u32 4294901760, %v1908_v58  ;;  %v2240_v41 = vand.u32 4294901760, %v6283_v56  ;;  %v2123_v47 = vand.u32 4294901760, %v6226_v17 }
 0x3e5   : > { %1693 = vst.msk [vmem:[#allocation3 + $0xf0] sm:$0xff] %vm615_vm8, %v1691_v46  ;;  %7572 = vst [vmem:[#allocation57_spill] sm:$0xff] %v6288_v28  ;;  %v7573_v39 = vand.u32 4294901760, %v6073_v61  ;;  %v6298_v29 = vsub.f32 %v1891_v44, %v1970_v23  ;;  %v2234_v8 = vsub.f32 %v6274_v12, %v2233_v16  ;;  %v7576_v37 = vand.u32 4294901760, %v6078_v13  ;;  %v1710_v61 = vpop.permute.xlu0 %1709  ;;  %v1893_v44 = vld [vmem:[#allocation3 + $0x68] sm:$0xff] }
 0x3e6   : > { %v1531_v46 = vpop.permute.xlu1 %1530  ;;  %v4507_v14 = vpack.c.bf16 %v2116_v59, %v2109_v4  ;;  %v6306_v28 = vsub.f32 %v1908_v58, %v2021_v0  ;;  %v1892_v15 = vld [vmem:[#allocation3 + $0x60] sm:$0xff]  ;;  %v2241_v17 = vsub.f32 %v6283_v56, %v2240_v41  ;;  %v2256_v4 = vand.u32 4294901760, %v6267_v11 }
 0x3e7   : > { %v6296_v35 = vpack.c.bf16 %v1970_v23, %v7573_v39  ;;  %7575 = vst [vmem:[#allocation59_spill] sm:$0xff] %v6298_v29  ;;  %v6304_v6 = vpack.c.bf16 %v7576_v37, %v2021_v0  ;;  %1533 = vst.msk [vmem:[#allocation3 + $0x70] sm:$0xff] %vm615_vm8, %v1531_v46  ;;  %v1973_v23 = vand.u32 4294901760, %v1892_v15  ;;  %v2235_v39 = vand.u32 4294901760, %v2234_v8 }
 0x3e8   : > { %v2128_v18 = vand.u32 4294901760, %v6298_v29  ;;  %v1712_v13 = vmul.f32 %v1710_v61, %v5884_v24  ;;  %4508 = vmatpush3.bf16.msra.mxu1 %v4507_v14  ;;  %v1976_v58 = vand.u32 4294901760, %v1893_v44  ;;  %v2242_v59 = vand.u32 4294901760, %v2241_v17 }
 0x3e9   : > { %7574 = vst [vmem:[#allocation58_spill] sm:$0xff] %v6296_v35  ;;  %7577 = vst [vmem:[#allocation60_spill] sm:$0xff] %v6304_v6  ;;  %4480 = vmatpush3.bf16.msra.mxu0 %v6296_v35  ;;  %v2247_v0 = vand.u32 4294901760, %v6306_v28  ;;  %v6316_v46 = vsub.f32 %v1892_v15, %v1973_v23  ;;  %v7578_v35 = vand.u32 4294901760, %v6279_v51  ;;  %v6324_v36 = vpack.c.bf16 %v2240_v41, %v2233_v16  ;;  %v1738_v40 = vpop.permute.xlu0 %1737  ;;  %v1911_v56 = vld [vmem:[#allocation3 + $0xf8] sm:$0xff] }
 0x3ea   : > { %4482 = vmatprep.subr.bf16.mxu0 %v6304_v6  ;;  %v2129_v37 = vsub.f32 %v6298_v29, %v2128_v18  ;;  %1714 = vrot.lane.b32.xlu1 %v1712_v13, %s4885_s18  ;;  %v1726_v11 = vpop.permute.xlu1 %1725  ;;  %v6327_v14 = vpack.c.bf16 %v1976_v58, %v1973_v23  ;;  %v6329_v61 = vsub.f32 %v1893_v44, %v1976_v58  ;;  %v2030_v23 = vand.u32 4294901760, %v1911_v56 }
 0x3eb   : > { %v6322_v8 = vsub.f32 %v6279_v51, %v7578_v35  ;;  %7579 = vst [vmem:[#allocation61_spill] sm:$0xff] %v6324_v36  ;;  %v4509_v17 = vpack.c.bf16 %v2242_v59, %v2235_v39  ;;  %v2248_v15 = vsub.f32 %v6306_v28, %v2247_v0  ;;  %v1728_v29 = vmul.f32 %v1726_v11, %v5884_v24 }
 0x3ec   : > { %7580 = vst [vmem:[#allocation62_spill] sm:$0xff] %v6327_v14  ;;  %v1910_v6 = vld [vmem:[#allocation3 + $0xf0] sm:$0xff]  ;;  %v2130_v35 = vand.u32 4294901760, %v2129_v37  ;;  %v2135_v16 = vand.u32 4294901760, %v6316_v46  ;;  %v1740_v41 = vmul.f32 %v1738_v40, %v5884_v24  ;;  %v2142_v39 = vand.u32 4294901760, %v6329_v61 }
 0x3ed   : > { %v2027_v12 = vand.u32 4294901760, %v1910_v6  ;;  %4484 = vmatpush3.bf16.msra.mxu0 %v6327_v14  ;;  %4510 = vmatprep.subr.bf16.mxu1 %v4509_v17  ;;  %v2249_v44 = vand.u32 4294901760, %v2248_v15  ;;  %v2042_v37 = vand.u32 4294901760, %v6322_v8  ;;  %v6345_v36 = vsub.f32 %v1911_v56, %v2030_v23 }
 0x3ee   : > { %1730 = vrot.lane.b32.xlu0 %v1728_v29, %s4883_s9  ;;  %v4511_v58 = vpack.c.bf16 %v2130_v35, %v2123_v47  ;;  %v2136_v59 = vsub.f32 %v6316_v46, %v2135_v16  ;;  %1742 = vrot.lane.b32.xlu1 %v1740_v41, %s4883_s9  ;;  %v1750_v11 = vpop.permute.xlu1 %1749  ;;  %v1894_v15 = vld [vmem:[#allocation3 + $0x70] sm:$0xff]  ;;  %v2143_v14 = vsub.f32 %v6329_v61, %v2142_v39  ;;  %v7581_v41 = vand.u32 4294901760, %v6083_v50 }
 0x3ef   : > { %v6338_v13 = vsub.f32 %v1910_v6, %v2027_v12  ;;  %v6343_v40 = vpack.c.bf16 %v2030_v23, %v2027_v12  ;;  %v4513_v17 = vpack.c.bf16 %v2256_v4, %v2249_v44  ;;  %v1752_v29 = vmul.f32 %v1750_v11, %v5884_v24  ;;  %v1762_v6 = vpop.permute.xlu0 %1761 }
 0x3f0   : > { %4512 = vmatpush3.bf16.msra.mxu1 %v4511_v58  ;;  %v1979_v47 = vand.u32 4294901760, %v1894_v15  ;;  %v2137_v35 = vand.u32 4294901760, %v2136_v59  ;;  %v1764_v8 = vmul.f32 %v1762_v6, %v5884_v24  ;;  %v2144_v12 = vand.u32 4294901760, %v2143_v14 }
 0x3f1   : > { %v2261_v51 = vand.u32 4294901760, %v6338_v13  ;;  %4486 = vmatprep.subr.bf16.mxu0 %v6343_v40  ;;  %4514 = vmatprep.subr.bf16.mxu1 %v4513_v17  ;;  %v4521_v56 = vpack.c.bf16 %v6087_v22, %v6080_v27  ;;  %v2268_v4 = vand.u32 4294901760, %v6345_v36  ;;  %v7582_v59 = vand.u32 4294901760, %v6142_v53 }
 0x3f2   : > { %1754 = vrot.lane.b32.xlu0 %v1752_v29, %s4884_s14  ;;  %v6358_v23 = vpack.c.bf16 %v7581_v41, %v1979_v47  ;;  %v6360_v44 = vsub.f32 %v1894_v15, %v1979_v47  ;;  %1766 = vrot.lane.b32.xlu1 %v1764_v8, %s4885_s18  ;;  %v1778_v27 = vpop.permute.xlu1 %1777  ;;  %v4515_v22 = vpack.c.bf16 %v2144_v12, %v2137_v35  ;;  %v7583_v11 = vand.u32 4294901760, %v6175_v10 }
 0x3f3   : > { %v2262_v58 = vsub.f32 %v6338_v13, %v2261_v51  ;;  %v6367_v14 = vpack.c.bf16 %v2128_v18, %v7582_v59  ;;  %v2269_v50 = vsub.f32 %v6345_v36, %v2268_v4  ;;  %v6377_v15 = vpack.c.bf16 %v2142_v39, %v2135_v16  ;;  %v1790_v6 = vpop.permute.xlu0 %1789 }
 0x3f4   : > { %v6375_v17 = vpack.c.bf16 %v7583_v11, %v2247_v0  ;;  %v1780_v29 = vmul.f32 %v1778_v27, %v5884_v24  ;;  %4488 = vmatpush3.bf16.msra.mxu0 %v6358_v23  ;;  %v2149_v47 = vand.u32 4294901760, %v6360_v44  ;;  %v7584_v35 = vand.u32 4294901760, %v6209_v49  ;;  %4516 = vmatpush3.bf16.msra.mxu1 %v4515_v22 }
 0x3f5   : > { %v2263_v18 = vand.u32 4294901760, %v2262_v58  ;;  %v1792_v12 = vmul.f32 %v1790_v6, %v5884_v24  ;;  %4522 = vmatprep.subr.bf16.mxu0 %v4521_v56  ;;  %v2270_v0 = vand.u32 4294901760, %v2269_v50  ;;  %v4523_v16 = vpack.c.bf16 %v6069_v1, %v6102_v63 }
 0x3f6   : > { %v2157_v8 = vsub.f32 %v6209_v49, %v7584_v35  ;;  %1782 = vrot.lane.b32.xlu0 %v1780_v29, %s4883_s9  ;;  %v2150_v39 = vsub.f32 %v6360_v44, %v2149_v47  ;;  %v1802_v41 = vpop.permute.xlu1 %1801  ;;  %v4525_v59 = vpack.c.bf16 %v6076_v21, %v6112_v43 }
 0x3f7   : > { %1794 = vrot.lane.b32.xlu1 %v1792_v12, %s4884_s14  ;;  %2043 = vmatmul.mubr.f32.vlgmr.msra.gmra.mrb[0].mxu0 %v2042_v37  ;;  %v4517_v58 = vpack.c.bf16 %v2270_v0, %v2263_v18  ;;  %v1804_v56 = vmul.f32 %v1802_v41, %v5884_v24  ;;  %v1814_v27 = vpop.permute.xlu0 %1813  ;;  %v4527_v37 = vpack.c.bf16 %v6146_v38, %v6129_v45 }
 0x3f8   : > { %4524 = vmatpush3.bf16.msra.mxu0 %v4523_v16  ;;  %v2151_v22 = vand.u32 4294901760, %v2150_v39  ;;  %v2158_v50 = vand.u32 4294901760, %v2157_v8  ;;  %2410 = vmatprep.mubr.f32.mxu0 %v6021_v62  ;;  %v1816_v11 = vmul.f32 %v1814_v27, %v5884_v24  ;;  %v4529_v18 = vpack.c.bf16 %v6162_v2, %v6156_v31  ;;  %v3471_v16 = vld [vmem:[%s7389_s5] sm:$0xff]  ;;  %v7588_v27 = vld [vmem:[#allocation45_spill] sm:$0xff] }
 0x3f9   : > { %4518 = vmatprep.subr.bf16.mxu1 %v4517_v58  ;;  %4526 = vmatprep.subr.bf16.mxu0 %v4525_v59  ;;  %v4531_v45 = vpack.c.bf16 %v6108_v48, %v6181_v30  ;;  %v4533_v2 = vpack.c.bf16 %v6201_v54, %v6185_v60  ;;  %v4535_v54 = vpack.c.bf16 %v6230_v33, %v6211_v42  ;;  %v3472_v60 = vld [vmem:[%s7389_s5 + $0x8] sm:$0xff]  ;;  %v7585_v39 = vand.u32 4294901760, %v6021_v62  ;;  %v3474_v62 = vld [vmem:[%s7389_s5 + $0x18] sm:$0xff]  ;;  %v3473_v58 = vld [vmem:[%s7389_s5 + $0x10] sm:$0xff] }
 0x3fa   : > { %1806 = vrot.lane.b32.xlu0 %v1804_v56, %s4885_s18  ;;  %v4519_v29 = vpack.c.bf16 %v2158_v50, %v2151_v22  ;;  %v1830_v6 = vpop.permute.xlu1 %1829  ;;  %v3475_v41 = vmul.f32 %v5486_v32, %v3471_v16  ;;  %v3476_v42 = vmul.f32 %v5507_v5, %v3472_v60  ;;  %v4539_v33 = vpack.c.bf16 %v6259_v25, %v6252_v19  ;;  %v7586_v59 = vld [vmem:[#allocation53_spill] sm:$0xff]  ;;  %v7587_v32 = vld [vmem:[#allocation56_spill] sm:$0xff]  ;;  %v7590_v50 = vld [vmem:[#allocation47_spill] sm:$0xff] }
 0x3fb   : > { %1818 = vrot.lane.b32.xlu1 %v1816_v11, %s4885_s18  ;;  %v1832_v35 = vmul.f32 %v1830_v6, %v5884_v24  ;;  %v1842_v8 = vpop.permute.xlu0 %1841  ;;  %v4541_v56 = vpack.c.bf16 %v7587_v32, %v7586_v59  ;;  %v7589_v5 = vld [vmem:[#allocation28_spill] sm:$0xff]  ;;  %v7591_v11 = vld [vmem:[#allocation17_spill] sm:$0xff]  ;;  %v7592_v19 = vld [vmem:[#allocation59_spill] sm:$0xff] }
 0x3fc   : > { %4520 = vmatpush3.bf16.msra.mxu1 %v4519_v29  ;;  %4528 = vmatpush3.bf16.msra.mxu0 %v4527_v37  ;;  %v1844_v12 = vmul.f32 %v1842_v8, %v5884_v24  ;;  %v3478_v22 = vmul.f32 %v7589_v5, %v3474_v62  ;;  %v3477_v29 = vmul.f32 %v7591_v11, %v3473_v58  ;;  %v7593_v6 = vld [vmem:[#allocation48_spill] sm:$0xff]  ;;  %v7606_v60 = vld [vmem:[#allocation42_spill] sm:$0xff]  ;;  %v7615_v62 = vld [vmem:[#allocation51_spill] sm:$0xff] }
 0x3fd   : > { %4530 = vmatprep.subr.bf16.mxu0 %v4529_v18  ;;  %4554 = vmatprep.subr.bf16.mxu1 %v6085_v55  ;;  %v4543_v25 = vpack.c.bf16 %v7592_v19, %v6142_v53  ;;  %v4545_v37 = vpack.c.bf16 %v6175_v10, %v6306_v28  ;;  %v7594_v18 = vld [vmem:[#allocation49_spill] sm:$0xff]  ;;  %v4549_v8 = vpack.c.bf16 %v6345_v36, %v6338_v13  ;;  %v7596_v53 = vld [vmem:[#allocation55_spill] sm:$0xff]  ;;  %v7597_v28 = vld [vmem:[#allocation58_spill] sm:$0xff] }
 0x3fe   : > { %1834 = vrot.lane.b32.xlu0 %v1832_v35, %s4883_s9  ;;  %v1854_v38 = vpop.permute.xlu1 %1853  ;;  %v4547_v35 = vpack.c.bf16 %v6329_v61, %v6316_v46  ;;  %v4551_v10 = vpack.c.bf16 %v6209_v49, %v6360_v44  ;;  %v7600_v46 = vand.u32 4294901760, %v6102_v63  ;;  %v7601_v61 = vand.u32 4294901760, %v6069_v1  ;;  %v7607_v63 = vld [vmem:[#allocation44_spill] sm:$0xff]  ;;  %v7608_v1 = vld [vmem:[#allocation46_spill] sm:$0xff] }
 0x3ff   : > { %1846 = vrot.lane.b32.xlu1 %v1844_v12, %s4884_s14  ;;  %2275 = vmatmul.mubr.f32.vlgmr.msra.gmra.mrb[0].mxu1 %v6249_v52  ;;  %v1856_v31 = vmul.f32 %v1854_v38, %v5910_v26  ;;  %v1870_v0 = vpop.permute.xlu0 %1869  ;;  %v7595_v12 = vld [vmem:[#allocation52_spill] sm:$0xff]  ;;  %v7599_v38 = vld [vmem:[#allocation43_spill] sm:$0xff] }
 0x400   : > { %4532 = vmatpush3.bf16.msra.mxu0 %v4531_v45  ;;  %4556 = vmatpush3.bf16.msra.mxu1 %v6100_v20  ;;  %v1872_v24 = vmul.f32 %v1870_v0, %v5910_v26  ;;  %v4537_v26 = vpack.c.bf16 %v6237_v3, %v6137_v9  ;;  %v7598_v45 = vld [vmem:[#allocation60_spill] sm:$0xff]  ;;  %v7603_v0 = vand.u32 4294901760, %v6112_v43  ;;  %v7609_v43 = vand.u32 4294901760, %v6181_v30 }
 0x401   : > { %4534 = vmatprep.subr.bf16.mxu0 %v4533_v2  ;;  %4558 = vmatprep.subr.bf16.mxu1 %v6110_v57  ;;  %v4587_v2 = vpack.c.bf16 %v7601_v61, %v7600_v46  ;;  %v7614_v30 = vand.u32 4294901760, %v6237_v3 }
 0x402   : > { %1858 = vrot.lane.b32.xlu0 %v1856_v31, %s4885_s18  ;;  %2517 = vmatprep.mubr.f32.mxu1 %v7585_v39  ;;  %v7602_v31 = vld [vmem:[#allocation54_spill] sm:$0xff] }
 0x403   : > { %1874 = vrot.lane.b32.xlu1 %v1872_v24, %s4883_s9  ;;  %v7604_v24 = vand.u32 4294901760, %v6076_v21  ;;  %v7610_v21 = vand.u32 4294901760, %v6108_v48  ;;  %v7613_v48 = vand.u32 4294901760, %v6137_v9 }
 0x404   : > { %4536 = vmatpush3.bf16.msra.mxu0 %v4535_v54  ;;  %4560 = vmatpush3.bf16.msra.mxu1 %v6144_v34  ;;  %v7605_v54 = vld [vmem:[#allocation62_spill] sm:$0xff] }
 0x405   : > { %4538 = vmatprep.subr.bf16.mxu0 %v4537_v26  ;;  %4562 = vmatprep.subr.bf16.mxu1 %v6160_v7  ;;  %v4589_v16 = vpack.c.bf16 %v7604_v24, %v7603_v0  ;;  %v4595_v39 = vpack.c.bf16 %v7610_v21, %v7609_v43  ;;  %v7611_v26 = vand.u32 4294901760, %v7602_v31 }
 0x406   : > { %3481 = vperm.xlu0 %4821, %v3475_v41   ;;  %v7612_v41 = vld [vmem:[#allocation50_spill] sm:$0xff] }
 0x407   : > { %3486 = vperm.xlu1 %4822, %v3476_v42   ;;  %v4601_v42 = vpack.c.bf16 %v7614_v30, %v7613_v48 }
 0x408   : > { %4540 = vmatpush3.bf16.msra.mxu0 %v4539_v33  ;;  %4564 = vmatpush3.bf16.msra.mxu1 %v7588_v27  ;;  %v7617_v33 = vld [vmem:[#allocation61_spill] sm:$0xff] }
 0x409   : > { %4542 = vmatprep.subr.bf16.mxu0 %v4541_v56  ;;  %4566 = vmatprep.subr.bf16.mxu1 %v7590_v50 }
 0x40a   : > { %3496 = vperm.xlu0 %4821, %v3478_v22  }
 0x40b   : > { %3491 = vperm.xlu1 %4822, %v3477_v29  }
 0x40c   : > { %4544 = vmatpush3.bf16.msra.mxu0 %v4543_v25  ;;  %4568 = vmatpush3.bf16.msra.mxu1 %v7593_v6 }
 0x40d   : > { %4546 = vmatprep.subr.bf16.mxu0 %v4545_v37  ;;  %4570 = vmatprep.subr.bf16.mxu1 %v7594_v18 }
 0x410   : > { %4548 = vmatpush3.bf16.msra.mxu0 %v4547_v35  ;;  %4572 = vmatpush3.bf16.msra.mxu1 %v7595_v12 }
 0x411   : > { %4550 = vmatprep.subr.bf16.mxu0 %v4549_v8  ;;  %4574 = vmatprep.subr.bf16.mxu1 %v7596_v53  ;;  %v6581_v8 = vld [vmem:[#allocation3 + $0x130] sm:$0xff] }
 0x414   : > { %4552 = vmatpush3.bf16.msra.mxu0 %v4551_v10  ;;  %4576 = vmatpush3.bf16.msra.mxu1 %v7597_v28 }
 0x415   : > { %4578 = vmatprep.subr.bf16.mxu1 %v7598_v45  ;;  %4586 = vmatprep.subr.bf16.mxu0 %v7599_v38 }
 0x417   : > { %2413 = vmatmul.mubr.f32.vlgmr.msra.gmra.mrb[2].mxu0 %v7602_v31 }
 0x418   : > { %4580 = vmatpush3.bf16.msra.mxu1 %v7605_v54  ;;  %4588 = vmatpush3.bf16.msra.mxu0 %v4587_v2 }
 0x419   : > { %4582 = vmatprep.subr.bf16.mxu1 %v6343_v40  ;;  %4590 = vmatprep.subr.bf16.mxu0 %v4589_v16 }
 0x41a   : > { %2687 = vmatprep.mubr.f32.mxu0 %v7606_v60 }
 0x41c   : > { %4584 = vmatpush3.bf16.msra.mxu1 %v6358_v23  ;;  %4592 = vmatpush3.bf16.msra.mxu0 %v7607_v63  ;;  %v6627_v63 = vld [vmem:[#allocation3 + $0x158] sm:$0xff] }
 0x41d   : > { %4594 = vmatprep.subr.bf16.mxu0 %v7608_v1  ;;  %4618 = vmatprep.subr.bf16.mxu1 %v6085_v55  ;;  %v6496_v55 = vld [vmem:[%s7387_s3 + $0x8] sm:$0xff] }
 0x41e   : > { %v6631_v43 = vand.u32 4294901760, %v6496_v55 }
 0x41f   : > { %2521 = vmatmul.mubr.f32.vlgmr.msra.gmra.mrb[2].mxu1 %v7611_v26 }
 0x420   : > { %4596 = vmatpush3.bf16.msra.mxu0 %v4595_v39  ;;  %4620 = vmatpush3.bf16.msra.mxu1 %v6100_v20  ;;  %v7616_v20 = vld [vmem:[#allocation57_spill] sm:$0xff] }
 0x421   : > { %4598 = vmatprep.subr.bf16.mxu0 %v7612_v41  ;;  %4622 = vmatprep.subr.bf16.mxu1 %v6110_v57  ;;  %v1932_v57 = vcombine.high %v6496_v55, %v6496_v55  ;;  %v2832_v41 = vand.u32 4294901760, %v6627_v63 }
 0x422   : > { %2791 = vmatprep.mubr.f32.mxu1 %v7606_v60 }
 0x423   : > { %v1934_v3 = vsel %vm1376_vm11, %v1932_v57, 0  ;;  %v6659_v57 = vsub.f32 %v6496_v55, %v6631_v43  ;;  %v6676_v55 = vld [vmem:[#allocation3 + $0x178] sm:$0xff] }
 0x424   : > { %4600 = vmatpush3.bf16.msra.mxu0 %v7615_v62  ;;  %4624 = vmatpush3.bf16.msra.mxu1 %v6144_v34  ;;  %v6514_v34 = vand.u32 4294901760, %v1934_v3 }
 0x425   : > { %4602 = vmatprep.subr.bf16.mxu0 %v4601_v42  ;;  %4626 = vmatprep.subr.bf16.mxu1 %v6160_v7  ;;  %v4613_v7 = vpack.c.bf16 %v2268_v4, %v2261_v51  ;;  %v4887_v51 = vmov 0.0|0.0  }
 0x426   : > { %v6525_v9 = vsub.f32 %v1934_v3, %v6514_v34 }
 0x428   : > { %4604 = vmatpush3.bf16.msra.mxu0 %v7616_v20  ;;  %4628 = vmatpush3.bf16.msra.mxu1 %v7588_v27  ;;  %v2881_v36 = vand.u32 4294901760, %v6525_v9 }
 0x429   : > { %4606 = vmatprep.subr.bf16.mxu0 %v7617_v33  ;;  %4630 = vmatprep.subr.bf16.mxu1 %v7590_v50 }
 0x42a   : > { %v2882_v13 = vsub.f32 %v6525_v9, %v2881_v36 }
 0x42c   : > { %4608 = vmatpush3.bf16.msra.mxu0 %v6367_v14  ;;  %4632 = vmatpush3.bf16.msra.mxu1 %v7593_v6  ;;  %v7618_v14 = vand.u32 4294901760, %v6209_v49  ;;  %v2883_v49 = vand.u32 4294901760, %v2882_v13 }
 0x42d   : > { %4610 = vmatprep.subr.bf16.mxu0 %v6375_v17  ;;  %4634 = vmatprep.subr.bf16.mxu1 %v7594_v18 }
 0x42e   : > { %v4615_v17 = vpack.c.bf16 %v7618_v14, %v2149_v47  ;;  %v6546_v47 = vld [vmem:[#allocation3 + $0x108] sm:$0xff] }
 0x42f   : > { %v2802_v59 = vand.u32 4294901760, %v6546_v47 }
 0x430   : > { %4612 = vmatpush3.bf16.msra.mxu0 %v6377_v15  ;;  %4636 = vmatpush3.bf16.msra.mxu1 %v7595_v12 }
 0x431   : > { %4614 = vmatprep.subr.bf16.mxu0 %v4613_v7  ;;  %4638 = vmatprep.subr.bf16.mxu1 %v7596_v53  ;;  %v6645_v48 = vsub.f32 %v6546_v47, %v2802_v59 }
 0x433   : > { %v2905_v13 = vand.u32 4294901760, %v6645_v48 }
 0x434   : > { %4616 = vmatpush3.bf16.msra.mxu0 %v4615_v17  ;;  %4640 = vmatpush3.bf16.msra.mxu1 %v7597_v28 }
 0x435   : > { %4642 = vmatprep.subr.bf16.mxu1 %v7598_v45  ;;  %4721 = vmatprep.subr.bf16.mxu0 %v4887_v51  ;;  %v2817_v45 = vand.u32 4294901760, %v6581_v8 }
 0x437   : > { %2689 = vmatmul.mubr.f32.vlgmr.msra.gmra.mrb[4].mxu0 %v6249_v52 }
 0x438   : > { %4644 = vmatpush3.bf16.msra.mxu1 %v7605_v54  ;;  %3244 = vmatprep.mubr.f32.mxu0 %v2881_v36  ;;  %v2887_v36 = vand.u32 4294901760, %v6659_v57 }
 0x439   : > { %4646 = vmatprep.subr.bf16.mxu1 %v6343_v40 }
 0x43c   : > { %4648 = vmatpush3.bf16.msra.mxu1 %v6358_v23 }
 0x43d   : > { %4649 = vmatprep.subr.bf16.mxu1 %v4887_v51 }
 0x43f   : > { %2793 = vmatmul.mubr.f32.vlgmr.msra.gmra.mrb[4].mxu1 %v6249_v52 }
 0x440   : > { %2884 = vmatprep.mubr.f32.mxu1 %v2883_v49 }
 0x45c   : > { %v1715_v4 = vpop.permute.xlu1 %1714 }
 0x45d   : > { %1717 = vst.msk [vmem:[#allocation3 + $0x100] sm:$0xff] %vm615_vm8, %v1715_v4 }
 0x460   : > { %v1731_v44 = vpop.permute.xlu0 %1730  ;;  %v1743_v15 = vpop.permute.xlu1 %1742 }
 0x461   : > { %1733 = vst.msk [vmem:[#allocation3 + $0x110] sm:$0xff] %vm615_vm8, %v1731_v44  ;;  %1745 = vst.msk [vmem:[#allocation3 + $0x118] sm:$0xff] %vm615_vm8, %v1743_v15 }
 0x464   : > { %v1755_v40 = vpop.permute.xlu0 %1754  ;;  %v1767_v58 = vpop.permute.xlu1 %1766  ;;  %v1912_v23 = vld [vmem:[#allocation3 + $0x100] sm:$0xff] }
 0x465   : > { %1757 = vst.msk [vmem:[#allocation3 + $0x120] sm:$0xff] %vm615_vm8, %v1755_v40  ;;  %1769 = vst.msk [vmem:[#allocation3 + $0x128] sm:$0xff] %vm615_vm8, %v1767_v58  ;;  %v2799_v52 = vand.u32 4294901760, %v1912_v23  ;;  %v7494_v40 = vand.u32 4294901760, %v6676_v55 }
 0x467   : > { %v6553_v56 = vpack.c.bf16 %v2802_v59, %v2799_v52  ;;  %v6633_v21 = vsub.f32 %v1912_v23, %v2799_v52  ;;  %v2888_v23 = vsub.f32 %v6659_v57, %v2887_v36  ;;  %v2906_v52 = vsub.f32 %v6645_v48, %v2905_v13 }
 0x468   : > { %v1783_v32 = vpop.permute.xlu0 %1782  ;;  %v6555_v27 = vld [vmem:[#allocation3 + $0x110] sm:$0xff]  ;;  %v6558_v22 = vld [vmem:[#allocation3 + $0x118] sm:$0xff] }
 0x469   : > { %v1795_v5 = vpop.permute.xlu1 %1794  ;;  %1785 = vst.msk [vmem:[#allocation3 + $0x138] sm:$0xff] %vm615_vm8, %v1783_v32  ;;  %v2805_v50 = vand.u32 4294901760, %v6555_v27  ;;  %4651 = vmatpush1.bf16.msra.mxu1 %v6553_v56  ;;  %4723 = vmatpush1.bf16.msra.mxu0 %v6553_v56  ;;  %v2808_v11 = vand.u32 4294901760, %v6558_v22  ;;  %v2898_v7 = vand.u32 4294901760, %v6633_v21 }
 0x46a   : > { %1797 = vst.msk [vmem:[#allocation3 + $0x140] sm:$0xff] %vm615_vm8, %v1795_v5  ;;  %4652 = vmatprep.subr.bf16.mxu1 %v4887_v51  ;;  %4724 = vmatprep.subr.bf16.mxu0 %v4887_v51 }
 0x46b   : > { %v6569_v19 = vpack.c.bf16 %v2808_v11, %v2805_v50  ;;  %v6664_v20 = vsub.f32 %v6555_v27, %v2805_v50  ;;  %v6667_v33 = vsub.f32 %v6558_v22, %v2808_v11  ;;  %v2899_v49 = vsub.f32 %v6633_v21, %v2898_v7 }
 0x46c   : > { %v1807_v29 = vpop.permute.xlu0 %1806  ;;  %v6571_v25 = vld [vmem:[#allocation3 + $0x120] sm:$0xff]  ;;  %v6574_v6 = vld [vmem:[#allocation3 + $0x128] sm:$0xff] }
 0x46d   : > { %v1819_v37 = vpop.permute.xlu1 %1818  ;;  %1809 = vst.msk [vmem:[#allocation3 + $0x148] sm:$0xff] %vm615_vm8, %v1807_v29  ;;  %v2811_v18 = vand.u32 4294901760, %v6571_v25  ;;  %4654 = vmatpush1.bf16.msra.mxu1 %v6569_v19  ;;  %4726 = vmatpush1.bf16.msra.mxu0 %v6569_v19  ;;  %v2814_v35 = vand.u32 4294901760, %v6574_v6  ;;  %v2912_v4 = vand.u32 4294901760, %v6664_v20  ;;  %v2919_v44 = vand.u32 4294901760, %v6667_v33  ;;  %v7619_v29 = vld [vmem:[#allocation8_spill] sm:$0xff] }
 0x46e   : > { %1821 = vst.msk [vmem:[#allocation3 + $0x150] sm:$0xff] %vm615_vm8, %v1819_v37  ;;  %4655 = vmatprep.subr.bf16.mxu1 %v4887_v51  ;;  %4727 = vmatprep.subr.bf16.mxu0 %v4887_v51  ;;  %v2900_v27 = vand.u32 4294901760, %v2899_v49 }
 0x46f   : > { %v6589_v53 = vpack.c.bf16 %v2814_v35, %v2811_v18  ;;  %v6693_v15 = vsub.f32 %v6571_v25, %v2811_v18  ;;  %v6698_v47 = vsub.f32 %v6574_v6, %v2814_v35  ;;  %v2913_v5 = vsub.f32 %v6664_v20, %v2912_v4  ;;  %v7620_v35 = vld [vmem:[#allocation9_spill] sm:$0xff] }
 0x470   : > { %v1835_v12 = vpop.permute.xlu0 %1834  ;;  %v6591_v10 = vld [vmem:[#allocation3 + $0x138] sm:$0xff]  ;;  %v2920_v22 = vsub.f32 %v6667_v33, %v2919_v44  ;;  %v6730_v18 = vsub.f32 %v6581_v8, %v2817_v45 }
 0x471   : > { %v1847_v28 = vpop.permute.xlu1 %1846  ;;  %1837 = vst.msk [vmem:[#allocation3 + $0x160] sm:$0xff] %vm615_vm8, %v1835_v12  ;;  %v2820_v38 = vand.u32 4294901760, %v6591_v10  ;;  %4657 = vmatpush1.bf16.msra.mxu1 %v6589_v53  ;;  %4729 = vmatpush1.bf16.msra.mxu0 %v6589_v53  ;;  %v6599_v46 = vld [vmem:[#allocation3 + $0x140] sm:$0xff]  ;;  %v2926_v37 = vand.u32 4294901760, %v6693_v15  ;;  %v2933_v6 = vand.u32 4294901760, %v6698_v47  ;;  %v2914_v8 = vand.u32 4294901760, %v2913_v5 }
 0x472   : > { %1849 = vst.msk [vmem:[#allocation3 + $0x168] sm:$0xff] %vm615_vm8, %v1847_v28  ;;  %4658 = vmatprep.subr.bf16.mxu1 %v4887_v51  ;;  %4730 = vmatprep.subr.bf16.mxu0 %v4887_v51  ;;  %v2823_v24 = vand.u32 4294901760, %v6599_v46  ;;  %v7622_v5 = vld [vmem:[#allocation11_spill] sm:$0xff] }
 0x473   : > { %v6607_v61 = vpack.c.bf16 %v2820_v38, %v2817_v45  ;;  %v6720_v50 = vsub.f32 %v6591_v10, %v2820_v38  ;;  %v7495_v10 = vmov 0.0   ;;  %v2889_v38 = vand.u32 4294901760, %v2888_v23 }
 0x474   : > { %v1859_v2 = vpop.permute.xlu0 %1858  ;;  %v6609_v31 = vld [vmem:[#allocation3 + $0x148] sm:$0xff]  ;;  %v2921_v45 = vand.u32 4294901760, %v2920_v22 }
 0x475   : > { %v1875_v0 = vpop.permute.xlu1 %1874  ;;  %1861 = vst.msk [vmem:[#allocation3 + $0x170] sm:$0xff] %vm615_vm8, %v1859_v2  ;;  %v2826_v16 = vand.u32 4294901760, %v6609_v31  ;;  %v6614_v54 = vld [vmem:[#allocation3 + $0x150] sm:$0xff]  ;;  %4660 = vmatpush1.bf16.msra.mxu1 %v6607_v61  ;;  %4732 = vmatpush1.bf16.msra.mxu0 %v6607_v61  ;;  %v2907_v2 = vand.u32 4294901760, %v2906_v52  ;;  %v2947_v23 = vand.u32 4294901760, %v6720_v50 }
 0x476   : > { %1877 = vst.msk [vmem:[#allocation3 + $0x180] sm:$0xff] %vm615_vm8, %v1875_v0  ;;  %4661 = vmatprep.subr.bf16.mxu1 %v4887_v51  ;;  %4733 = vmatprep.subr.bf16.mxu0 %v4887_v51  ;;  %v2829_v1 = vand.u32 4294901760, %v6614_v54  ;;  %v4746_v0 = vpack.c.bf16 %v2905_v13, %v2898_v7  ;;  %v7621_v13 = vld [vmem:[#allocation10_spill] sm:$0xff] }
 0x477   : > { %v6625_v60 = vpack.c.bf16 %v2826_v16, %v2823_v24  ;;  %v6748_v7 = vsub.f32 %v6609_v31, %v2826_v16  ;;  %v4677_v16 = vpack.c.bf16 %v2921_v45, %v2914_v8 }
 0x478   : > { %v6635_v39 = vld [vmem:[#allocation3 + $0x160] sm:$0xff]  ;;  %v6653_v30 = vpack.c.bf16 %v2832_v41, %v2829_v1 }
 0x479   : > { %v6637_v26 = vld [vmem:[#allocation3 + $0x168] sm:$0xff]  ;;  %4663 = vmatpush1.bf16.msra.mxu1 %v6625_v60  ;;  %4735 = vmatpush1.bf16.msra.mxu0 %v6625_v60  ;;  %v2835_v42 = vand.u32 4294901760, %v6635_v39 }
 0x47a   : > { %4664 = vmatprep.subr.bf16.mxu1 %v4887_v51  ;;  %4736 = vmatprep.subr.bf16.mxu0 %v4887_v51  ;;  %v2838_v62 = vand.u32 4294901760, %v6637_v26 }
 0x47b   : > { %v6786_v45 = vsub.f32 %v6635_v39, %v2835_v42 }
 0x47c   : > { %v6669_v3 = vld [vmem:[#allocation3 + $0x170] sm:$0xff]  ;;  %v6682_v14 = vpack.c.bf16 %v2838_v62, %v2835_v42 }
 0x47d   : > { %4666 = vmatpush1.bf16.msra.mxu1 %v6653_v30  ;;  %4738 = vmatpush1.bf16.msra.mxu0 %v6653_v30  ;;  %v2841_v17 = vand.u32 4294901760, %v6669_v3  ;;  %v6713_v32 = vld [vmem:[#allocation3 + $0x180] sm:$0xff] }
 0x47e   : > { %4667 = vmatprep.subr.bf16.mxu1 %v4887_v51  ;;  %4739 = vmatprep.subr.bf16.mxu0 %v4887_v51  ;;  %v6736_v28 = vand.u32 4294901760, %v6713_v32 }
 0x47f   : > { %v6709_v58 = vpack.c.bf16 %v7494_v40, %v2841_v17 }
 0x481   : > { %4669 = vmatpush1.bf16.msra.mxu1 %v6682_v14  ;;  %4741 = vmatpush1.bf16.msra.mxu0 %v6682_v14 }
 0x482   : > { %4670 = vmatprep.subr.bf16.mxu1 %v4887_v51  ;;  %4742 = vmatprep.subr.bf16.mxu0 %v4887_v51 }
 0x485   : > { %v3482_v59 = vpop.permute.xlu0 %3481  ;;  %4672 = vmatpush1.bf16.msra.mxu1 %v6709_v58  ;;  %4744 = vmatpush1.bf16.msra.mxu0 %v6709_v58 }
 0x486   : > { %v3487_v11 = vpop.permute.xlu1 %3486  ;;  %v3499_v25 = vmul.f32 %v3482_v59, %v7619_v29  ;;  %2846 = vmatprep.subr.mxu1 %v7495_v10  ;;  %3208 = vmatprep.subr.mxu0 %v7495_v10  ;;  %v2934_v10 = vsub.f32 %v6698_v47, %v2933_v6 }
 0x487   : > { %v3500_v12 = vmul.f32 %v3487_v11, %v7620_v35  ;;  %v4674_v11 = vpack.c.bf16 %v2907_v2, %v2900_v27  ;;  %v2927_v35 = vsub.f32 %v6693_v15, %v2926_v37  ;;  %v6764_v2 = vsub.f32 %v6614_v54, %v2829_v1 }
 0x488   : > { %v3503_v59 = vsel %vm615_vm8, %v3499_v25, 0.0  ;;  %v2940_v25 = vand.u32 4294901760, %v6730_v18  ;;  %v6777_v1 = vsub.f32 %v6627_v63, %v2832_v41  ;;  %v6791_v63 = vsub.f32 %v6637_v26, %v2838_v62 }
 0x489   : > { %v3504_v49 = vsel %vm615_vm8, %v3500_v12, 0.0  ;;  %v3497_v29 = vpop.permute.xlu0 %3496  ;;  %2848 = vmatpush1.msra.mxu1 %v6736_v28  ;;  %3210 = vmatpush1.msra.mxu0 %v6736_v28  ;;  %v6758_v12 = vsub.f32 %v6599_v46, %v2823_v24  ;;  %v2928_v24 = vand.u32 4294901760, %v2927_v35  ;;  %v2968_v8 = vand.u32 4294901760, %v6764_v2 }
 0x48a   : > { %v3492_v40 = vpop.permute.xlu1 %3491  ;;  %v3502_v22 = vmul.f32 %v3497_v29, %v7622_v5  ;;  %4673 = vmatprep.subr.bf16.mxu1 %v4887_v51  ;;  %4745 = vmatprep.subr.bf16.mxu0 %v4887_v51  ;;  %v3505_v27 = vadd.f32 %v3504_v49, %v3503_v59  ;;  %v2935_v49 = vand.u32 4294901760, %v2934_v10  ;;  %v2941_v54 = vsub.f32 %v6730_v18, %v2940_v25 }
 0x48b   : > { %v3501_v52 = vmul.f32 %v3492_v40, %v7621_v13  ;;  %2890 = vmatmul.mubr.f32.vlgmr.msra.gmra.mrb[6].mxu1 %v2889_v38  ;;  %3248 = vmatmul.mubr.f32.vlgmr.msra.gmra.mrb[6].mxu0 %v2887_v36  ;;  %v4749_v40 = vpack.c.bf16 %v2919_v44, %v2912_v4  ;;  %v2948_v36 = vsub.f32 %v6720_v50, %v2947_v23  ;;  %v2954_v44 = vand.u32 4294901760, %v6758_v12 }
 0x48c   : > { %4675 = vmatpush1.bf16.msra.mxu1 %v4674_v11  ;;  %4747 = vmatpush1.bf16.msra.mxu0 %v4746_v0  ;;  %v3508_v46 = vsel %vm615_vm8, %v3502_v22, 0.0  ;;  %v2961_v0 = vand.u32 4294901760, %v6748_v7  ;;  %v4752_v10 = vpack.c.bf16 %v2933_v6, %v2926_v37  ;;  %v4680_v41 = vpack.c.bf16 %v2935_v49, %v2928_v24 }
 0x48d   : > { %v3506_v31 = vsel %vm615_vm8, %v3501_v52, 0.0  ;;  %4676 = vmatprep.subr.bf16.mxu1 %v4887_v51  ;;  %4748 = vmatprep.subr.bf16.mxu0 %v4887_v51  ;;  %v2949_v29 = vand.u32 4294901760, %v2948_v36  ;;  %v2942_v13 = vand.u32 4294901760, %v2941_v54  ;;  %v2955_v37 = vsub.f32 %v6758_v12, %v2954_v44 }
 0x48e   : > { %v3507_v38 = vadd.f32 %v3506_v31, %v3505_v27  ;;  %3045 = vmatprep.mubr.f32.mxu1 %v6514_v34  ;;  %3369 = vmatprep.mubr.f32.mxu0 %v6514_v34  ;;  %v2962_v11 = vsub.f32 %v6748_v7, %v2961_v0  ;;  %v2975_v6 = vand.u32 4294901760, %v6777_v1  ;;  %v4755_v42 = vpack.c.bf16 %v2947_v23, %v2940_v25 }
 0x48f   : > { %v4683_v39 = vpack.c.bf16 %v2949_v29, %v2942_v13  ;;  %v2969_v26 = vsub.f32 %v6764_v2, %v2968_v8  ;;  %v6802_v62 = vsub.f32 %v6669_v3, %v2841_v17  ;;  %v2982_v22 = vand.u32 4294901760, %v6786_v45 }
 0x490   : > { %v3509_v4 = vadd.f32 %v3508_v46, %v3507_v38  ;;  %4678 = vmatpush1.bf16.msra.mxu1 %v4677_v16  ;;  %4750 = vmatpush1.bf16.msra.mxu0 %v4749_v40  ;;  %v2963_v5 = vand.u32 4294901760, %v2962_v11  ;;  %v2989_v27 = vand.u32 4294901760, %v6791_v63  ;;  %v7623_v16 = vand.u32 4294901760, %v6676_v55 }
 0x491   : > { %4679 = vmatprep.subr.bf16.mxu1 %v4887_v51  ;;  %4751 = vmatprep.subr.bf16.mxu0 %v4887_v51  ;;  %v2956_v23 = vand.u32 4294901760, %v2955_v37  ;;  %v2976_v25 = vsub.f32 %v6777_v1, %v2975_v6  ;;  %v4758_v3 = vpack.c.bf16 %v2961_v0, %v2954_v44  ;;  %v2970_v17 = vand.u32 4294901760, %v2969_v26 }
 0x492   : > { %v3510_v59 = vrot.slane %v3509_v4, 4  ;;  %v6809_v40 = vsub.f32 %v6676_v55, %v7623_v16  ;;  %v2983_v46 = vsub.f32 %v6786_v45, %v2982_v22  ;;  %v2990_v24 = vsub.f32 %v6791_v63, %v2989_v27 }
 0x493   : > { %v4686_v36 = vpack.c.bf16 %v2963_v5, %v2956_v23  ;;  %v2996_v55 = vand.u32 4294901760, %v6802_v62  ;;  %v4761_v0 = vpack.c.bf16 %v2975_v6, %v2968_v8  ;;  %v4764_v13 = vpack.c.bf16 %v2989_v27, %v2982_v22 }
 0x494   : > { %v3511_v35 = vadd.f32 %v3510_v59, %v3509_v4  ;;  %4681 = vmatpush1.bf16.msra.mxu1 %v4680_v41  ;;  %4753 = vmatpush1.bf16.msra.mxu0 %v4752_v10  ;;  %v2977_v4 = vand.u32 4294901760, %v2976_v25  ;;  %v3003_v54 = vand.u32 4294901760, %v6809_v40  ;;  %v6820_v59 = vsub.f32 %v6713_v32, %v6736_v28  ;;  %v7625_v25 = vld [vmem:[#allocation12_spill] sm:$0xff] }
 0x495   : > { %4682 = vmatprep.subr.bf16.mxu1 %v4887_v51  ;;  %4754 = vmatprep.subr.bf16.mxu0 %v4887_v51  ;;  %v2984_v29 = vand.u32 4294901760, %v2983_v46  ;;  %v2991_v41 = vand.u32 4294901760, %v2990_v24  ;;  %v2997_v11 = vsub.f32 %v6802_v62, %v2996_v55  ;;  %v7624_v5 = vmov 0.0   ;;  %v7628_v24 = vld [vmem:[#allocation15_spill] sm:$0xff] }
 0x496   : > { %v3512_v52 = vrot.slane %v3511_v35, 2  ;;  %v4689_v44 = vpack.c.bf16 %v2977_v4, %v2970_v17  ;;  %v4701_v16 = vpack.c.bf16 %v6667_v33, %v6664_v20 }
 0x497   : > { %v4692_v32 = vpack.c.bf16 %v2991_v41, %v2984_v29  ;;  %v2998_v37 = vand.u32 4294901760, %v2997_v11  ;;  %v7633_v41 = vld [vmem:[#allocation21_spill] sm:$0xff] }
 0x498   : > { %v3513_v31 = vadd.f32 %v3512_v52, %v3511_v35  ;;  %4684 = vmatpush1.bf16.msra.mxu1 %v4683_v39  ;;  %4756 = vmatpush1.bf16.msra.mxu0 %v4755_v42  ;;  %v3004_v35 = vsub.f32 %v6809_v40, %v3003_v54  ;;  %v3010_v52 = vand.u32 4294901760, %v6820_v59  ;;  %v4767_v39 = vpack.c.bf16 %v3003_v54, %v2996_v55  ;;  %v7630_v54 = vld [vmem:[#allocation18_spill] sm:$0xff] }
 0x499   : > { %4685 = vmatprep.subr.bf16.mxu1 %v4887_v51  ;;  %4757 = vmatprep.subr.bf16.mxu0 %v4887_v51 }
 0x49a   : > { %v3514_v38 = vrot.slane %v3513_v31, 1  ;;  %v3005_v8 = vand.u32 4294901760, %v3004_v35  ;;  %v3011_v42 = vsub.f32 %v6820_v59, %v3010_v52  ;;  %v7634_v35 = vld [vmem:[#allocation22_spill] sm:$0xff] }
 0x49c   : > { %v3515_v49 = vadd.f32 %v3514_v38, %v3513_v31  ;;  %4687 = vmatpush1.bf16.msra.mxu1 %v4686_v36  ;;  %4759 = vmatpush1.bf16.msra.mxu0 %v4758_v3  ;;  %v4695_v6 = vpack.c.bf16 %v3005_v8, %v2998_v37  ;;  %v3012_v27 = vand.u32 4294901760, %v3011_v42  ;;  %v4698_v31 = vpack.c.bf16 %v6645_v48, %v6633_v21  ;;  %v7626_v3 = vld [vmem:[#allocation13_spill] sm:$0xff]  ;;  %v7627_v36 = vld [vmem:[#allocation14_spill] sm:$0xff] }
 0x49d   : > { %4688 = vmatprep.subr.bf16.mxu1 %v4887_v51  ;;  %4760 = vmatprep.subr.bf16.mxu0 %v4887_v51  ;;  %v7638_v42 = vld [vmem:[#allocation26_spill] sm:$0xff] }
 0x49e   : > { %v4242_v10 = vmul.f32 -1.442695, %v3515_v49  ;;  %v7629_v49 = vld [vmem:[#allocation16_spill] sm:$0xff] }
 0x4a0   : > { %4841 = vpow2.f32 %v4242_v10  ;;  %4690 = vmatpush1.bf16.msra.mxu1 %v4689_v44  ;;  %4762 = vmatpush1.bf16.msra.mxu0 %v4761_v0  ;;  %v7631_v10 = vld [vmem:[#allocation19_spill] sm:$0xff]  ;;  %v7632_v44 = vld [vmem:[#allocation20_spill] sm:$0xff] }
 0x4a1   : > { %4691 = vmatprep.subr.bf16.mxu1 %v4887_v51  ;;  %4763 = vmatprep.subr.bf16.mxu0 %v4887_v51 }
 0x4a4   : > { %4693 = vmatpush1.bf16.msra.mxu1 %v4692_v32  ;;  %4765 = vmatpush1.bf16.msra.mxu0 %v4764_v13  ;;  %v7635_v13 = vld [vmem:[#allocation23_spill] sm:$0xff] }
 0x4a5   : > { %4694 = vmatprep.subr.bf16.mxu1 %v4887_v51  ;;  %4766 = vmatprep.subr.bf16.mxu0 %v4887_v51 }
 0x4a8   : > { %4696 = vmatpush1.bf16.msra.mxu1 %v4695_v6  ;;  %4768 = vmatpush1.bf16.msra.mxu0 %v4767_v39  ;;  %v7637_v6 = vld [vmem:[#allocation25_spill] sm:$0xff] }
 0x4a9   : > { %3007 = vmatprep.subr.mxu1 %v7624_v5  ;;  %3333 = vmatprep.subr.mxu0 %v7624_v5 }
 0x4aa   : > { %v4842_v26 = vpop.eup %4841 }
 0x4ab   : > { %v3519_v22 = vadd.f32 1.0, %v4842_v26 }
 0x4ac   : > { %3013 = vmatpush1.msra.mxu1 %v3012_v27  ;;  %3337 = vmatpush1.msra.mxu0 %v3010_v52  ;;  %v7636_v52 = vld [vmem:[#allocation24_spill] sm:$0xff]  ;;  %v7640_v27 = vld [vmem:[#allocation29_spill] sm:$0xff] }
 0x4ad   : > { %4843 = vrcp.f32 %v3519_v22  ;;  %4697 = vmatprep.subr.bf16.mxu1 %v4887_v51  ;;  %4769 = vmatprep.subr.bf16.mxu0 %v4887_v51 }
 0x4ae   : > { %3047 = vmatmul.mubr.f32.vlgmr.msra.gmra.mrb[6].mxu1 %v6631_v43  ;;  %3371 = vmatmul.mubr.f32.vlgmr.msra.gmra.mrb[6].mxu0 %v6631_v43 }
 0x4af   : > { %4699 = vmatpush1.bf16.msra.mxu1 %v4698_v31  ;;  %4771 = vmatpush1.bf16.msra.mxu0 %v6553_v56  ;;  %v4704_v56 = vpack.c.bf16 %v6698_v47, %v6693_v15 }
 0x4b0   : > { %4700 = vmatprep.subr.bf16.mxu1 %v4887_v51  ;;  %4772 = vmatprep.subr.bf16.mxu0 %v4887_v51 }
 0x4b1   : > { %3152 = vmatprep.mubr.f32.mxu1 %v6525_v9  ;;  %3458 = vmatprep.mubr.f32.mxu0 %v6514_v34  ;;  %v4707_v34 = vpack.c.bf16 %v6720_v50, %v6730_v18  ;;  %v4710_v9 = vpack.c.bf16 %v6748_v7, %v6758_v12 }
 0x4b3   : > { %4702 = vmatpush1.bf16.msra.mxu1 %v4701_v16  ;;  %4774 = vmatpush1.bf16.msra.mxu0 %v6569_v19  ;;  %v4713_v19 = vpack.c.bf16 %v6777_v1, %v6764_v2  ;;  %v7641_v16 = vld [vmem:[#allocation30_spill] sm:$0xff] }
 0x4b4   : > { %4703 = vmatprep.subr.bf16.mxu1 %v4887_v51  ;;  %4775 = vmatprep.subr.bf16.mxu0 %v4887_v51 }
 0x4b7   : > { %v4844_v21 = vpop.eup %4843  ;;  %4705 = vmatpush1.bf16.msra.mxu1 %v4704_v56  ;;  %4777 = vmatpush1.bf16.msra.mxu0 %v6589_v53  ;;  %v4716_v53 = vpack.c.bf16 %v6791_v63, %v6786_v45 }
 0x4b8   : > { %3523 = vbcast.lane.b32.xlu1 %v4844_v21, 256  ;;  %4706 = vmatprep.subr.bf16.mxu1 %v4887_v51  ;;  %v7642_v21 = vld [vmem:[#allocation31_spill] sm:$0xff] }
 0x4b9   : > { %4778 = vmatprep.subr.bf16.mxu0 %v4887_v51 }
 0x4bb   : > { %4708 = vmatpush1.bf16.msra.mxu1 %v4707_v34  ;;  %4780 = vmatpush1.bf16.msra.mxu0 %v6607_v61  ;;  %v4719_v61 = vpack.c.bf16 %v6809_v40, %v6802_v62 }
 0x4bc   : > { %4709 = vmatprep.subr.bf16.mxu1 %v4887_v51  ;;  %4781 = vmatprep.subr.bf16.mxu0 %v4887_v51 }
 0x4bf   : > { %4711 = vmatpush1.bf16.msra.mxu1 %v4710_v9  ;;  %4783 = vmatpush1.bf16.msra.mxu0 %v6625_v60  ;;  %v7643_v9 = vld [vmem:[#allocation32_spill] sm:$0xff] }
 0x4c0   : > { %4712 = vmatprep.subr.bf16.mxu1 %v4887_v51  ;;  %4784 = vmatprep.subr.bf16.mxu0 %v4887_v51 }
 0x4c3   : > { %4714 = vmatpush1.bf16.msra.mxu1 %v4713_v19  ;;  %4786 = vmatpush1.bf16.msra.mxu0 %v6653_v30 }
 0x4c4   : > { %4715 = vmatprep.subr.bf16.mxu1 %v4887_v51  ;;  %4787 = vmatprep.subr.bf16.mxu0 %v4887_v51 }
 0x4c7   : > { %4717 = vmatpush1.bf16.msra.mxu1 %v4716_v53  ;;  %4789 = vmatpush1.bf16.msra.mxu0 %v6682_v14  ;;  %v7644_v53 = vld [vmem:[#allocation33_spill] sm:$0xff] }
 0x4c8   : > { %4718 = vmatprep.subr.bf16.mxu1 %v4887_v51  ;;  %4790 = vmatprep.subr.bf16.mxu0 %v4887_v51 }
 0x4ca   : > { %v4279_v60 = vpop.f32.mrb[0].mxu0 }
 0x4cb   : > { %v4280_v48 = vpop.f32.mrb[1].mxu0  ;;  %4720 = vmatpush1.bf16.msra.mxu1 %v4719_v61  ;;  %4792 = vmatpush1.bf16.msra.mxu0 %v6709_v58 }
 0x4cc   : > { %v4281_v30 = vadd.f32 %v4280_v48, %v4279_v60  ;;  %3116 = vmatprep.subr.mxu1 %v7624_v5  ;;  %3424 = vmatprep.subr.mxu0 %v7624_v5  ;;  %v7639_v5 = vld [vmem:[#allocation27_spill] sm:$0xff]  ;;  %v7645_v60 = vld [vmem:[#allocation34_spill] sm:$0xff] }
 0x4cf   : > { %3119 = vmatpush1.msra.mxu1 %v6820_v59  ;;  %3426 = vmatpush1.msra.mxu0 %v6736_v28 }
 0x4d0   : > { %3155 = vmatmul.mubr.f32.vlgmr.msra.gmra.mrb[6].mxu1 %v6659_v57  ;;  %3460 = vmatmul.mubr.f32.vlgmr.msra.gmra.mrb[6].mxu0 %v6631_v43 }
 0x4d2   : > { %v4314_v51 = vpop.f32.mrb[0].mxu1 }
 0x4d3   : > { %v4315_v20 = vpop.f32.mrb[1].mxu1 }
 0x4d4   : > { %v4316_v33 = vadd.f32 %v4315_v20, %v4314_v51  ;;  %v7647_v20 = vld [vmem:[#allocation36_spill] sm:$0xff] }
 0x4d6   : > { %v2277_v14 = vadd.f32 %v4316_v33, %v4281_v30  ;;  %v7646_v30 = vld [vmem:[#allocation35_spill] sm:$0xff] }
 0x4ea   : > { %v4349_v15 = vpop.f32.mrb[2].mxu0 }
 0x4eb   : > { %v4350_v47 = vpop.f32.mrb[3].mxu0 }
 0x4ec   : > { %v4351_v58 = vadd.f32 %v4350_v47, %v4349_v15  ;;  %v7649_v47 = vld [vmem:[#allocation38_spill] sm:$0xff] }
 0x4ee   : > { %v2415_v50 = vadd.f32 %v4351_v58, %v2277_v14  ;;  %v7648_v14 = vld [vmem:[#allocation37_spill] sm:$0xff] }
 0x4f2   : > { %v4384_v18 = vpop.f32.mrb[2].mxu1 }
 0x4f3   : > { %v4385_v7 = vpop.f32.mrb[3].mxu1 }
 0x4f4   : > { %v4386_v12 = vadd.f32 %v4385_v7, %v4384_v18  ;;  %v7651_v7 = vld [vmem:[#allocation40_spill] sm:$0xff] }
 0x4f6   : > { %v2523_v2 = vadd.f32 %v4386_v12, %v2415_v50  ;;  %v7650_v50 = vld [vmem:[#allocation39_spill] sm:$0xff] }
 0x50a   : > { %v4419_v1 = vpop.f32.mrb[4].mxu0 }
 0x50b   : > { %v4420_v45 = vpop.f32.mrb[5].mxu0 }
 0x50c   : > { %v4421_v63 = vadd.f32 %v4420_v45, %v4419_v1  ;;  %v7653_v45 = vld [vmem:[#allocation4_spill] sm:$0xff] }
 0x50e   : > { %v2691_v28 = vadd.f32 %v4421_v63, %v2523_v2  ;;  %v7652_v2 = vld [vmem:[#allocation41_spill] sm:$0xff] }
 0x512   : > { %v4454_v62 = vpop.f32.mrb[4].mxu1 }
 0x513   : > { %v4455_v57 = vpop.f32.mrb[5].mxu1 }
 0x514   : > { %v4456_v40 = vadd.f32 %v4455_v57, %v4454_v62  ;;  %v7655_v57 = vld [vmem:[#allocation6_spill] sm:$0xff] }
 0x516   : > { %v6884_v43 = vadd.f32 %v4456_v40, %v2691_v28  ;;  %v7654_v28 = vld [vmem:[#allocation5_spill] sm:$0xff] }
 0x52a   : > { %v3524_v23 = vpop.permute.xlu1 %3523 }
 0x52b   : > { %v3781_v38 = vmul.f32 %v3524_v23, %v7625_v25  ;;  %v3782_v17 = vmul.f32 %v3524_v23, %v7626_v3  ;;  %v3783_v46 = vmul.f32 %v3524_v23, %v7627_v36  ;;  %v3784_v55 = vmul.f32 %v3524_v23, %v7628_v24 }
 0x52c   : > { %v3785_v4 = vmul.f32 %v3524_v23, %v7629_v49  ;;  %v3786_v59 = vmul.f32 %v3524_v23, %v7630_v54  ;;  %v3787_v0 = vmul.f32 %v3524_v23, %v7631_v10  ;;  %v3788_v29 = vmul.f32 %v3524_v23, %v7632_v44 }
 0x52d   : > { %v6895_v11 = vmul.f32 %v3524_v23, %v7633_v41  ;;  %v6898_v32 = vmul.f32 %v3524_v23, %v7634_v35  ;;  %v6901_v37 = vmul.f32 %v3524_v23, %v7635_v13  ;;  %v6904_v8 = vmul.f32 %v3524_v23, %v7636_v52 }
 0x52e   : > { %v6907_v39 = vmul.f32 %v3524_v23, %v7637_v6  ;;  %v6910_v26 = vmul.f32 %v3524_v23, %v7638_v42  ;;  %v6913_v22 = vmul.f32 %v3524_v23, %v7639_v5  ;;  %v6916_v31 = vmul.f32 %v3524_v23, %v7640_v27 }
 0x52f   : > { %v6919_v56 = vmul.f32 %v3524_v23, %v7641_v16  ;;  %v6922_v34 = vmul.f32 %v3524_v23, %v7642_v21  ;;  %v6925_v19 = vmul.f32 %v3524_v23, %v7643_v9  ;;  %v6928_v61 = vmul.f32 %v3524_v23, %v7644_v53 }
 0x530   : > { %v6931_v48 = vmul.f32 %v3524_v23, %v7645_v60  ;;  %v6934_v51 = vmul.f32 %v3524_v23, %v7646_v30  ;;  %v6937_v33 = vmul.f32 %v3524_v23, %v7647_v20  ;;  %v6940_v15 = vmul.f32 %v3524_v23, %v7648_v14 }
 0x531   : > { %v6943_v58 = vmul.f32 %v3524_v23, %v7649_v47  ;;  %v6946_v18 = vmul.f32 %v3524_v23, %v7650_v50  ;;  %v6949_v12 = vmul.f32 %v3524_v23, %v7651_v7  ;;  %v6952_v1 = vmul.f32 %v3524_v23, %v7652_v2  ;;  %v7656_v47 = vld [vmem:[#allocation7_spill] sm:$0xff] }
 0x532   : > { %v6955_v63 = vmul.f32 %v3524_v23, %v7653_v45  ;;  %v6958_v62 = vmul.f32 %v3524_v23, %v7654_v28  ;;  %v6961_v40 = vmul.f32 %v3524_v23, %v7655_v57  ;;  %v6964_v14 = vmul.f32 %v3524_v23, %v7656_v47 }
 0x533   : > { %v3813_v50 = vsel %vm284_vm0, %v3781_v38, -inf  ;;  %v3820_v7 = vsel %vm284_vm0, %v3782_v17, -inf  ;;  %v3827_v20 = vsel %vm284_vm0, %v3783_v46, -inf  ;;  %v3834_v2 = vsel %vm284_vm0, %v3784_v55, -inf }
 0x534   : > { %v3814_v30 = vrot.slane %v3813_v50, 4  ;;  %v3821_v45 = vrot.slane %v3820_v7, 4  ;;  %v3828_v60 = vrot.slane %v3827_v20, 4  ;;  %v3835_v53 = vrot.slane %v3834_v2, 4 }
 0x535   : > { %v3841_v28 = vsel %vm284_vm0, %v3785_v4, -inf  ;;  %v3848_v57 = vsel %vm284_vm0, %v3786_v59, -inf  ;;  %v3855_v9 = vsel %vm284_vm0, %v3787_v0, -inf  ;;  %v3862_v23 = vsel %vm284_vm0, %v3788_v29, -inf }
 0x536   : > { %v3815_v47 = vmax.f32 %v3813_v50, %v3814_v30  ;;  %v3822_v38 = vmax.f32 %v3820_v7, %v3821_v45  ;;  %v3829_v21 = vmax.f32 %v3827_v20, %v3828_v60  ;;  %v3836_v17 = vmax.f32 %v3834_v2, %v3835_v53 }
 0x537   : > { %v3842_v16 = vrot.slane %v3841_v28, 4  ;;  %v3849_v46 = vrot.slane %v3848_v57, 4  ;;  %v3856_v27 = vrot.slane %v3855_v9, 4  ;;  %v3863_v55 = vrot.slane %v3862_v23, 4 }
 0x538   : > { %v3816_v5 = vrot.slane %v3815_v47, 2  ;;  %v3823_v42 = vrot.slane %v3822_v38, 2  ;;  %v3830_v6 = vrot.slane %v3829_v21, 2  ;;  %v3837_v52 = vrot.slane %v3836_v17, 2 }
 0x539   : > { %v3843_v13 = vmax.f32 %v3841_v28, %v3842_v16  ;;  %v3850_v4 = vmax.f32 %v3848_v57, %v3849_v46  ;;  %v3857_v35 = vmax.f32 %v3855_v9, %v3856_v27  ;;  %v3864_v59 = vmax.f32 %v3862_v23, %v3863_v55 }
 0x53a   : > { %v3817_v41 = vmax.f32 %v3815_v47, %v3816_v5  ;;  %v3824_v0 = vmax.f32 %v3822_v38, %v3823_v42  ;;  %v3831_v44 = vmax.f32 %v3829_v21, %v3830_v6  ;;  %v3838_v29 = vmax.f32 %v3836_v17, %v3837_v52 }
 0x53b   : > { %v3844_v30 = vrot.slane %v3843_v13, 2  ;;  %v3851_v50 = vrot.slane %v3850_v4, 2  ;;  %v3858_v60 = vrot.slane %v3857_v35, 2  ;;  %v3865_v53 = vrot.slane %v3864_v59, 2 }
 0x53c   : > { %v3818_v20 = vrot.slane %v3817_v41, 1  ;;  %v3825_v7 = vrot.slane %v3824_v0, 1  ;;  %v3832_v2 = vrot.slane %v3831_v44, 1  ;;  %v3839_v45 = vrot.slane %v3838_v29, 1 }
 0x53d   : > { %v3845_v10 = vmax.f32 %v3843_v13, %v3844_v30  ;;  %v3852_v54 = vmax.f32 %v3850_v4, %v3851_v50  ;;  %v3859_v49 = vmax.f32 %v3857_v35, %v3858_v60  ;;  %v3866_v24 = vmax.f32 %v3864_v59, %v3865_v53 }
 0x53e   : > { %v6974_v16 = vmax.f32 %v3817_v41, %v3818_v20  ;;  %v6976_v27 = vmax.f32 %v3824_v0, %v3825_v7  ;;  %v6978_v5 = vmax.f32 %v3831_v44, %v3832_v2  ;;  %v6980_v6 = vmax.f32 %v3838_v29, %v3839_v45 }
 0x53f   : > { %v3846_v52 = vrot.slane %v3845_v10, 1  ;;  %v3853_v42 = vrot.slane %v3852_v54, 1  ;;  %v3860_v21 = vrot.slane %v3859_v49, 1  ;;  %v3867_v9 = vrot.slane %v3866_v24, 1 }
 0x540   : > { %v3869_v47 = vsel %vm284_vm0, %v6895_v11, -inf  ;;  %v3876_v13 = vsel %vm284_vm0, %v6898_v32, -inf  ;;  %v3883_v41 = vsel %vm284_vm0, %v6901_v37, -inf  ;;  %v3890_v35 = vsel %vm284_vm0, %v6904_v8, -inf }
 0x541   : > { %v6990_v44 = vmax.f32 %v3845_v10, %v3846_v52  ;;  %v6992_v28 = vmax.f32 %v3852_v54, %v3853_v42  ;;  %v6994_v57 = vmax.f32 %v3859_v49, %v3860_v21  ;;  %v6996_v23 = vmax.f32 %v3866_v24, %v3867_v9 }
 0x542   : > { %v3870_v38 = vrot.slane %v3869_v47, 4  ;;  %v3877_v17 = vrot.slane %v3876_v13, 4  ;;  %v3884_v11 = vrot.slane %v3883_v41, 4  ;;  %v3891_v46 = vrot.slane %v3890_v35, 4 }
 0x543   : > { %v3897_v32 = vsel %vm284_vm0, %v6907_v39, -inf  ;;  %v3904_v37 = vsel %vm284_vm0, %v6910_v26, -inf  ;;  %v3911_v10 = vsel %vm284_vm0, %v6913_v22, -inf  ;;  %v3918_v54 = vsel %vm284_vm0, %v6916_v31, -inf }
 0x544   : > { %v3871_v49 = vmax.f32 %v3869_v47, %v3870_v38  ;;  %v3878_v8 = vmax.f32 %v3876_v13, %v3877_v17  ;;  %v3885_v24 = vmax.f32 %v3883_v41, %v3884_v11  ;;  %v3892_v55 = vmax.f32 %v3890_v35, %v3891_v46 }
 0x545   : > { %v3898_v4 = vrot.slane %v3897_v32, 4  ;;  %v3905_v59 = vrot.slane %v3904_v37, 4  ;;  %v3912_v0 = vrot.slane %v3911_v10, 4  ;;  %v3919_v29 = vrot.slane %v3918_v54, 4 }
 0x546   : > { %v3872_v30 = vrot.slane %v3871_v49, 2  ;;  %v3879_v50 = vrot.slane %v3878_v8, 2  ;;  %v3886_v39 = vrot.slane %v3885_v24, 2  ;;  %v3893_v60 = vrot.slane %v3892_v55, 2 }
 0x547   : > { %v3899_v53 = vmax.f32 %v3897_v32, %v3898_v4  ;;  %v3906_v26 = vmax.f32 %v3904_v37, %v3905_v59  ;;  %v3913_v20 = vmax.f32 %v3911_v10, %v3912_v0  ;;  %v3920_v7 = vmax.f32 %v3918_v54, %v3919_v29 }
 0x548   : > { %v3873_v22 = vmax.f32 %v3871_v49, %v3872_v30  ;;  %v3880_v2 = vmax.f32 %v3878_v8, %v3879_v50  ;;  %v3887_v45 = vmax.f32 %v3885_v24, %v3886_v39  ;;  %v3894_v31 = vmax.f32 %v3892_v55, %v3893_v60 }
 0x549   : > { %v3900_v52 = vrot.slane %v3899_v53, 2  ;;  %v3907_v42 = vrot.slane %v3906_v26, 2  ;;  %v3914_v21 = vrot.slane %v3913_v20, 2  ;;  %v3921_v9 = vrot.slane %v3920_v7, 2 }
 0x54a   : > { %v3874_v47 = vrot.slane %v3873_v22, 1  ;;  %v3881_v13 = vrot.slane %v3880_v2, 1  ;;  %v3888_v41 = vrot.slane %v3887_v45, 1  ;;  %v3895_v35 = vrot.slane %v3894_v31, 1 }
 0x54b   : > { %v3901_v38 = vmax.f32 %v3899_v53, %v3900_v52  ;;  %v3908_v17 = vmax.f32 %v3906_v26, %v3907_v42  ;;  %v3915_v11 = vmax.f32 %v3913_v20, %v3914_v21  ;;  %v3922_v46 = vmax.f32 %v3920_v7, %v3921_v9 }
 0x54c   : > { %v7006_v32 = vmax.f32 %v3873_v22, %v3874_v47  ;;  %v7008_v37 = vmax.f32 %v3880_v2, %v3881_v13  ;;  %v7010_v10 = vmax.f32 %v3887_v45, %v3888_v41  ;;  %v7012_v54 = vmax.f32 %v3894_v31, %v3895_v35 }
 0x54d   : > { %v3902_v49 = vrot.slane %v3901_v38, 1  ;;  %v3909_v8 = vrot.slane %v3908_v17, 1  ;;  %v3916_v24 = vrot.slane %v3915_v11, 1  ;;  %v3923_v55 = vrot.slane %v3922_v46, 1 }
 0x54e   : > { %v3925_v4 = vsel %vm284_vm0, %v6919_v56, -inf  ;;  %v3932_v59 = vsel %vm284_vm0, %v6922_v34, -inf  ;;  %v3939_v0 = vsel %vm284_vm0, %v6925_v19, -inf  ;;  %v3946_v29 = vsel %vm284_vm0, %v6928_v61, -inf }
 0x54f   : > { %v7022_v30 = vmax.f32 %v3901_v38, %v3902_v49  ;;  %v7024_v50 = vmax.f32 %v3908_v17, %v3909_v8  ;;  %v7026_v39 = vmax.f32 %v3915_v11, %v3916_v24  ;;  %v7028_v60 = vmax.f32 %v3922_v46, %v3923_v55 }
 0x550   : > { %v3926_v53 = vrot.slane %v3925_v4, 4  ;;  %v3933_v26 = vrot.slane %v3932_v59, 4  ;;  %v3940_v56 = vrot.slane %v3939_v0, 4  ;;  %v3947_v20 = vrot.slane %v3946_v29, 4 }
 0x551   : > { %v3953_v34 = vsel %vm284_vm0, %v6931_v48, -inf  ;;  %v3960_v19 = vsel %vm284_vm0, %v6934_v51, -inf  ;;  %v3967_v61 = vsel %vm284_vm0, %v6937_v33, -inf  ;;  %v3974_v7 = vsel %vm284_vm0, %v6940_v15, -inf }
 0x552   : > { %v3927_v22 = vmax.f32 %v3925_v4, %v3926_v53  ;;  %v3934_v2 = vmax.f32 %v3932_v59, %v3933_v26  ;;  %v3941_v45 = vmax.f32 %v3939_v0, %v3940_v56  ;;  %v3948_v31 = vmax.f32 %v3946_v29, %v3947_v20 }
 0x553   : > { %v3954_v52 = vrot.slane %v3953_v34, 4  ;;  %v3961_v42 = vrot.slane %v3960_v19, 4  ;;  %v3968_v21 = vrot.slane %v3967_v61, 4  ;;  %v3975_v9 = vrot.slane %v3974_v7, 4 }
 0x554   : > { %v3928_v47 = vrot.slane %v3927_v22, 2  ;;  %v3935_v13 = vrot.slane %v3934_v2, 2  ;;  %v3942_v48 = vrot.slane %v3941_v45, 2  ;;  %v3949_v41 = vrot.slane %v3948_v31, 2 }
 0x555   : > { %v3955_v35 = vmax.f32 %v3953_v34, %v3954_v52  ;;  %v3962_v51 = vmax.f32 %v3960_v19, %v3961_v42  ;;  %v3969_v38 = vmax.f32 %v3967_v61, %v3968_v21  ;;  %v3976_v17 = vmax.f32 %v3974_v7, %v3975_v9 }
 0x556   : > { %v3929_v33 = vmax.f32 %v3927_v22, %v3928_v47  ;;  %v3936_v11 = vmax.f32 %v3934_v2, %v3935_v13  ;;  %v3943_v46 = vmax.f32 %v3941_v45, %v3942_v48  ;;  %v3950_v15 = vmax.f32 %v3948_v31, %v3949_v41 }
 0x557   : > { %v3956_v49 = vrot.slane %v3955_v35, 2  ;;  %v3963_v8 = vrot.slane %v3962_v51, 2  ;;  %v3970_v24 = vrot.slane %v3969_v38, 2  ;;  %v3977_v55 = vrot.slane %v3976_v17, 2 }
 0x558   : > { %v3930_v4 = vrot.slane %v3929_v33, 1  ;;  %v3937_v59 = vrot.slane %v3936_v11, 1  ;;  %v3944_v0 = vrot.slane %v3943_v46, 1  ;;  %v3951_v29 = vrot.slane %v3950_v15, 1 }
 0x559   : > { %v3957_v53 = vmax.f32 %v3955_v35, %v3956_v49  ;;  %v3964_v26 = vmax.f32 %v3962_v51, %v3963_v8  ;;  %v3971_v56 = vmax.f32 %v3969_v38, %v3970_v24  ;;  %v3978_v20 = vmax.f32 %v3976_v17, %v3977_v55 }
 0x55a   : > { %v7038_v34 = vmax.f32 %v3929_v33, %v3930_v4  ;;  %v7040_v19 = vmax.f32 %v3936_v11, %v3937_v59  ;;  %v7042_v61 = vmax.f32 %v3943_v46, %v3944_v0  ;;  %v7044_v7 = vmax.f32 %v3950_v15, %v3951_v29 }
 0x55b   : > { %v3958_v22 = vrot.slane %v3957_v53, 1  ;;  %v3965_v2 = vrot.slane %v3964_v26, 1  ;;  %v3972_v45 = vrot.slane %v3971_v56, 1  ;;  %v3979_v31 = vrot.slane %v3978_v20, 1 }
 0x55c   : > { %v3981_v52 = vsel %vm284_vm0, %v6943_v58, -inf  ;;  %v3988_v42 = vsel %vm284_vm0, %v6946_v18, -inf  ;;  %v3995_v21 = vsel %vm284_vm0, %v6949_v12, -inf  ;;  %v4002_v9 = vsel %vm284_vm0, %v6952_v1, -inf }
 0x55d   : > { %v7054_v47 = vmax.f32 %v3957_v53, %v3958_v22  ;;  %v7056_v13 = vmax.f32 %v3964_v26, %v3965_v2  ;;  %v7058_v48 = vmax.f32 %v3971_v56, %v3972_v45  ;;  %v7060_v41 = vmax.f32 %v3978_v20, %v3979_v31 }
 0x55e   : > { %v3982_v35 = vrot.slane %v3981_v52, 4  ;;  %v3989_v51 = vrot.slane %v3988_v42, 4  ;;  %v3996_v58 = vrot.slane %v3995_v21, 4  ;;  %v4003_v38 = vrot.slane %v4002_v9, 4 }
 0x55f   : > { %v4009_v18 = vsel %vm284_vm0, %v6955_v63, -inf  ;;  %v4016_v12 = vsel %vm284_vm0, %v6958_v62, -inf  ;;  %v4023_v1 = vsel %vm284_vm0, %v6961_v40, -inf  ;;  %v4030_v17 = vsel %vm284_vm0, %v6964_v14, -inf }
 0x560   : > { %v3983_v33 = vmax.f32 %v3981_v52, %v3982_v35  ;;  %v3990_v11 = vmax.f32 %v3988_v42, %v3989_v51  ;;  %v3997_v46 = vmax.f32 %v3995_v21, %v3996_v58  ;;  %v4004_v15 = vmax.f32 %v4002_v9, %v4003_v38 }
 0x561   : > { %v4010_v49 = vrot.slane %v4009_v18, 4  ;;  %v4017_v8 = vrot.slane %v4016_v12, 4  ;;  %v4024_v24 = vrot.slane %v4023_v1, 4  ;;  %v4031_v55 = vrot.slane %v4030_v17, 4 }
 0x562   : > { %v3984_v4 = vrot.slane %v3983_v33, 2  ;;  %v3991_v59 = vrot.slane %v3990_v11, 2  ;;  %v3998_v63 = vrot.slane %v3997_v46, 2  ;;  %v4005_v0 = vrot.slane %v4004_v15, 2 }
 0x563   : > { %v4011_v29 = vmax.f32 %v4009_v18, %v4010_v49  ;;  %v4018_v62 = vmax.f32 %v4016_v12, %v4017_v8  ;;  %v4025_v53 = vmax.f32 %v4023_v1, %v4024_v24  ;;  %v4032_v26 = vmax.f32 %v4030_v17, %v4031_v55 }
 0x564   : > { %v3985_v40 = vmax.f32 %v3983_v33, %v3984_v4  ;;  %v3992_v56 = vmax.f32 %v3990_v11, %v3991_v59  ;;  %v3999_v20 = vmax.f32 %v3997_v46, %v3998_v63  ;;  %v4006_v14 = vmax.f32 %v4004_v15, %v4005_v0 }
 0x565   : > { %v4012_v22 = vrot.slane %v4011_v29, 2  ;;  %v4019_v2 = vrot.slane %v4018_v62, 2  ;;  %v4026_v45 = vrot.slane %v4025_v53, 2  ;;  %v4033_v31 = vrot.slane %v4032_v26, 2 }
 0x566   : > { %v3986_v52 = vrot.slane %v3985_v40, 1  ;;  %v3993_v42 = vrot.slane %v3992_v56, 1  ;;  %v4000_v21 = vrot.slane %v3999_v20, 1  ;;  %v4007_v9 = vrot.slane %v4006_v14, 1 }
 0x567   : > { %v4013_v35 = vmax.f32 %v4011_v29, %v4012_v22  ;;  %v4020_v51 = vmax.f32 %v4018_v62, %v4019_v2  ;;  %v4027_v58 = vmax.f32 %v4025_v53, %v4026_v45  ;;  %v4034_v38 = vmax.f32 %v4032_v26, %v4033_v31 }
 0x568   : > { %v3987_v18 = vmax.f32 %v3985_v40, %v3986_v52  ;;  %v3994_v12 = vmax.f32 %v3992_v56, %v3993_v42  ;;  %v4001_v1 = vmax.f32 %v3999_v20, %v4000_v21  ;;  %v4008_v17 = vmax.f32 %v4006_v14, %v4007_v9  ;;  %v7657_v42 = vld [vmem:[#allocation15_spill] sm:$0xff]  ;;  %v7658_v9 = vld [vmem:[#allocation16_spill] sm:$0xff] }
 0x569   : > { %v4014_v33 = vrot.slane %v4013_v35, 1  ;;  %v4021_v11 = vrot.slane %v4020_v51, 1  ;;  %v4028_v46 = vrot.slane %v4027_v58, 1  ;;  %v4035_v15 = vrot.slane %v4034_v38, 1 }
 0x56a   : > { %v4133_v49 = vsel %vm576_vm1, %v6976_v27, %v6974_v16  ;;  %v4140_v8 = vsel %vm576_vm1, %v7008_v37, %v7006_v32  ;;  %v4147_v24 = vsel %vm576_vm1, %v7040_v19, %v7038_v34  ;;  %v4154_v55 = vsel %vm576_vm1, %v3994_v12, %v3987_v18  ;;  %v7661_v18 = vld [vmem:[#allocation20_spill] sm:$0xff] }
 0x56b   : > { %v4015_v4 = vmax.f32 %v4013_v35, %v4014_v33  ;;  %v4022_v59 = vmax.f32 %v4020_v51, %v4021_v11  ;;  %v4029_v63 = vmax.f32 %v4027_v58, %v4028_v46  ;;  %v4036_v0 = vmax.f32 %v4034_v38, %v4035_v15  ;;  %v7660_v58 = vld [vmem:[#allocation19_spill] sm:$0xff]  ;;  %v7663_v33 = vld [vmem:[#allocation22_spill] sm:$0xff]  ;;  %v7666_v15 = vld [vmem:[#allocation25_spill] sm:$0xff] }
 0x56c   : > { %v4134_v29 = vsel %vm578_vm2, %v6978_v5, %v4133_v49  ;;  %v4141_v16 = vsel %vm578_vm2, %v7010_v10, %v4140_v8  ;;  %v4148_v27 = vsel %vm578_vm2, %v7042_v61, %v4147_v24  ;;  %v4155_v32 = vsel %vm578_vm2, %v4001_v1, %v4154_v55  ;;  %v7662_v1 = vld [vmem:[#allocation21_spill] sm:$0xff]  ;;  %v7667_v8 = vld [vmem:[#allocation26_spill] sm:$0xff]  ;;  %v7668_v55 = vld [vmem:[#allocation27_spill] sm:$0xff] }
 0x56d   : > { %v4135_v37 = vsel %vm580_vm3, %v6980_v6, %v4134_v29  ;;  %v4142_v34 = vsel %vm580_vm3, %v7012_v54, %v4141_v16  ;;  %v4149_v19 = vsel %vm580_vm3, %v7044_v7, %v4148_v27  ;;  %v4156_v62 = vsel %vm580_vm3, %v4008_v17, %v4155_v32  ;;  %v7671_v16 = vld [vmem:[#allocation31_spill] sm:$0xff]  ;;  %v7672_v32 = vld [vmem:[#allocation32_spill] sm:$0xff] }
 0x56e   : > { %v4136_v5 = vsel %vm582_vm4, %v6990_v44, %v4135_v37  ;;  %v4143_v10 = vsel %vm582_vm4, %v7022_v30, %v4142_v34  ;;  %v4150_v61 = vsel %vm582_vm4, %v7054_v47, %v4149_v19  ;;  %v4157_v53 = vsel %vm582_vm4, %v4015_v4, %v4156_v62  ;;  %v7673_v34 = vld [vmem:[#allocation33_spill] sm:$0xff]  ;;  %v7674_v62 = vld [vmem:[#allocation34_spill] sm:$0xff] }
 0x56f   : > { %v4137_v6 = vsel %vm584_vm5, %v6992_v28, %v4136_v5  ;;  %v4144_v44 = vsel %vm584_vm5, %v7024_v50, %v4143_v10  ;;  %v4151_v54 = vsel %vm584_vm5, %v7056_v13, %v4150_v61  ;;  %v4158_v30 = vsel %vm584_vm5, %v4022_v59, %v4157_v53  ;;  %v7669_v59 = vld [vmem:[#allocation29_spill] sm:$0xff]  ;;  %v7675_v10 = vld [vmem:[#allocation35_spill] sm:$0xff]  ;;  %v7676_v53 = vld [vmem:[#allocation36_spill] sm:$0xff] }
 0x570   : > { %v4138_v7 = vsel %vm586_vm6, %v6994_v57, %v4137_v6  ;;  %v4145_v47 = vsel %vm586_vm6, %v7026_v39, %v4144_v44  ;;  %v4152_v26 = vsel %vm586_vm6, %v7058_v48, %v4151_v54  ;;  %v4159_v40 = vsel %vm586_vm6, %v4029_v63, %v4158_v30  ;;  %v7677_v44 = vld [vmem:[#allocation37_spill] sm:$0xff]  ;;  %v7678_v30 = vld [vmem:[#allocation38_spill] sm:$0xff] }
 0x571   : > { %v4139_v28 = vsel %vm588_vm7, %v6996_v23, %v4138_v7  ;;  %v4146_v50 = vsel %vm588_vm7, %v7028_v60, %v4145_v47  ;;  %v4153_v13 = vsel %vm588_vm7, %v7060_v41, %v4152_v26  ;;  %v4160_v56 = vsel %vm588_vm7, %v4036_v0, %v4159_v40  ;;  %v7670_v0 = vld [vmem:[#allocation30_spill] sm:$0xff]  ;;  %v7679_v47 = vld [vmem:[#allocation39_spill] sm:$0xff]  ;;  %v7680_v40 = vld [vmem:[#allocation40_spill] sm:$0xff] }
 0x572   : > { %4169 = vst.msk [vmem:[%s7105_s24 + $0x20] sm:$0xff] %vm615_vm8, %v4139_v28  ;;  %4170 = vst.msk [vmem:[%s7105_s24 + $0x28] sm:$0xff] %vm615_vm8, %v4146_v50  ;;  %v7681_v50 = vld [vmem:[#allocation41_spill] sm:$0xff] }
 0x573   : > { %4171 = vst.msk [vmem:[%s7105_s24 + $0x30] sm:$0xff] %vm615_vm8, %v4153_v13  ;;  %4172 = vst.msk [vmem:[%s7105_s24 + $0x38] sm:$0xff] %vm615_vm8, %v4160_v56  ;;  %v7682_v56 = vld [vmem:[#allocation4_spill] sm:$0xff] }
 0x5a3   : > { %v3156_v57 = vpop.f32.mrb[6].mxu1  ;;  %v3461_v39 = vpop.f32.mrb[6].mxu0 }
 0x5a4   : > { %v4793_v23 = vadd.f32 %v3156_v57, %v6884_v43  ;;  %v3158_v48 = vpop.f32.mrb[7].mxu1  ;;  %v3463_v20 = vpop.f32.mrb[7].mxu0  ;;  %v7659_v43 = vld [vmem:[#allocation18_spill] sm:$0xff] }
 0x5a5   : > { %v7684_v48 = vld [vmem:[#allocation6_spill] sm:$0xff] }
 0x5a6   : > { %v4794_v60 = vadd.f32 %v4793_v23, %v3461_v39  ;;  %v7683_v39 = vld [vmem:[#allocation5_spill] sm:$0xff] }
 0x5a8   : > { %v4241_v14 = vmul.f32 -1.442695, %v4794_v60  ;;  %v7685_v60 = vld [vmem:[#allocation7_spill] sm:$0xff] }
 0x5aa   : > { %4845 = vpow2.f32 %v4241_v14 }
 0x5b4   : > { %v4846_v41 = vpop.eup %4845 }
 0x5b5   : > { %v3468_v22 = vadd.f32 1.0, %v4846_v41 }
 0x5b7   : > { %4847 = vrcp.f32 %v3468_v22 }
 0x5c1   : > { %v4848_v2 = vpop.eup %4847 }
 0x5c2   : > { %v3525_v45 = vmul.f32 %v4848_v2, %v7625_v25  ;;  %v3526_v31 = vmul.f32 %v4848_v2, %v7626_v3  ;;  %v3527_v52 = vmul.f32 %v4848_v2, %v7627_v36  ;;  %v3528_v21 = vmul.f32 %v4848_v2, %v7657_v42  ;;  %v7664_v25 = vld [vmem:[#allocation23_spill] sm:$0xff]  ;;  %v7665_v36 = vld [vmem:[#allocation24_spill] sm:$0xff] }
 0x5c3   : > { %v3529_v35 = vmul.f32 %v4848_v2, %v7658_v9  ;;  %v3530_v51 = vmul.f32 %v4848_v2, %v7659_v43  ;;  %v3531_v38 = vmul.f32 %v4848_v2, %v7660_v58  ;;  %v3532_v12 = vmul.f32 %v4848_v2, %v7661_v18 }
 0x5c4   : > { %v7146_v17 = vmul.f32 %v4848_v2, %v7662_v1  ;;  %v7149_v11 = vmul.f32 %v4848_v2, %v7663_v33  ;;  %v7152_v3 = vmul.f32 %v4848_v2, %v7664_v25  ;;  %v7155_v46 = vmul.f32 %v4848_v2, %v7665_v36 }
 0x5c5   : > { %v7158_v49 = vmul.f32 %v4848_v2, %v7666_v15  ;;  %v7161_v24 = vmul.f32 %v4848_v2, %v7667_v8  ;;  %v7164_v4 = vmul.f32 %v4848_v2, %v7668_v55  ;;  %v7167_v63 = vmul.f32 %v4848_v2, %v7669_v59 }
 0x5c6   : > { %v7170_v29 = vmul.f32 %v4848_v2, %v7670_v0  ;;  %v7173_v27 = vmul.f32 %v4848_v2, %v7671_v16  ;;  %v7176_v37 = vmul.f32 %v4848_v2, %v7672_v32  ;;  %v7179_v19 = vmul.f32 %v4848_v2, %v7673_v34 }
 0x5c7   : > { %v7182_v5 = vmul.f32 %v4848_v2, %v7674_v62  ;;  %v7185_v61 = vmul.f32 %v4848_v2, %v7675_v10  ;;  %v7188_v6 = vmul.f32 %v4848_v2, %v7676_v53  ;;  %v7191_v54 = vmul.f32 %v4848_v2, %v7677_v44 }
 0x5c8   : > { %v7194_v7 = vmul.f32 %v4848_v2, %v7678_v30  ;;  %v7197_v26 = vmul.f32 %v4848_v2, %v7679_v47  ;;  %v7200_v28 = vmul.f32 %v4848_v2, %v7680_v40  ;;  %v7203_v13 = vmul.f32 %v4848_v2, %v7681_v50 }
 0x5c9   : > { %v7206_v57 = vmul.f32 %v4848_v2, %v7682_v56  ;;  %v7209_v23 = vmul.f32 %v4848_v2, %v7683_v39  ;;  %v7212_v20 = vmul.f32 %v4848_v2, %v7684_v48  ;;  %v7215_v14 = vmul.f32 %v4848_v2, %v7685_v60 }
 0x5ca   : > { %v3557_v41 = vsel %vm284_vm0, %v3525_v45, -inf  ;;  %v3564_v22 = vsel %vm284_vm0, %v3526_v31, -inf  ;;  %v3571_v42 = vsel %vm284_vm0, %v3527_v52, -inf  ;;  %v3578_v9 = vsel %vm284_vm0, %v3528_v21, -inf }
 0x5cb   : > { %v3558_v43 = vrot.slane %v3557_v41, 4  ;;  %v3565_v58 = vrot.slane %v3564_v22, 4  ;;  %v3572_v18 = vrot.slane %v3571_v42, 4  ;;  %v3579_v1 = vrot.slane %v3578_v9, 4 }
 0x5cc   : > { %v3585_v33 = vsel %vm284_vm0, %v3529_v35, -inf  ;;  %v3592_v25 = vsel %vm284_vm0, %v3530_v51, -inf  ;;  %v3599_v36 = vsel %vm284_vm0, %v3531_v38, -inf  ;;  %v3606_v2 = vsel %vm284_vm0, %v3532_v12, -inf }
 0x5cd   : > { %v3559_v15 = vmax.f32 %v3557_v41, %v3558_v43  ;;  %v3566_v45 = vmax.f32 %v3564_v22, %v3565_v58  ;;  %v3573_v8 = vmax.f32 %v3571_v42, %v3572_v18  ;;  %v3580_v31 = vmax.f32 %v3578_v9, %v3579_v1 }
 0x5ce   : > { %v3586_v55 = vrot.slane %v3585_v33, 4  ;;  %v3593_v52 = vrot.slane %v3592_v25, 4  ;;  %v3600_v59 = vrot.slane %v3599_v36, 4  ;;  %v3607_v21 = vrot.slane %v3606_v2, 4 }
 0x5cf   : > { %v3560_v0 = vrot.slane %v3559_v15, 2  ;;  %v3567_v16 = vrot.slane %v3566_v45, 2  ;;  %v3574_v32 = vrot.slane %v3573_v8, 2  ;;  %v3581_v34 = vrot.slane %v3580_v31, 2 }
 0x5d0   : > { %v3587_v62 = vmax.f32 %v3585_v33, %v3586_v55  ;;  %v3594_v35 = vmax.f32 %v3592_v25, %v3593_v52  ;;  %v3601_v10 = vmax.f32 %v3599_v36, %v3600_v59  ;;  %v3608_v51 = vmax.f32 %v3606_v2, %v3607_v21 }
 0x5d1   : > { %v3561_v53 = vmax.f32 %v3559_v15, %v3560_v0  ;;  %v3568_v38 = vmax.f32 %v3566_v45, %v3567_v16  ;;  %v3575_v44 = vmax.f32 %v3573_v8, %v3574_v32  ;;  %v3582_v12 = vmax.f32 %v3580_v31, %v3581_v34 }
 0x5d2   : > { %v3588_v30 = vrot.slane %v3587_v62, 2  ;;  %v3595_v47 = vrot.slane %v3594_v35, 2  ;;  %v3602_v40 = vrot.slane %v3601_v10, 2  ;;  %v3609_v50 = vrot.slane %v3608_v51, 2 }
 0x5d3   : > { %v3562_v56 = vrot.slane %v3561_v53, 1  ;;  %v3569_v39 = vrot.slane %v3568_v38, 1  ;;  %v3576_v48 = vrot.slane %v3575_v44, 1  ;;  %v3583_v60 = vrot.slane %v3582_v12, 1 }
 0x5d4   : > { %v3589_v41 = vmax.f32 %v3587_v62, %v3588_v30  ;;  %v3596_v22 = vmax.f32 %v3594_v35, %v3595_v47  ;;  %v3603_v42 = vmax.f32 %v3601_v10, %v3602_v40  ;;  %v3610_v9 = vmax.f32 %v3608_v51, %v3609_v50 }
 0x5d5   : > { %v7225_v43 = vmax.f32 %v3561_v53, %v3562_v56  ;;  %v7227_v58 = vmax.f32 %v3568_v38, %v3569_v39  ;;  %v7229_v18 = vmax.f32 %v3575_v44, %v3576_v48  ;;  %v7231_v1 = vmax.f32 %v3582_v12, %v3583_v60 }
 0x5d6   : > { %v3590_v33 = vrot.slane %v3589_v41, 1  ;;  %v3597_v25 = vrot.slane %v3596_v22, 1  ;;  %v3604_v36 = vrot.slane %v3603_v42, 1  ;;  %v3611_v2 = vrot.slane %v3610_v9, 1 }
 0x5d7   : > { %v3613_v15 = vsel %vm284_vm0, %v7146_v17, -inf  ;;  %v3620_v45 = vsel %vm284_vm0, %v7149_v11, -inf  ;;  %v3627_v8 = vsel %vm284_vm0, %v7152_v3, -inf  ;;  %v3634_v31 = vsel %vm284_vm0, %v7155_v46, -inf }
 0x5d8   : > { %v7241_v55 = vmax.f32 %v3589_v41, %v3590_v33  ;;  %v7243_v52 = vmax.f32 %v3596_v22, %v3597_v25  ;;  %v7245_v59 = vmax.f32 %v3603_v42, %v3604_v36  ;;  %v7247_v21 = vmax.f32 %v3610_v9, %v3611_v2 }
 0x5d9   : > { %v3614_v0 = vrot.slane %v3613_v15, 4  ;;  %v3621_v16 = vrot.slane %v3620_v45, 4  ;;  %v3628_v17 = vrot.slane %v3627_v8, 4  ;;  %v3635_v32 = vrot.slane %v3634_v31, 4 }
 0x5da   : > { %v3641_v11 = vsel %vm284_vm0, %v7158_v49, -inf  ;;  %v3648_v3 = vsel %vm284_vm0, %v7161_v24, -inf  ;;  %v3655_v46 = vsel %vm284_vm0, %v7164_v4, -inf  ;;  %v3662_v34 = vsel %vm284_vm0, %v7167_v63, -inf }
 0x5db   : > { %v3615_v62 = vmax.f32 %v3613_v15, %v3614_v0  ;;  %v3622_v35 = vmax.f32 %v3620_v45, %v3621_v16  ;;  %v3629_v10 = vmax.f32 %v3627_v8, %v3628_v17  ;;  %v3636_v51 = vmax.f32 %v3634_v31, %v3635_v32 }
 0x5dc   : > { %v3642_v53 = vrot.slane %v3641_v11, 4  ;;  %v3649_v38 = vrot.slane %v3648_v3, 4  ;;  %v3656_v44 = vrot.slane %v3655_v46, 4  ;;  %v3663_v12 = vrot.slane %v3662_v34, 4 }
 0x5dd   : > { %v3616_v30 = vrot.slane %v3615_v62, 2  ;;  %v3623_v47 = vrot.slane %v3622_v35, 2  ;;  %v3630_v49 = vrot.slane %v3629_v10, 2  ;;  %v3637_v40 = vrot.slane %v3636_v51, 2 }
 0x5de   : > { %v3643_v50 = vmax.f32 %v3641_v11, %v3642_v53  ;;  %v3650_v24 = vmax.f32 %v3648_v3, %v3649_v38  ;;  %v3657_v56 = vmax.f32 %v3655_v46, %v3656_v44  ;;  %v3664_v39 = vmax.f32 %v3662_v34, %v3663_v12 }
 0x5df   : > { %v3617_v4 = vmax.f32 %v3615_v62, %v3616_v30  ;;  %v3624_v48 = vmax.f32 %v3622_v35, %v3623_v47  ;;  %v3631_v60 = vmax.f32 %v3629_v10, %v3630_v49  ;;  %v3638_v63 = vmax.f32 %v3636_v51, %v3637_v40 }
 0x5e0   : > { %v3644_v41 = vrot.slane %v3643_v50, 2  ;;  %v3651_v22 = vrot.slane %v3650_v24, 2  ;;  %v3658_v42 = vrot.slane %v3657_v56, 2  ;;  %v3665_v9 = vrot.slane %v3664_v39, 2 }
 0x5e1   : > { %v3618_v33 = vrot.slane %v3617_v4, 1  ;;  %v3625_v25 = vrot.slane %v3624_v48, 1  ;;  %v3632_v36 = vrot.slane %v3631_v60, 1  ;;  %v3639_v2 = vrot.slane %v3638_v63, 1 }
 0x5e2   : > { %v3645_v15 = vmax.f32 %v3643_v50, %v3644_v41  ;;  %v3652_v45 = vmax.f32 %v3650_v24, %v3651_v22  ;;  %v3659_v8 = vmax.f32 %v3657_v56, %v3658_v42  ;;  %v3666_v31 = vmax.f32 %v3664_v39, %v3665_v9 }
 0x5e3   : > { %v7257_v0 = vmax.f32 %v3617_v4, %v3618_v33  ;;  %v7259_v16 = vmax.f32 %v3624_v48, %v3625_v25  ;;  %v7261_v17 = vmax.f32 %v3631_v60, %v3632_v36  ;;  %v7263_v32 = vmax.f32 %v3638_v63, %v3639_v2 }
 0x5e4   : > { %v3646_v11 = vrot.slane %v3645_v15, 1  ;;  %v3653_v3 = vrot.slane %v3652_v45, 1  ;;  %v3660_v46 = vrot.slane %v3659_v8, 1  ;;  %v3667_v34 = vrot.slane %v3666_v31, 1 }
 0x5e5   : > { %v3669_v62 = vsel %vm284_vm0, %v7170_v29, -inf  ;;  %v3676_v35 = vsel %vm284_vm0, %v7173_v27, -inf  ;;  %v3683_v10 = vsel %vm284_vm0, %v7176_v37, -inf  ;;  %v3690_v51 = vsel %vm284_vm0, %v7179_v19, -inf }
 0x5e6   : > { %v7273_v53 = vmax.f32 %v3645_v15, %v3646_v11  ;;  %v7275_v38 = vmax.f32 %v3652_v45, %v3653_v3  ;;  %v7277_v44 = vmax.f32 %v3659_v8, %v3660_v46  ;;  %v7279_v12 = vmax.f32 %v3666_v31, %v3667_v34 }
 0x5e7   : > { %v3670_v30 = vrot.slane %v3669_v62, 4  ;;  %v3677_v47 = vrot.slane %v3676_v35, 4  ;;  %v3684_v29 = vrot.slane %v3683_v10, 4  ;;  %v3691_v49 = vrot.slane %v3690_v51, 4 }
 0x5e8   : > { %v3697_v27 = vsel %vm284_vm0, %v7182_v5, -inf  ;;  %v3704_v37 = vsel %vm284_vm0, %v7185_v61, -inf  ;;  %v3711_v19 = vsel %vm284_vm0, %v7188_v6, -inf  ;;  %v3718_v40 = vsel %vm284_vm0, %v7191_v54, -inf }
 0x5e9   : > { %v3671_v50 = vmax.f32 %v3669_v62, %v3670_v30  ;;  %v3678_v24 = vmax.f32 %v3676_v35, %v3677_v47  ;;  %v3685_v56 = vmax.f32 %v3683_v10, %v3684_v29  ;;  %v3692_v39 = vmax.f32 %v3690_v51, %v3691_v49 }
 0x5ea   : > { %v3698_v4 = vrot.slane %v3697_v27, 4  ;;  %v3705_v48 = vrot.slane %v3704_v37, 4  ;;  %v3712_v60 = vrot.slane %v3711_v19, 4  ;;  %v3719_v63 = vrot.slane %v3718_v40, 4 }
 0x5eb   : > { %v3672_v41 = vrot.slane %v3671_v50, 2  ;;  %v3679_v22 = vrot.slane %v3678_v24, 2  ;;  %v3686_v5 = vrot.slane %v3685_v56, 2  ;;  %v3693_v42 = vrot.slane %v3692_v39, 2 }
 0x5ec   : > { %v3699_v9 = vmax.f32 %v3697_v27, %v3698_v4  ;;  %v3706_v61 = vmax.f32 %v3704_v37, %v3705_v48  ;;  %v3713_v33 = vmax.f32 %v3711_v19, %v3712_v60  ;;  %v3720_v25 = vmax.f32 %v3718_v40, %v3719_v63 }
 0x5ed   : > { %v3673_v6 = vmax.f32 %v3671_v50, %v3672_v41  ;;  %v3680_v36 = vmax.f32 %v3678_v24, %v3679_v22  ;;  %v3687_v2 = vmax.f32 %v3685_v56, %v3686_v5  ;;  %v3694_v54 = vmax.f32 %v3692_v39, %v3693_v42 }
 0x5ee   : > { %v3700_v15 = vrot.slane %v3699_v9, 2  ;;  %v3707_v45 = vrot.slane %v3706_v61, 2  ;;  %v3714_v8 = vrot.slane %v3713_v33, 2  ;;  %v3721_v31 = vrot.slane %v3720_v25, 2 }
 0x5ef   : > { %v3674_v11 = vrot.slane %v3673_v6, 1  ;;  %v3681_v3 = vrot.slane %v3680_v36, 1  ;;  %v3688_v46 = vrot.slane %v3687_v2, 1  ;;  %v3695_v34 = vrot.slane %v3694_v54, 1 }
 0x5f0   : > { %v3701_v62 = vmax.f32 %v3699_v9, %v3700_v15  ;;  %v3708_v35 = vmax.f32 %v3706_v61, %v3707_v45  ;;  %v3715_v10 = vmax.f32 %v3713_v33, %v3714_v8  ;;  %v3722_v51 = vmax.f32 %v3720_v25, %v3721_v31 }
 0x5f1   : > { %v7289_v30 = vmax.f32 %v3673_v6, %v3674_v11  ;;  %v7291_v47 = vmax.f32 %v3680_v36, %v3681_v3  ;;  %v7293_v29 = vmax.f32 %v3687_v2, %v3688_v46  ;;  %v7295_v49 = vmax.f32 %v3694_v54, %v3695_v34 }
 0x5f2   : > { %v3702_v27 = vrot.slane %v3701_v62, 1  ;;  %v3709_v37 = vrot.slane %v3708_v35, 1  ;;  %v3716_v19 = vrot.slane %v3715_v10, 1  ;;  %v3723_v40 = vrot.slane %v3722_v51, 1 }
 0x5f3   : > { %v3725_v50 = vsel %vm284_vm0, %v7194_v7, -inf  ;;  %v3732_v24 = vsel %vm284_vm0, %v7197_v26, -inf  ;;  %v3739_v56 = vsel %vm284_vm0, %v7200_v28, -inf  ;;  %v3746_v39 = vsel %vm284_vm0, %v7203_v13, -inf }
 0x5f4   : > { %v7305_v4 = vmax.f32 %v3701_v62, %v3702_v27  ;;  %v7307_v48 = vmax.f32 %v3708_v35, %v3709_v37  ;;  %v7309_v60 = vmax.f32 %v3715_v10, %v3716_v19  ;;  %v7311_v63 = vmax.f32 %v3722_v51, %v3723_v40 }
 0x5f5   : > { %v3726_v41 = vrot.slane %v3725_v50, 4  ;;  %v3733_v22 = vrot.slane %v3732_v24, 4  ;;  %v3740_v7 = vrot.slane %v3739_v56, 4  ;;  %v3747_v5 = vrot.slane %v3746_v39, 4 }
 0x5f6   : > { %v3753_v26 = vsel %vm284_vm0, %v7206_v57, -inf  ;;  %v3760_v28 = vsel %vm284_vm0, %v7209_v23, -inf  ;;  %v3767_v13 = vsel %vm284_vm0, %v7212_v20, -inf  ;;  %v3774_v42 = vsel %vm284_vm0, %v7215_v14, -inf }
 0x5f7   : > { %v3727_v9 = vmax.f32 %v3725_v50, %v3726_v41  ;;  %v3734_v61 = vmax.f32 %v3732_v24, %v3733_v22  ;;  %v3741_v33 = vmax.f32 %v3739_v56, %v3740_v7  ;;  %v3748_v25 = vmax.f32 %v3746_v39, %v3747_v5 }
 0x5f8   : > { %v3754_v6 = vrot.slane %v3753_v26, 4  ;;  %v3761_v36 = vrot.slane %v3760_v28, 4  ;;  %v3768_v2 = vrot.slane %v3767_v13, 4  ;;  %v3775_v54 = vrot.slane %v3774_v42, 4 }
 0x5f9   : > { %v3728_v15 = vrot.slane %v3727_v9, 2  ;;  %v3735_v45 = vrot.slane %v3734_v61, 2  ;;  %v3742_v57 = vrot.slane %v3741_v33, 2  ;;  %v3749_v8 = vrot.slane %v3748_v25, 2 }
 0x5fa   : > { %v3755_v31 = vmax.f32 %v3753_v26, %v3754_v6  ;;  %v3762_v23 = vmax.f32 %v3760_v28, %v3761_v36  ;;  %v3769_v11 = vmax.f32 %v3767_v13, %v3768_v2  ;;  %v3776_v3 = vmax.f32 %v3774_v42, %v3775_v54 }
 0x5fb   : > { %v3729_v20 = vmax.f32 %v3727_v9, %v3728_v15  ;;  %v3736_v46 = vmax.f32 %v3734_v61, %v3735_v45  ;;  %v3743_v34 = vmax.f32 %v3741_v33, %v3742_v57  ;;  %v3750_v14 = vmax.f32 %v3748_v25, %v3749_v8 }
 0x5fc   : > { %v3756_v62 = vrot.slane %v3755_v31, 2  ;;  %v3763_v35 = vrot.slane %v3762_v23, 2  ;;  %v3770_v10 = vrot.slane %v3769_v11, 2  ;;  %v3777_v51 = vrot.slane %v3776_v3, 2 }
 0x5fd   : > { %v3730_v27 = vrot.slane %v3729_v20, 1  ;;  %v3737_v37 = vrot.slane %v3736_v46, 1  ;;  %v3744_v19 = vrot.slane %v3743_v34, 1  ;;  %v3751_v40 = vrot.slane %v3750_v14, 1 }
 0x5fe   : > { %v3757_v50 = vmax.f32 %v3755_v31, %v3756_v62  ;;  %v3764_v24 = vmax.f32 %v3762_v23, %v3763_v35  ;;  %v3771_v56 = vmax.f32 %v3769_v11, %v3770_v10  ;;  %v3778_v39 = vmax.f32 %v3776_v3, %v3777_v51 }
 0x5ff   : > { %v3731_v41 = vmax.f32 %v3729_v20, %v3730_v27  ;;  %v3738_v22 = vmax.f32 %v3736_v46, %v3737_v37  ;;  %v3745_v7 = vmax.f32 %v3743_v34, %v3744_v19  ;;  %v3752_v5 = vmax.f32 %v3750_v14, %v3751_v40 }
 0x600   : > { %v3758_v26 = vrot.slane %v3757_v50, 1  ;;  %v3765_v28 = vrot.slane %v3764_v24, 1  ;;  %v3772_v13 = vrot.slane %v3771_v56, 1  ;;  %v3779_v42 = vrot.slane %v3778_v39, 1 }
 0x601   : > { %v4069_v9 = vsel %vm576_vm1, %v7227_v58, %v7225_v43  ;;  %v4076_v61 = vsel %vm576_vm1, %v7259_v16, %v7257_v0  ;;  %v4083_v33 = vsel %vm576_vm1, %v7291_v47, %v7289_v30  ;;  %v4090_v25 = vsel %vm576_vm1, %v3738_v22, %v3731_v41 }
 0x602   : > { %v3759_v6 = vmax.f32 %v3757_v50, %v3758_v26  ;;  %v3766_v36 = vmax.f32 %v3764_v24, %v3765_v28  ;;  %v3773_v2 = vmax.f32 %v3771_v56, %v3772_v13  ;;  %v3780_v54 = vmax.f32 %v3778_v39, %v3779_v42 }
 0x603   : > { %v4070_v15 = vsel %vm578_vm2, %v7229_v18, %v4069_v9  ;;  %v4077_v43 = vsel %vm578_vm2, %v7261_v17, %v4076_v61  ;;  %v4084_v58 = vsel %vm578_vm2, %v7293_v29, %v4083_v33  ;;  %v4091_v0 = vsel %vm578_vm2, %v3745_v7, %v4090_v25 }
 0x604   : > { %v4071_v16 = vsel %vm580_vm3, %v7231_v1, %v4070_v15  ;;  %v4078_v30 = vsel %vm580_vm3, %v7263_v32, %v4077_v43  ;;  %v4085_v47 = vsel %vm580_vm3, %v7295_v49, %v4084_v58  ;;  %v4092_v45 = vsel %vm580_vm3, %v3752_v5, %v4091_v0 }
 0x605   : > { %v4072_v18 = vsel %vm582_vm4, %v7241_v55, %v4071_v16  ;;  %v4079_v17 = vsel %vm582_vm4, %v7273_v53, %v4078_v30  ;;  %v4086_v29 = vsel %vm582_vm4, %v7305_v4, %v4085_v47  ;;  %v4093_v1 = vsel %vm582_vm4, %v3759_v6, %v4092_v45 }
 0x606   : > { %v4073_v32 = vsel %vm584_vm5, %v7243_v52, %v4072_v18  ;;  %v4080_v49 = vsel %vm584_vm5, %v7275_v38, %v4079_v17  ;;  %v4087_v55 = vsel %vm584_vm5, %v7307_v48, %v4086_v29  ;;  %v4094_v57 = vsel %vm584_vm5, %v3766_v36, %v4093_v1 }
 0x607   : > { %v4074_v53 = vsel %vm586_vm6, %v7245_v59, %v4073_v32  ;;  %v4081_v4 = vsel %vm586_vm6, %v7277_v44, %v4080_v49  ;;  %v4088_v8 = vsel %vm586_vm6, %v7309_v60, %v4087_v55  ;;  %v4095_v31 = vsel %vm586_vm6, %v3773_v2, %v4094_v57 }
 0x608   : > { %v4075_v52 = vsel %vm588_vm7, %v7247_v21, %v4074_v53  ;;  %v4082_v38 = vsel %vm588_vm7, %v7279_v12, %v4081_v4  ;;  %v4089_v48 = vsel %vm588_vm7, %v7311_v63, %v4088_v8  ;;  %v4096_v23 = vsel %vm588_vm7, %v3780_v54, %v4095_v31 }
 0x609   : > { %4165 = vst.msk [vmem:[%s7105_s24] sm:$0xff] %vm615_vm8, %v4075_v52  ;;  %4166 = vst.msk [vmem:[%s7105_s24 + $0x8] sm:$0xff] %vm615_vm8, %v4082_v38 }
 0x60a   : > { %4167 = vst.msk [vmem:[%s7105_s24 + $0x10] sm:$0xff] %vm615_vm8, %v4089_v48  ;;  %4168 = vst.msk [vmem:[%s7105_s24 + $0x18] sm:$0xff] %vm615_vm8, %v4096_v23 }
 0x60b PF: > { %s16_s21 = sadd.s32 1, %s4877_s21  }
 0x60c   : > { %p13_p4 = scmp.ge.s32.totalorder %s16_s21, 4  }
 0x60e   :  { %15 = sbr.rel (!%p13_p4) target bundleno = 1 (0x1), region = 74 }

</bundles_post_ra>
